<compile_context>
chip_gen: v7x
topology: tpu7x:2x2x1
jax: 0.10.0
libtpu: 0.0.40
codegen_flags: <defaults>
</compile_context>

<pallas_src>
import functools

import jax
import jax.numpy as jnp
import numpy as np
from jax import lax
from jax.experimental import pallas as pl
from jax.experimental.pallas import tpu as pltpu

EPS = 1e-6
KS = 7            # ConvNeXt grouped-conv kernel size
PAD = 3           # its padding
INV_SQRT2 = 0.7071067811865476
_GELU_C = 0.7978845608028654     # sqrt(2/pi)


def _gelu_tanh(x):
    # tanh-approx GELU: transcendental goes to the EUP slot; error vs exact erf
    # is <~5e-4, well inside the bf16-level test tolerance.
    return 0.5 * x * (1.0 + jnp.tanh(_GELU_C * (x + 0.044715 * x * x * x)))


# ----------------------------------------------------------------------------
# Fused kernel: ConvNeXt Block + label bind tail, channel-major, one batch/step
# ----------------------------------------------------------------------------
def _label_bind_kernel(lab_ref, x_ref, wconv_ref, consts_ref, w1_ref, w2_ref,
                       wfea_ref, wc1_ref, wc2_ref, wc3_ref, out_ref,
                       pad7_ref, pad3_ref, rhs7_ref, *, H, W):
    bf = jnp.bfloat16
    C = x_ref.shape[1]
    HW = H * W

    # Per-pixel output-column index (p % W).  The flattened padded buffers give
    # implicit zero padding for out-of-range rows; out-of-range *columns* wrap
    # into the neighbouring row and are zeroed with these masks.
    col = lax.broadcasted_iota(jnp.int32, (1, HW), 1) % W
    masks = {dw: jnp.logical_and(col >= -dw, col < W - dw)
             for dw in range(-PAD, PAD + 1) if dw != 0}

    # ------------------ stage 1: ConvNeXt Block (in_proj) -------------------
    x = x_ref[0]                                        # (C, HW) f32, residual

    # flattened zero-padded image for the 7x7 conv: source pixel (r, q) sits at
    # flat index PAD*(W+1) + r*W + q, so tap (kh, kw) is the HW-long slice
    # starting at kh*W + kw.
    pad7_ref[...] = jnp.zeros(pad7_ref.shape, pad7_ref.dtype)
    base7 = PAD * (W + 1)
    pad7_ref[:, base7:base7 + HW] = x.astype(bf)

    # im2col RHS (49*C, HW): tap k occupies rows [k*C, (k+1)*C) -> every store
    # is full-lane and sublane-aligned.
    for kh in range(KS):
        for kw in range(KS):
            sl = pad7_ref[:, kh * W + kw:kh * W + kw + HW]        # (C, HW) bf16
            dw = kw - PAD
            if dw != 0:
                sl = jnp.where(masks[dw], sl, jnp.zeros_like(sl))
            k = kh * KS + kw
            rhs7_ref[k * C:(k + 1) * C, :] = sl

    # ONE fused matmul for all 49 taps (bf16 x bf16 -> f32), then conv bias.
    acc = jnp.dot(wconv_ref[...], rhs7_ref[...],
                  preferred_element_type=jnp.float32)             # (C, HW)
    acc = acc + consts_ref[0:C, 0:1]

    # LayerNorm over channels (sublane axis); ln scale/shift folded into w1/b1.
    mu = jnp.mean(acc, axis=0, keepdims=True)
    var = jnp.mean((acc - mu) ** 2, axis=0, keepdims=True)
    xn = (acc - mu) * lax.rsqrt(var + EPS)

    # pwconv1 -> GELU(tanh) -> pwconv2 (layer-scale gamma folded into w2/b2).
    h = jnp.dot(w1_ref[...], xn.astype(bf),
                preferred_element_type=jnp.float32) + consts_ref[:, 1:2]
    h = _gelu_tanh(h)
    y = jnp.dot(w2_ref[...], h.astype(bf),
                preferred_element_type=jnp.float32) + consts_ref[0:C, 2:3]

    fea = x + y                                         # residual, f32 (C, HW)

    # ------------------ stage 2: expanding_pw + 3x conv3x3 + GELU -----------
    # expanding_pw = fea-part matmul + per-batch label bias column (label LN,
    # label-part matmul and bias are precomputed in plain JAX).
    pw = jnp.dot(wfea_ref[...], fea.astype(bf),
                 preferred_element_type=jnp.float32) + lab_ref[0]  # (2D, HW)

    base3 = W + 1

    def conv3x3(src, w_ref):
        # src: (cin, HW) f32; w_ref: (9, cout, cin).  Accumulates the 9 tap
        # matmuls straight from the padded scratch (no im2col scratch/stores).
        cin = w_ref.shape[2]
        pad3_ref[0:cin, base3:base3 + HW] = src.astype(bf)
        out = None
        for kh in range(3):
            for kw in range(3):
                sl = pad3_ref[0:cin, kh * W + kw:kh * W + kw + HW]
                dw = kw - 1
                if dw != 0:
                    sl = jnp.where(masks[dw], sl, jnp.zeros_like(sl))
                part = jnp.dot(w_ref[kh * 3 + kw], sl,
                               preferred_element_type=jnp.float32)
                out = part if out is None else out + part
        return out

    # Zero once per grid step: the pad regions are never written afterwards and
    # the interiors are fully overwritten before every read.
    pad3_ref[...] = jnp.zeros(pad3_ref.shape, pad3_ref.dtype)
    c = conv3x3(pw, wc1_ref)                            # (D, HW)
    c = conv3x3(c, wc2_ref)                             # (E, HW)
    c = conv3x3(c, wc3_ref)                             # (out_dim, HW)

    # lane-dense channel-major store (== NCHW flattened)
    out_ref[0] = _gelu_tanh(c).astype(out_ref.dtype)


# ----------------------------------------------------------------------------
# Weight preparation helpers (plain-JAX glue)
# ----------------------------------------------------------------------------
def _expand_grouped_weight(wconv, dim):
    """torch (dim, 4, 7, 7) grouped-conv weight -> (49*dim, dim) block-diagonal
    matmul weight, rows ordered (tap, in_channel), columns = out_channel.
    NOTE: dense expansion is fine while dim <= 128.
    # TODO(synk): for large dim keep a compact per-group layout instead."""
    G = dim // 4
    w = wconv.reshape(G, 4, 4, KS, KS)            # (g, co_l, ci_l, kh, kw)
    w = jnp.transpose(w, (3, 4, 0, 2, 1))         # (kh, kw, g, ci_l, co_l)
    w = w.reshape(KS * KS, G, 4, 4)               # (k, g, ci_l, co_l)
    eye = jnp.eye(G, dtype=w.dtype)
    wfull = jnp.einsum('kgio,gh->kgiho', w, eye)  # (k, g, ci_l, g_out, co_l)
    return wfull.reshape(KS * KS * dim, dim)


def _conv3x3_taps(w):
    """torch (Cout, Cin, 3, 3) conv weight -> (9, Cout, Cin) tap-major weights."""
    return jnp.transpose(w, (2, 3, 0, 1)).reshape(9, w.shape[0], w.shape[1])


# ----------------------------------------------------------------------------
# Public wrapper
# ----------------------------------------------------------------------------
@functools.partial(jax.jit, static_argnames=("label_expanding",))
def label_bind_block(x_nchw, labels, params, label_expanding=1):
    """x_nchw: (B, C, H, W) f32, labels: (B, L) f32 -> (B, out_dim, H, W) f32."""
    B, C, H, W = x_nchw.shape
    HW = H * W
    LL = labels.shape[1] * label_expanding
    D = C + LL
    D2 = 2 * D
    E = params["wc2"].shape[0]
    Cout = params["wc3"].shape[0]
    f32, bf = jnp.float32, jnp.bfloat16

    # TODO(synk): this fused whole-image-per-step kernel targets small spatial
    # sizes; for large H*W re-introduce row tiling (TH rows / grid step) with a
    # manually double-buffered row-window DMA (memory_space=pl.ANY) instead.
    assert KS * KS * C * HW * 2 <= 8 * 2 ** 20, "image too large for fused kernel"

    # ---- fold & repack weights for channel-major compute (plain JAX) ----
    wconv_cm = _expand_grouped_weight(params["dw_w"], C).T.astype(bf)   # (C, 49C)
    w1_cm = (params["pw1_w"].T * params["ln_w"][None, :]).astype(bf)    # (2C, C)
    b1_eff = params["ln_b"] @ params["pw1_w"] + params["pw1_b"]         # (2C,)
    w2_cm = (params["gamma"][:, None] * params["pw2_w"].T).astype(bf)   # (C, 2C)
    b2_eff = params["gamma"] * params["pw2_b"]                          # (C,)

    consts = jnp.zeros((2 * C, 3), f32)           # packed per-channel columns
    consts = consts.at[:C, 0].set(params["dw_b"])
    consts = consts.at[:, 1].set(b1_eff)
    consts = consts.at[:C, 2].set(b2_eff)

    # label path: channels_first LN + label half of expanding_pw + bias
    # (O(B*LL*D2) -> precomputed here, one (2D, 1) bias column per batch)
    lab = jnp.tile(labels.astype(f32), (1, label_expanding))            # (B, LL)
    mu = lab.mean(axis=1, keepdims=True)
    var = ((lab - mu) ** 2).mean(axis=1, keepdims=True)
    bcn = (lab - mu) / jnp.sqrt(var + EPS) * params["ln2_w"] + params["ln2_b"]
    lab_bias = (bcn @ params["pw_w"][C:] + params["pw_b"]).reshape(B, D2, 1)

    wfea_cm = params["pw_w"][:C].T.astype(bf)                           # (2D, C)
    wc1 = _conv3x3_taps(params["wc1"]).astype(bf)                       # (9, D, 2D)
    wc2 = _conv3x3_taps(params["wc2"]).astype(bf)                       # (9, E, D)
    wc3 = _conv3x3_taps(params["wc3"]).astype(bf)                       # (9, Cout, E)

    x_f = x_nchw.reshape(B, C, HW)                # NCHW consumed directly (free)

    L7 = (H + KS - 1) * W + KS - 1                # flattened padded lengths
    L3 = (H + 2) * W + 2
    CP = max(D2, E)

    def const_spec(shape):
        return pl.BlockSpec(shape, lambda *_: (0,) * len(shape))

    out = pl.pallas_call(
        functools.partial(_label_bind_kernel, H=H, W=W),
        out_shape=jax.ShapeDtypeStruct((B, Cout, HW), f32),
        grid_spec=pltpu.PrefetchScalarGridSpec(
            num_scalar_prefetch=0,
            grid=(B,),
            in_specs=[
                pl.BlockSpec((1, D2, 1), lambda b: (b, 0, 0)),    # label bias col
                pl.BlockSpec((1, C, HW), lambda b: (b, 0, 0)),    # x (NCHW flat)
                const_spec((C, KS * KS * C)),                     # 7x7 grouped conv
                const_spec((2 * C, 3)),                           # packed biases
                const_spec((2 * C, C)),                           # pwconv1 (ln folded)
                const_spec((C, 2 * C)),                           # pwconv2 (gamma folded)
                const_spec((D2, C)),                              # expanding_pw (fea part)
                const_spec((9, D, D2)),                           # conv3x3 #1
                const_spec((9, E, D)),                            # conv3x3 #2
                const_spec((9, Cout, E)),                         # conv3x3 #3
            ],
            out_specs=pl.BlockSpec((1, Cout, HW), lambda b: (b, 0, 0)),
            scratch_shapes=[
                pltpu.VMEM((C, L7), bf),              # padded image (7x7)
                pltpu.VMEM((CP, L3), bf),             # padded feature (3x3 convs)
                pltpu.VMEM((KS * KS * C, HW), bf),    # 7x7 im2col RHS
            ],
        ),
        # working set ~1.5 MiB: default scoped VMEM is plenty on v5e/v6e/v7x.
        compiler_params=pltpu.CompilerParams(
            dimension_semantics=("parallel",)),
    )(lab_bias, x_f, wconv_cm, consts, w1_cm, w2_cm, wfea_cm, wc1, wc2, wc3)

    return out.reshape(B, Cout, H, W)


# ----------------------------------------------------------------------------
# Pure-JAX reference (matches the PyTorch forward, exact-erf GELU, f32)
# ----------------------------------------------------------------------------
def _block_reference(x, p):
    C = x.shape[1]
    y = lax.conv_general_dilated(
        x, p["dw_w"], (1, 1), ((PAD, PAD), (PAD, PAD)),
        dimension_numbers=("NCHW", "OIHW", "NCHW"),
        feature_group_count=C // 4) + p["dw_b"][None, :, None, None]
    y = jnp.transpose(y, (0, 2, 3, 1))
    mu = y.mean(-1, keepdims=True)
    var = ((y - mu) ** 2).mean(-1, keepdims=True)
    y = (y - mu) / jnp.sqrt(var + EPS) * p["ln_w"] + p["ln_b"]
    y = y @ p["pw1_w"] + p["pw1_b"]
    y = 0.5 * y * (1.0 + lax.erf(y * INV_SQRT2))
    y = y @ p["pw2_w"] + p["pw2_b"]
    y = p["gamma"] * y
    return x + jnp.transpose(y, (0, 3, 1, 2))


def label_bind_reference(x, labels, p, label_expanding=1):
    B, C, H, W = x.shape
    LL = labels.shape[1] * label_expanding
    fea = _block_reference(x, p)
    bc = jnp.tile(labels.astype(jnp.float32), (1, label_expanding))
    bc = jnp.broadcast_to(bc[:, :, None, None], (B, LL, H, W))
    mu = bc.mean(1, keepdims=True)
    var = ((bc - mu) ** 2).mean(1, keepdims=True)
    bc = (bc - mu) / jnp.sqrt(var + EPS)
    bc = p["ln2_w"][None, :, None, None] * bc + p["ln2_b"][None, :, None, None]
    t = jnp.concatenate([fea, bc], axis=1)
    t = jnp.transpose(t, (0, 2, 3, 1)) @ p["pw_w"] + p["pw_b"]
    t = jnp.transpose(t, (0, 3, 1, 2))
    for w in (p["wc1"], p["wc2"], p["wc3"]):
        t = lax.conv_general_dilated(t, w, (1, 1), ((1, 1), (1, 1)),
                                     dimension_numbers=("NCHW", "OIHW", "NCHW"))
    return 0.5 * t * (1.0 + lax.erf(t * INV_SQRT2))


# ----------------------------------------------------------------------------
# Parameter init (torch-equivalent layouts documented per entry)
# ----------------------------------------------------------------------------
def init_params(key, in_dim=32, label_dim=4, out_dim=32, label_expanding=1,
                layer_scale_init_value=1e-6):
    LL = label_dim * label_expanding
    D = in_dim + LL
    E = out_dim + LL
    ks = jax.random.split(key, 11)
    n = jax.random.normal
    return dict(
        # ConvNeXt Block (in_proj)
        dw_w=0.1 * n(ks[0], (in_dim, 4, KS, KS), jnp.float32),   # (Cout, Cin/g, 7, 7)
        dw_b=0.1 * n(ks[1], (in_dim,), jnp.float32),
        ln_w=jnp.ones((in_dim,), jnp.float32),
        ln_b=jnp.zeros((in_dim,), jnp.float32),
        pw1_w=0.1 * n(ks[2], (in_dim, 2 * in_dim), jnp.float32),  # (in, out) = W.T
        pw1_b=0.1 * n(ks[3], (2 * in_dim,), jnp.float32),
        pw2_w=0.1 * n(ks[4], (2 * in_dim, in_dim), jnp.float32),
        pw2_b=0.1 * n(ks[5], (in_dim,), jnp.float32),
        gamma=layer_scale_init_value * jnp.ones((in_dim,), jnp.float32),
        # label LayerNorm (channels_first)
        ln2_w=jnp.ones((LL,), jnp.float32),
        ln2_b=jnp.zeros((LL,), jnp.float32),
        # expanding_pw Linear (stored as (in, out) = W.T)
        pw_w=0.05 * n(ks[6], (D, 2 * D), jnp.float32),
        pw_b=0.05 * n(ks[7], (2 * D,), jnp.float32),
        # 3x3 convs, torch layout (Cout, Cin, 3, 3), no bias
        wc1=0.05 * n(ks[8], (D, 2 * D, 3, 3), jnp.float32),
        wc2=0.05 * n(ks[9], (E, D, 3, 3), jnp.float32),
        wc3=0.05 * n(ks[10], (out_dim, E, 3, 3), jnp.float32),
    )


if __name__ == "__main__":
    B, C, H, W = 2, 32, 16, 16          # in_dim=32 (divisible by 4), 16x16 spatial
    L, ratio = 4, 1                     # label_dim=4, label_expanding=1
    key = jax.random.PRNGKey(0)
    kx, kl, kp = jax.random.split(key, 3)
    x = jax.random.normal(kx, (B, C, H, W), jnp.float32)
    labels = jax.random.normal(kl, (B, L), jnp.float32)
    params = init_params(kp, in_dim=C, label_dim=L, out_dim=C, label_expanding=ratio)

    out = jax.block_until_ready(
        label_bind_block(x, labels, params, label_expanding=ratio))

    ref = jax.block_until_ready(label_bind_reference(x, labels, params, ratio))
    # tolerance loosened vs f32 reference: bf16 matmul operands + tanh GELU
    np.testing.assert_allclose(np.asarray(out), np.asarray(ref), atol=2e-2, rtol=2e-2)

    print("KERNEL_OK")
</pallas_src>

<mosaic_0001>
module attributes {stable_mosaic.version = 11 : i64} {
  func.func @_label_bind_kernel(%arg0: i32, %arg1: memref<1x72x1xf32, #tpu.memory_space<vmem>>, %arg2: memref<1x32x256xf32, #tpu.memory_space<vmem>>, %arg3: memref<32x1568xbf16, #tpu.memory_space<vmem>>, %arg4: memref<64x3xf32, #tpu.memory_space<vmem>>, %arg5: memref<64x32xbf16, #tpu.memory_space<vmem>>, %arg6: memref<32x64xbf16, #tpu.memory_space<vmem>>, %arg7: memref<72x32xbf16, #tpu.memory_space<vmem>>, %arg8: memref<9x36x72xbf16, #tpu.memory_space<vmem>>, %arg9: memref<9x36x36xbf16, #tpu.memory_space<vmem>>, %arg10: memref<9x32x36xbf16, #tpu.memory_space<vmem>>, %arg11: memref<1x32x256xf32, #tpu.memory_space<vmem>>, %arg12: memref<32x358xbf16, #tpu.memory_space<vmem>>, %arg13: memref<72x290xbf16, #tpu.memory_space<vmem>>, %arg14: memref<1568x256xbf16, #tpu.memory_space<vmem>>) attributes {dimension_semantics = [#tpu.dimension_semantics<parallel>], iteration_bounds = array<i64: 2>, scalar_prefetch = 0 : i64, scratch_operands = 3 : i64, tpu.core_type = #tpu.core_type<tc>, window_params = [{transform_indices = @transform_0, window_bounds = array<i64: 1, 72, 1>}, {transform_indices = @transform_1, window_bounds = array<i64: 1, 32, 256>}, {pipeline_mode = #tpu.pipeline_mode<synchronous>, transform_indices = @transform_2, window_bounds = array<i64: 32, 1568>}, {pipeline_mode = #tpu.pipeline_mode<synchronous>, transform_indices = @transform_3, window_bounds = array<i64: 64, 3>}, {pipeline_mode = #tpu.pipeline_mode<synchronous>, transform_indices = @transform_4, window_bounds = array<i64: 64, 32>}, {pipeline_mode = #tpu.pipeline_mode<synchronous>, transform_indices = @transform_5, window_bounds = array<i64: 32, 64>}, {pipeline_mode = #tpu.pipeline_mode<synchronous>, transform_indices = @transform_6, window_bounds = array<i64: 72, 32>}, {pipeline_mode = #tpu.pipeline_mode<synchronous>, transform_indices = @transform_7, window_bounds = array<i64: 9, 36, 72>}, {pipeline_mode = #tpu.pipeline_mode<synchronous>, transform_indices = @transform_8, window_bounds = array<i64: 9, 36, 36>}, {pipeline_mode = #tpu.pipeline_mode<synchronous>, transform_indices = @transform_9, window_bounds = array<i64: 9, 32, 36>}, {transform_indices = @transform_10, window_bounds = array<i64: 1, 32, 256>}]} {
    %0 = tpu.iota {dimensions = array<i32: 1>} : vector<1x256xi32>
    %c16_i32 = arith.constant 16 : i32
    %c0_i32 = arith.constant 0 : i32
    %1 = arith.cmpi eq, %c16_i32, %c0_i32 : i32
    %c1_i32 = arith.constant 1 : i32
    %2 = arith.select %1, %c1_i32, %c16_i32 : i32
    %3 = vector.broadcast %2 : i32 to vector<1x256xi32>
    %4 = arith.remsi %0, %3 : vector<1x256xi32>
    %c0_i32_0 = arith.constant 0 : i32
    %5 = vector.broadcast %c0_i32_0 : i32 to vector<1x256xi32>
    %6 = arith.cmpi ne, %4, %5 : vector<1x256xi32>
    %c0_i32_1 = arith.constant 0 : i32
    %7 = vector.broadcast %c0_i32_1 : i32 to vector<1x256xi32>
    %8 = arith.cmpi slt, %4, %7 : vector<1x256xi32>
    %c0_i32_2 = arith.constant 0 : i32
    %9 = arith.cmpi slt, %2, %c0_i32_2 : i32
    %10 = vector.broadcast %9 : i1 to vector<1x256xi1>
    %11 = vector.broadcast %10 : vector<1x256xi1> to vector<1x256xi1>
    %12 = arith.xori %8, %11 : vector<1x256xi1>
    %13 = arith.andi %12, %6 : vector<1x256xi1>
    %14 = vector.broadcast %2 : i32 to vector<1x256xi32>
    %15 = arith.addi %4, %14 : vector<1x256xi32>
    %16 = arith.select %13, %15, %4 : vector<1x256xi1>, vector<1x256xi32>
    %c3_i32 = arith.constant 3 : i32
    %17 = vector.broadcast %c3_i32 : i32 to vector<1x256xi32>
    %18 = arith.cmpi sge, %16, %17 : vector<1x256xi32>
    %c19_i32 = arith.constant 19 : i32
    %19 = vector.broadcast %c19_i32 : i32 to vector<1x256xi32>
    %20 = arith.cmpi slt, %16, %19 : vector<1x256xi32>
    %21 = arith.andi %18, %20 : vector<1x256xi1>
    %c2_i32 = arith.constant 2 : i32
    %22 = vector.broadcast %c2_i32 : i32 to vector<1x256xi32>
    %23 = arith.cmpi sge, %16, %22 : vector<1x256xi32>
    %c18_i32 = arith.constant 18 : i32
    %24 = vector.broadcast %c18_i32 : i32 to vector<1x256xi32>
    %25 = arith.cmpi slt, %16, %24 : vector<1x256xi32>
    %26 = arith.andi %23, %25 : vector<1x256xi1>
    %c1_i32_3 = arith.constant 1 : i32
    %27 = vector.broadcast %c1_i32_3 : i32 to vector<1x256xi32>
    %28 = arith.cmpi sge, %16, %27 : vector<1x256xi32>
    %c17_i32 = arith.constant 17 : i32
    %29 = vector.broadcast %c17_i32 : i32 to vector<1x256xi32>
    %30 = arith.cmpi slt, %16, %29 : vector<1x256xi32>
    %31 = arith.andi %28, %30 : vector<1x256xi1>
    %c-1_i32 = arith.constant -1 : i32
    %32 = vector.broadcast %c-1_i32 : i32 to vector<1x256xi32>
    %33 = arith.cmpi sge, %16, %32 : vector<1x256xi32>
    %c15_i32 = arith.constant 15 : i32
    %34 = vector.broadcast %c15_i32 : i32 to vector<1x256xi32>
    %35 = arith.cmpi slt, %16, %34 : vector<1x256xi32>
    %36 = arith.andi %33, %35 : vector<1x256xi1>
    %c-2_i32 = arith.constant -2 : i32
    %37 = vector.broadcast %c-2_i32 : i32 to vector<1x256xi32>
    %38 = arith.cmpi sge, %16, %37 : vector<1x256xi32>
    %c14_i32 = arith.constant 14 : i32
    %39 = vector.broadcast %c14_i32 : i32 to vector<1x256xi32>
    %40 = arith.cmpi slt, %16, %39 : vector<1x256xi32>
    %41 = arith.andi %38, %40 : vector<1x256xi1>
    %c-3_i32 = arith.constant -3 : i32
    %42 = vector.broadcast %c-3_i32 : i32 to vector<1x256xi32>
    %43 = arith.cmpi sge, %16, %42 : vector<1x256xi32>
    %c13_i32 = arith.constant 13 : i32
    %44 = vector.broadcast %c13_i32 : i32 to vector<1x256xi32>
    %45 = arith.cmpi slt, %16, %44 : vector<1x256xi32>
    %46 = arith.andi %43, %45 : vector<1x256xi1>
    %c0 = arith.constant 0 : index
    %c0_4 = arith.constant 0 : index
    %c0_5 = arith.constant 0 : index
    %47 = vector.load %arg2[%c0, %c0_4, %c0_5] : memref<1x32x256xf32, #tpu.memory_space<vmem>>, vector<1x32x256xf32>
    %48 = vector.shape_cast %47 : vector<1x32x256xf32> to vector<32x256xf32>
    %cst = arith.constant 0.000000e+00 : bf16
    %49 = vector.broadcast %cst : bf16 to vector<32x358xbf16>
    %c0_6 = arith.constant 0 : index
    %c0_7 = arith.constant 0 : index
    %50 = vector.load %arg12[%c0_6, %c0_7] : memref<32x358xbf16, #tpu.memory_space<vmem>>, vector<32x358xbf16>
    tpu.vector_store %arg12[%c0_6, %c0_7], %49 {strides = array<i32>} : memref<32x358xbf16, #tpu.memory_space<vmem>>, vector<32x358xbf16>,
    %51 = arith.truncf %48 : vector<32x256xf32> to vector<32x256xbf16>
    %c0_8 = arith.constant 0 : index
    %c51 = arith.constant 51 : index
    %52 = vector.load %arg12[%c0_8, %c51] : memref<32x358xbf16, #tpu.memory_space<vmem>>, vector<32x256xbf16>
    tpu.vector_store %arg12[%c0_8, %c51], %51 {strides = array<i32>} : memref<32x358xbf16, #tpu.memory_space<vmem>>, vector<32x256xbf16>,
    %c0_9 = arith.constant 0 : index
    %c0_10 = arith.constant 0 : index
    %53 = vector.load %arg12[%c0_9, %c0_10] : memref<32x358xbf16, #tpu.memory_space<vmem>>, vector<32x256xbf16>
    %cst_11 = arith.constant 0.000000e+00 : bf16
    %54 = vector.broadcast %cst_11 : bf16 to vector<32x256xbf16>
    %55 = vector.shape_cast %21 : vector<1x256xi1> to vector<1x256xi1>
    %56 = vector.broadcast %55 : vector<1x256xi1> to vector<32x256xi1>
    %57 = arith.select %56, %53, %54 : vector<32x256xi1>, vector<32x256xbf16>
    %c0_12 = arith.constant 0 : index
    %c0_13 = arith.constant 0 : index
    %58 = vector.load %arg14[%c0_12, %c0_13] : memref<1568x256xbf16, #tpu.memory_space<vmem>>, vector<32x256xbf16>
    tpu.vector_store %arg14[%c0_12, %c0_13], %57 {strides = array<i32>} : memref<1568x256xbf16, #tpu.memory_space<vmem>>, vector<32x256xbf16>,
    %c0_14 = arith.constant 0 : index
    %c1 = arith.constant 1 : index
    %59 = vector.load %arg12[%c0_14, %c1] : memref<32x358xbf16, #tpu.memory_space<vmem>>, vector<32x256xbf16>
    %cst_15 = arith.constant 0.000000e+00 : bf16
    %60 = vector.broadcast %cst_15 : bf16 to vector<32x256xbf16>
    %61 = vector.shape_cast %26 : vector<1x256xi1> to vector<1x256xi1>
    %62 = vector.broadcast %61 : vector<1x256xi1> to vector<32x256xi1>
    %63 = arith.select %62, %59, %60 : vector<32x256xi1>, vector<32x256xbf16>
    %c32 = arith.constant 32 : index
    %c0_16 = arith.constant 0 : index
    %64 = vector.load %arg14[%c32, %c0_16] : memref<1568x256xbf16, #tpu.memory_space<vmem>>, vector<32x256xbf16>
    tpu.vector_store %arg14[%c32, %c0_16], %63 {strides = array<i32>} : memref<1568x256xbf16, #tpu.memory_space<vmem>>, vector<32x256xbf16>,
    %c0_17 = arith.constant 0 : index
    %c2 = arith.constant 2 : index
    %65 = vector.load %arg12[%c0_17, %c2] : memref<32x358xbf16, #tpu.memory_space<vmem>>, vector<32x256xbf16>
    %cst_18 = arith.constant 0.000000e+00 : bf16
    %66 = vector.broadcast %cst_18 : bf16 to vector<32x256xbf16>
    %67 = vector.shape_cast %31 : vector<1x256xi1> to vector<1x256xi1>
    %68 = vector.broadcast %67 : vector<1x256xi1> to vector<32x256xi1>
    %69 = arith.select %68, %65, %66 : vector<32x256xi1>, vector<32x256xbf16>
    %c64 = arith.constant 64 : index
    %c0_19 = arith.constant 0 : index
    %70 = vector.load %arg14[%c64, %c0_19] : memref<1568x256xbf16, #tpu.memory_space<vmem>>, vector<32x256xbf16>
    tpu.vector_store %arg14[%c64, %c0_19], %69 {strides = array<i32>} : memref<1568x256xbf16, #tpu.memory_space<vmem>>, vector<32x256xbf16>,
    %c0_20 = arith.constant 0 : index
    %c3 = arith.constant 3 : index
    %71 = vector.load %arg12[%c0_20, %c3] : memref<32x358xbf16, #tpu.memory_space<vmem>>, vector<32x256xbf16>
    %c96 = arith.constant 96 : index
    %c0_21 = arith.constant 0 : index
    %72 = vector.load %arg14[%c96, %c0_21] : memref<1568x256xbf16, #tpu.memory_space<vmem>>, vector<32x256xbf16>
    tpu.vector_store %arg14[%c96, %c0_21], %71 {strides = array<i32>} : memref<1568x256xbf16, #tpu.memory_space<vmem>>, vector<32x256xbf16>,
    %c0_22 = arith.constant 0 : index
    %c4 = arith.constant 4 : index
    %73 = vector.load %arg12[%c0_22, %c4] : memref<32x358xbf16, #tpu.memory_space<vmem>>, vector<32x256xbf16>
    %cst_23 = arith.constant 0.000000e+00 : bf16
    %74 = vector.broadcast %cst_23 : bf16 to vector<32x256xbf16>
    %75 = vector.shape_cast %36 : vector<1x256xi1> to vector<1x256xi1>
    %76 = vector.broadcast %75 : vector<1x256xi1> to vector<32x256xi1>
    %77 = arith.select %76, %73, %74 : vector<32x256xi1>, vector<32x256xbf16>
    %c128 = arith.constant 128 : index
    %c0_24 = arith.constant 0 : index
    %78 = vector.load %arg14[%c128, %c0_24] : memref<1568x256xbf16, #tpu.memory_space<vmem>>, vector<32x256xbf16>
    tpu.vector_store %arg14[%c128, %c0_24], %77 {strides = array<i32>} : memref<1568x256xbf16, #tpu.memory_space<vmem>>, vector<32x256xbf16>,
    %c0_25 = arith.constant 0 : index
    %c5 = arith.constant 5 : index
    %79 = vector.load %arg12[%c0_25, %c5] : memref<32x358xbf16, #tpu.memory_space<vmem>>, vector<32x256xbf16>
    %cst_26 = arith.constant 0.000000e+00 : bf16
    %80 = vector.broadcast %cst_26 : bf16 to vector<32x256xbf16>
    %81 = vector.shape_cast %41 : vector<1x256xi1> to vector<1x256xi1>
    %82 = vector.broadcast %81 : vector<1x256xi1> to vector<32x256xi1>
    %83 = arith.select %82, %79, %80 : vector<32x256xi1>, vector<32x256xbf16>
    %c160 = arith.constant 160 : index
    %c0_27 = arith.constant 0 : index
    %84 = vector.load %arg14[%c160, %c0_27] : memref<1568x256xbf16, #tpu.memory_space<vmem>>, vector<32x256xbf16>
    tpu.vector_store %arg14[%c160, %c0_27], %83 {strides = array<i32>} : memref<1568x256xbf16, #tpu.memory_space<vmem>>, vector<32x256xbf16>,
    %c0_28 = arith.constant 0 : index
    %c6 = arith.constant 6 : index
    %85 = vector.load %arg12[%c0_28, %c6] : memref<32x358xbf16, #tpu.memory_space<vmem>>, vector<32x256xbf16>
    %cst_29 = arith.constant 0.000000e+00 : bf16
    %86 = vector.broadcast %cst_29 : bf16 to vector<32x256xbf16>
    %87 = vector.shape_cast %46 : vector<1x256xi1> to vector<1x256xi1>
    %88 = vector.broadcast %87 : vector<1x256xi1> to vector<32x256xi1>
    %89 = arith.select %88, %85, %86 : vector<32x256xi1>, vector<32x256xbf16>
    %c192 = arith.constant 192 : index
    %c0_30 = arith.constant 0 : index
    %90 = vector.load %arg14[%c192, %c0_30] : memref<1568x256xbf16, #tpu.memory_space<vmem>>, vector<32x256xbf16>
    tpu.vector_store %arg14[%c192, %c0_30], %89 {strides = array<i32>} : memref<1568x256xbf16, #tpu.memory_space<vmem>>, vector<32x256xbf16>,
    %c0_31 = arith.constant 0 : index
    %c16 = arith.constant 16 : index
    %91 = vector.load %arg12[%c0_31, %c16] : memref<32x358xbf16, #tpu.memory_space<vmem>>, vector<32x256xbf16>
    %cst_32 = arith.constant 0.000000e+00 : bf16
    %92 = vector.broadcast %cst_32 : bf16 to vector<32x256xbf16>
    %93 = vector.shape_cast %21 : vector<1x256xi1> to vector<1x256xi1>
    %94 = vector.broadcast %93 : vector<1x256xi1> to vector<32x256xi1>
    %95 = arith.select %94, %91, %92 : vector<32x256xi1>, vector<32x256xbf16>
    %c224 = arith.constant 224 : index
    %c0_33 = arith.constant 0 : index
    %96 = vector.load %arg14[%c224, %c0_33] : memref<1568x256xbf16, #tpu.memory_space<vmem>>, vector<32x256xbf16>
    tpu.vector_store %arg14[%c224, %c0_33], %95 {strides = array<i32>} : memref<1568x256xbf16, #tpu.memory_space<vmem>>, vector<32x256xbf16>,
    %c0_34 = arith.constant 0 : index
    %c17 = arith.constant 17 : index
    %97 = vector.load %arg12[%c0_34, %c17] : memref<32x358xbf16, #tpu.memory_space<vmem>>, vector<32x256xbf16>
    %cst_35 = arith.constant 0.000000e+00 : bf16
    %98 = vector.broadcast %cst_35 : bf16 to vector<32x256xbf16>
    %99 = vector.shape_cast %26 : vector<1x256xi1> to vector<1x256xi1>
    %100 = vector.broadcast %99 : vector<1x256xi1> to vector<32x256xi1>
    %101 = arith.select %100, %97, %98 : vector<32x256xi1>, vector<32x256xbf16>
    %c256 = arith.constant 256 : index
    %c0_36 = arith.constant 0 : index
    %102 = vector.load %arg14[%c256, %c0_36] : memref<1568x256xbf16, #tpu.memory_space<vmem>>, vector<32x256xbf16>
    tpu.vector_store %arg14[%c256, %c0_36], %101 {strides = array<i32>} : memref<1568x256xbf16, #tpu.memory_space<vmem>>, vector<32x256xbf16>,
    %c0_37 = arith.constant 0 : index
    %c18 = arith.constant 18 : index
    %103 = vector.load %arg12[%c0_37, %c18] : memref<32x358xbf16, #tpu.memory_space<vmem>>, vector<32x256xbf16>
    %cst_38 = arith.constant 0.000000e+00 : bf16
    %104 = vector.broadcast %cst_38 : bf16 to vector<32x256xbf16>
    %105 = vector.shape_cast %31 : vector<1x256xi1> to vector<1x256xi1>
    %106 = vector.broadcast %105 : vector<1x256xi1> to vector<32x256xi1>
    %107 = arith.select %106, %103, %104 : vector<32x256xi1>, vector<32x256xbf16>
    %c288 = arith.constant 288 : index
    %c0_39 = arith.constant 0 : index
    %108 = vector.load %arg14[%c288, %c0_39] : memref<1568x256xbf16, #tpu.memory_space<vmem>>, vector<32x256xbf16>
    tpu.vector_store %arg14[%c288, %c0_39], %107 {strides = array<i32>} : memref<1568x256xbf16, #tpu.memory_space<vmem>>, vector<32x256xbf16>,
    %c0_40 = arith.constant 0 : index
    %c19 = arith.constant 19 : index
    %109 = vector.load %arg12[%c0_40, %c19] : memref<32x358xbf16, #tpu.memory_space<vmem>>, vector<32x256xbf16>
    %c320 = arith.constant 320 : index
    %c0_41 = arith.constant 0 : index
    %110 = vector.load %arg14[%c320, %c0_41] : memref<1568x256xbf16, #tpu.memory_space<vmem>>, vector<32x256xbf16>
    tpu.vector_store %arg14[%c320, %c0_41], %109 {strides = array<i32>} : memref<1568x256xbf16, #tpu.memory_space<vmem>>, vector<32x256xbf16>,
    %c0_42 = arith.constant 0 : index
    %c20 = arith.constant 20 : index
    %111 = vector.load %arg12[%c0_42, %c20] : memref<32x358xbf16, #tpu.memory_space<vmem>>, vector<32x256xbf16>
    %cst_43 = arith.constant 0.000000e+00 : bf16
    %112 = vector.broadcast %cst_43 : bf16 to vector<32x256xbf16>
    %113 = vector.shape_cast %36 : vector<1x256xi1> to vector<1x256xi1>
    %114 = vector.broadcast %113 : vector<1x256xi1> to vector<32x256xi1>
    %115 = arith.select %114, %111, %112 : vector<32x256xi1>, vector<32x256xbf16>
    %c352 = arith.constant 352 : index
    %c0_44 = arith.constant 0 : index
    %116 = vector.load %arg14[%c352, %c0_44] : memref<1568x256xbf16, #tpu.memory_space<vmem>>, vector<32x256xbf16>
    tpu.vector_store %arg14[%c352, %c0_44], %115 {strides = array<i32>} : memref<1568x256xbf16, #tpu.memory_space<vmem>>, vector<32x256xbf16>,
    %c0_45 = arith.constant 0 : index
    %c21 = arith.constant 21 : index
    %117 = vector.load %arg12[%c0_45, %c21] : memref<32x358xbf16, #tpu.memory_space<vmem>>, vector<32x256xbf16>
    %cst_46 = arith.constant 0.000000e+00 : bf16
    %118 = vector.broadcast %cst_46 : bf16 to vector<32x256xbf16>
    %119 = vector.shape_cast %41 : vector<1x256xi1> to vector<1x256xi1>
    %120 = vector.broadcast %119 : vector<1x256xi1> to vector<32x256xi1>
    %121 = arith.select %120, %117, %118 : vector<32x256xi1>, vector<32x256xbf16>
    %c384 = arith.constant 384 : index
    %c0_47 = arith.constant 0 : index
    %122 = vector.load %arg14[%c384, %c0_47] : memref<1568x256xbf16, #tpu.memory_space<vmem>>, vector<32x256xbf16>
    tpu.vector_store %arg14[%c384, %c0_47], %121 {strides = array<i32>} : memref<1568x256xbf16, #tpu.memory_space<vmem>>, vector<32x256xbf16>,
    %c0_48 = arith.constant 0 : index
    %c22 = arith.constant 22 : index
    %123 = vector.load %arg12[%c0_48, %c22] : memref<32x358xbf16, #tpu.memory_space<vmem>>, vector<32x256xbf16>
    %cst_49 = arith.constant 0.000000e+00 : bf16
    %124 = vector.broadcast %cst_49 : bf16 to vector<32x256xbf16>
    %125 = vector.shape_cast %46 : vector<1x256xi1> to vector<1x256xi1>
    %126 = vector.broadcast %125 : vector<1x256xi1> to vector<32x256xi1>
    %127 = arith.select %126, %123, %124 : vector<32x256xi1>, vector<32x256xbf16>
    %c416 = arith.constant 416 : index
    %c0_50 = arith.constant 0 : index
    %128 = vector.load %arg14[%c416, %c0_50] : memref<1568x256xbf16, #tpu.memory_space<vmem>>, vector<32x256xbf16>
    tpu.vector_store %arg14[%c416, %c0_50], %127 {strides = array<i32>} : memref<1568x256xbf16, #tpu.memory_space<vmem>>, vector<32x256xbf16>,
    %c0_51 = arith.constant 0 : index
    %c32_52 = arith.constant 32 : index
    %129 = vector.load %arg12[%c0_51, %c32_52] : memref<32x358xbf16, #tpu.memory_space<vmem>>, vector<32x256xbf16>
    %cst_53 = arith.constant 0.000000e+00 : bf16
    %130 = vector.broadcast %cst_53 : bf16 to vector<32x256xbf16>
    %131 = vector.shape_cast %21 : vector<1x256xi1> to vector<1x256xi1>
    %132 = vector.broadcast %131 : vector<1x256xi1> to vector<32x256xi1>
    %133 = arith.select %132, %129, %130 : vector<32x256xi1>, vector<32x256xbf16>
    %c448 = arith.constant 448 : index
    %c0_54 = arith.constant 0 : index
    %134 = vector.load %arg14[%c448, %c0_54] : memref<1568x256xbf16, #tpu.memory_space<vmem>>, vector<32x256xbf16>
    tpu.vector_store %arg14[%c448, %c0_54], %133 {strides = array<i32>} : memref<1568x256xbf16, #tpu.memory_space<vmem>>, vector<32x256xbf16>,
    %c0_55 = arith.constant 0 : index
    %c33 = arith.constant 33 : index
    %135 = vector.load %arg12[%c0_55, %c33] : memref<32x358xbf16, #tpu.memory_space<vmem>>, vector<32x256xbf16>
    %cst_56 = arith.constant 0.000000e+00 : bf16
    %136 = vector.broadcast %cst_56 : bf16 to vector<32x256xbf16>
    %137 = vector.shape_cast %26 : vector<1x256xi1> to vector<1x256xi1>
    %138 = vector.broadcast %137 : vector<1x256xi1> to vector<32x256xi1>
    %139 = arith.select %138, %135, %136 : vector<32x256xi1>, vector<32x256xbf16>
    %c480 = arith.constant 480 : index
    %c0_57 = arith.constant 0 : index
    %140 = vector.load %arg14[%c480, %c0_57] : memref<1568x256xbf16, #tpu.memory_space<vmem>>, vector<32x256xbf16>
    tpu.vector_store %arg14[%c480, %c0_57], %139 {strides = array<i32>} : memref<1568x256xbf16, #tpu.memory_space<vmem>>, vector<32x256xbf16>,
    %c0_58 = arith.constant 0 : index
    %c34 = arith.constant 34 : index
    %141 = vector.load %arg12[%c0_58, %c34] : memref<32x358xbf16, #tpu.memory_space<vmem>>, vector<32x256xbf16>
    %cst_59 = arith.constant 0.000000e+00 : bf16
    %142 = vector.broadcast %cst_59 : bf16 to vector<32x256xbf16>
    %143 = vector.shape_cast %31 : vector<1x256xi1> to vector<1x256xi1>
    %144 = vector.broadcast %143 : vector<1x256xi1> to vector<32x256xi1>
    %145 = arith.select %144, %141, %142 : vector<32x256xi1>, vector<32x256xbf16>
    %c512 = arith.constant 512 : index
    %c0_60 = arith.constant 0 : index
    %146 = vector.load %arg14[%c512, %c0_60] : memref<1568x256xbf16, #tpu.memory_space<vmem>>, vector<32x256xbf16>
    tpu.vector_store %arg14[%c512, %c0_60], %145 {strides = array<i32>} : memref<1568x256xbf16, #tpu.memory_space<vmem>>, vector<32x256xbf16>,
    %c0_61 = arith.constant 0 : index
    %c35 = arith.constant 35 : index
    %147 = vector.load %arg12[%c0_61, %c35] : memref<32x358xbf16, #tpu.memory_space<vmem>>, vector<32x256xbf16>
    %c544 = arith.constant 544 : index
    %c0_62 = arith.constant 0 : index
    %148 = vector.load %arg14[%c544, %c0_62] : memref<1568x256xbf16, #tpu.memory_space<vmem>>, vector<32x256xbf16>
    tpu.vector_store %arg14[%c544, %c0_62], %147 {strides = array<i32>} : memref<1568x256xbf16, #tpu.memory_space<vmem>>, vector<32x256xbf16>,
    %c0_63 = arith.constant 0 : index
    %c36 = arith.constant 36 : index
    %149 = vector.load %arg12[%c0_63, %c36] : memref<32x358xbf16, #tpu.memory_space<vmem>>, vector<32x256xbf16>
    %cst_64 = arith.constant 0.000000e+00 : bf16
    %150 = vector.broadcast %cst_64 : bf16 to vector<32x256xbf16>
    %151 = vector.shape_cast %36 : vector<1x256xi1> to vector<1x256xi1>
    %152 = vector.broadcast %151 : vector<1x256xi1> to vector<32x256xi1>
    %153 = arith.select %152, %149, %150 : vector<32x256xi1>, vector<32x256xbf16>
    %c576 = arith.constant 576 : index
    %c0_65 = arith.constant 0 : index
    %154 = vector.load %arg14[%c576, %c0_65] : memref<1568x256xbf16, #tpu.memory_space<vmem>>, vector<32x256xbf16>
    tpu.vector_store %arg14[%c576, %c0_65], %153 {strides = array<i32>} : memref<1568x256xbf16, #tpu.memory_space<vmem>>, vector<32x256xbf16>,
    %c0_66 = arith.constant 0 : index
    %c37 = arith.constant 37 : index
    %155 = vector.load %arg12[%c0_66, %c37] : memref<32x358xbf16, #tpu.memory_space<vmem>>, vector<32x256xbf16>
    %cst_67 = arith.constant 0.000000e+00 : bf16
    %156 = vector.broadcast %cst_67 : bf16 to vector<32x256xbf16>
    %157 = vector.shape_cast %41 : vector<1x256xi1> to vector<1x256xi1>
    %158 = vector.broadcast %157 : vector<1x256xi1> to vector<32x256xi1>
    %159 = arith.select %158, %155, %156 : vector<32x256xi1>, vector<32x256xbf16>
    %c608 = arith.constant 608 : index
    %c0_68 = arith.constant 0 : index
    %160 = vector.load %arg14[%c608, %c0_68] : memref<1568x256xbf16, #tpu.memory_space<vmem>>, vector<32x256xbf16>
    tpu.vector_store %arg14[%c608, %c0_68], %159 {strides = array<i32>} : memref<1568x256xbf16, #tpu.memory_space<vmem>>, vector<32x256xbf16>,
    %c0_69 = arith.constant 0 : index
    %c38 = arith.constant 38 : index
    %161 = vector.load %arg12[%c0_69, %c38] : memref<32x358xbf16, #tpu.memory_space<vmem>>, vector<32x256xbf16>
    %cst_70 = arith.constant 0.000000e+00 : bf16
    %162 = vector.broadcast %cst_70 : bf16 to vector<32x256xbf16>
    %163 = vector.shape_cast %46 : vector<1x256xi1> to vector<1x256xi1>
    %164 = vector.broadcast %163 : vector<1x256xi1> to vector<32x256xi1>
    %165 = arith.select %164, %161, %162 : vector<32x256xi1>, vector<32x256xbf16>
    %c640 = arith.constant 640 : index
    %c0_71 = arith.constant 0 : index
    %166 = vector.load %arg14[%c640, %c0_71] : memref<1568x256xbf16, #tpu.memory_space<vmem>>, vector<32x256xbf16>
    tpu.vector_store %arg14[%c640, %c0_71], %165 {strides = array<i32>} : memref<1568x256xbf16, #tpu.memory_space<vmem>>, vector<32x256xbf16>,
    %c0_72 = arith.constant 0 : index
    %c48 = arith.constant 48 : index
    %167 = vector.load %arg12[%c0_72, %c48] : memref<32x358xbf16, #tpu.memory_space<vmem>>, vector<32x256xbf16>
    %cst_73 = arith.constant 0.000000e+00 : bf16
    %168 = vector.broadcast %cst_73 : bf16 to vector<32x256xbf16>
    %169 = vector.shape_cast %21 : vector<1x256xi1> to vector<1x256xi1>
    %170 = vector.broadcast %169 : vector<1x256xi1> to vector<32x256xi1>
    %171 = arith.select %170, %167, %168 : vector<32x256xi1>, vector<32x256xbf16>
    %c672 = arith.constant 672 : index
    %c0_74 = arith.constant 0 : index
    %172 = vector.load %arg14[%c672, %c0_74] : memref<1568x256xbf16, #tpu.memory_space<vmem>>, vector<32x256xbf16>
    tpu.vector_store %arg14[%c672, %c0_74], %171 {strides = array<i32>} : memref<1568x256xbf16, #tpu.memory_space<vmem>>, vector<32x256xbf16>,
    %c0_75 = arith.constant 0 : index
    %c49 = arith.constant 49 : index
    %173 = vector.load %arg12[%c0_75, %c49] : memref<32x358xbf16, #tpu.memory_space<vmem>>, vector<32x256xbf16>
    %cst_76 = arith.constant 0.000000e+00 : bf16
    %174 = vector.broadcast %cst_76 : bf16 to vector<32x256xbf16>
    %175 = vector.shape_cast %26 : vector<1x256xi1> to vector<1x256xi1>
    %176 = vector.broadcast %175 : vector<1x256xi1> to vector<32x256xi1>
    %177 = arith.select %176, %173, %174 : vector<32x256xi1>, vector<32x256xbf16>
    %c704 = arith.constant 704 : index
    %c0_77 = arith.constant 0 : index
    %178 = vector.load %arg14[%c704, %c0_77] : memref<1568x256xbf16, #tpu.memory_space<vmem>>, vector<32x256xbf16>
    tpu.vector_store %arg14[%c704, %c0_77], %177 {strides = array<i32>} : memref<1568x256xbf16, #tpu.memory_space<vmem>>, vector<32x256xbf16>,
    %c0_78 = arith.constant 0 : index
    %c50 = arith.constant 50 : index
    %179 = vector.load %arg12[%c0_78, %c50] : memref<32x358xbf16, #tpu.memory_space<vmem>>, vector<32x256xbf16>
    %cst_79 = arith.constant 0.000000e+00 : bf16
    %180 = vector.broadcast %cst_79 : bf16 to vector<32x256xbf16>
    %181 = vector.shape_cast %31 : vector<1x256xi1> to vector<1x256xi1>
    %182 = vector.broadcast %181 : vector<1x256xi1> to vector<32x256xi1>
    %183 = arith.select %182, %179, %180 : vector<32x256xi1>, vector<32x256xbf16>
    %c736 = arith.constant 736 : index
    %c0_80 = arith.constant 0 : index
    %184 = vector.load %arg14[%c736, %c0_80] : memref<1568x256xbf16, #tpu.memory_space<vmem>>, vector<32x256xbf16>
    tpu.vector_store %arg14[%c736, %c0_80], %183 {strides = array<i32>} : memref<1568x256xbf16, #tpu.memory_space<vmem>>, vector<32x256xbf16>,
    %c0_81 = arith.constant 0 : index
    %c51_82 = arith.constant 51 : index
    %185 = vector.load %arg12[%c0_81, %c51_82] : memref<32x358xbf16, #tpu.memory_space<vmem>>, vector<32x256xbf16>
    %c768 = arith.constant 768 : index
    %c0_83 = arith.constant 0 : index
    %186 = vector.load %arg14[%c768, %c0_83] : memref<1568x256xbf16, #tpu.memory_space<vmem>>, vector<32x256xbf16>
    tpu.vector_store %arg14[%c768, %c0_83], %185 {strides = array<i32>} : memref<1568x256xbf16, #tpu.memory_space<vmem>>, vector<32x256xbf16>,
    %c0_84 = arith.constant 0 : index
    %c52 = arith.constant 52 : index
    %187 = vector.load %arg12[%c0_84, %c52] : memref<32x358xbf16, #tpu.memory_space<vmem>>, vector<32x256xbf16>
    %cst_85 = arith.constant 0.000000e+00 : bf16
    %188 = vector.broadcast %cst_85 : bf16 to vector<32x256xbf16>
    %189 = vector.shape_cast %36 : vector<1x256xi1> to vector<1x256xi1>
    %190 = vector.broadcast %189 : vector<1x256xi1> to vector<32x256xi1>
    %191 = arith.select %190, %187, %188 : vector<32x256xi1>, vector<32x256xbf16>
    %c800 = arith.constant 800 : index
    %c0_86 = arith.constant 0 : index
    %192 = vector.load %arg14[%c800, %c0_86] : memref<1568x256xbf16, #tpu.memory_space<vmem>>, vector<32x256xbf16>
    tpu.vector_store %arg14[%c800, %c0_86], %191 {strides = array<i32>} : memref<1568x256xbf16, #tpu.memory_space<vmem>>, vector<32x256xbf16>,
    %c0_87 = arith.constant 0 : index
    %c53 = arith.constant 53 : index
    %193 = vector.load %arg12[%c0_87, %c53] : memref<32x358xbf16, #tpu.memory_space<vmem>>, vector<32x256xbf16>
    %cst_88 = arith.constant 0.000000e+00 : bf16
    %194 = vector.broadcast %cst_88 : bf16 to vector<32x256xbf16>
    %195 = vector.shape_cast %41 : vector<1x256xi1> to vector<1x256xi1>
    %196 = vector.broadcast %195 : vector<1x256xi1> to vector<32x256xi1>
    %197 = arith.select %196, %193, %194 : vector<32x256xi1>, vector<32x256xbf16>
    %c832 = arith.constant 832 : index
    %c0_89 = arith.constant 0 : index
    %198 = vector.load %arg14[%c832, %c0_89] : memref<1568x256xbf16, #tpu.memory_space<vmem>>, vector<32x256xbf16>
    tpu.vector_store %arg14[%c832, %c0_89], %197 {strides = array<i32>} : memref<1568x256xbf16, #tpu.memory_space<vmem>>, vector<32x256xbf16>,
    %c0_90 = arith.constant 0 : index
    %c54 = arith.constant 54 : index
    %199 = vector.load %arg12[%c0_90, %c54] : memref<32x358xbf16, #tpu.memory_space<vmem>>, vector<32x256xbf16>
    %cst_91 = arith.constant 0.000000e+00 : bf16
    %200 = vector.broadcast %cst_91 : bf16 to vector<32x256xbf16>
    %201 = vector.shape_cast %46 : vector<1x256xi1> to vector<1x256xi1>
    %202 = vector.broadcast %201 : vector<1x256xi1> to vector<32x256xi1>
    %203 = arith.select %202, %199, %200 : vector<32x256xi1>, vector<32x256xbf16>
    %c864 = arith.constant 864 : index
    %c0_92 = arith.constant 0 : index
    %204 = vector.load %arg14[%c864, %c0_92] : memref<1568x256xbf16, #tpu.memory_space<vmem>>, vector<32x256xbf16>
    tpu.vector_store %arg14[%c864, %c0_92], %203 {strides = array<i32>} : memref<1568x256xbf16, #tpu.memory_space<vmem>>, vector<32x256xbf16>,
    %c0_93 = arith.constant 0 : index
    %c64_94 = arith.constant 64 : index
    %205 = vector.load %arg12[%c0_93, %c64_94] : memref<32x358xbf16, #tpu.memory_space<vmem>>, vector<32x256xbf16>
    %cst_95 = arith.constant 0.000000e+00 : bf16
    %206 = vector.broadcast %cst_95 : bf16 to vector<32x256xbf16>
    %207 = vector.shape_cast %21 : vector<1x256xi1> to vector<1x256xi1>
    %208 = vector.broadcast %207 : vector<1x256xi1> to vector<32x256xi1>
    %209 = arith.select %208, %205, %206 : vector<32x256xi1>, vector<32x256xbf16>
    %c896 = arith.constant 896 : index
    %c0_96 = arith.constant 0 : index
    %210 = vector.load %arg14[%c896, %c0_96] : memref<1568x256xbf16, #tpu.memory_space<vmem>>, vector<32x256xbf16>
    tpu.vector_store %arg14[%c896, %c0_96], %209 {strides = array<i32>} : memref<1568x256xbf16, #tpu.memory_space<vmem>>, vector<32x256xbf16>,
    %c0_97 = arith.constant 0 : index
    %c65 = arith.constant 65 : index
    %211 = vector.load %arg12[%c0_97, %c65] : memref<32x358xbf16, #tpu.memory_space<vmem>>, vector<32x256xbf16>
    %cst_98 = arith.constant 0.000000e+00 : bf16
    %212 = vector.broadcast %cst_98 : bf16 to vector<32x256xbf16>
    %213 = vector.shape_cast %26 : vector<1x256xi1> to vector<1x256xi1>
    %214 = vector.broadcast %213 : vector<1x256xi1> to vector<32x256xi1>
    %215 = arith.select %214, %211, %212 : vector<32x256xi1>, vector<32x256xbf16>
    %c928 = arith.constant 928 : index
    %c0_99 = arith.constant 0 : index
    %216 = vector.load %arg14[%c928, %c0_99] : memref<1568x256xbf16, #tpu.memory_space<vmem>>, vector<32x256xbf16>
    tpu.vector_store %arg14[%c928, %c0_99], %215 {strides = array<i32>} : memref<1568x256xbf16, #tpu.memory_space<vmem>>, vector<32x256xbf16>,
    %c0_100 = arith.constant 0 : index
    %c66 = arith.constant 66 : index
    %217 = vector.load %arg12[%c0_100, %c66] : memref<32x358xbf16, #tpu.memory_space<vmem>>, vector<32x256xbf16>
    %cst_101 = arith.constant 0.000000e+00 : bf16
    %218 = vector.broadcast %cst_101 : bf16 to vector<32x256xbf16>
    %219 = vector.shape_cast %31 : vector<1x256xi1> to vector<1x256xi1>
    %220 = vector.broadcast %219 : vector<1x256xi1> to vector<32x256xi1>
    %221 = arith.select %220, %217, %218 : vector<32x256xi1>, vector<32x256xbf16>
    %c960 = arith.constant 960 : index
    %c0_102 = arith.constant 0 : index
    %222 = vector.load %arg14[%c960, %c0_102] : memref<1568x256xbf16, #tpu.memory_space<vmem>>, vector<32x256xbf16>
    tpu.vector_store %arg14[%c960, %c0_102], %221 {strides = array<i32>} : memref<1568x256xbf16, #tpu.memory_space<vmem>>, vector<32x256xbf16>,
    %c0_103 = arith.constant 0 : index
    %c67 = arith.constant 67 : index
    %223 = vector.load %arg12[%c0_103, %c67] : memref<32x358xbf16, #tpu.memory_space<vmem>>, vector<32x256xbf16>
    %c992 = arith.constant 992 : index
    %c0_104 = arith.constant 0 : index
    %224 = vector.load %arg14[%c992, %c0_104] : memref<1568x256xbf16, #tpu.memory_space<vmem>>, vector<32x256xbf16>
    tpu.vector_store %arg14[%c992, %c0_104], %223 {strides = array<i32>} : memref<1568x256xbf16, #tpu.memory_space<vmem>>, vector<32x256xbf16>,
    %c0_105 = arith.constant 0 : index
    %c68 = arith.constant 68 : index
    %225 = vector.load %arg12[%c0_105, %c68] : memref<32x358xbf16, #tpu.memory_space<vmem>>, vector<32x256xbf16>
    %cst_106 = arith.constant 0.000000e+00 : bf16
    %226 = vector.broadcast %cst_106 : bf16 to vector<32x256xbf16>
    %227 = vector.shape_cast %36 : vector<1x256xi1> to vector<1x256xi1>
    %228 = vector.broadcast %227 : vector<1x256xi1> to vector<32x256xi1>
    %229 = arith.select %228, %225, %226 : vector<32x256xi1>, vector<32x256xbf16>
    %c1024 = arith.constant 1024 : index
    %c0_107 = arith.constant 0 : index
    %230 = vector.load %arg14[%c1024, %c0_107] : memref<1568x256xbf16, #tpu.memory_space<vmem>>, vector<32x256xbf16>
    tpu.vector_store %arg14[%c1024, %c0_107], %229 {strides = array<i32>} : memref<1568x256xbf16, #tpu.memory_space<vmem>>, vector<32x256xbf16>,
    %c0_108 = arith.constant 0 : index
    %c69 = arith.constant 69 : index
    %231 = vector.load %arg12[%c0_108, %c69] : memref<32x358xbf16, #tpu.memory_space<vmem>>, vector<32x256xbf16>
    %cst_109 = arith.constant 0.000000e+00 : bf16
    %232 = vector.broadcast %cst_109 : bf16 to vector<32x256xbf16>
    %233 = vector.shape_cast %41 : vector<1x256xi1> to vector<1x256xi1>
    %234 = vector.broadcast %233 : vector<1x256xi1> to vector<32x256xi1>
    %235 = arith.select %234, %231, %232 : vector<32x256xi1>, vector<32x256xbf16>
    %c1056 = arith.constant 1056 : index
    %c0_110 = arith.constant 0 : index
    %236 = vector.load %arg14[%c1056, %c0_110] : memref<1568x256xbf16, #tpu.memory_space<vmem>>, vector<32x256xbf16>
    tpu.vector_store %arg14[%c1056, %c0_110], %235 {strides = array<i32>} : memref<1568x256xbf16, #tpu.memory_space<vmem>>, vector<32x256xbf16>,
    %c0_111 = arith.constant 0 : index
    %c70 = arith.constant 70 : index
    %237 = vector.load %arg12[%c0_111, %c70] : memref<32x358xbf16, #tpu.memory_space<vmem>>, vector<32x256xbf16>
    %cst_112 = arith.constant 0.000000e+00 : bf16
    %238 = vector.broadcast %cst_112 : bf16 to vector<32x256xbf16>
    %239 = vector.shape_cast %46 : vector<1x256xi1> to vector<1x256xi1>
    %240 = vector.broadcast %239 : vector<1x256xi1> to vector<32x256xi1>
    %241 = arith.select %240, %237, %238 : vector<32x256xi1>, vector<32x256xbf16>
    %c1088 = arith.constant 1088 : index
    %c0_113 = arith.constant 0 : index
    %242 = vector.load %arg14[%c1088, %c0_113] : memref<1568x256xbf16, #tpu.memory_space<vmem>>, vector<32x256xbf16>
    tpu.vector_store %arg14[%c1088, %c0_113], %241 {strides = array<i32>} : memref<1568x256xbf16, #tpu.memory_space<vmem>>, vector<32x256xbf16>,
    %c0_114 = arith.constant 0 : index
    %c80 = arith.constant 80 : index
    %243 = vector.load %arg12[%c0_114, %c80] : memref<32x358xbf16, #tpu.memory_space<vmem>>, vector<32x256xbf16>
    %cst_115 = arith.constant 0.000000e+00 : bf16
    %244 = vector.broadcast %cst_115 : bf16 to vector<32x256xbf16>
    %245 = vector.shape_cast %21 : vector<1x256xi1> to vector<1x256xi1>
    %246 = vector.broadcast %245 : vector<1x256xi1> to vector<32x256xi1>
    %247 = arith.select %246, %243, %244 : vector<32x256xi1>, vector<32x256xbf16>
    %c1120 = arith.constant 1120 : index
    %c0_116 = arith.constant 0 : index
    %248 = vector.load %arg14[%c1120, %c0_116] : memref<1568x256xbf16, #tpu.memory_space<vmem>>, vector<32x256xbf16>
    tpu.vector_store %arg14[%c1120, %c0_116], %247 {strides = array<i32>} : memref<1568x256xbf16, #tpu.memory_space<vmem>>, vector<32x256xbf16>,
    %c0_117 = arith.constant 0 : index
    %c81 = arith.constant 81 : index
    %249 = vector.load %arg12[%c0_117, %c81] : memref<32x358xbf16, #tpu.memory_space<vmem>>, vector<32x256xbf16>
    %cst_118 = arith.constant 0.000000e+00 : bf16
    %250 = vector.broadcast %cst_118 : bf16 to vector<32x256xbf16>
    %251 = vector.shape_cast %26 : vector<1x256xi1> to vector<1x256xi1>
    %252 = vector.broadcast %251 : vector<1x256xi1> to vector<32x256xi1>
    %253 = arith.select %252, %249, %250 : vector<32x256xi1>, vector<32x256xbf16>
    %c1152 = arith.constant 1152 : index
    %c0_119 = arith.constant 0 : index
    %254 = vector.load %arg14[%c1152, %c0_119] : memref<1568x256xbf16, #tpu.memory_space<vmem>>, vector<32x256xbf16>
    tpu.vector_store %arg14[%c1152, %c0_119], %253 {strides = array<i32>} : memref<1568x256xbf16, #tpu.memory_space<vmem>>, vector<32x256xbf16>,
    %c0_120 = arith.constant 0 : index
    %c82 = arith.constant 82 : index
    %255 = vector.load %arg12[%c0_120, %c82] : memref<32x358xbf16, #tpu.memory_space<vmem>>, vector<32x256xbf16>
    %cst_121 = arith.constant 0.000000e+00 : bf16
    %256 = vector.broadcast %cst_121 : bf16 to vector<32x256xbf16>
    %257 = vector.shape_cast %31 : vector<1x256xi1> to vector<1x256xi1>
    %258 = vector.broadcast %257 : vector<1x256xi1> to vector<32x256xi1>
    %259 = arith.select %258, %255, %256 : vector<32x256xi1>, vector<32x256xbf16>
    %c1184 = arith.constant 1184 : index
    %c0_122 = arith.constant 0 : index
    %260 = vector.load %arg14[%c1184, %c0_122] : memref<1568x256xbf16, #tpu.memory_space<vmem>>, vector<32x256xbf16>
    tpu.vector_store %arg14[%c1184, %c0_122], %259 {strides = array<i32>} : memref<1568x256xbf16, #tpu.memory_space<vmem>>, vector<32x256xbf16>,
    %c0_123 = arith.constant 0 : index
    %c83 = arith.constant 83 : index
    %261 = vector.load %arg12[%c0_123, %c83] : memref<32x358xbf16, #tpu.memory_space<vmem>>, vector<32x256xbf16>
    %c1216 = arith.constant 1216 : index
    %c0_124 = arith.constant 0 : index
    %262 = vector.load %arg14[%c1216, %c0_124] : memref<1568x256xbf16, #tpu.memory_space<vmem>>, vector<32x256xbf16>
    tpu.vector_store %arg14[%c1216, %c0_124], %261 {strides = array<i32>} : memref<1568x256xbf16, #tpu.memory_space<vmem>>, vector<32x256xbf16>,
    %c0_125 = arith.constant 0 : index
    %c84 = arith.constant 84 : index
    %263 = vector.load %arg12[%c0_125, %c84] : memref<32x358xbf16, #tpu.memory_space<vmem>>, vector<32x256xbf16>
    %cst_126 = arith.constant 0.000000e+00 : bf16
    %264 = vector.broadcast %cst_126 : bf16 to vector<32x256xbf16>
    %265 = vector.shape_cast %36 : vector<1x256xi1> to vector<1x256xi1>
    %266 = vector.broadcast %265 : vector<1x256xi1> to vector<32x256xi1>
    %267 = arith.select %266, %263, %264 : vector<32x256xi1>, vector<32x256xbf16>
    %c1248 = arith.constant 1248 : index
    %c0_127 = arith.constant 0 : index
    %268 = vector.load %arg14[%c1248, %c0_127] : memref<1568x256xbf16, #tpu.memory_space<vmem>>, vector<32x256xbf16>
    tpu.vector_store %arg14[%c1248, %c0_127], %267 {strides = array<i32>} : memref<1568x256xbf16, #tpu.memory_space<vmem>>, vector<32x256xbf16>,
    %c0_128 = arith.constant 0 : index
    %c85 = arith.constant 85 : index
    %269 = vector.load %arg12[%c0_128, %c85] : memref<32x358xbf16, #tpu.memory_space<vmem>>, vector<32x256xbf16>
    %cst_129 = arith.constant 0.000000e+00 : bf16
    %270 = vector.broadcast %cst_129 : bf16 to vector<32x256xbf16>
    %271 = vector.shape_cast %41 : vector<1x256xi1> to vector<1x256xi1>
    %272 = vector.broadcast %271 : vector<1x256xi1> to vector<32x256xi1>
    %273 = arith.select %272, %269, %270 : vector<32x256xi1>, vector<32x256xbf16>
    %c1280 = arith.constant 1280 : index
    %c0_130 = arith.constant 0 : index
    %274 = vector.load %arg14[%c1280, %c0_130] : memref<1568x256xbf16, #tpu.memory_space<vmem>>, vector<32x256xbf16>
    tpu.vector_store %arg14[%c1280, %c0_130], %273 {strides = array<i32>} : memref<1568x256xbf16, #tpu.memory_space<vmem>>, vector<32x256xbf16>,
    %c0_131 = arith.constant 0 : index
    %c86 = arith.constant 86 : index
    %275 = vector.load %arg12[%c0_131, %c86] : memref<32x358xbf16, #tpu.memory_space<vmem>>, vector<32x256xbf16>
    %cst_132 = arith.constant 0.000000e+00 : bf16
    %276 = vector.broadcast %cst_132 : bf16 to vector<32x256xbf16>
    %277 = vector.shape_cast %46 : vector<1x256xi1> to vector<1x256xi1>
    %278 = vector.broadcast %277 : vector<1x256xi1> to vector<32x256xi1>
    %279 = arith.select %278, %275, %276 : vector<32x256xi1>, vector<32x256xbf16>
    %c1312 = arith.constant 1312 : index
    %c0_133 = arith.constant 0 : index
    %280 = vector.load %arg14[%c1312, %c0_133] : memref<1568x256xbf16, #tpu.memory_space<vmem>>, vector<32x256xbf16>
    tpu.vector_store %arg14[%c1312, %c0_133], %279 {strides = array<i32>} : memref<1568x256xbf16, #tpu.memory_space<vmem>>, vector<32x256xbf16>,
    %c0_134 = arith.constant 0 : index
    %c96_135 = arith.constant 96 : index
    %281 = vector.load %arg12[%c0_134, %c96_135] : memref<32x358xbf16, #tpu.memory_space<vmem>>, vector<32x256xbf16>
    %cst_136 = arith.constant 0.000000e+00 : bf16
    %282 = vector.broadcast %cst_136 : bf16 to vector<32x256xbf16>
    %283 = vector.shape_cast %21 : vector<1x256xi1> to vector<1x256xi1>
    %284 = vector.broadcast %283 : vector<1x256xi1> to vector<32x256xi1>
    %285 = arith.select %284, %281, %282 : vector<32x256xi1>, vector<32x256xbf16>
    %c1344 = arith.constant 1344 : index
    %c0_137 = arith.constant 0 : index
    %286 = vector.load %arg14[%c1344, %c0_137] : memref<1568x256xbf16, #tpu.memory_space<vmem>>, vector<32x256xbf16>
    tpu.vector_store %arg14[%c1344, %c0_137], %285 {strides = array<i32>} : memref<1568x256xbf16, #tpu.memory_space<vmem>>, vector<32x256xbf16>,
    %c0_138 = arith.constant 0 : index
    %c97 = arith.constant 97 : index
    %287 = vector.load %arg12[%c0_138, %c97] : memref<32x358xbf16, #tpu.memory_space<vmem>>, vector<32x256xbf16>
    %cst_139 = arith.constant 0.000000e+00 : bf16
    %288 = vector.broadcast %cst_139 : bf16 to vector<32x256xbf16>
    %289 = vector.shape_cast %26 : vector<1x256xi1> to vector<1x256xi1>
    %290 = vector.broadcast %289 : vector<1x256xi1> to vector<32x256xi1>
    %291 = arith.select %290, %287, %288 : vector<32x256xi1>, vector<32x256xbf16>
    %c1376 = arith.constant 1376 : index
    %c0_140 = arith.constant 0 : index
    %292 = vector.load %arg14[%c1376, %c0_140] : memref<1568x256xbf16, #tpu.memory_space<vmem>>, vector<32x256xbf16>
    tpu.vector_store %arg14[%c1376, %c0_140], %291 {strides = array<i32>} : memref<1568x256xbf16, #tpu.memory_space<vmem>>, vector<32x256xbf16>,
    %c0_141 = arith.constant 0 : index
    %c98 = arith.constant 98 : index
    %293 = vector.load %arg12[%c0_141, %c98] : memref<32x358xbf16, #tpu.memory_space<vmem>>, vector<32x256xbf16>
    %cst_142 = arith.constant 0.000000e+00 : bf16
    %294 = vector.broadcast %cst_142 : bf16 to vector<32x256xbf16>
    %295 = vector.shape_cast %31 : vector<1x256xi1> to vector<1x256xi1>
    %296 = vector.broadcast %295 : vector<1x256xi1> to vector<32x256xi1>
    %297 = arith.select %296, %293, %294 : vector<32x256xi1>, vector<32x256xbf16>
    %c1408 = arith.constant 1408 : index
    %c0_143 = arith.constant 0 : index
    %298 = vector.load %arg14[%c1408, %c0_143] : memref<1568x256xbf16, #tpu.memory_space<vmem>>, vector<32x256xbf16>
    tpu.vector_store %arg14[%c1408, %c0_143], %297 {strides = array<i32>} : memref<1568x256xbf16, #tpu.memory_space<vmem>>, vector<32x256xbf16>,
    %c0_144 = arith.constant 0 : index
    %c99 = arith.constant 99 : index
    %299 = vector.load %arg12[%c0_144, %c99] : memref<32x358xbf16, #tpu.memory_space<vmem>>, vector<32x256xbf16>
    %c1440 = arith.constant 1440 : index
    %c0_145 = arith.constant 0 : index
    %300 = vector.load %arg14[%c1440, %c0_145] : memref<1568x256xbf16, #tpu.memory_space<vmem>>, vector<32x256xbf16>
    tpu.vector_store %arg14[%c1440, %c0_145], %299 {strides = array<i32>} : memref<1568x256xbf16, #tpu.memory_space<vmem>>, vector<32x256xbf16>,
    %c0_146 = arith.constant 0 : index
    %c100 = arith.constant 100 : index
    %301 = vector.load %arg12[%c0_146, %c100] : memref<32x358xbf16, #tpu.memory_space<vmem>>, vector<32x256xbf16>
    %cst_147 = arith.constant 0.000000e+00 : bf16
    %302 = vector.broadcast %cst_147 : bf16 to vector<32x256xbf16>
    %303 = vector.shape_cast %36 : vector<1x256xi1> to vector<1x256xi1>
    %304 = vector.broadcast %303 : vector<1x256xi1> to vector<32x256xi1>
    %305 = arith.select %304, %301, %302 : vector<32x256xi1>, vector<32x256xbf16>
    %c1472 = arith.constant 1472 : index
    %c0_148 = arith.constant 0 : index
    %306 = vector.load %arg14[%c1472, %c0_148] : memref<1568x256xbf16, #tpu.memory_space<vmem>>, vector<32x256xbf16>
    tpu.vector_store %arg14[%c1472, %c0_148], %305 {strides = array<i32>} : memref<1568x256xbf16, #tpu.memory_space<vmem>>, vector<32x256xbf16>,
    %c0_149 = arith.constant 0 : index
    %c101 = arith.constant 101 : index
    %307 = vector.load %arg12[%c0_149, %c101] : memref<32x358xbf16, #tpu.memory_space<vmem>>, vector<32x256xbf16>
    %cst_150 = arith.constant 0.000000e+00 : bf16
    %308 = vector.broadcast %cst_150 : bf16 to vector<32x256xbf16>
    %309 = vector.shape_cast %41 : vector<1x256xi1> to vector<1x256xi1>
    %310 = vector.broadcast %309 : vector<1x256xi1> to vector<32x256xi1>
    %311 = arith.select %310, %307, %308 : vector<32x256xi1>, vector<32x256xbf16>
    %c1504 = arith.constant 1504 : index
    %c0_151 = arith.constant 0 : index
    %312 = vector.load %arg14[%c1504, %c0_151] : memref<1568x256xbf16, #tpu.memory_space<vmem>>, vector<32x256xbf16>
    tpu.vector_store %arg14[%c1504, %c0_151], %311 {strides = array<i32>} : memref<1568x256xbf16, #tpu.memory_space<vmem>>, vector<32x256xbf16>,
    %c0_152 = arith.constant 0 : index
    %c102 = arith.constant 102 : index
    %313 = vector.load %arg12[%c0_152, %c102] : memref<32x358xbf16, #tpu.memory_space<vmem>>, vector<32x256xbf16>
    %cst_153 = arith.constant 0.000000e+00 : bf16
    %314 = vector.broadcast %cst_153 : bf16 to vector<32x256xbf16>
    %315 = vector.shape_cast %46 : vector<1x256xi1> to vector<1x256xi1>
    %316 = vector.broadcast %315 : vector<1x256xi1> to vector<32x256xi1>
    %317 = arith.select %316, %313, %314 : vector<32x256xi1>, vector<32x256xbf16>
    %c1536 = arith.constant 1536 : index
    %c0_154 = arith.constant 0 : index
    %318 = vector.load %arg14[%c1536, %c0_154] : memref<1568x256xbf16, #tpu.memory_space<vmem>>, vector<32x256xbf16>
    tpu.vector_store %arg14[%c1536, %c0_154], %317 {strides = array<i32>} : memref<1568x256xbf16, #tpu.memory_space<vmem>>, vector<32x256xbf16>,
    %c0_155 = arith.constant 0 : index
    %c0_156 = arith.constant 0 : index
    %319 = vector.load %arg3[%c0_155, %c0_156] : memref<32x1568xbf16, #tpu.memory_space<vmem>>, vector<32x1568xbf16>
    %c0_157 = arith.constant 0 : index
    %c0_158 = arith.constant 0 : index
    %320 = vector.load %arg14[%c0_157, %c0_158] : memref<1568x256xbf16, #tpu.memory_space<vmem>>, vector<1568x256xbf16>
    %cst_159 = arith.constant dense<0.000000e+00> : vector<32x256xf32>
    %321 = tpu.matmul %319, %320, %cst_159 {dimension_numbers = #tpu.dot_dimension_numbers<[1], [0], [0], [1], [0, 0, 1, 1], [], []>} : vector<32x1568xbf16>, vector<1568x256xbf16>, vector<32x256xf32> -> vector<32x256xf32>
    %c0_160 = arith.constant 0 : index
    %c0_161 = arith.constant 0 : index
    %322 = vector.load %arg4[%c0_160, %c0_161] : memref<64x3xf32, #tpu.memory_space<vmem>>, vector<32x1xf32>
    %323 = vector.broadcast %322 : vector<32x1xf32> to vector<32x256xf32>
    %324 = arith.addf %321, %323 : vector<32x256xf32>
    %cst_162 = arith.constant dense<0.000000e+00> : vector<256xf32>
    %325 = vector.multi_reduction <add>, %324, %cst_162 [0] : vector<32x256xf32> to vector<256xf32>
    %326 = vector.shape_cast %325 : vector<256xf32> to vector<1x256xf32>
    %cst_163 = arith.constant 3.200000e+01 : f32
    %327 = vector.broadcast %cst_163 : f32 to vector<1x256xf32>
    %328 = arith.divf %326, %327 : vector<1x256xf32>
    %329 = vector.broadcast %328 : vector<1x256xf32> to vector<32x256xf32>
    %330 = arith.subf %324, %329 : vector<32x256xf32>
    %331 = arith.mulf %330, %330 : vector<32x256xf32>
    %cst_164 = arith.constant dense<0.000000e+00> : vector<256xf32>
    %332 = vector.multi_reduction <add>, %331, %cst_164 [0] : vector<32x256xf32> to vector<256xf32>
    %333 = vector.shape_cast %332 : vector<256xf32> to vector<1x256xf32>
    %cst_165 = arith.constant 3.200000e+01 : f32
    %334 = vector.broadcast %cst_165 : f32 to vector<1x256xf32>
    %335 = arith.divf %333, %334 : vector<1x256xf32>
    %336 = vector.broadcast %328 : vector<1x256xf32> to vector<32x256xf32>
    %337 = arith.subf %324, %336 : vector<32x256xf32>
    %cst_166 = arith.constant 9.99999997E-7 : f32
    %338 = vector.broadcast %cst_166 : f32 to vector<1x256xf32>
    %339 = arith.addf %335, %338 : vector<1x256xf32>
    %340 = math.rsqrt %339 : vector<1x256xf32>
    %341 = vector.broadcast %340 : vector<1x256xf32> to vector<32x256xf32>
    %342 = arith.mulf %337, %341 : vector<32x256xf32>
    %c0_167 = arith.constant 0 : index
    %c0_168 = arith.constant 0 : index
    %343 = vector.load %arg5[%c0_167, %c0_168] : memref<64x32xbf16, #tpu.memory_space<vmem>>, vector<64x32xbf16>
    %344 = arith.truncf %342 : vector<32x256xf32> to vector<32x256xbf16>
    %cst_169 = arith.constant dense<0.000000e+00> : vector<64x256xf32>
    %345 = tpu.matmul %343, %344, %cst_169 {dimension_numbers = #tpu.dot_dimension_numbers<[1], [0], [0], [1], [0, 0, 1, 1], [], []>} : vector<64x32xbf16>, vector<32x256xbf16>, vector<64x256xf32> -> vector<64x256xf32>
    %c0_170 = arith.constant 0 : index
    %c1_171 = arith.constant 1 : index
    %346 = vector.load %arg4[%c0_170, %c1_171] : memref<64x3xf32, #tpu.memory_space<vmem>>, vector<64x1xf32>
    %347 = vector.broadcast %346 : vector<64x1xf32> to vector<64x256xf32>
    %348 = arith.addf %345, %347 : vector<64x256xf32>
    %cst_172 = arith.constant 5.000000e-01 : f32
    %349 = vector.broadcast %cst_172 : f32 to vector<64x256xf32>
    %350 = arith.mulf %349, %348 : vector<64x256xf32>
    %cst_173 = arith.constant 4.471500e-02 : f32
    %351 = vector.broadcast %cst_173 : f32 to vector<64x256xf32>
    %352 = arith.mulf %351, %348 : vector<64x256xf32>
    %353 = arith.mulf %352, %348 : vector<64x256xf32>
    %354 = arith.mulf %353, %348 : vector<64x256xf32>
    %355 = arith.addf %348, %354 : vector<64x256xf32>
    %cst_174 = arith.constant 0.797884583 : f32
    %356 = vector.broadcast %cst_174 : f32 to vector<64x256xf32>
    %357 = arith.mulf %356, %355 : vector<64x256xf32>
    %358 = math.tanh %357 : vector<64x256xf32>
    %cst_175 = arith.constant 1.000000e+00 : f32
    %359 = vector.broadcast %cst_175 : f32 to vector<64x256xf32>
    %360 = arith.addf %359, %358 : vector<64x256xf32>
    %361 = arith.mulf %350, %360 : vector<64x256xf32>
    %c0_176 = arith.constant 0 : index
    %c0_177 = arith.constant 0 : index
    %362 = vector.load %arg6[%c0_176, %c0_177] : memref<32x64xbf16, #tpu.memory_space<vmem>>, vector<32x64xbf16>
    %363 = arith.truncf %361 : vector<64x256xf32> to vector<64x256xbf16>
    %cst_178 = arith.constant dense<0.000000e+00> : vector<32x256xf32>
    %364 = tpu.matmul %362, %363, %cst_178 {dimension_numbers = #tpu.dot_dimension_numbers<[1], [0], [0], [1], [0, 0, 1, 1], [], []>} : vector<32x64xbf16>, vector<64x256xbf16>, vector<32x256xf32> -> vector<32x256xf32>
    %c0_179 = arith.constant 0 : index
    %c2_180 = arith.constant 2 : index
    %365 = vector.load %arg4[%c0_179, %c2_180] : memref<64x3xf32, #tpu.memory_space<vmem>>, vector<32x1xf32>
    %366 = vector.broadcast %365 : vector<32x1xf32> to vector<32x256xf32>
    %367 = arith.addf %364, %366 : vector<32x256xf32>
    %368 = arith.addf %48, %367 : vector<32x256xf32>
    %c0_181 = arith.constant 0 : index
    %c0_182 = arith.constant 0 : index
    %369 = vector.load %arg7[%c0_181, %c0_182] : memref<72x32xbf16, #tpu.memory_space<vmem>>, vector<72x32xbf16>
    %370 = arith.truncf %368 : vector<32x256xf32> to vector<32x256xbf16>
    %cst_183 = arith.constant dense<0.000000e+00> : vector<72x256xf32>
    %371 = tpu.matmul %369, %370, %cst_183 {dimension_numbers = #tpu.dot_dimension_numbers<[1], [0], [0], [1], [0, 0, 1, 1], [], []>} : vector<72x32xbf16>, vector<32x256xbf16>, vector<72x256xf32> -> vector<72x256xf32>
    %c0_184 = arith.constant 0 : index
    %c0_185 = arith.constant 0 : index
    %c0_186 = arith.constant 0 : index
    %372 = vector.load %arg1[%c0_184, %c0_185, %c0_186] : memref<1x72x1xf32, #tpu.memory_space<vmem>>, vector<1x72x1xf32>
    %373 = vector.shape_cast %372 : vector<1x72x1xf32> to vector<72x1xf32>
    %374 = vector.broadcast %373 : vector<72x1xf32> to vector<72x256xf32>
    %375 = arith.addf %371, %374 : vector<72x256xf32>
    %cst_187 = arith.constant 0.000000e+00 : bf16
    %376 = vector.broadcast %cst_187 : bf16 to vector<72x290xbf16>
    %c0_188 = arith.constant 0 : index
    %c0_189 = arith.constant 0 : index
    %377 = vector.load %arg13[%c0_188, %c0_189] : memref<72x290xbf16, #tpu.memory_space<vmem>>, vector<72x290xbf16>
    tpu.vector_store %arg13[%c0_188, %c0_189], %376 {strides = array<i32>} : memref<72x290xbf16, #tpu.memory_space<vmem>>, vector<72x290xbf16>,
    %378 = arith.truncf %375 : vector<72x256xf32> to vector<72x256xbf16>
    %c0_190 = arith.constant 0 : index
    %c17_191 = arith.constant 17 : index
    %379 = vector.load %arg13[%c0_190, %c17_191] : memref<72x290xbf16, #tpu.memory_space<vmem>>, vector<72x256xbf16>
    tpu.vector_store %arg13[%c0_190, %c17_191], %378 {strides = array<i32>} : memref<72x290xbf16, #tpu.memory_space<vmem>>, vector<72x256xbf16>,
    %c0_192 = arith.constant 0 : index
    %c0_193 = arith.constant 0 : index
    %380 = vector.load %arg13[%c0_192, %c0_193] : memref<72x290xbf16, #tpu.memory_space<vmem>>, vector<72x256xbf16>
    %cst_194 = arith.constant 0.000000e+00 : bf16
    %381 = vector.broadcast %cst_194 : bf16 to vector<72x256xbf16>
    %382 = vector.shape_cast %31 : vector<1x256xi1> to vector<1x256xi1>
    %383 = vector.broadcast %382 : vector<1x256xi1> to vector<72x256xi1>
    %384 = arith.select %383, %380, %381 : vector<72x256xi1>, vector<72x256xbf16>
    %c0_195 = arith.constant 0 : index
    %c0_196 = arith.constant 0 : index
    %c0_197 = arith.constant 0 : index
    %385 = vector.load %arg8[%c0_195, %c0_196, %c0_197] : memref<9x36x72xbf16, #tpu.memory_space<vmem>>, vector<1x36x72xbf16>
    %386 = vector.shape_cast %385 : vector<1x36x72xbf16> to vector<36x72xbf16>
    %cst_198 = arith.constant dense<0.000000e+00> : vector<36x256xf32>
    %387 = tpu.matmul %386, %384, %cst_198 {dimension_numbers = #tpu.dot_dimension_numbers<[1], [0], [0], [1], [0, 0, 1, 1], [], []>} : vector<36x72xbf16>, vector<72x256xbf16>, vector<36x256xf32> -> vector<36x256xf32>
    %c0_199 = arith.constant 0 : index
    %c1_200 = arith.constant 1 : index
    %388 = vector.load %arg13[%c0_199, %c1_200] : memref<72x290xbf16, #tpu.memory_space<vmem>>, vector<72x256xbf16>
    %c1_201 = arith.constant 1 : index
    %c0_202 = arith.constant 0 : index
    %c0_203 = arith.constant 0 : index
    %389 = vector.load %arg8[%c1_201, %c0_202, %c0_203] : memref<9x36x72xbf16, #tpu.memory_space<vmem>>, vector<1x36x72xbf16>
    %390 = vector.shape_cast %389 : vector<1x36x72xbf16> to vector<36x72xbf16>
    %cst_204 = arith.constant dense<0.000000e+00> : vector<36x256xf32>
    %391 = tpu.matmul %390, %388, %cst_204 {dimension_numbers = #tpu.dot_dimension_numbers<[1], [0], [0], [1], [0, 0, 1, 1], [], []>} : vector<36x72xbf16>, vector<72x256xbf16>, vector<36x256xf32> -> vector<36x256xf32>
    %392 = arith.addf %387, %391 : vector<36x256xf32>
    %c0_205 = arith.constant 0 : index
    %c2_206 = arith.constant 2 : index
    %393 = vector.load %arg13[%c0_205, %c2_206] : memref<72x290xbf16, #tpu.memory_space<vmem>>, vector<72x256xbf16>
    %cst_207 = arith.constant 0.000000e+00 : bf16
    %394 = vector.broadcast %cst_207 : bf16 to vector<72x256xbf16>
    %395 = vector.shape_cast %36 : vector<1x256xi1> to vector<1x256xi1>
    %396 = vector.broadcast %395 : vector<1x256xi1> to vector<72x256xi1>
    %397 = arith.select %396, %393, %394 : vector<72x256xi1>, vector<72x256xbf16>
    %c2_208 = arith.constant 2 : index
    %c0_209 = arith.constant 0 : index
    %c0_210 = arith.constant 0 : index
    %398 = vector.load %arg8[%c2_208, %c0_209, %c0_210] : memref<9x36x72xbf16, #tpu.memory_space<vmem>>, vector<1x36x72xbf16>
    %399 = vector.shape_cast %398 : vector<1x36x72xbf16> to vector<36x72xbf16>
    %cst_211 = arith.constant dense<0.000000e+00> : vector<36x256xf32>
    %400 = tpu.matmul %399, %397, %cst_211 {dimension_numbers = #tpu.dot_dimension_numbers<[1], [0], [0], [1], [0, 0, 1, 1], [], []>} : vector<36x72xbf16>, vector<72x256xbf16>, vector<36x256xf32> -> vector<36x256xf32>
    %401 = arith.addf %392, %400 : vector<36x256xf32>
    %c0_212 = arith.constant 0 : index
    %c16_213 = arith.constant 16 : index
    %402 = vector.load %arg13[%c0_212, %c16_213] : memref<72x290xbf16, #tpu.memory_space<vmem>>, vector<72x256xbf16>
    %cst_214 = arith.constant 0.000000e+00 : bf16
    %403 = vector.broadcast %cst_214 : bf16 to vector<72x256xbf16>
    %404 = vector.shape_cast %31 : vector<1x256xi1> to vector<1x256xi1>
    %405 = vector.broadcast %404 : vector<1x256xi1> to vector<72x256xi1>
    %406 = arith.select %405, %402, %403 : vector<72x256xi1>, vector<72x256xbf16>
    %c3_215 = arith.constant 3 : index
    %c0_216 = arith.constant 0 : index
    %c0_217 = arith.constant 0 : index
    %407 = vector.load %arg8[%c3_215, %c0_216, %c0_217] : memref<9x36x72xbf16, #tpu.memory_space<vmem>>, vector<1x36x72xbf16>
    %408 = vector.shape_cast %407 : vector<1x36x72xbf16> to vector<36x72xbf16>
    %cst_218 = arith.constant dense<0.000000e+00> : vector<36x256xf32>
    %409 = tpu.matmul %408, %406, %cst_218 {dimension_numbers = #tpu.dot_dimension_numbers<[1], [0], [0], [1], [0, 0, 1, 1], [], []>} : vector<36x72xbf16>, vector<72x256xbf16>, vector<36x256xf32> -> vector<36x256xf32>
    %410 = arith.addf %401, %409 : vector<36x256xf32>
    %c0_219 = arith.constant 0 : index
    %c17_220 = arith.constant 17 : index
    %411 = vector.load %arg13[%c0_219, %c17_220] : memref<72x290xbf16, #tpu.memory_space<vmem>>, vector<72x256xbf16>
    %c4_221 = arith.constant 4 : index
    %c0_222 = arith.constant 0 : index
    %c0_223 = arith.constant 0 : index
    %412 = vector.load %arg8[%c4_221, %c0_222, %c0_223] : memref<9x36x72xbf16, #tpu.memory_space<vmem>>, vector<1x36x72xbf16>
    %413 = vector.shape_cast %412 : vector<1x36x72xbf16> to vector<36x72xbf16>
    %cst_224 = arith.constant dense<0.000000e+00> : vector<36x256xf32>
    %414 = tpu.matmul %413, %411, %cst_224 {dimension_numbers = #tpu.dot_dimension_numbers<[1], [0], [0], [1], [0, 0, 1, 1], [], []>} : vector<36x72xbf16>, vector<72x256xbf16>, vector<36x256xf32> -> vector<36x256xf32>
    %415 = arith.addf %410, %414 : vector<36x256xf32>
    %c0_225 = arith.constant 0 : index
    %c18_226 = arith.constant 18 : index
    %416 = vector.load %arg13[%c0_225, %c18_226] : memref<72x290xbf16, #tpu.memory_space<vmem>>, vector<72x256xbf16>
    %cst_227 = arith.constant 0.000000e+00 : bf16
    %417 = vector.broadcast %cst_227 : bf16 to vector<72x256xbf16>
    %418 = vector.shape_cast %36 : vector<1x256xi1> to vector<1x256xi1>
    %419 = vector.broadcast %418 : vector<1x256xi1> to vector<72x256xi1>
    %420 = arith.select %419, %416, %417 : vector<72x256xi1>, vector<72x256xbf16>
    %c5_228 = arith.constant 5 : index
    %c0_229 = arith.constant 0 : index
    %c0_230 = arith.constant 0 : index
    %421 = vector.load %arg8[%c5_228, %c0_229, %c0_230] : memref<9x36x72xbf16, #tpu.memory_space<vmem>>, vector<1x36x72xbf16>
    %422 = vector.shape_cast %421 : vector<1x36x72xbf16> to vector<36x72xbf16>
    %cst_231 = arith.constant dense<0.000000e+00> : vector<36x256xf32>
    %423 = tpu.matmul %422, %420, %cst_231 {dimension_numbers = #tpu.dot_dimension_numbers<[1], [0], [0], [1], [0, 0, 1, 1], [], []>} : vector<36x72xbf16>, vector<72x256xbf16>, vector<36x256xf32> -> vector<36x256xf32>
    %424 = arith.addf %415, %423 : vector<36x256xf32>
    %c0_232 = arith.constant 0 : index
    %c32_233 = arith.constant 32 : index
    %425 = vector.load %arg13[%c0_232, %c32_233] : memref<72x290xbf16, #tpu.memory_space<vmem>>, vector<72x256xbf16>
    %cst_234 = arith.constant 0.000000e+00 : bf16
    %426 = vector.broadcast %cst_234 : bf16 to vector<72x256xbf16>
    %427 = vector.shape_cast %31 : vector<1x256xi1> to vector<1x256xi1>
    %428 = vector.broadcast %427 : vector<1x256xi1> to vector<72x256xi1>
    %429 = arith.select %428, %425, %426 : vector<72x256xi1>, vector<72x256xbf16>
    %c6_235 = arith.constant 6 : index
    %c0_236 = arith.constant 0 : index
    %c0_237 = arith.constant 0 : index
    %430 = vector.load %arg8[%c6_235, %c0_236, %c0_237] : memref<9x36x72xbf16, #tpu.memory_space<vmem>>, vector<1x36x72xbf16>
    %431 = vector.shape_cast %430 : vector<1x36x72xbf16> to vector<36x72xbf16>
    %cst_238 = arith.constant dense<0.000000e+00> : vector<36x256xf32>
    %432 = tpu.matmul %431, %429, %cst_238 {dimension_numbers = #tpu.dot_dimension_numbers<[1], [0], [0], [1], [0, 0, 1, 1], [], []>} : vector<36x72xbf16>, vector<72x256xbf16>, vector<36x256xf32> -> vector<36x256xf32>
    %433 = arith.addf %424, %432 : vector<36x256xf32>
    %c0_239 = arith.constant 0 : index
    %c33_240 = arith.constant 33 : index
    %434 = vector.load %arg13[%c0_239, %c33_240] : memref<72x290xbf16, #tpu.memory_space<vmem>>, vector<72x256xbf16>
    %c7 = arith.constant 7 : index
    %c0_241 = arith.constant 0 : index
    %c0_242 = arith.constant 0 : index
    %435 = vector.load %arg8[%c7, %c0_241, %c0_242] : memref<9x36x72xbf16, #tpu.memory_space<vmem>>, vector<1x36x72xbf16>
    %436 = vector.shape_cast %435 : vector<1x36x72xbf16> to vector<36x72xbf16>
    %cst_243 = arith.constant dense<0.000000e+00> : vector<36x256xf32>
    %437 = tpu.matmul %436, %434, %cst_243 {dimension_numbers = #tpu.dot_dimension_numbers<[1], [0], [0], [1], [0, 0, 1, 1], [], []>} : vector<36x72xbf16>, vector<72x256xbf16>, vector<36x256xf32> -> vector<36x256xf32>
    %438 = arith.addf %433, %437 : vector<36x256xf32>
    %c0_244 = arith.constant 0 : index
    %c34_245 = arith.constant 34 : index
    %439 = vector.load %arg13[%c0_244, %c34_245] : memref<72x290xbf16, #tpu.memory_space<vmem>>, vector<72x256xbf16>
    %cst_246 = arith.constant 0.000000e+00 : bf16
    %440 = vector.broadcast %cst_246 : bf16 to vector<72x256xbf16>
    %441 = vector.shape_cast %36 : vector<1x256xi1> to vector<1x256xi1>
    %442 = vector.broadcast %441 : vector<1x256xi1> to vector<72x256xi1>
    %443 = arith.select %442, %439, %440 : vector<72x256xi1>, vector<72x256xbf16>
    %c8 = arith.constant 8 : index
    %c0_247 = arith.constant 0 : index
    %c0_248 = arith.constant 0 : index
    %444 = vector.load %arg8[%c8, %c0_247, %c0_248] : memref<9x36x72xbf16, #tpu.memory_space<vmem>>, vector<1x36x72xbf16>
    %445 = vector.shape_cast %444 : vector<1x36x72xbf16> to vector<36x72xbf16>
    %cst_249 = arith.constant dense<0.000000e+00> : vector<36x256xf32>
    %446 = tpu.matmul %445, %443, %cst_249 {dimension_numbers = #tpu.dot_dimension_numbers<[1], [0], [0], [1], [0, 0, 1, 1], [], []>} : vector<36x72xbf16>, vector<72x256xbf16>, vector<36x256xf32> -> vector<36x256xf32>
    %447 = arith.addf %438, %446 : vector<36x256xf32>
    %448 = arith.truncf %447 : vector<36x256xf32> to vector<36x256xbf16>
    %c0_250 = arith.constant 0 : index
    %c17_251 = arith.constant 17 : index
    %449 = vector.load %arg13[%c0_250, %c17_251] : memref<72x290xbf16, #tpu.memory_space<vmem>>, vector<36x256xbf16>
    tpu.vector_store %arg13[%c0_250, %c17_251], %448 {strides = array<i32>} : memref<72x290xbf16, #tpu.memory_space<vmem>>, vector<36x256xbf16>,
    %c0_252 = arith.constant 0 : index
    %c0_253 = arith.constant 0 : index
    %450 = vector.load %arg13[%c0_252, %c0_253] : memref<72x290xbf16, #tpu.memory_space<vmem>>, vector<36x256xbf16>
    %cst_254 = arith.constant 0.000000e+00 : bf16
    %451 = vector.broadcast %cst_254 : bf16 to vector<36x256xbf16>
    %452 = vector.shape_cast %31 : vector<1x256xi1> to vector<1x256xi1>
    %453 = vector.broadcast %452 : vector<1x256xi1> to vector<36x256xi1>
    %454 = arith.select %453, %450, %451 : vector<36x256xi1>, vector<36x256xbf16>
    %c0_255 = arith.constant 0 : index
    %c0_256 = arith.constant 0 : index
    %c0_257 = arith.constant 0 : index
    %455 = vector.load %arg9[%c0_255, %c0_256, %c0_257] : memref<9x36x36xbf16, #tpu.memory_space<vmem>>, vector<1x36x36xbf16>
    %456 = vector.shape_cast %455 : vector<1x36x36xbf16> to vector<36x36xbf16>
    %cst_258 = arith.constant dense<0.000000e+00> : vector<36x256xf32>
    %457 = tpu.matmul %456, %454, %cst_258 {dimension_numbers = #tpu.dot_dimension_numbers<[1], [0], [0], [1], [0, 0, 1, 1], [], []>} : vector<36x36xbf16>, vector<36x256xbf16>, vector<36x256xf32> -> vector<36x256xf32>
    %c0_259 = arith.constant 0 : index
    %c1_260 = arith.constant 1 : index
    %458 = vector.load %arg13[%c0_259, %c1_260] : memref<72x290xbf16, #tpu.memory_space<vmem>>, vector<36x256xbf16>
    %c1_261 = arith.constant 1 : index
    %c0_262 = arith.constant 0 : index
    %c0_263 = arith.constant 0 : index
    %459 = vector.load %arg9[%c1_261, %c0_262, %c0_263] : memref<9x36x36xbf16, #tpu.memory_space<vmem>>, vector<1x36x36xbf16>
    %460 = vector.shape_cast %459 : vector<1x36x36xbf16> to vector<36x36xbf16>
    %cst_264 = arith.constant dense<0.000000e+00> : vector<36x256xf32>
    %461 = tpu.matmul %460, %458, %cst_264 {dimension_numbers = #tpu.dot_dimension_numbers<[1], [0], [0], [1], [0, 0, 1, 1], [], []>} : vector<36x36xbf16>, vector<36x256xbf16>, vector<36x256xf32> -> vector<36x256xf32>
    %462 = arith.addf %457, %461 : vector<36x256xf32>
    %c0_265 = arith.constant 0 : index
    %c2_266 = arith.constant 2 : index
    %463 = vector.load %arg13[%c0_265, %c2_266] : memref<72x290xbf16, #tpu.memory_space<vmem>>, vector<36x256xbf16>
    %cst_267 = arith.constant 0.000000e+00 : bf16
    %464 = vector.broadcast %cst_267 : bf16 to vector<36x256xbf16>
    %465 = vector.shape_cast %36 : vector<1x256xi1> to vector<1x256xi1>
    %466 = vector.broadcast %465 : vector<1x256xi1> to vector<36x256xi1>
    %467 = arith.select %466, %463, %464 : vector<36x256xi1>, vector<36x256xbf16>
    %c2_268 = arith.constant 2 : index
    %c0_269 = arith.constant 0 : index
    %c0_270 = arith.constant 0 : index
    %468 = vector.load %arg9[%c2_268, %c0_269, %c0_270] : memref<9x36x36xbf16, #tpu.memory_space<vmem>>, vector<1x36x36xbf16>
    %469 = vector.shape_cast %468 : vector<1x36x36xbf16> to vector<36x36xbf16>
    %cst_271 = arith.constant dense<0.000000e+00> : vector<36x256xf32>
    %470 = tpu.matmul %469, %467, %cst_271 {dimension_numbers = #tpu.dot_dimension_numbers<[1], [0], [0], [1], [0, 0, 1, 1], [], []>} : vector<36x36xbf16>, vector<36x256xbf16>, vector<36x256xf32> -> vector<36x256xf32>
    %471 = arith.addf %462, %470 : vector<36x256xf32>
    %c0_272 = arith.constant 0 : index
    %c16_273 = arith.constant 16 : index
    %472 = vector.load %arg13[%c0_272, %c16_273] : memref<72x290xbf16, #tpu.memory_space<vmem>>, vector<36x256xbf16>
    %cst_274 = arith.constant 0.000000e+00 : bf16
    %473 = vector.broadcast %cst_274 : bf16 to vector<36x256xbf16>
    %474 = vector.shape_cast %31 : vector<1x256xi1> to vector<1x256xi1>
    %475 = vector.broadcast %474 : vector<1x256xi1> to vector<36x256xi1>
    %476 = arith.select %475, %472, %473 : vector<36x256xi1>, vector<36x256xbf16>
    %c3_275 = arith.constant 3 : index
    %c0_276 = arith.constant 0 : index
    %c0_277 = arith.constant 0 : index
    %477 = vector.load %arg9[%c3_275, %c0_276, %c0_277] : memref<9x36x36xbf16, #tpu.memory_space<vmem>>, vector<1x36x36xbf16>
    %478 = vector.shape_cast %477 : vector<1x36x36xbf16> to vector<36x36xbf16>
    %cst_278 = arith.constant dense<0.000000e+00> : vector<36x256xf32>
    %479 = tpu.matmul %478, %476, %cst_278 {dimension_numbers = #tpu.dot_dimension_numbers<[1], [0], [0], [1], [0, 0, 1, 1], [], []>} : vector<36x36xbf16>, vector<36x256xbf16>, vector<36x256xf32> -> vector<36x256xf32>
    %480 = arith.addf %471, %479 : vector<36x256xf32>
    %c0_279 = arith.constant 0 : index
    %c17_280 = arith.constant 17 : index
    %481 = vector.load %arg13[%c0_279, %c17_280] : memref<72x290xbf16, #tpu.memory_space<vmem>>, vector<36x256xbf16>
    %c4_281 = arith.constant 4 : index
    %c0_282 = arith.constant 0 : index
    %c0_283 = arith.constant 0 : index
    %482 = vector.load %arg9[%c4_281, %c0_282, %c0_283] : memref<9x36x36xbf16, #tpu.memory_space<vmem>>, vector<1x36x36xbf16>
    %483 = vector.shape_cast %482 : vector<1x36x36xbf16> to vector<36x36xbf16>
    %cst_284 = arith.constant dense<0.000000e+00> : vector<36x256xf32>
    %484 = tpu.matmul %483, %481, %cst_284 {dimension_numbers = #tpu.dot_dimension_numbers<[1], [0], [0], [1], [0, 0, 1, 1], [], []>} : vector<36x36xbf16>, vector<36x256xbf16>, vector<36x256xf32> -> vector<36x256xf32>
    %485 = arith.addf %480, %484 : vector<36x256xf32>
    %c0_285 = arith.constant 0 : index
    %c18_286 = arith.constant 18 : index
    %486 = vector.load %arg13[%c0_285, %c18_286] : memref<72x290xbf16, #tpu.memory_space<vmem>>, vector<36x256xbf16>
    %cst_287 = arith.constant 0.000000e+00 : bf16
    %487 = vector.broadcast %cst_287 : bf16 to vector<36x256xbf16>
    %488 = vector.shape_cast %36 : vector<1x256xi1> to vector<1x256xi1>
    %489 = vector.broadcast %488 : vector<1x256xi1> to vector<36x256xi1>
    %490 = arith.select %489, %486, %487 : vector<36x256xi1>, vector<36x256xbf16>
    %c5_288 = arith.constant 5 : index
    %c0_289 = arith.constant 0 : index
    %c0_290 = arith.constant 0 : index
    %491 = vector.load %arg9[%c5_288, %c0_289, %c0_290] : memref<9x36x36xbf16, #tpu.memory_space<vmem>>, vector<1x36x36xbf16>
    %492 = vector.shape_cast %491 : vector<1x36x36xbf16> to vector<36x36xbf16>
    %cst_291 = arith.constant dense<0.000000e+00> : vector<36x256xf32>
    %493 = tpu.matmul %492, %490, %cst_291 {dimension_numbers = #tpu.dot_dimension_numbers<[1], [0], [0], [1], [0, 0, 1, 1], [], []>} : vector<36x36xbf16>, vector<36x256xbf16>, vector<36x256xf32> -> vector<36x256xf32>
    %494 = arith.addf %485, %493 : vector<36x256xf32>
    %c0_292 = arith.constant 0 : index
    %c32_293 = arith.constant 32 : index
    %495 = vector.load %arg13[%c0_292, %c32_293] : memref<72x290xbf16, #tpu.memory_space<vmem>>, vector<36x256xbf16>
    %cst_294 = arith.constant 0.000000e+00 : bf16
    %496 = vector.broadcast %cst_294 : bf16 to vector<36x256xbf16>
    %497 = vector.shape_cast %31 : vector<1x256xi1> to vector<1x256xi1>
    %498 = vector.broadcast %497 : vector<1x256xi1> to vector<36x256xi1>
    %499 = arith.select %498, %495, %496 : vector<36x256xi1>, vector<36x256xbf16>
    %c6_295 = arith.constant 6 : index
    %c0_296 = arith.constant 0 : index
    %c0_297 = arith.constant 0 : index
    %500 = vector.load %arg9[%c6_295, %c0_296, %c0_297] : memref<9x36x36xbf16, #tpu.memory_space<vmem>>, vector<1x36x36xbf16>
    %501 = vector.shape_cast %500 : vector<1x36x36xbf16> to vector<36x36xbf16>
    %cst_298 = arith.constant dense<0.000000e+00> : vector<36x256xf32>
    %502 = tpu.matmul %501, %499, %cst_298 {dimension_numbers = #tpu.dot_dimension_numbers<[1], [0], [0], [1], [0, 0, 1, 1], [], []>} : vector<36x36xbf16>, vector<36x256xbf16>, vector<36x256xf32> -> vector<36x256xf32>
    %503 = arith.addf %494, %502 : vector<36x256xf32>
    %c0_299 = arith.constant 0 : index
    %c33_300 = arith.constant 33 : index
    %504 = vector.load %arg13[%c0_299, %c33_300] : memref<72x290xbf16, #tpu.memory_space<vmem>>, vector<36x256xbf16>
    %c7_301 = arith.constant 7 : index
    %c0_302 = arith.constant 0 : index
    %c0_303 = arith.constant 0 : index
    %505 = vector.load %arg9[%c7_301, %c0_302, %c0_303] : memref<9x36x36xbf16, #tpu.memory_space<vmem>>, vector<1x36x36xbf16>
    %506 = vector.shape_cast %505 : vector<1x36x36xbf16> to vector<36x36xbf16>
    %cst_304 = arith.constant dense<0.000000e+00> : vector<36x256xf32>
    %507 = tpu.matmul %506, %504, %cst_304 {dimension_numbers = #tpu.dot_dimension_numbers<[1], [0], [0], [1], [0, 0, 1, 1], [], []>} : vector<36x36xbf16>, vector<36x256xbf16>, vector<36x256xf32> -> vector<36x256xf32>
    %508 = arith.addf %503, %507 : vector<36x256xf32>
    %c0_305 = arith.constant 0 : index
    %c34_306 = arith.constant 34 : index
    %509 = vector.load %arg13[%c0_305, %c34_306] : memref<72x290xbf16, #tpu.memory_space<vmem>>, vector<36x256xbf16>
    %cst_307 = arith.constant 0.000000e+00 : bf16
    %510 = vector.broadcast %cst_307 : bf16 to vector<36x256xbf16>
    %511 = vector.shape_cast %36 : vector<1x256xi1> to vector<1x256xi1>
    %512 = vector.broadcast %511 : vector<1x256xi1> to vector<36x256xi1>
    %513 = arith.select %512, %509, %510 : vector<36x256xi1>, vector<36x256xbf16>
    %c8_308 = arith.constant 8 : index
    %c0_309 = arith.constant 0 : index
    %c0_310 = arith.constant 0 : index
    %514 = vector.load %arg9[%c8_308, %c0_309, %c0_310] : memref<9x36x36xbf16, #tpu.memory_space<vmem>>, vector<1x36x36xbf16>
    %515 = vector.shape_cast %514 : vector<1x36x36xbf16> to vector<36x36xbf16>
    %cst_311 = arith.constant dense<0.000000e+00> : vector<36x256xf32>
    %516 = tpu.matmul %515, %513, %cst_311 {dimension_numbers = #tpu.dot_dimension_numbers<[1], [0], [0], [1], [0, 0, 1, 1], [], []>} : vector<36x36xbf16>, vector<36x256xbf16>, vector<36x256xf32> -> vector<36x256xf32>
    %517 = arith.addf %508, %516 : vector<36x256xf32>
    %518 = arith.truncf %517 : vector<36x256xf32> to vector<36x256xbf16>
    %c0_312 = arith.constant 0 : index
    %c17_313 = arith.constant 17 : index
    %519 = vector.load %arg13[%c0_312, %c17_313] : memref<72x290xbf16, #tpu.memory_space<vmem>>, vector<36x256xbf16>
    tpu.vector_store %arg13[%c0_312, %c17_313], %518 {strides = array<i32>} : memref<72x290xbf16, #tpu.memory_space<vmem>>, vector<36x256xbf16>,
    %c0_314 = arith.constant 0 : index
    %c0_315 = arith.constant 0 : index
    %520 = vector.load %arg13[%c0_314, %c0_315] : memref<72x290xbf16, #tpu.memory_space<vmem>>, vector<36x256xbf16>
    %cst_316 = arith.constant 0.000000e+00 : bf16
    %521 = vector.broadcast %cst_316 : bf16 to vector<36x256xbf16>
    %522 = vector.shape_cast %31 : vector<1x256xi1> to vector<1x256xi1>
    %523 = vector.broadcast %522 : vector<1x256xi1> to vector<36x256xi1>
    %524 = arith.select %523, %520, %521 : vector<36x256xi1>, vector<36x256xbf16>
    %c0_317 = arith.constant 0 : index
    %c0_318 = arith.constant 0 : index
    %c0_319 = arith.constant 0 : index
    %525 = vector.load %arg10[%c0_317, %c0_318, %c0_319] : memref<9x32x36xbf16, #tpu.memory_space<vmem>>, vector<1x32x36xbf16>
    %526 = vector.shape_cast %525 : vector<1x32x36xbf16> to vector<32x36xbf16>
    %cst_320 = arith.constant dense<0.000000e+00> : vector<32x256xf32>
    %527 = tpu.matmul %526, %524, %cst_320 {dimension_numbers = #tpu.dot_dimension_numbers<[1], [0], [0], [1], [0, 0, 1, 1], [], []>} : vector<32x36xbf16>, vector<36x256xbf16>, vector<32x256xf32> -> vector<32x256xf32>
    %c0_321 = arith.constant 0 : index
    %c1_322 = arith.constant 1 : index
    %528 = vector.load %arg13[%c0_321, %c1_322] : memref<72x290xbf16, #tpu.memory_space<vmem>>, vector<36x256xbf16>
    %c1_323 = arith.constant 1 : index
    %c0_324 = arith.constant 0 : index
    %c0_325 = arith.constant 0 : index
    %529 = vector.load %arg10[%c1_323, %c0_324, %c0_325] : memref<9x32x36xbf16, #tpu.memory_space<vmem>>, vector<1x32x36xbf16>
    %530 = vector.shape_cast %529 : vector<1x32x36xbf16> to vector<32x36xbf16>
    %cst_326 = arith.constant dense<0.000000e+00> : vector<32x256xf32>
    %531 = tpu.matmul %530, %528, %cst_326 {dimension_numbers = #tpu.dot_dimension_numbers<[1], [0], [0], [1], [0, 0, 1, 1], [], []>} : vector<32x36xbf16>, vector<36x256xbf16>, vector<32x256xf32> -> vector<32x256xf32>
    %532 = arith.addf %527, %531 : vector<32x256xf32>
    %c0_327 = arith.constant 0 : index
    %c2_328 = arith.constant 2 : index
    %533 = vector.load %arg13[%c0_327, %c2_328] : memref<72x290xbf16, #tpu.memory_space<vmem>>, vector<36x256xbf16>
    %cst_329 = arith.constant 0.000000e+00 : bf16
    %534 = vector.broadcast %cst_329 : bf16 to vector<36x256xbf16>
    %535 = vector.shape_cast %36 : vector<1x256xi1> to vector<1x256xi1>
    %536 = vector.broadcast %535 : vector<1x256xi1> to vector<36x256xi1>
    %537 = arith.select %536, %533, %534 : vector<36x256xi1>, vector<36x256xbf16>
    %c2_330 = arith.constant 2 : index
    %c0_331 = arith.constant 0 : index
    %c0_332 = arith.constant 0 : index
    %538 = vector.load %arg10[%c2_330, %c0_331, %c0_332] : memref<9x32x36xbf16, #tpu.memory_space<vmem>>, vector<1x32x36xbf16>
    %539 = vector.shape_cast %538 : vector<1x32x36xbf16> to vector<32x36xbf16>
    %cst_333 = arith.constant dense<0.000000e+00> : vector<32x256xf32>
    %540 = tpu.matmul %539, %537, %cst_333 {dimension_numbers = #tpu.dot_dimension_numbers<[1], [0], [0], [1], [0, 0, 1, 1], [], []>} : vector<32x36xbf16>, vector<36x256xbf16>, vector<32x256xf32> -> vector<32x256xf32>
    %541 = arith.addf %532, %540 : vector<32x256xf32>
    %c0_334 = arith.constant 0 : index
    %c16_335 = arith.constant 16 : index
    %542 = vector.load %arg13[%c0_334, %c16_335] : memref<72x290xbf16, #tpu.memory_space<vmem>>, vector<36x256xbf16>
    %cst_336 = arith.constant 0.000000e+00 : bf16
    %543 = vector.broadcast %cst_336 : bf16 to vector<36x256xbf16>
    %544 = vector.shape_cast %31 : vector<1x256xi1> to vector<1x256xi1>
    %545 = vector.broadcast %544 : vector<1x256xi1> to vector<36x256xi1>
    %546 = arith.select %545, %542, %543 : vector<36x256xi1>, vector<36x256xbf16>
    %c3_337 = arith.constant 3 : index
    %c0_338 = arith.constant 0 : index
    %c0_339 = arith.constant 0 : index
    %547 = vector.load %arg10[%c3_337, %c0_338, %c0_339] : memref<9x32x36xbf16, #tpu.memory_space<vmem>>, vector<1x32x36xbf16>
    %548 = vector.shape_cast %547 : vector<1x32x36xbf16> to vector<32x36xbf16>
    %cst_340 = arith.constant dense<0.000000e+00> : vector<32x256xf32>
    %549 = tpu.matmul %548, %546, %cst_340 {dimension_numbers = #tpu.dot_dimension_numbers<[1], [0], [0], [1], [0, 0, 1, 1], [], []>} : vector<32x36xbf16>, vector<36x256xbf16>, vector<32x256xf32> -> vector<32x256xf32>
    %550 = arith.addf %541, %549 : vector<32x256xf32>
    %c0_341 = arith.constant 0 : index
    %c17_342 = arith.constant 17 : index
    %551 = vector.load %arg13[%c0_341, %c17_342] : memref<72x290xbf16, #tpu.memory_space<vmem>>, vector<36x256xbf16>
    %c4_343 = arith.constant 4 : index
    %c0_344 = arith.constant 0 : index
    %c0_345 = arith.constant 0 : index
    %552 = vector.load %arg10[%c4_343, %c0_344, %c0_345] : memref<9x32x36xbf16, #tpu.memory_space<vmem>>, vector<1x32x36xbf16>
    %553 = vector.shape_cast %552 : vector<1x32x36xbf16> to vector<32x36xbf16>
    %cst_346 = arith.constant dense<0.000000e+00> : vector<32x256xf32>
    %554 = tpu.matmul %553, %551, %cst_346 {dimension_numbers = #tpu.dot_dimension_numbers<[1], [0], [0], [1], [0, 0, 1, 1], [], []>} : vector<32x36xbf16>, vector<36x256xbf16>, vector<32x256xf32> -> vector<32x256xf32>
    %555 = arith.addf %550, %554 : vector<32x256xf32>
    %c0_347 = arith.constant 0 : index
    %c18_348 = arith.constant 18 : index
    %556 = vector.load %arg13[%c0_347, %c18_348] : memref<72x290xbf16, #tpu.memory_space<vmem>>, vector<36x256xbf16>
    %cst_349 = arith.constant 0.000000e+00 : bf16
    %557 = vector.broadcast %cst_349 : bf16 to vector<36x256xbf16>
    %558 = vector.shape_cast %36 : vector<1x256xi1> to vector<1x256xi1>
    %559 = vector.broadcast %558 : vector<1x256xi1> to vector<36x256xi1>
    %560 = arith.select %559, %556, %557 : vector<36x256xi1>, vector<36x256xbf16>
    %c5_350 = arith.constant 5 : index
    %c0_351 = arith.constant 0 : index
    %c0_352 = arith.constant 0 : index
    %561 = vector.load %arg10[%c5_350, %c0_351, %c0_352] : memref<9x32x36xbf16, #tpu.memory_space<vmem>>, vector<1x32x36xbf16>
    %562 = vector.shape_cast %561 : vector<1x32x36xbf16> to vector<32x36xbf16>
    %cst_353 = arith.constant dense<0.000000e+00> : vector<32x256xf32>
    %563 = tpu.matmul %562, %560, %cst_353 {dimension_numbers = #tpu.dot_dimension_numbers<[1], [0], [0], [1], [0, 0, 1, 1], [], []>} : vector<32x36xbf16>, vector<36x256xbf16>, vector<32x256xf32> -> vector<32x256xf32>
    %564 = arith.addf %555, %563 : vector<32x256xf32>
    %c0_354 = arith.constant 0 : index
    %c32_355 = arith.constant 32 : index
    %565 = vector.load %arg13[%c0_354, %c32_355] : memref<72x290xbf16, #tpu.memory_space<vmem>>, vector<36x256xbf16>
    %cst_356 = arith.constant 0.000000e+00 : bf16
    %566 = vector.broadcast %cst_356 : bf16 to vector<36x256xbf16>
    %567 = vector.shape_cast %31 : vector<1x256xi1> to vector<1x256xi1>
    %568 = vector.broadcast %567 : vector<1x256xi1> to vector<36x256xi1>
    %569 = arith.select %568, %565, %566 : vector<36x256xi1>, vector<36x256xbf16>
    %c6_357 = arith.constant 6 : index
    %c0_358 = arith.constant 0 : index
    %c0_359 = arith.constant 0 : index
    %570 = vector.load %arg10[%c6_357, %c0_358, %c0_359] : memref<9x32x36xbf16, #tpu.memory_space<vmem>>, vector<1x32x36xbf16>
    %571 = vector.shape_cast %570 : vector<1x32x36xbf16> to vector<32x36xbf16>
    %cst_360 = arith.constant dense<0.000000e+00> : vector<32x256xf32>
    %572 = tpu.matmul %571, %569, %cst_360 {dimension_numbers = #tpu.dot_dimension_numbers<[1], [0], [0], [1], [0, 0, 1, 1], [], []>} : vector<32x36xbf16>, vector<36x256xbf16>, vector<32x256xf32> -> vector<32x256xf32>
    %573 = arith.addf %564, %572 : vector<32x256xf32>
    %c0_361 = arith.constant 0 : index
    %c33_362 = arith.constant 33 : index
    %574 = vector.load %arg13[%c0_361, %c33_362] : memref<72x290xbf16, #tpu.memory_space<vmem>>, vector<36x256xbf16>
    %c7_363 = arith.constant 7 : index
    %c0_364 = arith.constant 0 : index
    %c0_365 = arith.constant 0 : index
    %575 = vector.load %arg10[%c7_363, %c0_364, %c0_365] : memref<9x32x36xbf16, #tpu.memory_space<vmem>>, vector<1x32x36xbf16>
    %576 = vector.shape_cast %575 : vector<1x32x36xbf16> to vector<32x36xbf16>
    %cst_366 = arith.constant dense<0.000000e+00> : vector<32x256xf32>
    %577 = tpu.matmul %576, %574, %cst_366 {dimension_numbers = #tpu.dot_dimension_numbers<[1], [0], [0], [1], [0, 0, 1, 1], [], []>} : vector<32x36xbf16>, vector<36x256xbf16>, vector<32x256xf32> -> vector<32x256xf32>
    %578 = arith.addf %573, %577 : vector<32x256xf32>
    %c0_367 = arith.constant 0 : index
    %c34_368 = arith.constant 34 : index
    %579 = vector.load %arg13[%c0_367, %c34_368] : memref<72x290xbf16, #tpu.memory_space<vmem>>, vector<36x256xbf16>
    %cst_369 = arith.constant 0.000000e+00 : bf16
    %580 = vector.broadcast %cst_369 : bf16 to vector<36x256xbf16>
    %581 = vector.shape_cast %36 : vector<1x256xi1> to vector<1x256xi1>
    %582 = vector.broadcast %581 : vector<1x256xi1> to vector<36x256xi1>
    %583 = arith.select %582, %579, %580 : vector<36x256xi1>, vector<36x256xbf16>
    %c8_370 = arith.constant 8 : index
    %c0_371 = arith.constant 0 : index
    %c0_372 = arith.constant 0 : index
    %584 = vector.load %arg10[%c8_370, %c0_371, %c0_372] : memref<9x32x36xbf16, #tpu.memory_space<vmem>>, vector<1x32x36xbf16>
    %585 = vector.shape_cast %584 : vector<1x32x36xbf16> to vector<32x36xbf16>
    %cst_373 = arith.constant dense<0.000000e+00> : vector<32x256xf32>
    %586 = tpu.matmul %585, %583, %cst_373 {dimension_numbers = #tpu.dot_dimension_numbers<[1], [0], [0], [1], [0, 0, 1, 1], [], []>} : vector<32x36xbf16>, vector<36x256xbf16>, vector<32x256xf32> -> vector<32x256xf32>
    %587 = arith.addf %578, %586 : vector<32x256xf32>
    %cst_374 = arith.constant 5.000000e-01 : f32
    %588 = vector.broadcast %cst_374 : f32 to vector<32x256xf32>
    %589 = arith.mulf %588, %587 : vector<32x256xf32>
    %cst_375 = arith.constant 4.471500e-02 : f32
    %590 = vector.broadcast %cst_375 : f32 to vector<32x256xf32>
    %591 = arith.mulf %590, %587 : vector<32x256xf32>
    %592 = arith.mulf %591, %587 : vector<32x256xf32>
    %593 = arith.mulf %592, %587 : vector<32x256xf32>
    %594 = arith.addf %587, %593 : vector<32x256xf32>
    %cst_376 = arith.constant 0.797884583 : f32
    %595 = vector.broadcast %cst_376 : f32 to vector<32x256xf32>
    %596 = arith.mulf %595, %594 : vector<32x256xf32>
    %597 = math.tanh %596 : vector<32x256xf32>
    %cst_377 = arith.constant 1.000000e+00 : f32
    %598 = vector.broadcast %cst_377 : f32 to vector<32x256xf32>
    %599 = arith.addf %598, %597 : vector<32x256xf32>
    %600 = arith.mulf %589, %599 : vector<32x256xf32>
    %c0_378 = arith.constant 0 : index
    %c0_379 = arith.constant 0 : index
    %c0_380 = arith.constant 0 : index
    %601 = vector.load %arg11[%c0_378, %c0_379, %c0_380] : memref<1x32x256xf32, #tpu.memory_space<vmem>>, vector<1x32x256xf32>
    %602 = vector.shape_cast %601 : vector<1x32x256xf32> to vector<32x256xf32>
    %603 = vector.shape_cast %600 : vector<32x256xf32> to vector<1x32x256xf32>
    tpu.vector_store %arg11[%c0_378, %c0_379, %c0_380], %603 {strides = array<i32>} : memref<1x32x256xf32, #tpu.memory_space<vmem>>, vector<1x32x256xf32>,
    return
  }
  func.func @transform_0(%arg0: i32) -> (i32, i32, i32) {
    %c0_i32 = arith.constant 0 : i32
    %c0_i32_0 = arith.constant 0 : i32
    %c0_i32_1 = arith.constant 0 : i32
    return %arg0, %c0_i32, %c0_i32_0 : i32, i32, i32
  }
  func.func @transform_1(%arg0: i32) -> (i32, i32, i32) {
    %c0_i32 = arith.constant 0 : i32
    %c0_i32_0 = arith.constant 0 : i32
    %c0_i32_1 = arith.constant 0 : i32
    return %arg0, %c0_i32, %c0_i32_0 : i32, i32, i32
  }
  func.func @transform_2(%arg0: i32) -> (i32, i32) {
    %c0_i32 = arith.constant 0 : i32
    %c0_i32_0 = arith.constant 0 : i32
    %c0_i32_1 = arith.constant 0 : i32
    return %c0_i32, %c0_i32_0 : i32, i32
  }
  func.func @transform_3(%arg0: i32) -> (i32, i32) {
    %c0_i32 = arith.constant 0 : i32
    %c0_i32_0 = arith.constant 0 : i32
    %c0_i32_1 = arith.constant 0 : i32
    return %c0_i32, %c0_i32_0 : i32, i32
  }
  func.func @transform_4(%arg0: i32) -> (i32, i32) {
    %c0_i32 = arith.constant 0 : i32
    %c0_i32_0 = arith.constant 0 : i32
    %c0_i32_1 = arith.constant 0 : i32
    return %c0_i32, %c0_i32_0 : i32, i32
  }
  func.func @transform_5(%arg0: i32) -> (i32, i32) {
    %c0_i32 = arith.constant 0 : i32
    %c0_i32_0 = arith.constant 0 : i32
    %c0_i32_1 = arith.constant 0 : i32
    return %c0_i32, %c0_i32_0 : i32, i32
  }
  func.func @transform_6(%arg0: i32) -> (i32, i32) {
    %c0_i32 = arith.constant 0 : i32
    %c0_i32_0 = arith.constant 0 : i32
    %c0_i32_1 = arith.constant 0 : i32
    return %c0_i32, %c0_i32_0 : i32, i32
  }
  func.func @transform_7(%arg0: i32) -> (i32, i32, i32) {
    %c0_i32 = arith.constant 0 : i32
    %c0_i32_0 = arith.constant 0 : i32
    %c0_i32_1 = arith.constant 0 : i32
    %c0_i32_2 = arith.constant 0 : i32
    return %c0_i32, %c0_i32_0, %c0_i32_1 : i32, i32, i32
  }
  func.func @transform_8(%arg0: i32) -> (i32, i32, i32) {
    %c0_i32 = arith.constant 0 : i32
    %c0_i32_0 = arith.constant 0 : i32
    %c0_i32_1 = arith.constant 0 : i32
    %c0_i32_2 = arith.constant 0 : i32
    return %c0_i32, %c0_i32_0, %c0_i32_1 : i32, i32, i32
  }
  func.func @transform_9(%arg0: i32) -> (i32, i32, i32) {
    %c0_i32 = arith.constant 0 : i32
    %c0_i32_0 = arith.constant 0 : i32
    %c0_i32_1 = arith.constant 0 : i32
    %c0_i32_2 = arith.constant 0 : i32
    return %c0_i32, %c0_i32_0, %c0_i32_1 : i32, i32, i32
  }
  func.func @transform_10(%arg0: i32) -> (i32, i32, i32) {
    %c0_i32 = arith.constant 0 : i32
    %c0_i32_0 = arith.constant 0 : i32
    %c0_i32_1 = arith.constant 0 : i32
    return %arg0, %c0_i32, %c0_i32_0 : i32, i32, i32
  }
}

</mosaic_0001>

<bundles_post_ra>
// kernel: label_bind_block.1
= control target key start
LH: loop header
LB: loop body
LE: loop exit
PB: predicated region body
PF: predicated region fallthrough
CT: control target
= control target key end

     0   :  { %s10821_s13 = smov 0   ;;  %s14654_s0 = inlined_call_operand.vmem [shape: f32[2,72,1], index: 0, kind: input, shape index: {}]   ;;  %s14655_s1 = inlined_call_operand.vmem [shape: f32[2,32,256], index: 1, kind: input, shape index: {}]   ;;  %s14656_s2 = inlined_call_operand.vmem [shape: bf16[32,1568], index: 2, kind: input, shape index: {}]   ;;  %s14657_s3 = inlined_call_operand.vmem [shape: f32[64,3], index: 3, kind: input, shape index: {}]   ;;  %s14658_s4 = inlined_call_operand.vmem [shape: bf16[64,32], index: 4, kind: input, shape index: {}]   ;;  %s14659_s5 = inlined_call_operand.vmem [shape: bf16[32,64], index: 5, kind: input, shape index: {}]   ;;  %s14660_s6 = inlined_call_operand.vmem [shape: bf16[72,32], index: 6, kind: input, shape index: {}]   ;;  %s14661_s7 = inlined_call_operand.vmem [shape: bf16[9,36,72], index: 7, kind: input, shape index: {}]   ;;  %s14662_s8 = inlined_call_operand.vmem [shape: bf16[9,36,36], index: 8, kind: input, shape index: {}]   ;;  %s14663_s9 = inlined_call_operand.vmem [shape: bf16[9,32,36], index: 9, kind: input, shape index: {}]   ;;  %s14664_s10 = inlined_call_operand.vmem [shape: f32[2,32,256], index: 10, kind: output, shape index: {}]  }
   0x1 LB: > { %s9430_s14 = sadd.s32 4294967295, %s10676_s13   ;;  %p9434_p0 = scmp.ge.s32.totalorder %s10676_s13, 1  ;;  %s10676_s13 = sphi %s10821_s13, %s20_s13  }
   0x2   : > { %p322_p1 = scmp.lt.s32.totalorder %s10676_s13, 3 }
   0x4   : > { %p323_p2 = pnand %p9434_p0, %p322_p1 }
   0x6   : > { %326 = sbr.rel (%p323_p2) target bundleno = 4088 (0xff8), region = 60 }
   0xd   : > { %p10829_p3 = scmp.lt.s32.totalorder %s9430_s14, 1  ;;  %v383_v0 = vlaneseq  ;;  %vm456_vm0 = vcmask 834560   ;;  %v10678_v1 = vmov 0   ;;  %s10679_s20 = smov 51   ;;  %v14717_v22 = vmov 0 }
   0xe   : > { %454 = vst [vmem:[#allocation2] sm:$0xff] %v10678_v1  ;;  %458 = vst [vmem:[#allocation2 + $0x18] sm:$0xff] %v10678_v1  ;;  %3713 = vmatprep.mubr.bf16.mxu1 %v10678_v1  ;;  %10446 = vset.pattern.permute.xlu0 %v10678_v1  ;;  %s10680_s21 = smov 1   ;;  %s10681_s22 = smov 2  }
   0xf   : > { %4404 = vst [vmem:[#allocation3] sm:$0xff] %v10678_v1  ;;  %4407 = vst [vmem:[#allocation3 + $0xc] sm:$0xff] %v10678_v1  ;;  %s15033_s14 = smov (!%p10829_p3, %s9430_s14), 1  ;;  %v384_v2 = vand.u32 127, %v383_v0  ;;  %10447 = vset.pattern.permute.xlu1 %v10678_v1  ;;  %v505_v5 = vshrl.u32 %v383_v0, 7  ;;  %s10682_s23 = smov 4  }
  0x10   : > { %4409 = vst [vmem:[#allocation3 + $0x18] sm:$0xff] %v10678_v1  ;;  %4411 = vst [vmem:[#allocation3 + $0x24] sm:$0xff] %v10678_v1  ;;  %s14665_s16 = sshll.u32 %s15033_s14, 6  ;;  %s10683_s24 = smov 5  }
  0x11   : > { %4413 = vst [vmem:[#allocation3 + $0x30] sm:$0xff] %v10678_v1  ;;  %4415 = vst [vmem:[#allocation3 + $0x3c] sm:$0xff] %v10678_v1  ;;  %v385_v3 = vadd.s32 128, %v384_v2  ;;  %v390_v4 = vand.u32 15, %v384_v2  ;;  %s10861_s19 = scalar_lea.vmem %s14655_s1, %s14665_s16  ;;  %v510_v18 = vsub.s32 4, %v505_v5  ;;  %v506_v21 = vsub.s32 0, %v505_v5 }
  0x12   : > { %4417 = vst [vmem:[#allocation3 + $0x48] sm:$0xff] %v10678_v1  ;;  %4419 = vst [vmem:[#allocation3 + $0x54] sm:$0xff] %v10678_v1  ;;  %v450_v6 = vld [vmem:[%s10861_s19 + $0x20] sm:$0xff]  ;;  %v452_v7 = vld [vmem:[%s10861_s19 + $0x30] sm:$0xff]  ;;  %s10684_s25 = smov 6   ;;  %s10685_s26 = smov 16  }
  0x13   : > { %4421 = vst [vmem:[#allocation3 + $0x60] sm:$0xff] %v10678_v1  ;;  %460 = vst.msk [vmem:[#allocation2 + $0x28] sm:$0xff] %vm456_vm0, %v10678_v1  ;;  %v446_v8 = vld [vmem:[%s10861_s19] sm:$0xff]  ;;  %v397_v9 = vand.u32 15, %v385_v3  ;;  %vm416_vm1 = vcmp.ge.s32.totalorder %v390_v4, 2  ;;  %v463_v10 = vpack.c.bf16 %v452_v7, %v450_v6  ;;  %v448_v11 = vld [vmem:[%s10861_s19 + $0x10] sm:$0xff] }
  0x14   : > { %457 = vst.msk [vmem:[#allocation2 + $0x10] sm:$0xff] %vm456_vm0, %v10678_v1  ;;  %v451_v12 = vld [vmem:[%s10861_s19 + $0x28] sm:$0xff]  ;;  %v453_v13 = vld [vmem:[%s10861_s19 + $0x38] sm:$0xff]  ;;  %v461_v14 = vpack.c.bf16 %v448_v11, %v446_v8  ;;  %vm422_vm3 = vcmp.ge.s32.totalorder %v390_v4, 1  ;;  %vm430_vm7 = vcmp.lt.s32.totalorder %v390_v4, 15  ;;  %vm436_vm10 = vcmp.lt.s32.totalorder %v390_v4, 14 }
  0x15   : > { %v447_v15 = vld [vmem:[%s10861_s19 + $0x8] sm:$0xff]  ;;  %v449_v16 = vld [vmem:[%s10861_s19 + $0x18] sm:$0xff]  ;;  %vm417_vm2 = vcmp.ge.s32.totalorder %v397_v9, 2  ;;  %vm423_vm4 = vcmp.ge.s32.totalorder %v397_v9, 1  ;;  %473 = vrot.lane.b32.xlu1 %v463_v10, %s10679_s20  ;;  %v464_v17 = vpack.c.bf16 %v453_v13, %v451_v12  ;;  %vm431_vm8 = vcmp.lt.s32.totalorder %v397_v9, 15  ;;  %s10686_s27 = smov 17  }
  0x16   : > { %vm532_vm5 = vmpackc.low %vm417_vm2, %vm416_vm1  ;;  %469 = vrot.lane.b32.xlu0 %v461_v14, %s10679_s20  ;;  %v462_v19 = vpack.c.bf16 %v449_v16, %v447_v15  ;;  %vm437_vm11 = vcmp.lt.s32.totalorder %v397_v9, 14  ;;  %vm442_vm12 = vcmp.lt.s32.totalorder %v390_v4, 13  ;;  %vm443_vm14 = vcmp.lt.s32.totalorder %v397_v9, 13  ;;  %s10687_s28 = smov 18   ;;  %s10688_s29 = smov 20  }
  0x17   : > { %v533_v20 = vsel %vm532_vm5, 65537, %v10678_v1  ;;  %vm10873_vm6 = vmpackc.low %vm423_vm4, %vm422_vm3  ;;  %vm410_vm15 = vcmp.ge.s32.totalorder %v390_v4, 3  ;;  %vm411_vm2 = vcmp.ge.s32.totalorder %v397_v9, 3  ;;  %s10689_s30 = smov 21   ;;  %s10690_s11 = smov 22   ;;  %vm486_vm4 = vcmask 1047960  }
  0x18   : > { %v14718_v22 = vsel %vm10873_vm6, 4294967295, %v14717_v22  ;;  %v10877_v23 = vrot.slane %v533_v20, %v510_v18  ;;  %v10879_v24 = vrot.slane %v533_v20, %v506_v21  ;;  %v10884_v25 = vsel %vm10873_vm6, 65537, %v10678_v1  ;;  %vm701_vm9 = vmpackc.low %vm431_vm8, %vm430_vm7  ;;  %s10691_s12 = smov 32   ;;  %s10692_s15 = smov 33  }
  0x19   : > { %14719 = vst [vmem:[#allocation5_spill] sm:$0xff] %v14718_v22  ;;  %475 = vrot.lane.b32.xlu1 %v464_v17, %s10679_s20  ;;  %v10888_v26 = vrot.slane %v10884_v25, %v510_v18  ;;  %v10892_v27 = vrot.slane %v10884_v25, %v506_v21  ;;  %v10895_v28 = vsel %vm701_vm9, 65537, %v10678_v1  ;;  %vm767_vm13 = vmpackc.low %vm437_vm11, %vm436_vm10  ;;  %vm477_vm5 = vcmask 416768   ;;  %s10693_s17 = smov 125   ;;  %s10694_s18 = smov 127  }
  0x1a   : > { %471 = vrot.lane.b32.xlu0 %v462_v19, %s10679_s20  ;;  %v10900_v29 = vrot.slane %v10895_v28, %v510_v18  ;;  %v768_v30 = vsel %vm767_vm13, 65537, %v10678_v1  ;;  %vm833_vm1 = vmpackc.low %vm443_vm14, %vm442_vm12  ;;  %v10906_v31 = vrot.slane %v10895_v28, %v506_v21  ;;  %s10695_s20 = smov 126   ;;  %s10717_s16 = smov 52   ;;  %v10519_v22 = vld [vmem:[%s14661_s7 + $0x24] ss:$0 sps:$4 sm:$0x33]  }
  0x1b   : > { %v10909_v32 = vrot.slane %v768_v30, %v510_v18  ;;  %v834_v33 = vsel %vm833_vm1, 65537, %v10678_v1  ;;  %vm502_vm3 = vmpackc.low %vm411_vm2, %vm410_vm15  ;;  %v10913_v34 = vrot.slane %v768_v30, %v506_v21 }
  0x1c   : > { %v10916_v35 = vrot.slane %v834_v33, %v510_v18  ;;  %v503_v36 = vsel %vm502_vm3, 65537, %v10678_v1  ;;  %v10920_v37 = vrot.slane %v834_v33, %v506_v21 }
  0x1d   : > { %544 = vrot.lane.b32.xlu1 %v10877_v23, %s10680_s21  ;;  %v10923_v38 = vrot.slane %v503_v36, %v510_v18  ;;  %v10926_v39 = vrot.slane %v503_v36, %v506_v21 }
  0x1e   : > { %542 = vrot.lane.b32.xlu0 %v10879_v24, %s10680_s21  ;;  %s10696_s21 = smov 124  }
  0x1f   : > { %vm513_vm7 = vcmp.ne.s16.totalorder %v10923_v38, 0  ;;  %vm512_vm8 = vcmp.ne.s16.totalorder %v10926_v39, 0 }
  0x21   : > { %610 = vrot.lane.b32.xlu1 %v10888_v26, %s10681_s22 }
  0x22   : > { %608 = vrot.lane.b32.xlu0 %v10892_v27, %s10681_s22 }
  0x25   : > { %713 = vrot.lane.b32.xlu1 %v10900_v29, %s10682_s23 }
  0x26   : > { %711 = vrot.lane.b32.xlu0 %v10906_v31, %s10682_s23  ;;  %s10697_s23 = smov 123  }
  0x29   : > { %779 = vrot.lane.b32.xlu1 %v10909_v32, %s10683_s24 }
  0x2a   : > { %777 = vrot.lane.b32.xlu0 %v10913_v34, %s10683_s24  ;;  %s10698_s24 = smov 122  }
  0x2d   : > { %845 = vrot.lane.b32.xlu1 %v10916_v35, %s10684_s25 }
  0x2e   : > { %843 = vrot.lane.b32.xlu0 %v10920_v37, %s10684_s25  ;;  %s14681_s25 = smov 112  }
  0x31   : > { %897 = vrot.lane.b32.xlu1 %v10923_v38, %s10685_s26 }
  0x32   : > { %895 = vrot.lane.b32.xlu0 %v10926_v39, %s10685_s26 }
  0x35   : > { %949 = vrot.lane.b32.xlu1 %v10877_v23, %s10686_s27 }
  0x36   : > { %947 = vrot.lane.b32.xlu0 %v10879_v24, %s10686_s27 }
  0x39   : > { %999 = vrot.lane.b32.xlu1 %v10892_v27, %s10687_s28 }
  0x3a   : > { %1001 = vrot.lane.b32.xlu0 %v10888_v26, %s10687_s28 }
  0x3d   : > { %1088 = vrot.lane.b32.xlu1 %v10906_v31, %s10688_s29 }
  0x3e   : > { %1090 = vrot.lane.b32.xlu0 %v10900_v29, %s10688_s29  ;;  %s14679_s29 = smov 111  }
  0x41   : > { %1140 = vrot.lane.b32.xlu1 %v10913_v34, %s10689_s30 }
  0x42   : > { %1142 = vrot.lane.b32.xlu0 %v10909_v32, %s10689_s30  ;;  %s14670_s30 = smov 34  }
  0x45   : > { %1192 = vrot.lane.b32.xlu1 %v10920_v37, %s10690_s11 }
  0x46   : > { %1194 = vrot.lane.b32.xlu0 %v10916_v35, %s10690_s11  ;;  %s10706_s11 = smov 37  }
  0x49   : > { %1244 = vrot.lane.b32.xlu1 %v10926_v39, %s10691_s12 }
  0x4a   : > { %1246 = vrot.lane.b32.xlu0 %v10923_v38, %s10691_s12 }
  0x4d   : > { %1296 = vrot.lane.b32.xlu1 %v10879_v24, %s10692_s15 }
  0x87   : > { %v474_v40 = vpop.permute.xlu1 %473 }
  0x88   : > { %491 = vst.msk [vmem:[#allocation2 + $0x18] sm:$0xff] %vm486_vm4, %v474_v40  ;;  %v470_v41 = vpop.permute.xlu0 %469 }
  0x89   : > { %487 = vst.msk [vmem:[#allocation2] sm:$0xff] %vm486_vm4, %v470_v41  ;;  %vm546_vm4 = vcmask 7168  }
  0x8b   : > { %v476_v42 = vpop.permute.xlu1 %475 }
  0x8c   : > { %v10953_v43 = vsel %vm477_vm5, %v474_v40, %v476_v42  ;;  %493 = vst.msk [vmem:[#allocation2 + $0x28] sm:$0xff] %vm477_vm5, %v476_v42  ;;  %v472_v44 = vpop.permute.xlu0 %471 }
  0x8d   : > { %492 = vst [vmem:[#allocation2 + $0x20] sm:$0xff] %v10953_v43  ;;  %v10956_v45 = vsel %vm477_vm5, %v470_v41, %v472_v44  ;;  %490 = vst.msk [vmem:[#allocation2 + $0x10] sm:$0xff] %vm477_vm5, %v472_v44 }
  0x8e   : > { %488 = vst [vmem:[#allocation2 + $0x8] sm:$0xff] %v10956_v45  ;;  %10035 = vmatprep.subr.msk.bf16.mxu0 %vm513_vm7, %v10956_v45 }
  0x8f   : > { %v10970_v49 = vld [vmem:[#allocation2 + $0x18] sm:$0xff]  ;;  %v10985_v53 = vpop.permute.xlu1 %544 }
  0x90   : > { %v10963_v46 = vld [vmem:[#allocation2] sm:$0xff]  ;;  %v10968_v48 = vpop.permute.xlu0 %542  ;;  %v516_v52 = vsel %vm512_vm8, %v10970_v49, 0  ;;  %vm550_vm10 = vcmp.ne.s16.totalorder %v10985_v53, 0 }
  0x91   : > { %666 = vrot.lane.b32.xlu0 %v10963_v46, %s10693_s17  ;;  %v514_v47 = vsel %vm512_vm8, %v10963_v46, 0  ;;  %vm548_vm9 = vcmp.ne.s16.totalorder %v10968_v48, 0  ;;  %v547_v19 = vsel %vm546_vm4, %v10968_v48, %v10985_v53  ;;  %vm951_vm4 = vcmask 138240  }
  0x92   : > { %3364 = vmatpush1.bf16.msra.mxu0 %v514_v47  ;;  %v551_v54 = vsel %vm548_vm9, %v10963_v46, 0  ;;  %v554_v59 = vsel %vm548_vm9, %v10970_v49, 0  ;;  %vm549_vm9 = vcmp.ne.s16.totalorder %v547_v19, 0 }
  0x93   : > { %v10972_v50 = vld [vmem:[#allocation2 + $0x28] sm:$0xff]  ;;  %10036 = vmatprep.subr.msk.bf16.mxu0 %vm513_vm7, %v10953_v43  ;;  %v11001_v58 = vpop.permute.xlu1 %610  ;;  %vm612_vm7 = vcmask 15360   ;;  %v552_v36 = vsel %vm549_vm9, %v10956_v45, 0  ;;  %v555_v41 = vsel %vm549_vm9, %v10953_v43, 0 }
  0x94   : > { %v10977_v51 = vld [vmem:[#allocation2 + $0x10] sm:$0xff]  ;;  %v10994_v55 = vpop.permute.xlu0 %608  ;;  %v556_v57 = vsel %vm550_vm10, %v10972_v50, 0  ;;  %vm616_vm12 = vcmp.ne.s16.totalorder %v11001_v58, 0 }
  0x95   : > { %676 = vrot.lane.b32.xlu0 %v10972_v50, %s10693_s17  ;;  %670 = vrot.lane.b32.xlu1 %v10977_v51, %s10693_s17  ;;  %v553_v56 = vsel %vm550_vm10, %v10977_v51, 0  ;;  %vm614_vm11 = vcmp.ne.s16.totalorder %v10994_v55, 0  ;;  %v619_v61 = vsel %vm616_vm12, %v10977_v51, 0  ;;  %v622_v62 = vsel %vm616_vm12, %v10972_v50, 0 }
  0x96   : > { %3366 = vmatpush1.bf16.msra.mxu0 %v516_v52  ;;  %v617_v60 = vsel %vm614_vm11, %v10963_v46, 0  ;;  %v620_v0 = vsel %vm614_vm11, %v10970_v49, 0  ;;  %v613_v30 = vsel %vm612_vm7, %v10994_v55, %v11001_v58  ;;  %vm715_vm10 = vcmask 31744  }
  0x97   : > { %v714_v1 = vpop.permute.xlu1 %713  ;;  %vm615_vm11 = vcmp.ne.s16.totalorder %v613_v30, 0  ;;  %vm781_vm12 = vcmask 39936  }
  0x98   : > { %v712_v63 = vpop.permute.xlu0 %711  ;;  %vm719_vm14 = vcmp.ne.s16.totalorder %v714_v1, 0  ;;  %v618_v42 = vsel %vm615_vm11, %v10956_v45, 0  ;;  %v621_v47 = vsel %vm615_vm11, %v10953_v43, 0 }
  0x99   : > { %672 = vrot.lane.b32.xlu1 %v10970_v49, %s10693_s17  ;;  %563 = vrot.lane.b32.xlu0 %v551_v54, %s10694_s18  ;;  %vm717_vm13 = vcmp.ne.s16.totalorder %v712_v63, 0  ;;  %v722_v4 = vsel %vm719_vm14, %v10977_v51, 0  ;;  %v725_v5 = vsel %vm719_vm14, %v10972_v50, 0  ;;  %v716_v40 = vsel %vm715_vm10, %v712_v63, %v714_v1 }
  0x9a   : > { %v720_v2 = vsel %vm717_vm13, %v10963_v46, 0  ;;  %v723_v7 = vsel %vm717_vm13, %v10970_v49, 0  ;;  %vm718_vm13 = vcmp.ne.s16.totalorder %v716_v40, 0  ;;  %vm847_vm14 = vcmask 48128  }
  0x9b   : > { %v780_v6 = vpop.permute.xlu1 %779  ;;  %v721_v48 = vsel %vm718_vm13, %v10956_v45, 0  ;;  %v724_v53 = vsel %vm718_vm13, %v10953_v43, 0 }
  0x9c   : > { %v778_v3 = vpop.permute.xlu0 %777  ;;  %vm785_vm1 = vcmp.ne.s16.totalorder %v780_v6, 0 }
  0x9d   : > { %567 = vrot.lane.b32.xlu1 %v553_v56, %s10694_s18  ;;  %573 = vrot.lane.b32.xlu0 %v556_v57, %s10694_s18  ;;  %vm783_vm15 = vcmp.ne.s16.totalorder %v778_v3, 0  ;;  %v788_v10 = vsel %vm785_vm1, %v10977_v51, 0  ;;  %v791_v11 = vsel %vm785_vm1, %v10972_v50, 0  ;;  %v782_v44 = vsel %vm781_vm12, %v778_v3, %v780_v6 }
  0x9e   : > { %v786_v8 = vsel %vm783_vm15, %v10963_v46, 0  ;;  %v789_v13 = vsel %vm783_vm15, %v10970_v49, 0  ;;  %vm784_vm15 = vcmp.ne.s16.totalorder %v782_v44, 0  ;;  %vm899_vm1 = vcmask 130048  }
  0x9f   : > { %v846_v12 = vpop.permute.xlu1 %845  ;;  %v787_v54 = vsel %vm784_vm15, %v10956_v45, 0  ;;  %v790_v56 = vsel %vm784_vm15, %v10953_v43, 0 }
  0xa0   : > { %v844_v9 = vpop.permute.xlu0 %843  ;;  %vm851_vm3 = vcmp.ne.s16.totalorder %v846_v12, 0 }
  0xa1   : > { %569 = vrot.lane.b32.xlu1 %v554_v59, %s10694_s18  ;;  %629 = vrot.lane.b32.xlu0 %v617_v60, %s10695_s20  ;;  %vm849_vm2 = vcmp.ne.s16.totalorder %v844_v9, 0  ;;  %v854_v16 = vsel %vm851_vm3, %v10977_v51, 0  ;;  %v857_v17 = vsel %vm851_vm3, %v10972_v50, 0  ;;  %v848_v52 = vsel %vm847_vm14, %v844_v9, %v846_v12 }
  0xa2   : > { %v852_v14 = vsel %vm849_vm2, %v10963_v46, 0  ;;  %v855_v20 = vsel %vm849_vm2, %v10970_v49, 0  ;;  %vm850_vm2 = vcmp.ne.s16.totalorder %v848_v52, 0  ;;  %vm1092_vm14 = vcmask 162816  }
  0xa3   : > { %v898_v18 = vpop.permute.xlu1 %897  ;;  %v853_v57 = vsel %vm850_vm2, %v10956_v45, 0  ;;  %v856_v58 = vsel %vm850_vm2, %v10953_v43, 0 }
  0xa4   : > { %v11039_v15 = vpop.permute.xlu0 %895  ;;  %vm903_vm8 = vcmp.ne.s16.totalorder %v898_v18, 0 }
  0xa5   : > { %633 = vrot.lane.b32.xlu1 %v619_v61, %s10695_s20  ;;  %639 = vrot.lane.b32.xlu0 %v622_v62, %s10695_s20  ;;  %vm901_vm5 = vcmp.ne.s16.totalorder %v11039_v15, 0  ;;  %v906_v33 = vsel %vm903_vm8, %v10977_v51, 0  ;;  %v900_v55 = vsel %vm899_vm1, %v11039_v15, %v898_v18  ;;  %v909_v1 = vsel %vm903_vm8, %v10972_v50, 0  ;;  %v10456_v15 = vld [vmem:[%s14656_s2 + $0x4] ss:$52 sps:$4 sm:$0xff]  }
  0xa6   : > { %v904_v21 = vsel %vm901_vm5, %v10963_v46, 0  ;;  %vm902_vm3 = vcmp.ne.s16.totalorder %v900_v55, 0  ;;  %vm14685_vm8 = vcmask 146432   ;;  %3395 = vmatprep.mubr.bf16.mxu0 %v10456_v15 }
  0xa7   : > { %v905_v59 = vsel %vm902_vm3, %v10956_v45, 0  ;;  %v950_v60 = vpop.permute.xlu1 %949  ;;  %v908_v62 = vsel %vm902_vm3, %v10953_v43, 0 }
  0xa8   : > { %v948_v61 = vpop.permute.xlu0 %947  ;;  %vm955_vm9 = vcmp.ne.s16.totalorder %v950_v60, 0 }
  0xa9   : > { %635 = vrot.lane.b32.xlu1 %v620_v0, %s10695_s20  ;;  %668 = vrot.lane.b32.xlu0 %v10956_v45, %s10693_s17  ;;  %v952_v63 = vsel %vm951_vm4, %v948_v61, %v950_v60  ;;  %v907_v0 = vsel %vm901_vm5, %v10970_v49, 0  ;;  %vm953_vm5 = vcmp.ne.s16.totalorder %v948_v61, 0 }
  0xaa   : > { %vm954_vm10 = vcmp.ne.s16.totalorder %v952_v63, 0 }
  0xab   : > { %v960_v9 = vsel %vm954_vm10, %v10953_v43, 0 }
  0xac   : > { %v1002_v3 = vpop.permute.xlu0 %1001 }
  0xad   : > { %674 = vrot.lane.b32.xlu1 %v10953_v43, %s10693_s17  ;;  %732 = vrot.lane.b32.xlu0 %v720_v2, %s10696_s21  ;;  %v1000_v2 = vpop.permute.xlu1 %999  ;;  %vm1007_vm11 = vcmp.ne.s16.totalorder %v1002_v3, 0  ;;  %s14671_s17 = smov 110  }
  0xae   : > { %vm1005_vm13 = vcmp.ne.s16.totalorder %v1000_v2, 0  ;;  %v1013_v40 = vsel %vm1007_vm11, %v10972_v50, 0 }
  0xb1   : > { %736 = vrot.lane.b32.xlu1 %v722_v4, %s10696_s21  ;;  %742 = vrot.lane.b32.xlu0 %v725_v5, %s10696_s21  ;;  %v958_v4 = vsel %vm955_vm9, %v10977_v51, 0  ;;  %v957_v5 = vsel %vm954_vm10, %v10956_v45, 0  ;;  %v11102_v6 = vpop.permute.xlu1 %1088 }
  0xb2   : > { %vm1094_vm3 = vcmp.ne.s16.totalorder %v11102_v6, 0 }
  0xb5   : > { %738 = vrot.lane.b32.xlu1 %v723_v7, %s10696_s21  ;;  %798 = vrot.lane.b32.xlu0 %v786_v8, %s10697_s23  ;;  %v956_v7 = vsel %vm953_vm5, %v10963_v46, 0  ;;  %v11105_v8 = vpop.permute.xlu0 %1090 }
  0xb6   : > { %vm1096_vm15 = vcmp.ne.s16.totalorder %v11105_v8, 0 }
  0xb9   : > { %802 = vrot.lane.b32.xlu1 %v788_v10, %s10697_s23  ;;  %808 = vrot.lane.b32.xlu0 %v791_v11, %s10697_s23  ;;  %v11111_v10 = vpop.permute.xlu1 %1140  ;;  %v1004_v11 = vsel %vm14685_vm8, %v1000_v2, %v1002_v3  ;;  %v11117_v12 = vpop.permute.xlu0 %1142 }
  0xba   : > { %vm1006_vm12 = vcmp.ne.s16.totalorder %v1004_v11, 0 }
  0xbb   : > { %v1009_v18 = vsel %vm1006_vm12, %v10956_v45, 0 }
  0xbd   : > { %804 = vrot.lane.b32.xlu1 %v789_v13, %s10697_s23  ;;  %864 = vrot.lane.b32.xlu0 %v852_v14, %s10698_s24  ;;  %v959_v13 = vsel %vm953_vm5, %v10970_v49, 0  ;;  %v961_v14 = vsel %vm955_vm9, %v10972_v50, 0  ;;  %v11132_v19 = vpop.permute.xlu0 %1194  ;;  %vm1144_vm9 = vcmask 171008   ;;  %vm1148_vm5 = vcmp.ne.s16.totalorder %v11117_v12, 0 }
  0xbe   : > { %v1145_v2 = vsel %vm1144_vm9, %v11111_v10, %v11117_v12  ;;  %vm14678_vm9 = vcmask 1031168  }
  0xbf   : > { %vm1147_vm10 = vcmp.ne.s16.totalorder %v1145_v2, 0 }
  0xc1   : > { %868 = vrot.lane.b32.xlu1 %v854_v16, %s10698_s24  ;;  %874 = vrot.lane.b32.xlu0 %v857_v17, %s10698_s24  ;;  %v11127_v16 = vpop.permute.xlu1 %1192  ;;  %v1010_v17 = vsel %vm1007_vm11, %v10977_v51, 0  ;;  %vm1146_vm11 = vcmp.ne.s16.totalorder %v11111_v10, 0 }
  0xc2   : > { %v1149_v15 = vsel %vm1146_vm11, %v10963_v46, 0 }
  0xc5   : > { %870 = vrot.lane.b32.xlu1 %v855_v20, %s10698_s24  ;;  %916 = vrot.lane.b32.xlu0 %v904_v21, %s14681_s25  ;;  %v1012_v20 = vsel %vm1006_vm12, %v10953_v43, 0  ;;  %v1008_v21 = vsel %vm1005_vm13, %v10963_v46, 0  ;;  %v11138_v30 = vpop.permute.xlu1 %1244  ;;  %vm1196_vm12 = vcmask 179200  }
  0xc9   : > { %920 = vrot.lane.b32.xlu1 %v906_v33, %s14681_s25  ;;  %565 = vrot.lane.b32.xlu0 %v552_v36, %s10694_s18  ;;  %v11142_v33 = vpop.permute.xlu0 %1246  ;;  %v1011_v36 = vsel %vm1005_vm13, %v10970_v49, 0 }
  0xcd   : > { %571 = vrot.lane.b32.xlu1 %v555_v41, %s10694_s18  ;;  %631 = vrot.lane.b32.xlu0 %v618_v42, %s10695_s20  ;;  %v11149_v41 = vpop.permute.xlu1 %1296 }
  0xd1   : > { %637 = vrot.lane.b32.xlu1 %v621_v47, %s10695_s20  ;;  %734 = vrot.lane.b32.xlu0 %v721_v48, %s10696_s21 }
  0xd5   : > { %740 = vrot.lane.b32.xlu1 %v724_v53, %s10696_s21  ;;  %800 = vrot.lane.b32.xlu0 %v787_v54, %s10697_s23  ;;  %s10703_s21 = smov 109   ;;  %v1093_v53 = vsel %vm1092_vm14, %v11102_v6, %v11105_v8  ;;  %v1150_v6 = vsel %vm1147_vm10, %v10956_v45, 0  ;;  %vm1200_vm14 = vcmp.ne.s16.totalorder %v11132_v19, 0 }
  0xd6   : > { %vm1095_vm2 = vcmp.ne.s16.totalorder %v1093_v53, 0  ;;  %v1152_v53 = vsel %vm1146_vm11, %v10970_v49, 0  ;;  %vm1250_vm11 = vcmp.ne.s16.totalorder %v11138_v30, 0 }
  0xd9   : > { %806 = vrot.lane.b32.xlu1 %v790_v56, %s10697_s23  ;;  %866 = vrot.lane.b32.xlu0 %v853_v57, %s10698_s24  ;;  %s10704_s23 = smov 36  }
  0xdd   : > { %872 = vrot.lane.b32.xlu1 %v856_v58, %s10698_s24  ;;  %918 = vrot.lane.b32.xlu0 %v905_v59, %s14681_s25  ;;  %v1099_v58 = vsel %vm1096_vm15, %v10977_v51, 0  ;;  %v1098_v59 = vsel %vm1095_vm2, %v10956_v45, 0  ;;  %s10705_s24 = smov 108  }
  0xe1   : > { %924 = vrot.lane.b32.xlu1 %v908_v62, %s14681_s25  ;;  %1298 = vrot.lane.b32.xlu0 %v10877_v23, %s10692_s15  ;;  %v1097_v62 = vsel %vm1094_vm3, %v10963_v46, 0  ;;  %s10707_s15 = smov 107  }
  0xe5   : > { %922 = vrot.lane.b32.xlu1 %v907_v0, %s14681_s25  ;;  %926 = vrot.lane.b32.xlu0 %v909_v1, %s14681_s25  ;;  %v1101_v1 = vsel %vm1095_vm2, %v10953_v43, 0  ;;  %vm14686_vm2 = vcmask 1039360   ;;  %s10731_s25 = smov 76  }
  0xe9   : > { %972 = vrot.lane.b32.xlu1 %v958_v4, %s14679_s29  ;;  %970 = vrot.lane.b32.xlu0 %v957_v5, %s14679_s29  ;;  %v1100_v5 = vsel %vm1094_vm3, %v10970_v49, 0  ;;  %vm1248_vm3 = vcmask 261120  }
  0xed   : > { %1348 = vrot.lane.b32.xlu1 %v10892_v27, %s14670_s30  ;;  %968 = vrot.lane.b32.xlu0 %v956_v7, %s14679_s29  ;;  %v1102_v7 = vsel %vm1096_vm15, %v10972_v50, 0  ;;  %vm1198_vm15 = vcmp.ne.s16.totalorder %v11127_v16, 0 }
  0xf1   : > { %976 = vrot.lane.b32.xlu1 %v960_v9, %s14679_s29  ;;  %1350 = vrot.lane.b32.xlu0 %v10888_v26, %s14670_s30  ;;  %s10721_s30 = smov 54  }
  0xf5   : > { %974 = vrot.lane.b32.xlu1 %v959_v13, %s14679_s29  ;;  %978 = vrot.lane.b32.xlu0 %v961_v14, %s14679_s29  ;;  %v1151_v13 = vsel %vm1148_vm5, %v10977_v51, 0  ;;  %s10732_s29 = smov 69  }
  0xf9   : > { %1024 = vrot.lane.b32.xlu1 %v1010_v17, %s14671_s17  ;;  %1022 = vrot.lane.b32.xlu0 %v1009_v18, %s14671_s17 }
  0xfd   : > { %1028 = vrot.lane.b32.xlu1 %v1012_v20, %s14671_s17  ;;  %1020 = vrot.lane.b32.xlu0 %v1008_v21, %s14671_s17  ;;  %v1153_v20 = vsel %vm1147_vm10, %v10953_v43, 0  ;;  %v1197_v21 = vsel %vm1196_vm12, %v11127_v16, %v11132_v19  ;;  %vm678_vm12 = vcmask 1022976  }
  0xfe   : > { %vm1199_vm13 = vcmp.ne.s16.totalorder %v1197_v21, 0 }
  0xff   : > { %v1202_v10 = vsel %vm1199_vm13, %v10956_v45, 0 }
 0x101   : > { %1026 = vrot.lane.b32.xlu1 %v1011_v36, %s14671_s17  ;;  %1030 = vrot.lane.b32.xlu0 %v1013_v40, %s14671_s17  ;;  %s10718_s17 = smov 92  }
 0x103   : > { %v11151_v42 = vpop.permute.xlu0 %666 }
 0x105   : > { %1061 = vrot.lane.b32.xlu1 %v10977_v51, %s10703_s21  ;;  %1059 = vrot.lane.b32.xlu0 %v10956_v45, %s10703_s21 }
 0x107   : > { %v11155_v44 = vpop.permute.xlu1 %670  ;;  %v11157_v47 = vpop.permute.xlu0 %676 }
 0x109   : > { %1437 = vrot.lane.b32.xlu1 %v10906_v31, %s10704_s23  ;;  %1057 = vrot.lane.b32.xlu0 %v10963_v46, %s10703_s21 }
 0x10b   : > { %v11161_v48 = vpop.permute.xlu1 %672  ;;  %v11163_v52 = vpop.permute.xlu0 %563 }
 0x10d   : > { %1065 = vrot.lane.b32.xlu1 %v10953_v43, %s10703_s21  ;;  %1439 = vrot.lane.b32.xlu0 %v10900_v29, %s10704_s23  ;;  %s10709_s23 = smov 106  }
 0x10f   : > { %v11169_v54 = vpop.permute.xlu1 %567  ;;  %v11171_v55 = vpop.permute.xlu0 %573 }
 0x111   : > { %1063 = vrot.lane.b32.xlu1 %v10970_v49, %s10703_s21  ;;  %1067 = vrot.lane.b32.xlu0 %v10972_v50, %s10703_s21  ;;  %s10708_s21 = smov 38  }
 0x113   : > { %v11176_v56 = vpop.permute.xlu1 %569  ;;  %v11178_v57 = vpop.permute.xlu0 %629 }
 0x115   : > { %1113 = vrot.lane.b32.xlu1 %v1099_v58, %s10705_s24  ;;  %1111 = vrot.lane.b32.xlu0 %v1098_v59, %s10705_s24  ;;  %v1154_v58 = vsel %vm1148_vm5, %v10972_v50, 0  ;;  %vm1252_vm5 = vcmp.ne.s16.totalorder %v11142_v33, 0 }
 0x117   : > { %v11186_v60 = vpop.permute.xlu1 %633  ;;  %v11188_v61 = vpop.permute.xlu0 %639 }
 0x119   : > { %1489 = vrot.lane.b32.xlu1 %v10913_v34, %s10706_s11  ;;  %1109 = vrot.lane.b32.xlu0 %v1097_v62, %s10705_s24 }
 0x11b   : > { %v11194_v63 = vpop.permute.xlu1 %635  ;;  %v11196_v0 = vpop.permute.xlu0 %668 }
 0x11d   : > { %1117 = vrot.lane.b32.xlu1 %v1101_v1, %s10705_s24  ;;  %1491 = vrot.lane.b32.xlu0 %v10909_v32, %s10706_s11  ;;  %v1203_v1 = vsel %vm1200_vm14, %v10977_v51, 0  ;;  %s10711_s11 = smov 96  }
 0x11f   : > { %v11203_v3 = vpop.permute.xlu1 %674  ;;  %v11205_v4 = vpop.permute.xlu0 %732 }
 0x121   : > { %1115 = vrot.lane.b32.xlu1 %v1100_v5, %s10705_s24  ;;  %1119 = vrot.lane.b32.xlu0 %v1102_v7, %s10705_s24  ;;  %v1201_v5 = vsel %vm1198_vm15, %v10963_v46, 0  ;;  %s10710_s24 = smov 48  }
 0x123   : > { %v11214_v9 = vpop.permute.xlu1 %736  ;;  %v11216_v11 = vpop.permute.xlu0 %742 }
 0x125   : > { %1165 = vrot.lane.b32.xlu1 %v1151_v13, %s10707_s15  ;;  %1163 = vrot.lane.b32.xlu0 %v1150_v6, %s10707_s15  ;;  %v1205_v6 = vsel %vm1199_vm13, %v10953_v43, 0  ;;  %vm744_vm13 = vcmask 1014784  }
 0x127   : > { %v11224_v8 = vpop.permute.xlu1 %738  ;;  %v11226_v14 = vpop.permute.xlu0 %798 }
 0x129   : > { %1541 = vrot.lane.b32.xlu1 %v10920_v37, %s10708_s21  ;;  %1161 = vrot.lane.b32.xlu0 %v1149_v15, %s10707_s15 }
 0x12b   : > { %v11232_v17 = vpop.permute.xlu1 %802  ;;  %v11234_v18 = vpop.permute.xlu0 %808 }
 0x12d   : > { %1169 = vrot.lane.b32.xlu1 %v1153_v20, %s10707_s15  ;;  %1543 = vrot.lane.b32.xlu0 %v10916_v35, %s10708_s21  ;;  %s14666_s21 = smov 95  }
 0x12f   : > { %v11241_v36 = vpop.permute.xlu1 %804  ;;  %v11243_v40 = vpop.permute.xlu0 %864 }
 0x131   : > { %1167 = vrot.lane.b32.xlu1 %v1152_v53, %s10707_s15  ;;  %1171 = vrot.lane.b32.xlu0 %v1154_v58, %s10707_s15  ;;  %v1249_v53 = vsel %vm1248_vm3, %v11138_v30, %v11142_v33  ;;  %s10712_s15 = smov 49  }
 0x132   : > { %vm1251_vm10 = vcmp.ne.s16.totalorder %v1249_v53, 0  ;;  %v1256_v53 = vsel %vm1250_vm11, %v10970_v49, 0 }
 0x133   : > { %v11252_v59 = vpop.permute.xlu1 %868  ;;  %v11254_v62 = vpop.permute.xlu0 %874 }
 0x135   : > { %1217 = vrot.lane.b32.xlu1 %v1203_v1, %s10709_s23  ;;  %1215 = vrot.lane.b32.xlu0 %v1202_v10, %s10709_s23 }
 0x137   : > { %v11264_v12 = vpop.permute.xlu1 %870  ;;  %v11266_v2 = vpop.permute.xlu0 %916 }
 0x139   : > { %1593 = vrot.lane.b32.xlu1 %v10926_v39, %s10710_s24  ;;  %1213 = vrot.lane.b32.xlu0 %v1201_v5, %s10709_s23 }
 0x13b   : > { %v11274_v7 = vpop.permute.xlu1 %920  ;;  %v566_v13 = vpop.permute.xlu0 %565 }
 0x13c   : > { %v577_v15 = vsel %vm14686_vm2, %v566_v13, %v11169_v54  ;;  %v576_v20 = vsel %vm14686_vm2, %v11163_v52, %v566_v13  ;;  %v1204_v54 = vsel %vm1198_vm15, %v10970_v49, 0  ;;  %v1206_v52 = vsel %vm1200_vm14, %v10972_v50, 0 }
 0x13d   : > { %1221 = vrot.lane.b32.xlu1 %v1205_v6, %s10709_s23  ;;  %1595 = vrot.lane.b32.xlu0 %v10923_v38, %s10710_s24  ;;  %vm1300_vm14 = vcmask 269312  }
 0x13e   : > { %3367 = vmatprep.subr.bf16.mxu0 %v577_v15 }
 0x13f   : > { %3368 = vmatpush1.bf16.msra.mxu0 %v576_v20  ;;  %v572_v58 = vpop.permute.xlu1 %571  ;;  %v632_v21 = vpop.permute.xlu0 %631  ;;  %v1253_v20 = vsel %vm1250_vm11, %v10963_v46, 0  ;;  %vm810_vm11 = vcmask 1006592  }
 0x140   : > { %v579_v1 = vsel %vm14686_vm2, %v572_v58, %v11171_v55  ;;  %v578_v10 = vsel %vm14686_vm2, %v11176_v56, %v572_v58  ;;  %v643_v19 = vsel %vm14678_vm9, %v632_v21, %v11186_v60  ;;  %v1255_v55 = vsel %vm1252_vm5, %v10977_v51, 0 }
 0x141   : > { %1219 = vrot.lane.b32.xlu1 %v1204_v54, %s10709_s23  ;;  %1223 = vrot.lane.b32.xlu0 %v1206_v52, %s10709_s23  ;;  %v1254_v56 = vsel %vm1251_vm10, %v10956_v45, 0  ;;  %v642_v13 = vsel %vm14678_vm9, %v11178_v57, %v632_v21  ;;  %v1257_v54 = vsel %vm1251_vm10, %v10953_v43, 0  ;;  %s10714_s23 = smov 50  }
 0x142   : > { %3369 = vmatprep.subr.bf16.mxu0 %v579_v1 }
 0x143   : > { %3370 = vmatpush1.bf16.msra.mxu0 %v578_v10  ;;  %v638_v16 = vpop.permute.xlu1 %637  ;;  %v735_v5 = vpop.permute.xlu0 %734  ;;  %v1258_v10 = vsel %vm1252_vm5, %v10972_v50, 0  ;;  %vm1302_vm5 = vcmp.ne.s16.totalorder %v11149_v41, 0 }
 0x144   : > { %3371 = vmatprep.subr.bf16.mxu0 %v643_v19  ;;  %v645_v6 = vsel %vm14678_vm9, %v638_v16, %v11188_v61  ;;  %v644_v57 = vsel %vm14678_vm9, %v11194_v63, %v638_v16  ;;  %v680_v61 = vsel %vm678_vm12, %v11196_v0, %v11155_v44  ;;  %v679_v63 = vsel %vm678_vm12, %v11151_v42, %v11196_v0 }
 0x145   : > { %1269 = vrot.lane.b32.xlu1 %v1255_v55, %s10711_s11  ;;  %1267 = vrot.lane.b32.xlu0 %v1254_v56, %s10711_s11  ;;  %v682_v44 = vsel %vm678_vm12, %v11203_v3, %v11157_v47  ;;  %v681_v42 = vsel %vm678_vm12, %v11161_v48, %v11203_v3  ;;  %v746_v30 = vsel %vm744_vm13, %v735_v5, %v11214_v9  ;;  %vm876_vm12 = vcmask 998400  }
 0x146   : > { %v745_v19 = vsel %vm744_vm13, %v11205_v4, %v735_v5 }
 0x147   : > { %3372 = vmatpush1.bf16.msra.mxu0 %v642_v13  ;;  %v741_v60 = vpop.permute.xlu1 %740  ;;  %v801_v15 = vpop.permute.xlu0 %800 }
 0x148   : > { %3373 = vmatprep.subr.bf16.mxu0 %v645_v6  ;;  %v748_v9 = vsel %vm744_vm13, %v741_v60, %v11216_v11  ;;  %v747_v4 = vsel %vm744_vm13, %v11224_v8, %v741_v60  ;;  %v812_v11 = vsel %vm810_vm11, %v801_v15, %v11232_v17  ;;  %v811_v13 = vsel %vm810_vm11, %v11226_v14, %v801_v15 }
 0x149   : > { %1645 = vrot.lane.b32.xlu1 %v10879_v24, %s10712_s15  ;;  %1265 = vrot.lane.b32.xlu0 %v1253_v20, %s10711_s11  ;;  %vm14673_vm13 = vcmask 277504  }
 0x14b   : > { %3374 = vmatpush1.bf16.msra.mxu0 %v644_v57  ;;  %v11322_v58 = vpop.permute.xlu1 %806  ;;  %v11327_v21 = vpop.permute.xlu0 %866  ;;  %v11416_v57 = vld [vmem:[#allocation2 + $0x8] sm:$0xff] }
 0x14c   : > { %3375 = vmatprep.subr.bf16.mxu0 %v680_v61  ;;  %v814_v60 = vsel %vm810_vm11, %v11322_v58, %v11234_v18  ;;  %v813_v14 = vsel %vm810_vm11, %v11241_v36, %v11322_v58  ;;  %v878_v15 = vsel %vm876_vm12, %v11327_v21, %v11252_v59  ;;  %vm14674_vm11 = vcmask 908288  }
 0x14d   : > { %1273 = vrot.lane.b32.xlu1 %v1257_v54, %s10711_s11  ;;  %1647 = vrot.lane.b32.xlu0 %v10877_v23, %s10712_s15  ;;  %s14668_s15 = smov 94   ;;  %v11428_v54 = vld [vmem:[#allocation2 + $0x20] sm:$0xff] }
 0x14f   : > { %3376 = vmatpush1.bf16.msra.mxu0 %v679_v63  ;;  %v11336_v52 = vpop.permute.xlu1 %872  ;;  %v11341_v1 = vpop.permute.xlu0 %918 }
 0x150   : > { %3377 = vmatprep.subr.bf16.mxu0 %v682_v44  ;;  %v880_v61 = vsel %vm876_vm12, %v11336_v52, %v11254_v62  ;;  %v879_v63 = vsel %vm876_vm12, %v11264_v12, %v11336_v52 }
 0x151   : > { %1271 = vrot.lane.b32.xlu1 %v1256_v53, %s10711_s11  ;;  %1275 = vrot.lane.b32.xlu0 %v1258_v10, %s10711_s11 }
 0x153   : > { %3378 = vmatpush1.bf16.msra.mxu0 %v681_v42  ;;  %v11354_v47 = vpop.permute.xlu1 %924  ;;  %v1299_v0 = vpop.permute.xlu0 %1298 }
 0x154   : > { %3379 = vmatprep.subr.bf16.mxu0 %v746_v30  ;;  %v1301_v33 = vsel %vm1300_vm14, %v11149_v41, %v1299_v0  ;;  %vm1304_vm15 = vcmp.ne.s16.totalorder %v1299_v0, 0  ;;  %v11446_v30 = vld [vmem:[#allocation2 + $0x28] sm:$0xff] }
 0x155   : > { %vm1303_vm10 = vcmp.ne.s16.totalorder %v1301_v33, 0  ;;  %v1307_v16 = vsel %vm1304_vm15, %v10977_v51, 0  ;;  %v1310_v18 = vsel %vm1304_vm15, %v10972_v50, 0  ;;  %v877_v50 = vsel %vm876_vm12, %v11243_v40, %v11327_v21  ;;  %v11432_v21 = vld [vmem:[#allocation2] sm:$0xff]  ;;  %v11458_v33 = vld [vmem:[#allocation2 + $0x10] sm:$0xff] }
 0x156   : > { %1321 = vrot.lane.b32.xlu1 %v1307_v16, %s14666_s21  ;;  %v1306_v48 = vsel %vm1303_vm10, %v10956_v45, 0  ;;  %v1305_v45 = vsel %vm1302_vm5, %v10963_v46, 0  ;;  %v1309_v8 = vsel %vm1303_vm10, %v10953_v43, 0  ;;  %v1308_v43 = vsel %vm1302_vm5, %v10970_v49, 0 }
 0x157   : > { %3380 = vmatpush1.bf16.msra.mxu0 %v745_v19  ;;  %v11367_v3 = vpop.permute.xlu1 %922  ;;  %1319 = vrot.lane.b32.xlu0 %v1306_v48, %s14666_s21  ;;  %v11372_v55 = vpop.permute.xlu0 %926  ;;  %vm14677_vm5 = vcmask 916480   ;;  %vm14676_vm12 = vcmask 900096  }
 0x158   : > { %3381 = vmatprep.subr.bf16.mxu0 %v748_v9  ;;  %v930_v53 = vsel %vm14677_vm5, %v11341_v1, %v11274_v7  ;;  %v929_v12 = vsel %vm14677_vm5, %v11266_v2, %v11341_v1  ;;  %v932_v0 = vsel %vm14677_vm5, %v11354_v47, %v11372_v55  ;;  %v931_v2 = vsel %vm14677_vm5, %v11367_v3, %v11354_v47  ;;  %v10454_v1 = vld [vmem:[%s14656_s2] ss:$52 sps:$4 sm:$0xff]  }
 0x159   : > { %v10457_v47 = vld [vmem:[%s14656_s2 + $0x6c] ss:$52 sps:$4 sm:$0xff]  }
 0x15a   : > { %1697 = vrot.lane.b32.xlu1 %v10892_v27, %s10714_s23 }
 0x15b   : > { %3382 = vmatpush1.bf16.msra.mxu0 %v747_v4  ;;  %v11380_v5 = vpop.permute.xlu1 %972  ;;  %1317 = vrot.lane.b32.xlu0 %v1305_v45, %s14666_s21  ;;  %v11385_v56 = vpop.permute.xlu0 %970 }
 0x15c   : > { %3383 = vmatprep.subr.bf16.mxu0 %v812_v11  ;;  %v982_v19 = vsel %vm14674_vm11, %v11385_v56, %v11380_v5  ;;  %v10459_v5 = vld [vmem:[%s14656_s2 + $0x68] ss:$52 sps:$4 sm:$0xff]  }
 0x15e   : > { %1325 = vrot.lane.b32.xlu1 %v1309_v8, %s14666_s21 }
 0x15f   : > { %3384 = vmatpush1.bf16.msra.mxu0 %v811_v13  ;;  %v1349_v46 = vpop.permute.xlu1 %1348  ;;  %1699 = vrot.lane.b32.xlu0 %v10888_v26, %s10714_s23  ;;  %v11396_v17 = vpop.permute.xlu0 %968  ;;  %s10716_s23 = smov 93   ;;  %v10462_v13 = vld [vmem:[%s14656_s2 + $0xc] ss:$52 sps:$4 sm:$0xff]  }
 0x160   : > { %3385 = vmatprep.subr.bf16.mxu0 %v814_v60  ;;  %vm1354_vm15 = vcmp.ne.s16.totalorder %v1349_v46, 0  ;;  %v981_v3 = vsel %vm14674_vm11, %v11396_v17, %v11385_v56 }
 0x161   : > { %v1357_v62 = vsel %vm1354_vm15, %v11432_v21, 0  ;;  %v1360_v42 = vsel %vm1354_vm15, %v10970_v49, 0 }
 0x162   : > { %1323 = vrot.lane.b32.xlu1 %v1308_v43, %s14666_s21 }
 0x163   : > { %3386 = vmatpush1.bf16.msra.mxu0 %v813_v14  ;;  %v11407_v6 = vpop.permute.xlu1 %976  ;;  %1327 = vrot.lane.b32.xlu0 %v1310_v18, %s14666_s21  ;;  %v1351_v41 = vpop.permute.xlu0 %1350  ;;  %s10722_s21 = smov 90  }
 0x164   : > { %3387 = vmatprep.subr.bf16.mxu0 %v878_v15  ;;  %v1353_v20 = vsel %vm14673_vm13, %v1349_v46, %v1351_v41  ;;  %vm1356_vm14 = vcmp.ne.s16.totalorder %v1351_v41, 0  ;;  %v11496_v46 = vld [vmem:[#allocation2 + $0x18] sm:$0xff] }
 0x165   : > { %vm1355_vm10 = vcmp.ne.s16.totalorder %v1353_v20, 0  ;;  %v1359_v36 = vsel %vm1356_vm14, %v10977_v51, 0  ;;  %v1362_v52 = vsel %vm1356_vm14, %v11446_v30, 0  ;;  %vm14675_vm14 = vcmask 293888  }
 0x166   : > { %1373 = vrot.lane.b32.xlu1 %v1359_v36, %s14668_s15  ;;  %v1358_v59 = vsel %vm1355_vm10, %v11416_v57, 0  ;;  %v1361_v40 = vsel %vm1355_vm10, %v11428_v54, 0  ;;  %vm1069_vm10 = vcmask 891904  }
 0x167   : > { %3388 = vmatpush1.bf16.msra.mxu0 %v877_v50  ;;  %v975_v58 = vpop.permute.xlu1 %974  ;;  %1371 = vrot.lane.b32.xlu0 %v1358_v59, %s14668_s15  ;;  %v979_v51 = vpop.permute.xlu0 %978 }
 0x168   : > { %3389 = vmatprep.subr.bf16.mxu0 %v880_v61  ;;  %v984_v55 = vsel %vm14674_vm11, %v11407_v6, %v979_v51  ;;  %v983_v45 = vsel %vm14674_vm11, %v975_v58, %v11407_v6 }
 0x16a   : > { %1377 = vrot.lane.b32.xlu1 %v1361_v40, %s14668_s15 }
 0x16b   : > { %3390 = vmatpush1.bf16.msra.mxu0 %v879_v63  ;;  %v1025_v44 = vpop.permute.xlu1 %1024  ;;  %1369 = vrot.lane.b32.xlu0 %v1357_v62, %s14668_s15  ;;  %v1023_v10 = vpop.permute.xlu0 %1022 }
 0x16c   : > { %3391 = vmatprep.subr.bf16.mxu0 %v930_v53  ;;  %v1034_v56 = vsel %vm14676_vm12, %v1023_v10, %v1025_v44 }
 0x16e   : > { %1375 = vrot.lane.b32.xlu1 %v1360_v42, %s14668_s15 }
 0x16f   : > { %3392 = vmatpush1.bf16.msra.mxu0 %v929_v12  ;;  %v1029_v7 = vpop.permute.xlu1 %1028  ;;  %1379 = vrot.lane.b32.xlu0 %v1362_v52, %s14668_s15  ;;  %v1021_v49 = vpop.permute.xlu0 %1020  ;;  %s10723_s15 = smov 64  }
 0x170   : > { %3393 = vmatprep.subr.bf16.mxu0 %v932_v0  ;;  %v1033_v60 = vsel %vm14676_vm12, %v1021_v49, %v1023_v10 }
 0x172   : > { %1410 = vrot.lane.b32.xlu1 %v11458_v33, %s10716_s23 }
 0x173   : > { %3394 = vmatpush1.bf16.msra.mxu0 %v931_v2  ;;  %v1027_v16 = vpop.permute.xlu1 %1026  ;;  %1408 = vrot.lane.b32.xlu0 %v11416_v57, %s10716_s23  ;;  %v1031_v48 = vpop.permute.xlu0 %1030 }
 0x174   : > { %3416 = vmatprep.subr.bf16.mxu0 %v982_v19  ;;  %v1036_v43 = vsel %vm14676_vm12, %v1029_v7, %v1031_v48  ;;  %v1035_v15 = vsel %vm14676_vm12, %v1027_v16, %v1029_v7  ;;  %vm1493_vm12 = vcmask 302080  }
 0x176   : > { %3396 = vmatmul.mubr.bf16.vlgmr.msra.gmra.mrb[0].mxu0 %v10454_v1  ;;  %1786 = vrot.lane.b32.xlu1 %v10906_v31, %s10717_s16 }
 0x177   : > { %3417 = vmatpush1.bf16.msra.mxu0 %v981_v3  ;;  %v1062_v9 = vpop.permute.xlu1 %1061  ;;  %1406 = vrot.lane.b32.xlu0 %v11432_v21, %s10716_s23  ;;  %v1060_v4 = vpop.permute.xlu0 %1059 }
 0x178   : > { %3418 = vmatprep.subr.bf16.mxu0 %v984_v55  ;;  %3405 = vmatprep.mubr.bf16.mxu0 %v10457_v47  ;;  %v1071_v36 = vsel %vm1069_vm10, %v1060_v4, %v1062_v9 }
 0x17a   : > { %1414 = vrot.lane.b32.xlu1 %v11428_v54, %s10716_s23 }
 0x17b   : > { %3419 = vmatpush1.bf16.msra.mxu0 %v983_v45  ;;  %v1438_v11 = vpop.permute.xlu1 %1437  ;;  %1788 = vrot.lane.b32.xlu0 %v10900_v29, %s10717_s16  ;;  %v1058_v8 = vpop.permute.xlu0 %1057  ;;  %s10720_s16 = smov 91  }
 0x17c   : > { %3420 = vmatprep.subr.bf16.mxu0 %v1034_v56  ;;  %vm1443_vm11 = vcmp.ne.s16.totalorder %v1438_v11, 0  ;;  %v1070_v59 = vsel %vm1069_vm10, %v1058_v8, %v1060_v4 }
 0x17d   : > { %v1446_v58 = vsel %vm1443_vm11, %v11432_v21, 0  ;;  %v1449_v12 = vsel %vm1443_vm11, %v11496_v46, 0 }
 0x17e   : > { %1412 = vrot.lane.b32.xlu1 %v11496_v46, %s10716_s23  ;;  %3406 = vmatmul.mubr.bf16.gmra.mrb[4].mxu0 %v10459_v5 }
 0x17f   : > { %3421 = vmatpush1.bf16.msra.mxu0 %v1033_v60  ;;  %v1066_v17 = vpop.permute.xlu1 %1065  ;;  %1416 = vrot.lane.b32.xlu0 %v11446_v30, %s10716_s23  ;;  %v1440_v14 = vpop.permute.xlu0 %1439  ;;  %s10719_s23 = smov 53  }
 0x180   : > { %3422 = vmatprep.subr.bf16.mxu0 %v1036_v43  ;;  %v1442_v18 = vsel %vm14675_vm14, %v1438_v11, %v1440_v14  ;;  %vm1445_vm15 = vcmp.ne.s16.totalorder %v1440_v14, 0  ;;  %3448 = vmatprep.mubr.bf16.mxu0 %v10462_v13  ;;  %vm1121_vm14 = vcmask 883712  }
 0x181   : > { %vm1444_vm13 = vcmp.ne.s16.totalorder %v1442_v18, 0  ;;  %v1448_v6 = vsel %vm1445_vm15, %v11458_v33, 0  ;;  %v1451_v52 = vsel %vm1445_vm15, %v11446_v30, 0 }
 0x182   : > { %1462 = vrot.lane.b32.xlu1 %v1448_v6, %s10718_s17  ;;  %v1447_v41 = vsel %vm1444_vm13, %v11416_v57, 0  ;;  %v1450_v63 = vsel %vm1444_vm13, %v11428_v54, 0 }
 0x183   : > { %3423 = vmatpush1.bf16.msra.mxu0 %v1035_v15  ;;  %v1064_v20 = vpop.permute.xlu1 %1063  ;;  %1460 = vrot.lane.b32.xlu0 %v1447_v41, %s10718_s17  ;;  %v1068_v50 = vpop.permute.xlu0 %1067 }
 0x184   : > { %3424 = vmatprep.subr.bf16.mxu0 %v1071_v36  ;;  %v1073_v51 = vsel %vm1069_vm10, %v1066_v17, %v1068_v50  ;;  %v1072_v62 = vsel %vm1069_vm10, %v1064_v20, %v1066_v17 }
 0x186   : > { %1838 = vrot.lane.b32.xlu1 %v10913_v34, %s10719_s23 }
 0x187   : > { %3425 = vmatpush1.bf16.msra.mxu0 %v1070_v59  ;;  %v1114_v61 = vpop.permute.xlu1 %1113  ;;  %1458 = vrot.lane.b32.xlu0 %v1446_v58, %s10718_s17  ;;  %v1112_v40 = vpop.permute.xlu0 %1111 }
 0x188   : > { %3426 = vmatprep.subr.bf16.mxu0 %v1073_v51  ;;  %v1123_v53 = vsel %vm1121_vm14, %v1112_v40, %v1114_v61 }
 0x18a   : > { %1466 = vrot.lane.b32.xlu1 %v1450_v63, %s10718_s17 }
 0x18b   : > { %3427 = vmatpush1.bf16.msra.mxu0 %v1072_v62  ;;  %v1490_v44 = vpop.permute.xlu1 %1489  ;;  %1840 = vrot.lane.b32.xlu0 %v10909_v32, %s10719_s23  ;;  %v1110_v10 = vpop.permute.xlu0 %1109  ;;  %s10725_s23 = smov 65  }
 0x18c   : > { %3428 = vmatprep.subr.bf16.mxu0 %v1123_v53  ;;  %v1122_v42 = vsel %vm1121_vm14, %v1110_v10, %v1112_v40  ;;  %vm1495_vm11 = vcmp.ne.s16.totalorder %v1490_v44, 0 }
 0x18d   : > { %v1498_v3 = vsel %vm1495_vm11, %v11432_v21, 0  ;;  %v1501_v8 = vsel %vm1495_vm11, %v11496_v46, 0 }
 0x18e   : > { %1464 = vrot.lane.b32.xlu1 %v1449_v12, %s10718_s17 }
 0x18f   : > { %3429 = vmatpush1.bf16.msra.mxu0 %v1122_v42  ;;  %v1118_v7 = vpop.permute.xlu1 %1117  ;;  %1468 = vrot.lane.b32.xlu0 %v1451_v52, %s10718_s17  ;;  %v1492_v0 = vpop.permute.xlu0 %1491  ;;  %s10724_s17 = smov 80  }
 0x190   : > { %v1494_v49 = vsel %vm1493_vm12, %v1490_v44, %v1492_v0  ;;  %vm1497_vm13 = vcmp.ne.s16.totalorder %v1492_v0, 0  ;;  %vm1173_vm12 = vcmask 875520  }
 0x191   : > { %vm1496_vm10 = vcmp.ne.s16.totalorder %v1494_v49, 0  ;;  %v1500_v2 = vsel %vm1497_vm13, %v11458_v33, 0  ;;  %v1503_v13 = vsel %vm1497_vm13, %v11446_v30, 0  ;;  %vm1225_vm13 = vcmask 867328  }
 0x192   : > { %1514 = vrot.lane.b32.xlu1 %v1500_v2, %s10720_s16  ;;  %v1499_v1 = vsel %vm1496_vm10, %v11416_v57, 0  ;;  %v1502_v45 = vsel %vm1496_vm10, %v11428_v54, 0 }
 0x193   : > { %v1116_v16 = vpop.permute.xlu1 %1115  ;;  %1512 = vrot.lane.b32.xlu0 %v1499_v1, %s10720_s16  ;;  %v1120_v19 = vpop.permute.xlu0 %1119 }
 0x194   : > { %v1124_v48 = vsel %vm1121_vm14, %v1116_v16, %v1118_v7  ;;  %v1125_v47 = vsel %vm1121_vm14, %v1118_v7, %v1120_v19  ;;  %vm1545_vm14 = vcmask 310272  }
 0x195   : > { %3430 = vmatprep.subr.bf16.mxu0 %v1125_v47 }
 0x196   : > { %1890 = vrot.lane.b32.xlu1 %v10920_v37, %s10721_s30  ;;  %3431 = vmatpush1.bf16.msra.mxu0 %v1124_v48 }
 0x197   : > { %v1166_v9 = vpop.permute.xlu1 %1165  ;;  %1510 = vrot.lane.b32.xlu0 %v1498_v3, %s10720_s16  ;;  %v1164_v55 = vpop.permute.xlu0 %1163 }
 0x198   : > { %v1175_v4 = vsel %vm1173_vm12, %v1164_v55, %v1166_v9 }
 0x199   : > { %3432 = vmatprep.subr.bf16.mxu0 %v1175_v4 }
 0x19a   : > { %1518 = vrot.lane.b32.xlu1 %v1502_v45, %s10720_s16 }
 0x19b   : > { %v1542_v5 = vpop.permute.xlu1 %1541  ;;  %1892 = vrot.lane.b32.xlu0 %v10916_v35, %s10721_s30  ;;  %v1162_v11 = vpop.permute.xlu0 %1161  ;;  %s10727_s30 = smov 66  }
 0x19c   : > { %v1174_v56 = vsel %vm1173_vm12, %v1162_v11, %v1164_v55  ;;  %vm1547_vm11 = vcmp.ne.s16.totalorder %v1542_v5, 0 }
 0x19d   : > { %3433 = vmatpush1.bf16.msra.mxu0 %v1174_v56  ;;  %v1550_v36 = vsel %vm1547_vm11, %v11432_v21, 0  ;;  %v1553_v62 = vsel %vm1547_vm11, %v11496_v46, 0 }
 0x19e   : > { %1516 = vrot.lane.b32.xlu1 %v1501_v8, %s10720_s16 }
 0x19f   : > { %v1170_v60 = vpop.permute.xlu1 %1169  ;;  %1520 = vrot.lane.b32.xlu0 %v1503_v13, %s10720_s16  ;;  %v1544_v17 = vpop.permute.xlu0 %1543  ;;  %s10726_s16 = smov 79  }
 0x1a0   : > { %v1546_v43 = vsel %vm1545_vm14, %v1542_v5, %v1544_v17  ;;  %vm1549_vm15 = vcmp.ne.s16.totalorder %v1544_v17, 0 }
 0x1a1   : > { %vm1548_vm10 = vcmp.ne.s16.totalorder %v1546_v43, 0  ;;  %v1552_v14 = vsel %vm1549_vm15, %v11458_v33, 0  ;;  %v1555_v44 = vsel %vm1549_vm15, %v11446_v30, 0  ;;  %vm14712_vm15 = vcmask 785408  }
 0x1a2   : > { %1566 = vrot.lane.b32.xlu1 %v1552_v14, %s10722_s21  ;;  %v1551_v18 = vsel %vm1548_vm10, %v11416_v57, 0  ;;  %v1554_v61 = vsel %vm1548_vm10, %v11428_v54, 0 }
 0x1a3   : > { %v1168_v6 = vpop.permute.xlu1 %1167  ;;  %1564 = vrot.lane.b32.xlu0 %v1551_v18, %s10722_s21  ;;  %v1172_v15 = vpop.permute.xlu0 %1171 }
 0x1a4   : > { %v1176_v41 = vsel %vm1173_vm12, %v1168_v6, %v1170_v60  ;;  %v1177_v20 = vsel %vm1173_vm12, %v1170_v60, %v1172_v15  ;;  %vm1597_vm12 = vcmask 392192  }
 0x1a5   : > { %3434 = vmatprep.subr.bf16.mxu0 %v1177_v20 }
 0x1a6   : > { %1942 = vrot.lane.b32.xlu1 %v10926_v39, %s10723_s15  ;;  %3435 = vmatpush1.bf16.msra.mxu0 %v1176_v41 }
 0x1a7   : > { %v1218_v50 = vpop.permute.xlu1 %1217  ;;  %1562 = vrot.lane.b32.xlu0 %v1550_v36, %s10722_s21  ;;  %v1216_v59 = vpop.permute.xlu0 %1215 }
 0x1a8   : > { %v1227_v58 = vsel %vm1225_vm13, %v1216_v59, %v1218_v50 }
 0x1a9   : > { %3436 = vmatprep.subr.bf16.mxu0 %v1227_v58 }
 0x1aa   : > { %1570 = vrot.lane.b32.xlu1 %v1554_v61, %s10722_s21 }
 0x1ab   : > { %v1594_v51 = vpop.permute.xlu1 %1593  ;;  %1944 = vrot.lane.b32.xlu0 %v10923_v38, %s10723_s15  ;;  %v1214_v40 = vpop.permute.xlu0 %1213 }
 0x1ac   : > { %v1226_v63 = vsel %vm1225_vm13, %v1214_v40, %v1216_v59  ;;  %vm1599_vm11 = vcmp.ne.s16.totalorder %v1594_v51, 0 }
 0x1ad   : > { %3437 = vmatpush1.bf16.msra.mxu0 %v1226_v63  ;;  %v1602_v1 = vsel %vm1599_vm11, %v11432_v21, 0  ;;  %v1605_v4 = vsel %vm1599_vm11, %v11496_v46, 0 }
 0x1ae   : > { %1568 = vrot.lane.b32.xlu1 %v1553_v62, %s10722_s21 }
 0x1af   : > { %v1222_v53 = vpop.permute.xlu1 %1221  ;;  %1572 = vrot.lane.b32.xlu0 %v1555_v44, %s10722_s21  ;;  %v1596_v10 = vpop.permute.xlu0 %1595  ;;  %s10728_s21 = smov 78  }
 0x1b0   : > { %v1598_v42 = vsel %vm1597_vm12, %v1594_v51, %v1596_v10  ;;  %vm1601_vm14 = vcmp.ne.s16.totalorder %v1596_v10, 0 }
 0x1b1   : > { %vm1600_vm10 = vcmp.ne.s16.totalorder %v1598_v42, 0  ;;  %v1604_v12 = vsel %vm1601_vm14, %v11458_v33, 0  ;;  %v1607_v45 = vsel %vm1601_vm14, %v11446_v30, 0  ;;  %vm14684_vm14 = vcmask 777216  }
 0x1b2   : > { %1618 = vrot.lane.b32.xlu1 %v1604_v12, %s10724_s17  ;;  %v1603_v52 = vsel %vm1600_vm10, %v11416_v57, 0  ;;  %v1606_v47 = vsel %vm1600_vm10, %v11428_v54, 0 }
 0x1b3   : > { %v1220_v7 = vpop.permute.xlu1 %1219  ;;  %1616 = vrot.lane.b32.xlu0 %v1603_v52, %s10724_s17  ;;  %v1224_v0 = vpop.permute.xlu0 %1223 }
 0x1b4   : > { %v1228_v49 = vsel %vm1225_vm13, %v1220_v7, %v1222_v53  ;;  %v1229_v2 = vsel %vm1225_vm13, %v1222_v53, %v1224_v0  ;;  %vm1649_vm13 = vcmask 400384   ;;  %v10460_v7 = vld [vmem:[%s14656_s2 + $0x8] ss:$52 sps:$4 sm:$0xff]  }
 0x1b5   : > { %3438 = vmatprep.subr.bf16.mxu0 %v1229_v2  ;;  %v10463_v2 = vld [vmem:[%s14656_s2 + $0x74] ss:$52 sps:$4 sm:$0xff]  }
 0x1b6   : > { %1993 = vrot.lane.b32.xlu1 %v10879_v24, %s10725_s23  ;;  %3439 = vmatpush1.bf16.msra.mxu0 %v1228_v49 }
 0x1b7   : > { %v1270_v16 = vpop.permute.xlu1 %1269  ;;  %1614 = vrot.lane.b32.xlu0 %v1602_v1, %s10724_s17  ;;  %v1268_v19 = vpop.permute.xlu0 %1267 }
 0x1b8   : > { %v1279_v48 = vsel %vm14712_vm15, %v1268_v19, %v1270_v16 }
 0x1b9   : > { %3440 = vmatprep.subr.bf16.mxu0 %v1279_v48 }
 0x1ba   : > { %1622 = vrot.lane.b32.xlu1 %v1606_v47, %s10724_s17 }
 0x1bb   : > { %v1646_v3 = vpop.permute.xlu1 %1645  ;;  %1995 = vrot.lane.b32.xlu0 %v10877_v23, %s10725_s23  ;;  %v1266_v9 = vpop.permute.xlu0 %1265  ;;  %s10733_s23 = smov 75  }
 0x1bc   : > { %v1278_v55 = vsel %vm14712_vm15, %v1266_v9, %v1268_v19  ;;  %vm1651_vm11 = vcmp.ne.s16.totalorder %v1646_v3, 0 }
 0x1bd   : > { %3441 = vmatpush1.bf16.msra.mxu0 %v1278_v55  ;;  %v1654_v18 = vsel %vm1651_vm11, %v11432_v21, 0  ;;  %v1657_v59 = vsel %vm1651_vm11, %v11496_v46, 0  ;;  %v10465_v55 = vld [vmem:[%s14656_s2 + $0x70] ss:$52 sps:$4 sm:$0xff]  }
 0x1be   : > { %1620 = vrot.lane.b32.xlu1 %v1605_v4, %s10724_s17 }
 0x1bf   : > { %v1274_v5 = vpop.permute.xlu1 %1273  ;;  %1624 = vrot.lane.b32.xlu0 %v1607_v45, %s10724_s17  ;;  %v1648_v11 = vpop.permute.xlu0 %1647 }
 0x1c0   : > { %v1650_v56 = vsel %vm1649_vm13, %v1646_v3, %v1648_v11  ;;  %vm1653_vm10 = vcmp.ne.s16.totalorder %v1648_v11, 0 }
 0x1c1   : > { %vm1652_vm5 = vcmp.ne.s16.totalorder %v1650_v56, 0  ;;  %v1656_v8 = vsel %vm1653_vm10, %v11458_v33, 0  ;;  %v1659_v61 = vsel %vm1653_vm10, %v11446_v30, 0  ;;  %vm14683_vm10 = vcmask 769024  }
 0x1c2   : > { %1670 = vrot.lane.b32.xlu1 %v1656_v8, %s10726_s16  ;;  %v1655_v13 = vsel %vm1652_vm5, %v11416_v57, 0  ;;  %v1658_v41 = vsel %vm1652_vm5, %v11428_v54, 0  ;;  %vm1701_vm5 = vcmask 408576  }
 0x1c3   : > { %v1272_v60 = vpop.permute.xlu1 %1271  ;;  %1668 = vrot.lane.b32.xlu0 %v1655_v13, %s10726_s16  ;;  %v1276_v17 = vpop.permute.xlu0 %1275 }
 0x1c4   : > { %v1280_v43 = vsel %vm14712_vm15, %v1272_v60, %v1274_v5  ;;  %v1281_v14 = vsel %vm14712_vm15, %v1274_v5, %v1276_v17  ;;  %v10468_v5 = vld [vmem:[%s14656_s2 + $0x14] ss:$52 sps:$4 sm:$0xff]  }
 0x1c5   : > { %3442 = vmatprep.subr.bf16.mxu0 %v1281_v14 }
 0x1c6   : > { %2045 = vrot.lane.b32.xlu1 %v10892_v27, %s10727_s30  ;;  %3443 = vmatpush1.bf16.msra.mxu0 %v1280_v43 }
 0x1c7   : > { %1666 = vrot.lane.b32.xlu0 %v1654_v18, %s10726_s16 }
 0x1c8   : > { %v1322_v6 = vpop.permute.xlu1 %1321 }
 0x1c9   : > { %v1320_v15 = vpop.permute.xlu0 %1319 }
 0x1ca   : > { %1674 = vrot.lane.b32.xlu1 %v1658_v41, %s10726_s16  ;;  %v1331_v20 = vsel %vm14684_vm14, %v1320_v15, %v1322_v6 }
 0x1cb   : > { %2047 = vrot.lane.b32.xlu0 %v10888_v26, %s10727_s30  ;;  %3444 = vmatprep.subr.bf16.mxu0 %v1331_v20  ;;  %s10735_s30 = smov 74  }
 0x1cc   : > { %v1698_v36 = vpop.permute.xlu1 %1697 }
 0x1cd   : > { %v1318_v50 = vpop.permute.xlu0 %1317  ;;  %vm1703_vm11 = vcmp.ne.s16.totalorder %v1698_v36, 0 }
 0x1ce   : > { %v1330_v58 = vsel %vm14684_vm14, %v1318_v50, %v1320_v15  ;;  %1672 = vrot.lane.b32.xlu1 %v1657_v59, %s10726_s16  ;;  %v1706_v49 = vsel %vm1703_vm11, %v11432_v21, 0  ;;  %v1709_v19 = vsel %vm1703_vm11, %v11496_v46, 0 }
 0x1cf   : > { %1676 = vrot.lane.b32.xlu0 %v1659_v61, %s10726_s16  ;;  %3445 = vmatpush1.bf16.msra.mxu0 %v1330_v58  ;;  %s10729_s16 = smov 77  }
 0x1d0   : > { %v1326_v51 = vpop.permute.xlu1 %1325 }
 0x1d1   : > { %v1700_v40 = vpop.permute.xlu0 %1699 }
 0x1d2   : > { %v1702_v63 = vsel %vm1701_vm5, %v1698_v36, %v1700_v40  ;;  %vm1705_vm13 = vcmp.ne.s16.totalorder %v1700_v40, 0  ;;  %vm1790_vm5 = vcmask 424960  }
 0x1d3   : > { %vm1704_vm9 = vcmp.ne.s16.totalorder %v1702_v63, 0  ;;  %v1708_v62 = vsel %vm1705_vm13, %v11458_v33, 0  ;;  %v1711_v47 = vsel %vm1705_vm13, %v11446_v30, 0 }
 0x1d4   : > { %v1324_v44 = vpop.permute.xlu1 %1323  ;;  %1722 = vrot.lane.b32.xlu1 %v1708_v62, %s10728_s21  ;;  %v1707_v53 = vsel %vm1704_vm9, %v11416_v57, 0  ;;  %v1710_v52 = vsel %vm1704_vm9, %v11428_v54, 0  ;;  %vm1418_vm9 = vcmask 760832  }
 0x1d5   : > { %1720 = vrot.lane.b32.xlu0 %v1707_v53, %s10728_s21  ;;  %v1328_v10 = vpop.permute.xlu0 %1327  ;;  %v1332_v12 = vsel %vm14684_vm14, %v1324_v44, %v1326_v51 }
 0x1d6   : > { %v1333_v42 = vsel %vm14684_vm14, %v1326_v51, %v1328_v10 }
 0x1d7   : > { %3446 = vmatprep.subr.bf16.mxu0 %v1333_v42 }
 0x1d8   : > { %v1374_v0 = vpop.permute.xlu1 %1373  ;;  %1726 = vrot.lane.b32.xlu1 %v1710_v52, %s10728_s21  ;;  %3447 = vmatpush1.bf16.msra.mxu0 %v1332_v12 }
 0x1d9   : > { %1718 = vrot.lane.b32.xlu0 %v1706_v49, %s10728_s21  ;;  %v1372_v1 = vpop.permute.xlu0 %1371 }
 0x1da   : > { %v1383_v16 = vsel %vm14683_vm10, %v1372_v1, %v1374_v0 }
 0x1db   : > { %3469 = vmatprep.subr.bf16.mxu0 %v1383_v16  ;;  %3449 = vmatmul.mubr.bf16.vlgmr.msra.gmra.mrb[0].mxu0 %v10460_v7 }
 0x1dc   : > { %v1378_v48 = vpop.permute.xlu1 %1377  ;;  %1724 = vrot.lane.b32.xlu1 %v1709_v19, %s10728_s21  ;;  %3458 = vmatprep.mubr.bf16.mxu0 %v10463_v2 }
 0x1dd   : > { %1728 = vrot.lane.b32.xlu0 %v1711_v47, %s10728_s21  ;;  %v1370_v3 = vpop.permute.xlu0 %1369  ;;  %s10730_s21 = smov 68  }
 0x1de   : > { %v1382_v9 = vsel %vm14683_vm10, %v1370_v3, %v1372_v1 }
 0x1df   : > { %3470 = vmatpush1.bf16.msra.mxu0 %v1382_v9 }
 0x1e0   : > { %v1376_v4 = vpop.permute.xlu1 %1375  ;;  %1759 = vrot.lane.b32.xlu1 %v11458_v33, %s10729_s16 }
 0x1e1   : > { %1757 = vrot.lane.b32.xlu0 %v11416_v57, %s10729_s16  ;;  %v1380_v45 = vpop.permute.xlu0 %1379  ;;  %v1384_v56 = vsel %vm14683_vm10, %v1376_v4, %v1378_v48 }
 0x1e2   : > { %v1385_v11 = vsel %vm14683_vm10, %v1378_v48, %v1380_v45 }
 0x1e3   : > { %3471 = vmatprep.subr.bf16.mxu0 %v1385_v11  ;;  %3459 = vmatmul.mubr.bf16.gmra.mrb[4].mxu0 %v10465_v55 }
 0x1e4   : > { %v1411_v8 = vpop.permute.xlu1 %1410  ;;  %2134 = vrot.lane.b32.xlu1 %v10906_v31, %s10730_s21  ;;  %3472 = vmatpush1.bf16.msra.mxu0 %v1384_v56 }
 0x1e5   : > { %1755 = vrot.lane.b32.xlu0 %v11432_v21, %s10729_s16  ;;  %v1409_v13 = vpop.permute.xlu0 %1408  ;;  %3501 = vmatprep.mubr.bf16.mxu0 %v10468_v5 }
 0x1e6   : > { %v1420_v60 = vsel %vm1418_vm9, %v1409_v13, %v1411_v8 }
 0x1e7   : > { %3473 = vmatprep.subr.bf16.mxu0 %v1420_v60 }
 0x1e8   : > { %v1787_v17 = vpop.permute.xlu1 %1786  ;;  %1763 = vrot.lane.b32.xlu1 %v11428_v54, %s10729_s16 }
 0x1e9   : > { %2136 = vrot.lane.b32.xlu0 %v10900_v29, %s10730_s21  ;;  %v1407_v43 = vpop.permute.xlu0 %1406  ;;  %vm1792_vm10 = vcmp.ne.s16.totalorder %v1787_v17, 0  ;;  %s10737_s21 = smov 63  }
 0x1ea   : > { %v1419_v14 = vsel %vm1418_vm9, %v1407_v43, %v1409_v13  ;;  %v1795_v51 = vsel %vm1792_vm10, %v11432_v21, 0  ;;  %v1798_v42 = vsel %vm1792_vm10, %v11496_v46, 0 }
 0x1eb   : > { %3474 = vmatpush1.bf16.msra.mxu0 %v1419_v14 }
 0x1ec   : > { %v1415_v18 = vpop.permute.xlu1 %1414  ;;  %1761 = vrot.lane.b32.xlu1 %v11496_v46, %s10729_s16 }
 0x1ed   : > { %1765 = vrot.lane.b32.xlu0 %v11446_v30, %s10729_s16  ;;  %v1789_v6 = vpop.permute.xlu0 %1788  ;;  %s10734_s16 = smov 70  }
 0x1ee   : > { %v1791_v15 = vsel %vm1790_vm5, %v1787_v17, %v1789_v6  ;;  %vm1794_vm13 = vcmp.ne.s16.totalorder %v1789_v6, 0  ;;  %vm1470_vm5 = vcmask 752640  }
 0x1ef   : > { %vm1793_vm11 = vcmp.ne.s16.totalorder %v1791_v15, 0  ;;  %v1797_v41 = vsel %vm1794_vm13, %v11458_v33, 0  ;;  %v1800_v52 = vsel %vm1794_vm13, %v11446_v30, 0  ;;  %vm1522_vm13 = vcmask 744448  }
 0x1f0   : > { %v1413_v20 = vpop.permute.xlu1 %1412  ;;  %1811 = vrot.lane.b32.xlu1 %v1797_v41, %s10731_s25  ;;  %v1796_v36 = vsel %vm1793_vm11, %v11416_v57, 0  ;;  %v1799_v62 = vsel %vm1793_vm11, %v11428_v54, 0 }
 0x1f1   : > { %1809 = vrot.lane.b32.xlu0 %v1796_v36, %s10731_s25  ;;  %v1417_v50 = vpop.permute.xlu0 %1416  ;;  %v1421_v58 = vsel %vm1418_vm9, %v1413_v20, %v1415_v18 }
 0x1f2   : > { %v1422_v59 = vsel %vm1418_vm9, %v1415_v18, %v1417_v50  ;;  %vm1842_vm9 = vcmask 433152  }
 0x1f3   : > { %3475 = vmatprep.subr.bf16.mxu0 %v1422_v59 }
 0x1f4   : > { %v1463_v61 = vpop.permute.xlu1 %1462  ;;  %2186 = vrot.lane.b32.xlu1 %v10913_v34, %s10732_s29  ;;  %3476 = vmatpush1.bf16.msra.mxu0 %v1421_v58 }
 0x1f5   : > { %1807 = vrot.lane.b32.xlu0 %v1795_v51, %s10731_s25  ;;  %v1461_v40 = vpop.permute.xlu0 %1460 }
 0x1f6   : > { %v1472_v63 = vsel %vm1470_vm5, %v1461_v40, %v1463_v61 }
 0x1f7   : > { %3477 = vmatprep.subr.bf16.mxu0 %v1472_v63 }
 0x1f8   : > { %v1839_v44 = vpop.permute.xlu1 %1838  ;;  %1815 = vrot.lane.b32.xlu1 %v1799_v62, %s10731_s25 }
 0x1f9   : > { %2188 = vrot.lane.b32.xlu0 %v10909_v32, %s10732_s29  ;;  %v1459_v53 = vpop.permute.xlu0 %1458  ;;  %vm1844_vm10 = vcmp.ne.s16.totalorder %v1839_v44, 0  ;;  %s10740_s29 = smov 61  }
 0x1fa   : > { %v1471_v10 = vsel %vm1470_vm5, %v1459_v53, %v1461_v40  ;;  %v1847_v3 = vsel %vm1844_vm10, %v11432_v21, 0  ;;  %v1850_v56 = vsel %vm1844_vm10, %v11496_v46, 0  ;;  %v11734_v53 = vld [vmem:[#allocation2 + $0x8] sm:$0xff] }
 0x1fb   : > { %3478 = vmatpush1.bf16.msra.mxu0 %v1471_v10 }
 0x1fc   : > { %v1467_v12 = vpop.permute.xlu1 %1466  ;;  %1813 = vrot.lane.b32.xlu1 %v1798_v42, %s10731_s25 }
 0x1fd   : > { %1817 = vrot.lane.b32.xlu0 %v1800_v52, %s10731_s25  ;;  %v1841_v7 = vpop.permute.xlu0 %1840  ;;  %s10739_s25 = smov 62  }
 0x1fe   : > { %v1843_v0 = vsel %vm1842_vm9, %v1839_v44, %v1841_v7  ;;  %vm1846_vm11 = vcmp.ne.s16.totalorder %v1841_v7, 0  ;;  %v11742_v7 = vld [vmem:[#allocation2] sm:$0xff] }
 0x1ff   : > { %vm1845_vm14 = vcmp.ne.s16.totalorder %v1843_v0, 0  ;;  %v1849_v49 = vsel %vm1846_vm11, %v11458_v33, 0  ;;  %v1852_v13 = vsel %vm1846_vm11, %v11446_v30, 0  ;;  %vm1574_vm11 = vcmask 736256  }
 0x200   : > { %v1465_v2 = vpop.permute.xlu1 %1464  ;;  %1863 = vrot.lane.b32.xlu1 %v1849_v49, %s10733_s23  ;;  %v1848_v1 = vsel %vm1845_vm14, %v11416_v57, 0  ;;  %v1851_v4 = vsel %vm1845_vm14, %v11428_v54, 0 }
 0x201   : > { %1861 = vrot.lane.b32.xlu0 %v1848_v1, %s10733_s23  ;;  %v1469_v16 = vpop.permute.xlu0 %1468  ;;  %v1473_v48 = vsel %vm1470_vm5, %v1465_v2, %v1467_v12  ;;  %v11749_v1 = vld [vmem:[#allocation2 + $0x20] sm:$0xff] }
 0x202   : > { %v1474_v19 = vsel %vm1470_vm5, %v1467_v12, %v1469_v16  ;;  %vm1894_vm5 = vcmask 441344  }
 0x203   : > { %3479 = vmatprep.subr.bf16.mxu0 %v1474_v19 }
 0x204   : > { %v1515_v47 = vpop.permute.xlu1 %1514  ;;  %2238 = vrot.lane.b32.xlu1 %v10920_v37, %s10734_s16  ;;  %3480 = vmatpush1.bf16.msra.mxu0 %v1473_v48 }
 0x205   : > { %1859 = vrot.lane.b32.xlu0 %v1847_v3, %s10733_s23  ;;  %v1513_v9 = vpop.permute.xlu0 %1512 }
 0x206   : > { %v1524_v55 = vsel %vm1522_vm13, %v1513_v9, %v1515_v47 }
 0x207   : > { %3481 = vmatprep.subr.bf16.mxu0 %v1524_v55 }
 0x208   : > { %v1891_v45 = vpop.permute.xlu1 %1890  ;;  %1867 = vrot.lane.b32.xlu1 %v1851_v4, %s10733_s23 }
 0x209   : > { %2240 = vrot.lane.b32.xlu0 %v10916_v35, %s10734_s16  ;;  %v1511_v5 = vpop.permute.xlu0 %1510  ;;  %vm1896_vm10 = vcmp.ne.s16.totalorder %v1891_v45, 0  ;;  %s10750_s16 = smov 46  }
 0x20a   : > { %v1523_v11 = vsel %vm1522_vm13, %v1511_v5, %v1513_v9  ;;  %v1899_v36 = vsel %vm1896_vm10, %v11432_v21, 0  ;;  %v1902_v21 = vsel %vm1896_vm10, %v11496_v46, 0  ;;  %v11758_v9 = vld [vmem:[#allocation2 + $0x28] sm:$0xff] }
 0x20b   : > { %3482 = vmatpush1.bf16.msra.mxu0 %v1523_v11  ;;  %v11764_v11 = vld [vmem:[#allocation2 + $0x10] sm:$0xff] }
 0x20c   : > { %v1519_v8 = vpop.permute.xlu1 %1518  ;;  %1865 = vrot.lane.b32.xlu1 %v1850_v56, %s10733_s23 }
 0x20d   : > { %1869 = vrot.lane.b32.xlu0 %v1852_v13, %s10733_s23  ;;  %v1893_v60 = vpop.permute.xlu0 %1892  ;;  %s10741_s23 = smov 84  }
 0x20e   : > { %v1895_v17 = vsel %vm1894_vm5, %v1891_v45, %v1893_v60  ;;  %vm1898_vm14 = vcmp.ne.s16.totalorder %v1893_v60, 0 }
 0x20f   : > { %vm1897_vm9 = vcmp.ne.s16.totalorder %v1895_v17, 0  ;;  %v1901_v43 = vsel %vm1898_vm14, %v11458_v33, 0  ;;  %v1904_v63 = vsel %vm1898_vm14, %v11446_v30, 0  ;;  %vm1626_vm14 = vcmask 654336  }
 0x210   : > { %v1517_v14 = vpop.permute.xlu1 %1516  ;;  %1915 = vrot.lane.b32.xlu1 %v1901_v43, %s10735_s30  ;;  %v1900_v18 = vsel %vm1897_vm9, %v11416_v57, 0  ;;  %v1903_v59 = vsel %vm1897_vm9, %v11428_v54, 0 }
 0x211   : > { %1913 = vrot.lane.b32.xlu0 %v1900_v18, %s10735_s30  ;;  %v1521_v6 = vpop.permute.xlu0 %1520  ;;  %v1525_v41 = vsel %vm1522_vm13, %v1517_v14, %v1519_v8 }
 0x212   : > { %v1526_v15 = vsel %vm1522_vm13, %v1519_v8, %v1521_v6  ;;  %vm1946_vm13 = vcmask 523264  }
 0x213   : > { %3483 = vmatprep.subr.bf16.mxu0 %v1526_v15 }
 0x214   : > { %v1567_v20 = vpop.permute.xlu1 %1566  ;;  %2290 = vrot.lane.b32.xlu1 %v10926_v39, %s10724_s17  ;;  %3484 = vmatpush1.bf16.msra.mxu0 %v1525_v41 }
 0x215   : > { %1911 = vrot.lane.b32.xlu0 %v1899_v36, %s10735_s30  ;;  %v1565_v50 = vpop.permute.xlu0 %1564 }
 0x216   : > { %v1576_v57 = vsel %vm1574_vm11, %v1565_v50, %v1567_v20 }
 0x217   : > { %3485 = vmatprep.subr.bf16.mxu0 %v1576_v57 }
 0x218   : > { %v1943_v58 = vpop.permute.xlu1 %1942  ;;  %1919 = vrot.lane.b32.xlu1 %v1903_v59, %s10735_s30 }
 0x219   : > { %2292 = vrot.lane.b32.xlu0 %v10923_v38, %s10724_s17  ;;  %v1563_v61 = vpop.permute.xlu0 %1562  ;;  %vm1948_vm10 = vcmp.ne.s16.totalorder %v1943_v58, 0  ;;  %s10736_s17 = smov 81  }
 0x21a   : > { %v1575_v51 = vsel %vm1574_vm11, %v1563_v61, %v1565_v50  ;;  %v1951_v0 = vsel %vm1948_vm10, %v11742_v7, 0  ;;  %v1954_v3 = vsel %vm1948_vm10, %v11496_v46, 0  ;;  %v11784_v50 = vld [vmem:[#allocation2 + $0x18] sm:$0xff] }
 0x21b   : > { %3486 = vmatpush1.bf16.msra.mxu0 %v1575_v51 }
 0x21c   : > { %v1571_v40 = vpop.permute.xlu1 %1570  ;;  %1917 = vrot.lane.b32.xlu1 %v1902_v21, %s10735_s30 }
 0x21d   : > { %1921 = vrot.lane.b32.xlu0 %v1904_v63, %s10735_s30  ;;  %v1945_v54 = vpop.permute.xlu0 %1944  ;;  %s10743_s30 = smov 85  }
 0x21e   : > { %v1947_v62 = vsel %vm1946_vm13, %v1943_v58, %v1945_v54  ;;  %vm1950_vm5 = vcmp.ne.s16.totalorder %v1945_v54, 0 }
 0x21f   : > { %vm1949_vm9 = vcmp.ne.s16.totalorder %v1947_v62, 0  ;;  %v1953_v44 = vsel %vm1950_vm5, %v11458_v33, 0  ;;  %v1956_v4 = vsel %vm1950_vm5, %v11758_v9, 0  ;;  %vm1678_vm5 = vcmask 646144  }
 0x220   : > { %v1569_v10 = vpop.permute.xlu1 %1568  ;;  %1967 = vrot.lane.b32.xlu1 %v1953_v44, %s10723_s15  ;;  %v1952_v42 = vsel %vm1949_vm9, %v11734_v53, 0  ;;  %v1955_v16 = vsel %vm1949_vm9, %v11749_v1, 0 }
 0x221   : > { %1965 = vrot.lane.b32.xlu0 %v1952_v42, %s10723_s15  ;;  %v1573_v30 = vpop.permute.xlu0 %1572  ;;  %v1577_v52 = vsel %vm1574_vm11, %v1569_v10, %v1571_v40 }
 0x222   : > { %v1578_v12 = vsel %vm1574_vm11, %v1571_v40, %v1573_v30  ;;  %vm1997_vm11 = vcmask 531456  }
 0x223   : > { %3487 = vmatprep.subr.bf16.mxu0 %v1578_v12 }
 0x224   : > { %v1619_v33 = vpop.permute.xlu1 %1618  ;;  %2340 = vrot.lane.b32.xlu1 %v10879_v24, %s10736_s17  ;;  %3488 = vmatpush1.bf16.msra.mxu0 %v1577_v52 }
 0x225   : > { %1963 = vrot.lane.b32.xlu0 %v1951_v0, %s10723_s15  ;;  %v1617_v49 = vpop.permute.xlu0 %1616 }
 0x226   : > { %v1628_v2 = vsel %vm1626_vm14, %v1617_v49, %v1619_v33 }
 0x227   : > { %3489 = vmatprep.subr.bf16.mxu0 %v1628_v2 }
 0x228   : > { %v1994_v19 = vpop.permute.xlu1 %1993  ;;  %1971 = vrot.lane.b32.xlu1 %v1955_v16, %s10723_s15 }
 0x229   : > { %2342 = vrot.lane.b32.xlu0 %v10877_v23, %s10736_s17  ;;  %v1615_v48 = vpop.permute.xlu0 %1614  ;;  %vm1999_vm10 = vcmp.ne.s16.totalorder %v1994_v19, 0  ;;  %s10744_s17 = smov 59  }
 0x22a   : > { %v1627_v47 = vsel %vm1626_vm14, %v1615_v48, %v1617_v49  ;;  %v2002_v14 = vsel %vm1999_vm10, %v11742_v7, 0  ;;  %v2005_v57 = vsel %vm1999_vm10, %v11784_v50, 0 }
 0x22b   : > { %3490 = vmatpush1.bf16.msra.mxu0 %v1627_v47 }
 0x22c   : > { %v1623_v55 = vpop.permute.xlu1 %1622  ;;  %1969 = vrot.lane.b32.xlu1 %v1954_v3, %s10723_s15 }
 0x22d   : > { %1973 = vrot.lane.b32.xlu0 %v1956_v4, %s10723_s15  ;;  %v1996_v45 = vpop.permute.xlu0 %1995  ;;  %s10738_s15 = smov 82   ;;  %v10466_v4 = vld [vmem:[%s14656_s2 + $0x10] ss:$52 sps:$4 sm:$0xff]  }
 0x22e   : > { %v1998_v5 = vsel %vm1997_vm11, %v1994_v19, %v1996_v45  ;;  %vm2001_vm9 = vcmp.ne.s16.totalorder %v1996_v45, 0  ;;  %vm2049_vm11 = vcmask 539648  }
 0x22f   : > { %vm2000_vm8 = vcmp.ne.s16.totalorder %v1998_v5, 0  ;;  %v2004_v46 = vsel %vm2001_vm9, %v11764_v11, 0  ;;  %v2007_v58 = vsel %vm2001_vm9, %v11758_v9, 0  ;;  %vm1730_vm9 = vcmask 637952   ;;  %v10469_v5 = vld [vmem:[%s14656_s2 + $0x7c] ss:$52 sps:$4 sm:$0xff]  }
 0x230   : > { %v1621_v56 = vpop.permute.xlu1 %1620  ;;  %2018 = vrot.lane.b32.xlu1 %v2004_v46, %s10737_s21  ;;  %v2003_v8 = vsel %vm2000_vm8, %v11734_v53, 0  ;;  %v2006_v15 = vsel %vm2000_vm8, %v11749_v1, 0 }
 0x231   : > { %2016 = vrot.lane.b32.xlu0 %v2003_v8, %s10737_s21  ;;  %v1625_v13 = vpop.permute.xlu0 %1624  ;;  %v1629_v17 = vsel %vm1626_vm14, %v1621_v56, %v1623_v55 }
 0x232   : > { %v1630_v60 = vsel %vm1626_vm14, %v1623_v55, %v1625_v13 }
 0x233   : > { %3491 = vmatprep.subr.bf16.mxu0 %v1630_v60 }
 0x234   : > { %v1671_v43 = vpop.permute.xlu1 %1670  ;;  %2392 = vrot.lane.b32.xlu1 %v10892_v27, %s10738_s15  ;;  %3492 = vmatpush1.bf16.msra.mxu0 %v1629_v17  ;;  %v10471_v17 = vld [vmem:[%s14656_s2 + $0x78] ss:$52 sps:$4 sm:$0xff]  }
 0x235   : > { %2014 = vrot.lane.b32.xlu0 %v2002_v14, %s10737_s21  ;;  %v1669_v18 = vpop.permute.xlu0 %1668  ;;  %v10474_v14 = vld [vmem:[%s14656_s2 + $0x1c] ss:$52 sps:$4 sm:$0xff]  }
 0x236   : > { %v1680_v6 = vsel %vm1678_vm5, %v1669_v18, %v1671_v43 }
 0x237   : > { %3493 = vmatprep.subr.bf16.mxu0 %v1680_v6 }
 0x238   : > { %v2046_v41 = vpop.permute.xlu1 %2045  ;;  %2022 = vrot.lane.b32.xlu1 %v2006_v15, %s10737_s21 }
 0x239   : > { %2394 = vrot.lane.b32.xlu0 %v10888_v26, %s10738_s15  ;;  %v1667_v20 = vpop.permute.xlu0 %1666  ;;  %vm2051_vm10 = vcmp.ne.s16.totalorder %v2046_v41, 0  ;;  %s10746_s15 = smov 58  }
 0x23a   : > { %v1679_v36 = vsel %vm1678_vm5, %v1667_v20, %v1669_v18  ;;  %v2054_v42 = vsel %vm2051_vm10, %v11742_v7, 0  ;;  %v2057_v52 = vsel %vm2051_vm10, %v11784_v50, 0 }
 0x23b   : > { %3494 = vmatpush1.bf16.msra.mxu0 %v1679_v36 }
 0x23c   : > { %v1675_v59 = vpop.permute.xlu1 %1674  ;;  %2020 = vrot.lane.b32.xlu1 %v2005_v57, %s10737_s21 }
 0x23d   : > { %2024 = vrot.lane.b32.xlu0 %v2007_v58, %s10737_s21  ;;  %v2048_v61 = vpop.permute.xlu0 %2047  ;;  %s10745_s21 = smov 86  }
 0x23e   : > { %v2050_v51 = vsel %vm2049_vm11, %v2046_v41, %v2048_v61  ;;  %vm2053_vm8 = vcmp.ne.s16.totalorder %v2048_v61, 0 }
 0x23f   : > { %vm2052_vm2 = vcmp.ne.s16.totalorder %v2050_v51, 0  ;;  %v2056_v21 = vsel %vm2053_vm8, %v11764_v11, 0  ;;  %v2059_v33 = vsel %vm2053_vm8, %v11758_v9, 0 }
 0x240   : > { %v1673_v40 = vpop.permute.xlu1 %1672  ;;  %2070 = vrot.lane.b32.xlu1 %v2056_v21, %s10739_s25  ;;  %v2055_v63 = vsel %vm2052_vm2, %v11734_v53, 0  ;;  %v2058_v10 = vsel %vm2052_vm2, %v11749_v1, 0  ;;  %vm1767_vm2 = vcmask 629760  }
 0x241   : > { %2068 = vrot.lane.b32.xlu0 %v2055_v63, %s10739_s25  ;;  %v1677_v54 = vpop.permute.xlu0 %1676  ;;  %v1681_v44 = vsel %vm1678_vm5, %v1673_v40, %v1675_v59 }
 0x242   : > { %v1682_v62 = vsel %vm1678_vm5, %v1675_v59, %v1677_v54  ;;  %vm2138_vm5 = vcmask 556032  }
 0x243   : > { %3495 = vmatprep.subr.bf16.mxu0 %v1682_v62 }
 0x244   : > { %2074 = vrot.lane.b32.xlu1 %v2058_v10, %s10739_s25  ;;  %3496 = vmatpush1.bf16.msra.mxu0 %v1681_v44 }
 0x245   : > { %2066 = vrot.lane.b32.xlu0 %v2054_v42, %s10739_s25 }
 0x246   : > { %v1723_v30 = vpop.permute.xlu1 %1722 }
 0x247   : > { %v1721_v12 = vpop.permute.xlu0 %1720 }
 0x248   : > { %2072 = vrot.lane.b32.xlu1 %v2057_v52, %s10739_s25  ;;  %v1732_v0 = vsel %vm1730_vm9, %v1721_v12, %v1723_v30 }
 0x249   : > { %2076 = vrot.lane.b32.xlu0 %v2059_v33, %s10739_s25  ;;  %3497 = vmatprep.subr.bf16.mxu0 %v1732_v0  ;;  %s10747_s25 = smov 97  }
 0x24a   : > { %v1727_v49 = vpop.permute.xlu1 %1726 }
 0x24b   : > { %v1719_v2 = vpop.permute.xlu0 %1718 }
 0x24c   : > { %v1731_v16 = vsel %vm1730_vm9, %v1719_v2, %v1721_v12  ;;  %2107 = vrot.lane.b32.xlu1 %v11764_v11, %s10740_s29 }
 0x24d   : > { %2105 = vrot.lane.b32.xlu0 %v11734_v53, %s10740_s29  ;;  %3498 = vmatpush1.bf16.msra.mxu0 %v1731_v16 }
 0x24e   : > { %v1725_v19 = vpop.permute.xlu1 %1724 }
 0x24f   : > { %v1729_v48 = vpop.permute.xlu0 %1728  ;;  %v1733_v3 = vsel %vm1730_vm9, %v1725_v19, %v1727_v49 }
 0x250   : > { %2481 = vrot.lane.b32.xlu1 %v10906_v31, %s10741_s23  ;;  %v1734_v47 = vsel %vm1730_vm9, %v1727_v49, %v1729_v48  ;;  %vm1819_vm9 = vcmask 621568  }
 0x251   : > { %2103 = vrot.lane.b32.xlu0 %v11742_v7, %s10740_s29  ;;  %3499 = vmatprep.subr.bf16.mxu0 %v1734_v47 }
 0x252   : > { %v1760_v55 = vpop.permute.xlu1 %1759  ;;  %3500 = vmatpush1.bf16.msra.mxu0 %v1733_v3 }
 0x253   : > { %v1758_v45 = vpop.permute.xlu0 %1757 }
 0x254   : > { %2111 = vrot.lane.b32.xlu1 %v11749_v1, %s10740_s29  ;;  %v1769_v46 = vsel %vm1767_vm2, %v1758_v45, %v1760_v55 }
 0x255   : > { %2483 = vrot.lane.b32.xlu0 %v10900_v29, %s10741_s23  ;;  %3522 = vmatprep.subr.bf16.mxu0 %v1769_v46  ;;  %s10748_s23 = smov 47  }
 0x256   : > { %v2135_v56 = vpop.permute.xlu1 %2134  ;;  %3502 = vmatmul.mubr.bf16.vlgmr.msra.gmra.mrb[0].mxu0 %v10466_v4 }
 0x257   : > { %v1756_v8 = vpop.permute.xlu0 %1755  ;;  %3511 = vmatprep.mubr.bf16.mxu0 %v10469_v5  ;;  %vm2140_vm10 = vcmp.ne.s16.totalorder %v2135_v56, 0 }
 0x258   : > { %v1768_v13 = vsel %vm1767_vm2, %v1756_v8, %v1758_v45  ;;  %2109 = vrot.lane.b32.xlu1 %v11784_v50, %s10740_s29  ;;  %v2143_v58 = vsel %vm2140_vm10, %v11742_v7, 0  ;;  %v2146_v62 = vsel %vm2140_vm10, %v11784_v50, 0 }
 0x259   : > { %2113 = vrot.lane.b32.xlu0 %v11758_v9, %s10740_s29  ;;  %3523 = vmatpush1.bf16.msra.mxu0 %v1768_v13  ;;  %s10742_s29 = smov 60  }
 0x25a   : > { %v1764_v60 = vpop.permute.xlu1 %1763 }
 0x25b   : > { %v2137_v43 = vpop.permute.xlu0 %2136 }
 0x25c   : > { %v2139_v18 = vsel %vm2138_vm5, %v2135_v56, %v2137_v43  ;;  %vm2142_vm11 = vcmp.ne.s16.totalorder %v2137_v43, 0 }
 0x25d   : > { %vm2141_vm8 = vcmp.ne.s16.totalorder %v2139_v18, 0  ;;  %v2145_v6 = vsel %vm2142_vm11, %v11764_v11, 0  ;;  %v2148_v10 = vsel %vm2142_vm11, %v11758_v9, 0  ;;  %vm1871_vm11 = vcmask 613376  }
 0x25e   : > { %v1762_v15 = vpop.permute.xlu1 %1761  ;;  %2159 = vrot.lane.b32.xlu1 %v2145_v6, %s10742_s29  ;;  %v2144_v41 = vsel %vm2141_vm8, %v11734_v53, 0  ;;  %3512 = vmatmul.mubr.bf16.gmra.mrb[4].mxu0 %v10471_v17  ;;  %v2147_v21 = vsel %vm2141_vm8, %v11749_v1, 0 }
 0x25f   : > { %2157 = vrot.lane.b32.xlu0 %v2144_v41, %s10742_s29  ;;  %v1766_v20 = vpop.permute.xlu0 %1765  ;;  %3554 = vmatprep.mubr.bf16.mxu0 %v10474_v14  ;;  %v1770_v57 = vsel %vm1767_vm2, %v1762_v15, %v1764_v60 }
 0x260   : > { %v1771_v36 = vsel %vm1767_vm2, %v1764_v60, %v1766_v20  ;;  %vm2190_vm2 = vcmask 564224  }
 0x261   : > { %3524 = vmatprep.subr.bf16.mxu0 %v1771_v36 }
 0x262   : > { %v1812_v59 = vpop.permute.xlu1 %1811  ;;  %2533 = vrot.lane.b32.xlu1 %v10913_v34, %s10743_s30  ;;  %3525 = vmatpush1.bf16.msra.mxu0 %v1770_v57 }
 0x263   : > { %2155 = vrot.lane.b32.xlu0 %v2143_v58, %s10742_s29  ;;  %v1810_v61 = vpop.permute.xlu0 %1809 }
 0x264   : > { %v1821_v51 = vsel %vm1819_vm9, %v1810_v61, %v1812_v59 }
 0x265   : > { %3526 = vmatprep.subr.bf16.mxu0 %v1821_v51 }
 0x266   : > { %v2187_v40 = vpop.permute.xlu1 %2186  ;;  %2163 = vrot.lane.b32.xlu1 %v2147_v21, %s10742_s29 }
 0x267   : > { %2535 = vrot.lane.b32.xlu0 %v10909_v32, %s10743_s30  ;;  %v1808_v63 = vpop.permute.xlu0 %1807  ;;  %vm2192_vm10 = vcmp.ne.s16.totalorder %v2187_v40, 0  ;;  %s10752_s30 = smov 100  }
 0x268   : > { %v1820_v54 = vsel %vm1819_vm9, %v1808_v63, %v1810_v61  ;;  %v2195_v19 = vsel %vm2192_vm10, %v11742_v7, 0  ;;  %v2198_v5 = vsel %vm2192_vm10, %v11784_v50, 0 }
 0x269   : > { %3527 = vmatpush1.bf16.msra.mxu0 %v1820_v54 }
 0x26a   : > { %v1816_v44 = vpop.permute.xlu1 %1815  ;;  %2161 = vrot.lane.b32.xlu1 %v2146_v62, %s10742_s29 }
 0x26b   : > { %2165 = vrot.lane.b32.xlu0 %v2148_v10, %s10742_s29  ;;  %v2189_v42 = vpop.permute.xlu0 %2188  ;;  %s10751_s29 = smov 45  }
 0x26c   : > { %v2191_v30 = vsel %vm2190_vm2, %v2187_v40, %v2189_v42  ;;  %vm2194_vm5 = vcmp.ne.s16.totalorder %v2189_v42, 0 }
 0x26d   : > { %vm2193_vm8 = vcmp.ne.s16.totalorder %v2191_v30, 0  ;;  %v2197_v12 = vsel %vm2194_vm5, %v11764_v11, 0  ;;  %v2200_v56 = vsel %vm2194_vm5, %v11758_v9, 0  ;;  %vm1923_vm5 = vcmask 605184  }
 0x26e   : > { %v1814_v52 = vpop.permute.xlu1 %1813  ;;  %2211 = vrot.lane.b32.xlu1 %v2197_v12, %s10744_s17  ;;  %v2196_v33 = vsel %vm2193_vm8, %v11734_v53, 0  ;;  %v2199_v3 = vsel %vm2193_vm8, %v11749_v1, 0 }
 0x26f   : > { %2209 = vrot.lane.b32.xlu0 %v2196_v33, %s10744_s17  ;;  %v1818_v0 = vpop.permute.xlu0 %1817  ;;  %v1822_v2 = vsel %vm1819_vm9, %v1814_v52, %v1816_v44 }
 0x270   : > { %v1823_v49 = vsel %vm1819_vm9, %v1816_v44, %v1818_v0  ;;  %vm2242_vm9 = vcmask 572416  }
 0x271   : > { %3528 = vmatprep.subr.bf16.mxu0 %v1823_v49 }
 0x272   : > { %v1864_v16 = vpop.permute.xlu1 %1863  ;;  %2585 = vrot.lane.b32.xlu1 %v10920_v37, %s10745_s21  ;;  %3529 = vmatpush1.bf16.msra.mxu0 %v1822_v2 }
 0x273   : > { %2207 = vrot.lane.b32.xlu0 %v2195_v19, %s10744_s17  ;;  %v1862_v48 = vpop.permute.xlu0 %1861 }
 0x274   : > { %v1873_v47 = vsel %vm1871_vm11, %v1862_v48, %v1864_v16 }
 0x275   : > { %3530 = vmatprep.subr.bf16.mxu0 %v1873_v47 }
 0x276   : > { %v2239_v55 = vpop.permute.xlu1 %2238  ;;  %2215 = vrot.lane.b32.xlu1 %v2199_v3, %s10744_s17 }
 0x277   : > { %2587 = vrot.lane.b32.xlu0 %v10916_v35, %s10745_s21  ;;  %v1860_v4 = vpop.permute.xlu0 %1859  ;;  %vm2244_vm10 = vcmp.ne.s16.totalorder %v2239_v55, 0 }
 0x278   : > { %v1872_v45 = vsel %vm1871_vm11, %v1860_v4, %v1862_v48  ;;  %v2247_v41 = vsel %vm2244_vm10, %v11742_v7, 0  ;;  %v2250_v61 = vsel %vm2244_vm10, %v11784_v50, 0 }
 0x279   : > { %3531 = vmatpush1.bf16.msra.mxu0 %v1872_v45 }
 0x27a   : > { %v1868_v46 = vpop.permute.xlu1 %1867  ;;  %2213 = vrot.lane.b32.xlu1 %v2198_v5, %s10744_s17 }
 0x27b   : > { %2217 = vrot.lane.b32.xlu0 %v2200_v56, %s10744_s17  ;;  %v2241_v8 = vpop.permute.xlu0 %2240  ;;  %s10753_s17 = smov 44  }
 0x27c   : > { %v2243_v13 = vsel %vm2242_vm9, %v2239_v55, %v2241_v8  ;;  %vm2246_vm2 = vcmp.ne.s16.totalorder %v2241_v8, 0 }
 0x27d   : > { %vm2245_vm8 = vcmp.ne.s16.totalorder %v2243_v13, 0  ;;  %v2249_v60 = vsel %vm2246_vm2, %v11764_v11, 0  ;;  %v2252_v21 = vsel %vm2246_vm2, %v11758_v9, 0 }
 0x27e   : > { %v1866_v17 = vpop.permute.xlu1 %1865  ;;  %2263 = vrot.lane.b32.xlu1 %v2249_v60, %s10746_s15  ;;  %v2248_v43 = vsel %vm2245_vm8, %v11734_v53, 0  ;;  %v2251_v57 = vsel %vm2245_vm8, %v11749_v1, 0 }
 0x27f   : > { %2261 = vrot.lane.b32.xlu0 %v2248_v43, %s10746_s15  ;;  %v1870_v14 = vpop.permute.xlu0 %1869  ;;  %v1874_v6 = vsel %vm1871_vm11, %v1866_v17, %v1868_v46 }
 0x280   : > { %v1875_v18 = vsel %vm1871_vm11, %v1868_v46, %v1870_v14 }
 0x281   : > { %3532 = vmatprep.subr.bf16.mxu0 %v1875_v18 }
 0x282   : > { %v1916_v15 = vpop.permute.xlu1 %1915  ;;  %2637 = vrot.lane.b32.xlu1 %v10926_v39, %s10711_s11  ;;  %3533 = vmatpush1.bf16.msra.mxu0 %v1874_v6 }
 0x283   : > { %2259 = vrot.lane.b32.xlu0 %v2247_v41, %s10746_s15  ;;  %v1914_v20 = vpop.permute.xlu0 %1913 }
 0x284   : > { %v1925_v36 = vsel %vm1923_vm5, %v1914_v20, %v1916_v15 }
 0x285   : > { %3534 = vmatprep.subr.bf16.mxu0 %v1925_v36 }
 0x286   : > { %v2291_v59 = vpop.permute.xlu1 %2290  ;;  %2267 = vrot.lane.b32.xlu1 %v2251_v57, %s10746_s15 }
 0x287   : > { %2639 = vrot.lane.b32.xlu0 %v10923_v38, %s10711_s11  ;;  %v1912_v58 = vpop.permute.xlu0 %1911  ;;  %vm2295_vm8 = vcmp.ne.s16.totalorder %v2291_v59, 0 }
 0x288   : > { %v1924_v39 = vsel %vm1923_vm5, %v1912_v58, %v1914_v20  ;;  %v2298_v12 = vsel %vm2295_vm8, %v11742_v7, 0  ;;  %v2301_v16 = vsel %vm2295_vm8, %v11784_v50, 0 }
 0x289   : > { %3535 = vmatpush1.bf16.msra.mxu0 %v1924_v39 }
 0x28a   : > { %v1920_v51 = vpop.permute.xlu1 %1919  ;;  %2265 = vrot.lane.b32.xlu1 %v2250_v61, %s10746_s15 }
 0x28b   : > { %2269 = vrot.lane.b32.xlu0 %v2252_v21, %s10746_s15  ;;  %v2293_v40 = vpop.permute.xlu0 %2292  ;;  %s10755_s15 = smov 102  }
 0x28c   : > { %v2294_v63 = vsel %vm1626_vm14, %v2291_v59, %v2293_v40  ;;  %vm2297_vm11 = vcmp.ne.s16.totalorder %v2293_v40, 0  ;;  %vm2344_vm14 = vcmask 662528  }
 0x28d   : > { %vm2296_vm9 = vcmp.ne.s16.totalorder %v2294_v63, 0  ;;  %v2300_v38 = vsel %vm2297_vm11, %v11764_v11, 0  ;;  %v2303_v48 = vsel %vm2297_vm11, %v11758_v9, 0  ;;  %vm2026_vm11 = vcmask 515072  }
 0x28e   : > { %v1918_v54 = vpop.permute.xlu1 %1917  ;;  %2314 = vrot.lane.b32.xlu1 %v2300_v38, %s10710_s24  ;;  %v2299_v62 = vsel %vm2296_vm9, %v11734_v53, 0  ;;  %v2302_v0 = vsel %vm2296_vm9, %v11749_v1, 0  ;;  %vm2396_vm9 = vcmask 670720  }
 0x28f   : > { %2312 = vrot.lane.b32.xlu0 %v2299_v62, %s10710_s24  ;;  %v1922_v44 = vpop.permute.xlu0 %1921  ;;  %v1926_v42 = vsel %vm1923_vm5, %v1918_v54, %v1920_v51 }
 0x290   : > { %v1927_v10 = vsel %vm1923_vm5, %v1920_v51, %v1922_v44 }
 0x291   : > { %3536 = vmatprep.subr.bf16.mxu0 %v1927_v10 }
 0x292   : > { %v1968_v30 = vpop.permute.xlu1 %1967  ;;  %2687 = vrot.lane.b32.xlu1 %v10879_v24, %s10747_s25  ;;  %3537 = vmatpush1.bf16.msra.mxu0 %v1926_v42 }
 0x293   : > { %2310 = vrot.lane.b32.xlu0 %v2298_v12, %s10710_s24  ;;  %v1966_v52 = vpop.permute.xlu0 %1965 }
 0x294   : > { %v1976_v33 = vsel %vm1946_vm13, %v1966_v52, %v1968_v30 }
 0x295   : > { %3538 = vmatprep.subr.bf16.mxu0 %v1976_v33 }
 0x296   : > { %v2341_v49 = vpop.permute.xlu1 %2340  ;;  %2318 = vrot.lane.b32.xlu1 %v2302_v0, %s10710_s24 }
 0x297   : > { %2689 = vrot.lane.b32.xlu0 %v10877_v23, %s10747_s25  ;;  %v1964_v2 = vpop.permute.xlu0 %1963  ;;  %vm2346_vm5 = vcmp.ne.s16.totalorder %v2341_v49, 0  ;;  %s10754_s25 = smov 101  }
 0x298   : > { %v1975_v24 = vsel %vm1946_vm13, %v1964_v2, %v1966_v52  ;;  %v2349_v8 = vsel %vm2346_vm5, %v11742_v7, 0  ;;  %v2352_v18 = vsel %vm2346_vm5, %v11784_v50, 0  ;;  %vm2115_vm5 = vcmask 498688  }
 0x299   : > { %3539 = vmatpush1.bf16.msra.mxu0 %v1975_v24 }
 0x29a   : > { %v1972_v19 = vpop.permute.xlu1 %1971  ;;  %2316 = vrot.lane.b32.xlu1 %v2301_v16, %s10710_s24 }
 0x29b   : > { %2320 = vrot.lane.b32.xlu0 %v2303_v48, %s10710_s24  ;;  %v2343_v47 = vpop.permute.xlu0 %2342  ;;  %s10749_s24 = smov 98  }
 0x29c   : > { %v2345_v3 = vsel %vm2344_vm14, %v2341_v49, %v2343_v47  ;;  %vm2348_vm2 = vcmp.ne.s16.totalorder %v2343_v47, 0 }
 0x29d   : > { %vm2347_vm10 = vcmp.ne.s16.totalorder %v2345_v3, 0  ;;  %v2351_v23 = vsel %vm2348_vm2, %v11764_v11, 0  ;;  %v2354_v15 = vsel %vm2348_vm2, %v11758_v9, 0  ;;  %vm2078_vm2 = vcmask 506880  }
 0x29e   : > { %v1970_v55 = vpop.permute.xlu1 %1969  ;;  %2365 = vrot.lane.b32.xlu1 %v2351_v23, %s10748_s23  ;;  %v2350_v4 = vsel %vm2347_vm10, %v11734_v53, 0  ;;  %v2353_v17 = vsel %vm2347_vm10, %v11749_v1, 0 }
 0x29f   : > { %2363 = vrot.lane.b32.xlu0 %v2350_v4, %s10748_s23  ;;  %v1974_v45 = vpop.permute.xlu0 %1973  ;;  %v1977_v46 = vsel %vm1946_vm13, %v1970_v55, %v1972_v19 }
 0x2a0   : > { %v1978_v5 = vsel %vm1946_vm13, %v1972_v19, %v1974_v45  ;;  %v10472_v45 = vld [vmem:[%s14656_s2 + $0x18] ss:$52 sps:$4 sm:$0xff]  }
 0x2a1   : > { %3540 = vmatprep.subr.bf16.mxu0 %v1978_v5  ;;  %v10475_v5 = vld [vmem:[%s14656_s2 + $0x84] ss:$52 sps:$4 sm:$0xff]  }
 0x2a2   : > { %v2019_v56 = vpop.permute.xlu1 %2018  ;;  %2739 = vrot.lane.b32.xlu1 %v10892_v27, %s10749_s24  ;;  %3541 = vmatpush1.bf16.msra.mxu0 %v1977_v46 }
 0x2a3   : > { %2361 = vrot.lane.b32.xlu0 %v2349_v8, %s10748_s23  ;;  %v2017_v13 = vpop.permute.xlu0 %2016 }
 0x2a4   : > { %v2028_v60 = vsel %vm2026_vm11, %v2017_v13, %v2019_v56 }
 0x2a5   : > { %3542 = vmatprep.subr.bf16.mxu0 %v2028_v60 }
 0x2a6   : > { %v2393_v43 = vpop.permute.xlu1 %2392  ;;  %2369 = vrot.lane.b32.xlu1 %v2353_v17, %s10748_s23  ;;  %v10477_v17 = vld [vmem:[%s14656_s2 + $0x80] ss:$52 sps:$4 sm:$0xff]  }
 0x2a7   : > { %2741 = vrot.lane.b32.xlu0 %v10888_v26, %s10749_s24  ;;  %v2015_v14 = vpop.permute.xlu0 %2014  ;;  %vm2398_vm10 = vcmp.ne.s16.totalorder %v2393_v43, 0  ;;  %s10759_s24 = smov 30  }
 0x2a8   : > { %v2027_v27 = vsel %vm2026_vm11, %v2015_v14, %v2017_v13  ;;  %v2401_v21 = vsel %vm2398_vm10, %v11742_v7, 0  ;;  %v2404_v38 = vsel %vm2398_vm10, %v11784_v50, 0  ;;  %vm2167_vm10 = vcmask 490496  }
 0x2a9   : > { %3543 = vmatpush1.bf16.msra.mxu0 %v2027_v27 }
 0x2aa   : > { %v2023_v6 = vpop.permute.xlu1 %2022  ;;  %2367 = vrot.lane.b32.xlu1 %v2352_v18, %s10748_s23 }
 0x2ab   : > { %2371 = vrot.lane.b32.xlu0 %v2354_v15, %s10748_s23  ;;  %v2395_v41 = vpop.permute.xlu0 %2394  ;;  %s10758_s23 = smov 31  }
 0x2ac   : > { %v2397_v20 = vsel %vm2396_vm9, %v2393_v43, %v2395_v41  ;;  %vm2400_vm8 = vcmp.ne.s16.totalorder %v2395_v41, 0 }
 0x2ad   : > { %vm2399_vm14 = vcmp.ne.s16.totalorder %v2397_v20, 0  ;;  %v2403_v26 = vsel %vm2400_vm8, %v11764_v11, 0  ;;  %v2406_v62 = vsel %vm2400_vm8, %v11758_v9, 0  ;;  %v12011_v20 = vld [vmem:[#allocation2 + $0x8] sm:$0xff] }
 0x2ae   : > { %v2021_v36 = vpop.permute.xlu1 %2020  ;;  %2417 = vrot.lane.b32.xlu1 %v2403_v26, %s10750_s16  ;;  %v2402_v57 = vsel %vm2399_vm14, %v11734_v53, 0  ;;  %v2405_v61 = vsel %vm2399_vm14, %v11749_v1, 0 }
 0x2af   : > { %2415 = vrot.lane.b32.xlu0 %v2402_v57, %s10750_s16  ;;  %v2025_v59 = vpop.permute.xlu0 %2024  ;;  %v2029_v39 = vsel %vm2026_vm11, %v2021_v36, %v2023_v6 }
 0x2b0   : > { %v2030_v58 = vsel %vm2026_vm11, %v2023_v6, %v2025_v59  ;;  %vm2485_vm11 = vcmask 687104   ;;  %v12019_v59 = vld [vmem:[#allocation2] sm:$0xff] }
 0x2b1   : > { %3544 = vmatprep.subr.bf16.mxu0 %v2030_v58 }
 0x2b2   : > { %v2071_v51 = vpop.permute.xlu1 %2070  ;;  %2421 = vrot.lane.b32.xlu1 %v2405_v61, %s10750_s16  ;;  %3545 = vmatpush1.bf16.msra.mxu0 %v2029_v39 }
 0x2b3   : > { %2413 = vrot.lane.b32.xlu0 %v2401_v21, %s10750_s16  ;;  %v2069_v40 = vpop.permute.xlu0 %2068 }
 0x2b4   : > { %v2080_v63 = vsel %vm2078_vm2, %v2069_v40, %v2071_v51 }
 0x2b5   : > { %3546 = vmatprep.subr.bf16.mxu0 %v2080_v63 }
 0x2b6   : > { %v2075_v54 = vpop.permute.xlu1 %2074  ;;  %2419 = vrot.lane.b32.xlu1 %v2404_v38, %s10750_s16 }
 0x2b7   : > { %2423 = vrot.lane.b32.xlu0 %v2406_v62, %s10750_s16  ;;  %v2067_v44 = vpop.permute.xlu0 %2066  ;;  %s10760_s16 = smov 29  }
 0x2b8   : > { %v2079_v10 = vsel %vm2078_vm2, %v2067_v44, %v2069_v40  ;;  %v12026_v40 = vld [vmem:[#allocation2 + $0x28] sm:$0xff]  ;;  %v12031_v44 = vld [vmem:[#allocation2 + $0x10] sm:$0xff] }
 0x2b9   : > { %3547 = vmatpush1.bf16.msra.mxu0 %v2079_v10 }
 0x2ba   : > { %v2073_v42 = vpop.permute.xlu1 %2072  ;;  %2454 = vrot.lane.b32.xlu1 %v11764_v11, %s10751_s29 }
 0x2bb   : > { %2452 = vrot.lane.b32.xlu0 %v11734_v53, %s10751_s29  ;;  %v2077_v30 = vpop.permute.xlu0 %2076  ;;  %v2081_v52 = vsel %vm2078_vm2, %v2073_v42, %v2075_v54 }
 0x2bc   : > { %v2082_v12 = vsel %vm2078_vm2, %v2075_v54, %v2077_v30  ;;  %vm2537_vm2 = vcmask 695296  }
 0x2bd   : > { %3548 = vmatprep.subr.bf16.mxu0 %v2082_v12 }
 0x2be   : > { %v2108_v33 = vpop.permute.xlu1 %2107  ;;  %2828 = vrot.lane.b32.xlu1 %v10906_v31, %s10752_s30  ;;  %3549 = vmatpush1.bf16.msra.mxu0 %v2081_v52 }
 0x2bf   : > { %2450 = vrot.lane.b32.xlu0 %v11742_v7, %s10751_s29  ;;  %v2106_v0 = vpop.permute.xlu0 %2105 }
 0x2c0   : > { %v2117_v49 = vsel %vm2115_vm5, %v2106_v0, %v2108_v33  ;;  %v12037_v33 = vld [vmem:[#allocation2 + $0x20] sm:$0xff] }
 0x2c1   : > { %3550 = vmatprep.subr.bf16.mxu0 %v2117_v49 }
 0x2c2   : > { %v2482_v2 = vpop.permute.xlu1 %2481  ;;  %2458 = vrot.lane.b32.xlu1 %v11749_v1, %s10751_s29 }
 0x2c3   : > { %2830 = vrot.lane.b32.xlu0 %v10900_v29, %s10752_s30  ;;  %v2104_v24 = vpop.permute.xlu0 %2103  ;;  %vm2487_vm14 = vcmp.ne.s16.totalorder %v2482_v2, 0  ;;  %s10762_s30 = smov 27  }
 0x2c4   : > { %v2116_v16 = vsel %vm2115_vm5, %v2104_v24, %v2106_v0  ;;  %v2493_v60 = vsel %vm2487_vm14, %v11784_v50, 0 }
 0x2c5   : > { %3551 = vmatpush1.bf16.msra.mxu0 %v2116_v16 }
 0x2c6   : > { %v2112_v19 = vpop.permute.xlu1 %2111  ;;  %2456 = vrot.lane.b32.xlu1 %v11784_v50, %s10751_s29 }
 0x2c7   : > { %2460 = vrot.lane.b32.xlu0 %v11758_v9, %s10751_s29  ;;  %v2484_v31 = vpop.permute.xlu0 %2483  ;;  %s10761_s29 = smov 28  }
 0x2c8   : > { %v2486_v48 = vsel %vm2485_vm11, %v2482_v2, %v2484_v31  ;;  %vm2489_vm9 = vcmp.ne.s16.totalorder %v2484_v31, 0 }
 0x2c9   : > { %vm2488_vm8 = vcmp.ne.s16.totalorder %v2486_v48, 0  ;;  %v2492_v47 = vsel %vm2489_vm9, %v11764_v11, 0  ;;  %v2495_v14 = vsel %vm2489_vm9, %v11758_v9, 0 }
 0x2ca   : > { %v2110_v3 = vpop.permute.xlu1 %2109  ;;  %2506 = vrot.lane.b32.xlu1 %v2492_v47, %s10753_s17  ;;  %v2491_v29 = vsel %vm2488_vm8, %v11734_v53, 0  ;;  %v2490_v53 = vsel %vm2487_vm14, %v11742_v7, 0  ;;  %v2494_v8 = vsel %vm2488_vm8, %v11749_v1, 0  ;;  %vm2219_vm8 = vcmask 482304  }
 0x2cb   : > { %2504 = vrot.lane.b32.xlu0 %v2491_v29, %s10753_s17  ;;  %v2114_v23 = vpop.permute.xlu0 %2113  ;;  %v2118_v4 = vsel %vm2115_vm5, %v2110_v3, %v2112_v19  ;;  %vm2589_vm14 = vcmask 703488  }
 0x2cc   : > { %v2119_v55 = vsel %vm2115_vm5, %v2112_v19, %v2114_v23 }
 0x2cd   : > { %3552 = vmatprep.subr.bf16.mxu0 %v2119_v55 }
 0x2ce   : > { %2880 = vrot.lane.b32.xlu1 %v10913_v34, %s10754_s25  ;;  %3553 = vmatpush1.bf16.msra.mxu0 %v2118_v4 }
 0x2cf   : > { %2502 = vrot.lane.b32.xlu0 %v2490_v53, %s10753_s17 }
 0x2d0   : > { %v2160_v46 = vpop.permute.xlu1 %2159 }
 0x2d1   : > { %v2158_v56 = vpop.permute.xlu0 %2157  ;;  %3555 = vmatmul.mubr.bf16.vlgmr.msra.gmra.mrb[0].mxu0 %v10472_v45 }
 0x2d2   : > { %2510 = vrot.lane.b32.xlu1 %v2494_v8, %s10753_s17  ;;  %v2169_v34 = vsel %vm2167_vm10, %v2158_v56, %v2160_v46  ;;  %3564 = vmatprep.mubr.bf16.mxu0 %v10475_v5 }
 0x2d3   : > { %2882 = vrot.lane.b32.xlu0 %v10909_v32, %s10754_s25  ;;  %3575 = vmatprep.subr.bf16.mxu0 %v2169_v34  ;;  %v10480_v32 = vld [vmem:[%s14656_s2 + $0x24] ss:$52 sps:$4 sm:$0xff]   ;;  %s10757_s25 = smov 42  }
 0x2d4   : > { %v2534_v7 = vpop.permute.xlu1 %2533 }
 0x2d5   : > { %v2156_v13 = vpop.permute.xlu0 %2155  ;;  %vm2539_vm9 = vcmp.ne.s16.totalorder %v2534_v7, 0 }
 0x2d6   : > { %v2168_v43 = vsel %vm2167_vm10, %v2156_v13, %v2158_v56  ;;  %2508 = vrot.lane.b32.xlu1 %v2493_v60, %s10753_s17  ;;  %v2542_v58 = vsel %vm2539_vm9, %v12019_v59, 0  ;;  %v2545_v21 = vsel %vm2539_vm9, %v11784_v50, 0 }
 0x2d7   : > { %2512 = vrot.lane.b32.xlu0 %v2495_v14, %s10753_s17  ;;  %3576 = vmatpush1.bf16.msra.mxu0 %v2168_v43  ;;  %s10756_s17 = smov 43  }
 0x2d8   : > { %v2164_v27 = vpop.permute.xlu1 %2163 }
 0x2d9   : > { %v2536_v18 = vpop.permute.xlu0 %2535  ;;  %3565 = vmatmul.mubr.bf16.gmra.mrb[4].mxu0 %v10477_v17  ;;  %v12063_v17 = vld [vmem:[#allocation2 + $0x18] sm:$0xff] }
 0x2da   : > { %v2538_v6 = vsel %vm2537_vm2, %v2534_v7, %v2536_v18  ;;  %vm2541_vm5 = vcmp.ne.s16.totalorder %v2536_v18, 0  ;;  %2934 = vrot.lane.b32.xlu1 %v10916_v35, %s10755_s15  ;;  %3607 = vmatprep.mubr.bf16.mxu0 %v10480_v32 }
 0x2db   : > { %vm2540_vm11 = vcmp.ne.s16.totalorder %v2538_v6, 0  ;;  %2932 = vrot.lane.b32.xlu0 %v10920_v37, %s10755_s15  ;;  %v2544_v41 = vsel %vm2541_vm5, %v11764_v11, 0 }
 0x2dc   : > { %v2162_v9 = vpop.permute.xlu1 %2161  ;;  %v2543_v26 = vsel %vm2540_vm11, %v12011_v20, 0  ;;  %v2546_v11 = vsel %vm2540_vm11, %v11749_v1, 0  ;;  %v2547_v1 = vsel %vm2541_vm5, %v12026_v40, 0  ;;  %vm2271_vm5 = vcmask 474112  }
 0x2dd   : > { %v2166_v15 = vpop.permute.xlu0 %2165  ;;  %v2170_v35 = vsel %vm2167_vm10, %v2162_v9, %v2164_v27 }
 0x2de   : > { %2558 = vrot.lane.b32.xlu1 %v2544_v41, %s10756_s17  ;;  %v2171_v36 = vsel %vm2167_vm10, %v2164_v27, %v2166_v15 }
 0x2df   : > { %2556 = vrot.lane.b32.xlu0 %v2543_v26, %s10756_s17  ;;  %3577 = vmatprep.subr.bf16.mxu0 %v2171_v36 }
 0x2e0   : > { %v2212_v37 = vpop.permute.xlu1 %2211  ;;  %3578 = vmatpush1.bf16.msra.mxu0 %v2170_v35 }
 0x2e1   : > { %v2210_v57 = vpop.permute.xlu0 %2209 }
 0x2e2   : > { %2562 = vrot.lane.b32.xlu1 %v2546_v11, %s10756_s17  ;;  %v2221_v39 = vsel %vm2219_vm8, %v2210_v57, %v2212_v37 }
 0x2e3   : > { %2554 = vrot.lane.b32.xlu0 %v2542_v58, %s10756_s17  ;;  %3579 = vmatprep.subr.bf16.mxu0 %v2221_v39 }
 0x2e4   : > { %v2586_v61 = vpop.permute.xlu1 %2585 }
 0x2e5   : > { %v2208_v51 = vpop.permute.xlu0 %2207  ;;  %vm2591_vm11 = vcmp.ne.s16.totalorder %v2586_v61, 0 }
 0x2e6   : > { %v2220_v63 = vsel %vm2219_vm8, %v2208_v51, %v2210_v57  ;;  %2560 = vrot.lane.b32.xlu1 %v2545_v21, %s10756_s17  ;;  %v2594_v24 = vsel %vm2591_vm11, %v12019_v59, 0  ;;  %v2597_v31 = vsel %vm2591_vm11, %v11784_v50, 0 }
 0x2e7   : > { %2564 = vrot.lane.b32.xlu0 %v2547_v1, %s10756_s17  ;;  %3580 = vmatpush1.bf16.msra.mxu0 %v2220_v63  ;;  %s10349_s17 = smul.u32 72, %s15033_s14 }
 0x2e8   : > { %v2216_v38 = vpop.permute.xlu1 %2215 }
 0x2e9   : > { %v2588_v54 = vpop.permute.xlu0 %2587 }
 0x2ea   : > { %v2590_v62 = vsel %vm2589_vm14, %v2586_v61, %v2588_v54  ;;  %vm2593_vm10 = vcmp.ne.s16.totalorder %v2588_v54, 0 }
 0x2eb   : > { %vm2592_vm2 = vcmp.ne.s16.totalorder %v2590_v62, 0  ;;  %v2596_v10 = vsel %vm2593_vm10, %v12031_v44, 0  ;;  %v2599_v47 = vsel %vm2593_vm10, %v12026_v40, 0  ;;  %vm2691_vm10 = vcmask 793600  }
 0x2ec   : > { %v2214_v42 = vpop.permute.xlu1 %2213  ;;  %2610 = vrot.lane.b32.xlu1 %v2596_v10, %s10757_s25  ;;  %v2595_v30 = vsel %vm2592_vm2, %v12011_v20, 0  ;;  %v2598_v49 = vsel %vm2592_vm2, %v12037_v33, 0 }
 0x2ed   : > { %2608 = vrot.lane.b32.xlu0 %v2595_v30, %s10757_s25  ;;  %v2218_v12 = vpop.permute.xlu0 %2217  ;;  %v2222_v0 = vsel %vm2219_vm8, %v2214_v42, %v2216_v38 }
 0x2ee   : > { %v2223_v52 = vsel %vm2219_vm8, %v2216_v38, %v2218_v12 }
 0x2ef   : > { %3581 = vmatprep.subr.bf16.mxu0 %v2223_v52 }
 0x2f0   : > { %v2264_v2 = vpop.permute.xlu1 %2263  ;;  %2614 = vrot.lane.b32.xlu1 %v2598_v49, %s10757_s25  ;;  %3582 = vmatpush1.bf16.msra.mxu0 %v2222_v0 }
 0x2f1   : > { %2606 = vrot.lane.b32.xlu0 %v2594_v24, %s10757_s25  ;;  %v2262_v16 = vpop.permute.xlu0 %2261 }
 0x2f2   : > { %v2273_v19 = vsel %vm2271_vm5, %v2262_v16, %v2264_v2 }
 0x2f3   : > { %3583 = vmatprep.subr.bf16.mxu0 %v2273_v19 }
 0x2f4   : > { %v2638_v48 = vpop.permute.xlu1 %2637  ;;  %2612 = vrot.lane.b32.xlu1 %v2597_v31, %s10757_s25 }
 0x2f5   : > { %2616 = vrot.lane.b32.xlu0 %v2599_v47, %s10757_s25  ;;  %v2260_v3 = vpop.permute.xlu0 %2259  ;;  %vm2642_vm14 = vcmp.ne.s16.totalorder %v2638_v48, 0 }
 0x2f6   : > { %v2272_v29 = vsel %vm2271_vm5, %v2260_v3, %v2262_v16  ;;  %v2645_v7 = vsel %vm2642_vm14, %v12019_v59, 0  ;;  %v2648_v43 = vsel %vm2642_vm14, %v12063_v17, 0 }
 0x2f7   : > { %3584 = vmatpush1.bf16.msra.mxu0 %v2272_v29 }
 0x2f8   : > { %v2268_v23 = vpop.permute.xlu1 %2267 }
 0x2f9   : > { %v2640_v55 = vpop.permute.xlu0 %2639 }
 0x2fa   : > { %v2641_v4 = vsel %vm14712_vm15, %v2638_v48, %v2640_v55  ;;  %vm2644_vm9 = vcmp.ne.s16.totalorder %v2640_v55, 0 }
 0x2fb   : > { %vm2643_vm8 = vcmp.ne.s16.totalorder %v2641_v4, 0  ;;  %v2647_v45 = vsel %vm2644_vm9, %v12031_v44, 0  ;;  %v2650_v32 = vsel %vm2644_vm9, %v12026_v40, 0  ;;  %vm2373_vm9 = vcmask 384000  }
 0x2fc   : > { %v2266_v50 = vpop.permute.xlu1 %2265  ;;  %2661 = vrot.lane.b32.xlu1 %v2647_v45, %s10691_s12  ;;  %v2646_v53 = vsel %vm2643_vm8, %v12011_v20, 0  ;;  %v2649_v8 = vsel %vm2643_vm8, %v12037_v33, 0 }
 0x2fd   : > { %2659 = vrot.lane.b32.xlu0 %v2646_v53, %s10691_s12  ;;  %v2270_v5 = vpop.permute.xlu0 %2269  ;;  %v2274_v56 = vsel %vm2271_vm5, %v2266_v50, %v2268_v23 }
 0x2fe   : > { %v2275_v46 = vsel %vm2271_vm5, %v2268_v23, %v2270_v5 }
 0x2ff   : > { %3585 = vmatprep.subr.bf16.mxu0 %v2275_v46 }
 0x300   : > { %v2315_v34 = vpop.permute.xlu1 %2314  ;;  %2665 = vrot.lane.b32.xlu1 %v2649_v8, %s10691_s12  ;;  %3586 = vmatpush1.bf16.msra.mxu0 %v2274_v56 }
 0x301   : > { %2657 = vrot.lane.b32.xlu0 %v2645_v7, %s10691_s12  ;;  %v2313_v13 = vpop.permute.xlu0 %2312 }
 0x302   : > { %v2323_v60 = vsel %vm1597_vm12, %v2313_v13, %v2315_v34 }
 0x303   : > { %3587 = vmatprep.subr.bf16.mxu0 %v2323_v60 }
 0x304   : > { %v2688_v14 = vpop.permute.xlu1 %2687  ;;  %2663 = vrot.lane.b32.xlu1 %v2648_v43, %s10691_s12 }
 0x305   : > { %2667 = vrot.lane.b32.xlu0 %v2650_v32, %s10691_s12  ;;  %v2311_v27 = vpop.permute.xlu0 %2310  ;;  %vm2693_vm5 = vcmp.ne.s16.totalorder %v2688_v14, 0 }
 0x306   : > { %v2322_v18 = vsel %vm1597_vm12, %v2311_v27, %v2313_v13  ;;  %v2696_v39 = vsel %vm2693_vm5, %v12019_v59, 0  ;;  %v2699_v21 = vsel %vm2693_vm5, %v12063_v17, 0  ;;  %vm2832_vm5 = vcmask 818176  }
 0x307   : > { %3588 = vmatpush1.bf16.msra.mxu0 %v2322_v18 }
 0x308   : > { %v2319_v6 = vpop.permute.xlu1 %2318 }
 0x309   : > { %v2690_v9 = vpop.permute.xlu0 %2689 }
 0x30a   : > { %v2692_v15 = vsel %vm2691_vm10, %v2688_v14, %v2690_v9  ;;  %vm2695_vm2 = vcmp.ne.s16.totalorder %v2690_v9, 0 }
 0x30b   : > { %vm2694_vm11 = vcmp.ne.s16.totalorder %v2692_v15, 0  ;;  %v2698_v41 = vsel %vm2695_vm2, %v12031_v44, 0  ;;  %v2701_v1 = vsel %vm2695_vm2, %v12026_v40, 0  ;;  %vm2425_vm2 = vcmask 375808  }
 0x30c   : > { %v2317_v26 = vpop.permute.xlu1 %2316  ;;  %2712 = vrot.lane.b32.xlu1 %v2698_v41, %s10758_s23  ;;  %v2697_v36 = vsel %vm2694_vm11, %v12011_v20, 0  ;;  %v2700_v11 = vsel %vm2694_vm11, %v12037_v33, 0  ;;  %vm2462_vm11 = vcmask 367616  }
 0x30d   : > { %2710 = vrot.lane.b32.xlu0 %v2697_v36, %s10758_s23  ;;  %v2321_v35 = vpop.permute.xlu0 %2320  ;;  %v2324_v57 = vsel %vm1597_vm12, %v2317_v26, %v2319_v6 }
 0x30e   : > { %v2325_v37 = vsel %vm1597_vm12, %v2319_v6, %v2321_v35  ;;  %vm2743_vm12 = vcmask 801792  }
 0x30f   : > { %3589 = vmatprep.subr.bf16.mxu0 %v2325_v37 }
 0x310   : > { %v2366_v58 = vpop.permute.xlu1 %2365  ;;  %2716 = vrot.lane.b32.xlu1 %v2700_v11, %s10758_s23  ;;  %3590 = vmatpush1.bf16.msra.mxu0 %v2324_v57 }
 0x311   : > { %2708 = vrot.lane.b32.xlu0 %v2696_v39, %s10758_s23  ;;  %v2364_v61 = vpop.permute.xlu0 %2363 }
 0x312   : > { %v2375_v51 = vsel %vm2373_vm9, %v2364_v61, %v2366_v58 }
 0x313   : > { %3591 = vmatprep.subr.bf16.mxu0 %v2375_v51 }
 0x314   : > { %v2740_v63 = vpop.permute.xlu1 %2739  ;;  %2714 = vrot.lane.b32.xlu1 %v2699_v21, %s10758_s23 }
 0x315   : > { %2718 = vrot.lane.b32.xlu0 %v2701_v1, %s10758_s23  ;;  %v2362_v38 = vpop.permute.xlu0 %2361  ;;  %vm2745_vm10 = vcmp.ne.s16.totalorder %v2740_v63, 0  ;;  %s10763_s23 = smov 26  }
 0x316   : > { %v2374_v54 = vsel %vm2373_vm9, %v2362_v38, %v2364_v61  ;;  %v2748_v19 = vsel %vm2745_vm10, %v12019_v59, 0  ;;  %v2751_v47 = vsel %vm2745_vm10, %v12063_v17, 0  ;;  %vm2884_vm10 = vcmask 826368  }
 0x317   : > { %3592 = vmatpush1.bf16.msra.mxu0 %v2374_v54 }
 0x318   : > { %v2370_v62 = vpop.permute.xlu1 %2369 }
 0x319   : > { %v2742_v10 = vpop.permute.xlu0 %2741 }
 0x31a   : > { %v2744_v42 = vsel %vm2743_vm12, %v2740_v63, %v2742_v10  ;;  %vm2747_vm8 = vcmp.ne.s16.totalorder %v2742_v10, 0 }
 0x31b   : > { %vm2746_vm14 = vcmp.ne.s16.totalorder %v2744_v42, 0  ;;  %v2750_v30 = vsel %vm2747_vm8, %v12031_v44, 0  ;;  %v2753_v29 = vsel %vm2747_vm8, %v12026_v40, 0  ;;  %v10478_v42 = vld [vmem:[%s14656_s2 + $0x20] ss:$52 sps:$4 sm:$0xff]  }
 0x31c   : > { %v2368_v12 = vpop.permute.xlu1 %2367  ;;  %2764 = vrot.lane.b32.xlu1 %v2750_v30, %s10759_s24  ;;  %v2749_v52 = vsel %vm2746_vm14, %v12011_v20, 0  ;;  %v2752_v24 = vsel %vm2746_vm14, %v12037_v33, 0  ;;  %vm2514_vm14 = vcmask 359424  }
 0x31d   : > { %2762 = vrot.lane.b32.xlu0 %v2749_v52, %s10759_s24  ;;  %v2372_v0 = vpop.permute.xlu0 %2371  ;;  %v2376_v2 = vsel %vm2373_vm9, %v2368_v12, %v2370_v62  ;;  %v10481_v52 = vld [vmem:[%s14656_s2 + $0x8c] ss:$52 sps:$4 sm:$0xff]  }
 0x31e   : > { %v2377_v49 = vsel %vm2373_vm9, %v2370_v62, %v2372_v0 }
 0x31f   : > { %3593 = vmatprep.subr.bf16.mxu0 %v2377_v49 }
 0x320   : > { %v2418_v16 = vpop.permute.xlu1 %2417  ;;  %2768 = vrot.lane.b32.xlu1 %v2752_v24, %s10759_s24  ;;  %3594 = vmatpush1.bf16.msra.mxu0 %v2376_v2 }
 0x321   : > { %2760 = vrot.lane.b32.xlu0 %v2748_v19, %s10759_s24  ;;  %v2416_v31 = vpop.permute.xlu0 %2415 }
 0x322   : > { %v2427_v48 = vsel %vm2425_vm2, %v2416_v31, %v2418_v16 }
 0x323   : > { %3595 = vmatprep.subr.bf16.mxu0 %v2427_v48 }
 0x324   : > { %v2422_v3 = vpop.permute.xlu1 %2421  ;;  %2766 = vrot.lane.b32.xlu1 %v2751_v47, %s10759_s24 }
 0x325   : > { %2770 = vrot.lane.b32.xlu0 %v2753_v29, %s10759_s24  ;;  %v2414_v23 = vpop.permute.xlu0 %2413 }
 0x326   : > { %v2426_v55 = vsel %vm2425_vm2, %v2414_v23, %v2416_v31  ;;  %v10486_v23 = vld [vmem:[%s14656_s2 + $0x2c] ss:$52 sps:$4 sm:$0xff]  }
 0x327   : > { %3596 = vmatpush1.bf16.msra.mxu0 %v2426_v55 }
 0x328   : > { %v2420_v4 = vpop.permute.xlu1 %2419  ;;  %2801 = vrot.lane.b32.xlu1 %v12031_v44, %s10760_s16 }
 0x329   : > { %2799 = vrot.lane.b32.xlu0 %v12011_v20, %s10760_s16  ;;  %v2424_v45 = vpop.permute.xlu0 %2423  ;;  %v2428_v53 = vsel %vm2425_vm2, %v2420_v4, %v2422_v3 }
 0x32a   : > { %v2429_v50 = vsel %vm2425_vm2, %v2422_v3, %v2424_v45 }
 0x32b   : > { %3597 = vmatprep.subr.bf16.mxu0 %v2429_v50 }
 0x32c   : > { %v2455_v5 = vpop.permute.xlu1 %2454  ;;  %2805 = vrot.lane.b32.xlu1 %v12037_v33, %s10760_s16  ;;  %3598 = vmatpush1.bf16.msra.mxu0 %v2428_v53 }
 0x32d   : > { %2797 = vrot.lane.b32.xlu0 %v12019_v59, %s10760_s16  ;;  %v2453_v46 = vpop.permute.xlu0 %2452 }
 0x32e   : > { %v2464_v56 = vsel %vm2462_vm11, %v2453_v46, %v2455_v5 }
 0x32f   : > { %3599 = vmatprep.subr.bf16.mxu0 %v2464_v56 }
 0x330   : > { %v2829_v8 = vpop.permute.xlu1 %2828  ;;  %2803 = vrot.lane.b32.xlu1 %v12063_v17, %s10760_s16 }
 0x331   : > { %2807 = vrot.lane.b32.xlu0 %v12026_v40, %s10760_s16  ;;  %v2451_v34 = vpop.permute.xlu0 %2450  ;;  %vm2834_vm8 = vcmp.ne.s16.totalorder %v2829_v8, 0  ;;  %s369_s16 = scalar_lea.vmem %s14654_s0, %s10349_s17 }
 0x332   : > { %v2463_v7 = vsel %vm2462_vm11, %v2451_v34, %v2453_v46  ;;  %v2837_v26 = vsel %vm2834_vm8, %v12019_v59, 0  ;;  %v2840_v37 = vsel %vm2834_vm8, %v12063_v17, 0  ;;  %vm2566_vm8 = vcmask 351232  }
 0x333   : > { %3600 = vmatpush1.bf16.msra.mxu0 %v2463_v7 }
 0x334   : > { %v2459_v13 = vpop.permute.xlu1 %2458 }
 0x335   : > { %v2831_v60 = vpop.permute.xlu0 %2830 }
 0x336   : > { %v2833_v43 = vsel %vm2832_vm5, %v2829_v8, %v2831_v60  ;;  %vm2836_vm9 = vcmp.ne.s16.totalorder %v2831_v60, 0 }
 0x337   : > { %vm2835_vm12 = vcmp.ne.s16.totalorder %v2833_v43, 0  ;;  %v2839_v14 = vsel %vm2836_vm9, %v12031_v44, 0  ;;  %v2842_v11 = vsel %vm2836_vm9, %v12026_v40, 0 }
 0x338   : > { %v2457_v32 = vpop.permute.xlu1 %2456  ;;  %2853 = vrot.lane.b32.xlu1 %v2839_v14, %s10761_s29  ;;  %v2838_v27 = vsel %vm2835_vm12, %v12011_v20, 0  ;;  %v2841_v15 = vsel %vm2835_vm12, %v12037_v33, 0 }
 0x339   : > { %2851 = vrot.lane.b32.xlu0 %v2838_v27, %s10761_s29  ;;  %v2461_v18 = vpop.permute.xlu0 %2460  ;;  %v2465_v9 = vsel %vm2462_vm11, %v2457_v32, %v2459_v13  ;;  %v12201_v32 = vld [vmem:[%s14657_s3 + $0x10] sm:$0xff] }
 0x33a   : > { %v2466_v6 = vsel %vm2462_vm11, %v2459_v13, %v2461_v18  ;;  %v12182_v13 = vld [vmem:[%s14657_s3] sm:$0xff] }
 0x33b   : > { %3601 = vmatprep.subr.bf16.mxu0 %v2466_v6 }
 0x33c   : > { %v2507_v41 = vpop.permute.xlu1 %2506  ;;  %2857 = vrot.lane.b32.xlu1 %v2841_v15, %s10761_s29  ;;  %3602 = vmatpush1.bf16.msra.mxu0 %v2465_v9 }
 0x33d   : > { %2849 = vrot.lane.b32.xlu0 %v2837_v26, %s10761_s29  ;;  %v2505_v36 = vpop.permute.xlu0 %2504 }
 0x33e   : > { %v2516_v35 = vsel %vm2514_vm14, %v2505_v36, %v2507_v41 }
 0x33f   : > { %3603 = vmatprep.subr.bf16.mxu0 %v2516_v35 }
 0x340   : > { %v2881_v57 = vpop.permute.xlu1 %2880  ;;  %2855 = vrot.lane.b32.xlu1 %v2840_v37, %s10761_s29 }
 0x341   : > { %2859 = vrot.lane.b32.xlu0 %v2842_v11, %s10761_s29  ;;  %v2503_v58 = vpop.permute.xlu0 %2502  ;;  %vm2886_vm5 = vcmp.ne.s16.totalorder %v2881_v57, 0  ;;  %s14761_s29 = smov 95  }
 0x342   : > { %v2515_v39 = vsel %vm2514_vm14, %v2503_v58, %v2505_v36  ;;  %v2889_v12 = vsel %vm2886_vm5, %v12019_v59, 0 }
 0x343   : > { %3604 = vmatpush1.bf16.msra.mxu0 %v2515_v39 }
 0x344   : > { %v2511_v61 = vpop.permute.xlu1 %2510 }
 0x345   : > { %v2883_v51 = vpop.permute.xlu0 %2882 }
 0x346   : > { %v2885_v21 = vsel %vm2884_vm10, %v2881_v57, %v2883_v51  ;;  %vm2888_vm2 = vcmp.ne.s16.totalorder %v2883_v51, 0  ;;  %vm2720_vm10 = vcmask 252928  }
 0x347   : > { %vm2887_vm11 = vcmp.ne.s16.totalorder %v2885_v21, 0  ;;  %v2891_v63 = vsel %vm2888_vm2, %v12031_v44, 0  ;;  %v2894_v4 = vsel %vm2888_vm2, %v12026_v40, 0  ;;  %vm2772_vm2 = vcmask 244736  }
 0x348   : > { %v2509_v1 = vpop.permute.xlu1 %2508  ;;  %2905 = vrot.lane.b32.xlu1 %v2891_v63, %s10762_s30  ;;  %v2890_v38 = vsel %vm2887_vm11, %v12011_v20, 0  ;;  %v2893_v47 = vsel %vm2887_vm11, %v12037_v33, 0  ;;  %vm2809_vm11 = vcmask 236544  }
 0x349   : > { %2903 = vrot.lane.b32.xlu0 %v2890_v38, %s10762_s30  ;;  %v2513_v54 = vpop.permute.xlu0 %2512  ;;  %v2517_v10 = vsel %vm2514_vm14, %v2509_v1, %v2511_v61 }
 0x34a   : > { %v2518_v62 = vsel %vm2514_vm14, %v2511_v61, %v2513_v54 }
 0x34b   : > { %3605 = vmatprep.subr.bf16.mxu0 %v2518_v62 }
 0x34c   : > { %v2935_v30 = vpop.permute.xlu1 %2934  ;;  %3606 = vmatpush1.bf16.msra.mxu0 %v2517_v10 }
 0x34d   : > { %vm2940_vm9 = vcmp.ne.s16.totalorder %v2935_v30, 0  ;;  %2901 = vrot.lane.b32.xlu0 %v2889_v12, %s10762_s30  ;;  %v2933_v0 = vpop.permute.xlu0 %2932 }
 0x34e   : > { %v2937_v49 = vsel %vm456_vm0, %v2933_v0, %v2935_v30  ;;  %v2943_v24 = vsel %vm2940_vm9, %v12031_v44, 0  ;;  %vm2938_vm14 = vcmp.ne.s16.totalorder %v2933_v0, 0  ;;  %v2946_v5 = vsel %vm2940_vm9, %v12026_v40, 0 }
 0x34f   : > { %vm2939_vm12 = vcmp.ne.s16.totalorder %v2937_v49, 0  ;;  %3608 = vmatmul.mubr.bf16.vlgmr.msra.gmra.mrb[0].mxu0 %v10478_v42  ;;  %v2941_v44 = vsel %vm2938_vm14, %v12019_v59, 0  ;;  %v2892_v59 = vsel %vm2886_vm5, %v12063_v17, 0  ;;  %vm2618_vm0 = vcmask 343040  }
 0x350   : > { %v2559_v2 = vpop.permute.xlu1 %2558  ;;  %v2942_v16 = vsel %vm2939_vm12, %v12011_v20, 0  ;;  %3617 = vmatprep.mubr.bf16.mxu0 %v10481_v52  ;;  %v10483_v20 = vld [vmem:[%s14656_s2 + $0x88] ss:$52 sps:$4 sm:$0xff]   ;;  %v2945_v46 = vsel %vm2939_vm12, %v12037_v33, 0  ;;  %v2944_v34 = vsel %vm2938_vm14, %v12063_v17, 0  ;;  %vm2861_vm5 = vcmask 228352  }
 0x351   : > { %2957 = vrot.lane.b32.xlu0 %v2943_v24, %s10763_s23  ;;  %2955 = vrot.lane.b32.xlu1 %v2942_v16, %s10763_s23  ;;  %v2557_v19 = vpop.permute.xlu0 %2556  ;;  %v12189_v33 = vld [vmem:[%s14657_s3 + $0x8] sm:$0xff]  ;;  %v12194_v17 = vld [vmem:[%s14657_s3 + $0x18] sm:$0xff]  ;;  %vm2913_vm9 = vcmask 220160   ;;  %vm2965_vm12 = vcmask 211968   ;;  %vm4525_vm14 = vcmask 1047556  }
 0x352   : > { %v2568_v31 = vsel %vm2566_vm8, %v2557_v19, %v2559_v2 }
 0x353   : > { %3628 = vmatprep.subr.bf16.mxu0 %v2568_v31 }
 0x354   : > { %v2563_v48 = vpop.permute.xlu1 %2562 }
 0x355   : > { %2909 = vrot.lane.b32.xlu0 %v2893_v47, %s10762_s30  ;;  %2953 = vrot.lane.b32.xlu1 %v2941_v44, %s10763_s23  ;;  %v2555_v3 = vpop.permute.xlu0 %2554 }
 0x356   : > { %v2567_v29 = vsel %vm2566_vm8, %v2555_v3, %v2557_v19 }
 0x357   : > { %3629 = vmatpush1.bf16.msra.mxu0 %v2567_v29 }
 0x358   : > { %v2561_v55 = vpop.permute.xlu1 %2560  ;;  %3618 = vmatmul.mubr.bf16.gmra.mrb[4].mxu0 %v10483_v20 }
 0x359   : > { %2907 = vrot.lane.b32.xlu0 %v2892_v59, %s10762_s30  ;;  %2911 = vrot.lane.b32.xlu1 %v2894_v4, %s10762_s30  ;;  %v2565_v45 = vpop.permute.xlu0 %2564  ;;  %v2569_v53 = vsel %vm2566_vm8, %v2561_v55, %v2563_v48 }
 0x35a   : > { %v2570_v50 = vsel %vm2566_vm8, %v2563_v48, %v2565_v45  ;;  %3660 = vmatprep.mubr.bf16.mxu0 %v10486_v23  ;;  %vm4524_vm8 = vcmask 1043592  }
 0x35b   : > { %3630 = vmatprep.subr.bf16.mxu0 %v2570_v50 }
 0x35c   : > { %3631 = vmatpush1.bf16.msra.mxu0 %v2569_v53 }
 0x35d   : > { %2963 = vrot.lane.b32.xlu0 %v2946_v5, %s10763_s23  ;;  %2961 = vrot.lane.b32.xlu1 %v2945_v46, %s10763_s23 }
 0x35e   : > { %v2611_v56 = vpop.permute.xlu1 %2610 }
 0x35f   : > { %v2609_v8 = vpop.permute.xlu0 %2608 }
 0x360   : > { %v2620_v7 = vsel %vm2618_vm0, %v2609_v8, %v2611_v56 }
 0x361   : > { %2959 = vrot.lane.b32.xlu1 %v2944_v34, %s10763_s23  ;;  %3632 = vmatprep.subr.bf16.mxu0 %v2620_v7 }
 0x362   : > { %v2615_v40 = vpop.permute.xlu1 %2614  ;;  %3208 = vperm.xlu0 %10446, %v12182_v13  }
 0x363   : > { %v2607_v60 = vpop.permute.xlu0 %2606 }
 0x364   : > { %v2619_v43 = vsel %vm2618_vm0, %v2607_v60, %v2609_v8 }
 0x365   : > { %3633 = vmatpush1.bf16.msra.mxu0 %v2619_v43  ;;  %3213 = vperm.xlu1 %10447, %v12189_v33  }
 0x366   : > { %v2613_v14 = vpop.permute.xlu1 %2612  ;;  %3223 = vperm.xlu0 %10446, %v12194_v17  }
 0x367   : > { %v2617_v27 = vpop.permute.xlu0 %2616  ;;  %v2621_v6 = vsel %vm2618_vm0, %v2613_v14, %v2615_v40 }
 0x368   : > { %v2622_v18 = vsel %vm2618_vm0, %v2615_v40, %v2617_v27  ;;  %vm14715_vm0 = vcmask 134144  }
 0x369   : > { %3634 = vmatprep.subr.bf16.mxu0 %v2622_v18  ;;  %3218 = vperm.xlu1 %10447, %v12201_v32  }
 0x36a   : > { %3635 = vmatpush1.bf16.msra.mxu0 %v2621_v6 }
 0x36e   : > { %v2662_v9 = vpop.permute.xlu1 %2661 }
 0x36f   : > { %v2660_v15 = vpop.permute.xlu0 %2659 }
 0x370   : > { %v2670_v41 = vsel %vm1248_vm3, %v2660_v15, %v2662_v9 }
 0x371   : > { %3636 = vmatprep.subr.bf16.mxu0 %v2670_v41 }
 0x372   : > { %v2666_v26 = vpop.permute.xlu1 %2665 }
 0x373   : > { %v2658_v36 = vpop.permute.xlu0 %2657 }
 0x374   : > { %v2669_v35 = vsel %vm1248_vm3, %v2658_v36, %v2660_v15 }
 0x375   : > { %3637 = vmatpush1.bf16.msra.mxu0 %v2669_v35 }
 0x376   : > { %v2664_v37 = vpop.permute.xlu1 %2663 }
 0x377   : > { %v2668_v57 = vpop.permute.xlu0 %2667  ;;  %v2671_v58 = vsel %vm1248_vm3, %v2664_v37, %v2666_v26 }
 0x378   : > { %v2672_v11 = vsel %vm1248_vm3, %v2666_v26, %v2668_v57 }
 0x379   : > { %3638 = vmatprep.subr.bf16.mxu0 %v2672_v11  ;;  %v10484_v11 = vld [vmem:[%s14656_s2 + $0x28] ss:$52 sps:$4 sm:$0xff]  }
 0x37a   : > { %3639 = vmatpush1.bf16.msra.mxu0 %v2671_v58  ;;  %v10487_v58 = vld [vmem:[%s14656_s2 + $0x94] ss:$52 sps:$4 sm:$0xff]  }
 0x37e   : > { %v2713_v39 = vpop.permute.xlu1 %2712 }
 0x37f   : > { %v2711_v61 = vpop.permute.xlu0 %2710 }
 0x380   : > { %v2722_v51 = vsel %vm2720_vm10, %v2711_v61, %v2713_v39 }
 0x381   : > { %3640 = vmatprep.subr.bf16.mxu0 %v2722_v51 }
 0x382   : > { %v2717_v21 = vpop.permute.xlu1 %2716 }
 0x383   : > { %v2709_v63 = vpop.permute.xlu0 %2708 }
 0x384   : > { %v2721_v1 = vsel %vm2720_vm10, %v2709_v63, %v2711_v61 }
 0x385   : > { %3641 = vmatpush1.bf16.msra.mxu0 %v2721_v1  ;;  %v10489_v1 = vld [vmem:[%s14656_s2 + $0x30] ss:$52 sps:$4 sm:$0xff]  }
 0x386   : > { %v2715_v38 = vpop.permute.xlu1 %2714 }
 0x387   : > { %v2719_v54 = vpop.permute.xlu0 %2718  ;;  %v2723_v10 = vsel %vm2720_vm10, %v2715_v38, %v2717_v21  ;;  %v10490_v38 = vld [vmem:[%s14656_s2 + $0x90] ss:$52 sps:$4 sm:$0xff]  }
 0x388   : > { %v2724_v62 = vsel %vm2720_vm10, %v2717_v21, %v2719_v54  ;;  %v12232_v54 = vld [vmem:[#allocation3] sm:$0xff]  ;;  %vm12442_vm10 = vmor %vm4525_vm14, %vm4524_vm8 }
 0x389   : > { %3642 = vmatprep.subr.bf16.mxu0 %v2724_v62  ;;  %v10491_v62 = vld [vmem:[%s14656_s2 + $0x98] ss:$52 sps:$4 sm:$0xff]  }
 0x38a   : > { %3643 = vmatpush1.bf16.msra.mxu0 %v2723_v10  ;;  %v10764_v10 = vmov 1  }
 0x38b   : > { %10448 = vset.pattern.permute.xlu1 %v10764_v10  ;;  %10449 = vset.pattern.permute.xlu0 %v10764_v10 }
 0x38c   : > { %3825 = vperm.xlu1 %10448, %v12182_v13   ;;  %3830 = vperm.xlu0 %10449, %v12189_v33  }
 0x38e   : > { %v2765_v42 = vpop.permute.xlu1 %2764 }
 0x38f   : > { %v2763_v30 = vpop.permute.xlu0 %2762 }
 0x390   : > { %v2774_v12 = vsel %vm2772_vm2, %v2763_v30, %v2765_v42  ;;  %v3819_v42 = vld [vmem:[%s14657_s3 + $0x20] sm:$0xff]  ;;  %3835 = vperm.xlu1 %10448, %v12201_v32  }
 0x391   : > { %3644 = vmatprep.subr.bf16.mxu0 %v2774_v12  ;;  %3845 = vperm.xlu0 %10449, %v3819_v42   ;;  %v3820_v12 = vld [vmem:[%s14657_s3 + $0x28] sm:$0xff] }
 0x392   : > { %v2769_v52 = vpop.permute.xlu1 %2768 }
 0x393   : > { %v2761_v0 = vpop.permute.xlu0 %2760 }
 0x394   : > { %v2773_v49 = vsel %vm2772_vm2, %v2761_v0, %v2763_v30  ;;  %v3821_v30 = vld [vmem:[%s14657_s3 + $0x30] sm:$0xff]  ;;  %3840 = vperm.xlu1 %10448, %v12194_v17  }
 0x395   : > { %3645 = vmatpush1.bf16.msra.mxu0 %v2773_v49  ;;  %3855 = vperm.xlu0 %10449, %v3821_v30  }
 0x396   : > { %v2767_v2 = vpop.permute.xlu1 %2766 }
 0x397   : > { %v2771_v24 = vpop.permute.xlu0 %2770  ;;  %v2775_v19 = vsel %vm2772_vm2, %v2767_v2, %v2769_v52 }
 0x398   : > { %v2776_v16 = vsel %vm2772_vm2, %v2769_v52, %v2771_v24  ;;  %3850 = vperm.xlu1 %10448, %v3820_v12   ;;  %v3822_v52 = vld [vmem:[%s14657_s3 + $0x38] sm:$0xff] }
 0x399   : > { %3646 = vmatprep.subr.bf16.mxu0 %v2776_v16 }
 0x39a   : > { %v2802_v31 = vpop.permute.xlu1 %2801  ;;  %3647 = vmatpush1.bf16.msra.mxu0 %v2775_v19 }
 0x39b   : > { %v2800_v48 = vpop.permute.xlu0 %2799 }
 0x39c   : > { %v2811_v47 = vsel %vm2809_vm11, %v2800_v48, %v2802_v31  ;;  %3860 = vperm.xlu1 %10448, %v3822_v52  }
 0x39d   : > { %3648 = vmatprep.subr.bf16.mxu0 %v2811_v47 }
 0x39e   : > { %v2806_v44 = vpop.permute.xlu1 %2805 }
 0x39f   : > { %v2798_v20 = vpop.permute.xlu0 %2797 }
 0x3a0   : > { %v2810_v3 = vsel %vm2809_vm11, %v2798_v20, %v2800_v48 }
 0x3a1   : > { %3649 = vmatpush1.bf16.msra.mxu0 %v2810_v3 }
 0x3a2   : > { %v2804_v29 = vpop.permute.xlu1 %2803 }
 0x3a3   : > { %v2808_v23 = vpop.permute.xlu0 %2807  ;;  %v2812_v59 = vsel %vm2809_vm11, %v2804_v29, %v2806_v44 }
 0x3a4   : > { %v2813_v55 = vsel %vm2809_vm11, %v2806_v44, %v2808_v23 }
 0x3a5   : > { %3650 = vmatprep.subr.bf16.mxu0 %v2813_v55 }
 0x3a6   : > { %3651 = vmatpush1.bf16.msra.mxu0 %v2812_v59 }
 0x3aa   : > { %v2854_v4 = vpop.permute.xlu1 %2853 }
 0x3ab   : > { %v2852_v45 = vpop.permute.xlu0 %2851 }
 0x3ac   : > { %v2863_v50 = vsel %vm2861_vm5, %v2852_v45, %v2854_v4 }
 0x3ad   : > { %3652 = vmatprep.subr.bf16.mxu0 %v2863_v50 }
 0x3ae   : > { %v2858_v53 = vpop.permute.xlu1 %2857 }
 0x3af   : > { %v2850_v5 = vpop.permute.xlu0 %2849 }
 0x3b0   : > { %v2862_v46 = vsel %vm2861_vm5, %v2850_v5, %v2852_v45 }
 0x3b1   : > { %3653 = vmatpush1.bf16.msra.mxu0 %v2862_v46 }
 0x3b2   : > { %v2856_v56 = vpop.permute.xlu1 %2855 }
 0x3b3   : > { %v2860_v8 = vpop.permute.xlu0 %2859  ;;  %v2864_v7 = vsel %vm2861_vm5, %v2856_v56, %v2858_v53 }
 0x3b4   : > { %v2865_v34 = vsel %vm2861_vm5, %v2858_v53, %v2860_v8  ;;  %vm14740_vm5 = vcmask 1039360  }
 0x3b5   : > { %3654 = vmatprep.subr.bf16.mxu0 %v2865_v34  ;;  %vm14747_vm14 = vmmov %vm14740_vm5 }
 0x3b6   : > { %3655 = vmatpush1.bf16.msra.mxu0 %v2864_v7 }
 0x3ba   : > { %v2906_v40 = vpop.permute.xlu1 %2905 }
 0x3bb   : > { %v2904_v60 = vpop.permute.xlu0 %2903 }
 0x3bc   : > { %v2915_v43 = vsel %vm2913_vm9, %v2904_v60, %v2906_v40 }
 0x3bd   : > { %3656 = vmatprep.subr.bf16.mxu0 %v2915_v43 }
 0x3bf   : > { %v2902_v14 = vpop.permute.xlu0 %2901 }
 0x3c0   : > { %v2914_v27 = vsel %vm2913_vm9, %v2902_v14, %v2904_v60 }
 0x3c1   : > { %3657 = vmatpush1.bf16.msra.mxu0 %v2914_v27 }
 0x3c3   : > { %v2956_v18 = vpop.permute.xlu1 %2955  ;;  %v2958_v6 = vpop.permute.xlu0 %2957 }
 0x3c4   : > { %v2967_v9 = vsel %vm2965_vm12, %v2956_v18, %v2958_v6 }
 0x3c5   : > { %3681 = vmatprep.subr.bf16.mxu1 %v2967_v9 }
 0x3c7   : > { %v2954_v15 = vpop.permute.xlu1 %2953  ;;  %v2910_v41 = vpop.permute.xlu0 %2909 }
 0x3c8   : > { %v2966_v26 = vsel %vm2965_vm12, %v2954_v15, %v2956_v18 }
 0x3c9   : > { %3682 = vmatpush1.bf16.msra.mxu1 %v2966_v26 }
 0x3cb   : > { %v2912_v36 = vpop.permute.xlu1 %2911  ;;  %v2908_v35 = vpop.permute.xlu0 %2907 }
 0x3cc   : > { %v2916_v37 = vsel %vm2913_vm9, %v2908_v35, %v2910_v41  ;;  %v2917_v57 = vsel %vm2913_vm9, %v2910_v41, %v2912_v36  ;;  %vm14741_vm9 = vmmov %vm14740_vm5 }
 0x3cd   : > { %3658 = vmatprep.subr.bf16.mxu0 %v2917_v57 }
 0x3ce   : > { %3659 = vmatpush1.bf16.msra.mxu0 %v2916_v37 }
 0x3cf   : > { %v2962_v39 = vpop.permute.xlu1 %2961  ;;  %v2964_v61 = vpop.permute.xlu0 %2963 }
 0x3d0   : > { %v2969_v51 = vsel %vm2965_vm12, %v2962_v39, %v2964_v61 }
 0x3d1   : > { %3661 = vmatmul.mubr.bf16.vlgmr.msra.gmra.mrb[0].mxu0 %v10484_v11  ;;  %3683 = vmatprep.subr.bf16.mxu1 %v2969_v51 }
 0x3d2   : > { %3670 = vmatprep.mubr.bf16.mxu0 %v10487_v58 }
 0x3d3   : > { %v2960_v21 = vpop.permute.xlu1 %2959 }
 0x3d4   : > { %v2968_v63 = vsel %vm2965_vm12, %v2960_v21, %v2962_v39  ;;  %vm14742_vm12 = vcmask 146432  }
 0x3d5   : > { %3684 = vmatpush1.bf16.msra.mxu1 %v2968_v63 }
 0x3d8   : > { %9466 = vmatmul.mubr.msk.bf16.vlgmr.msra.gmra.mrb[0].mxu1 %vm1248_vm3, %v10489_v1 }
 0x3d9   : > { %3671 = vmatmul.mubr.bf16.gmra.mrb[4].mxu0 %v10490_v38  ;;  %3723 = vmatprep.mubr.bf16.mxu1 %v12232_v54 }
 0x3da   : > { %8130 = vmatprep.mubr.bf16.mxu0 %v12232_v54 }
 0x3e0   : > { %9467 = vmatmul.mubr.msk.bf16.gmra.mrb[4].mxu1 %vm1248_vm3, %v10491_v62 }
 0x3e1   : > { %3927 = vmatprep.mubr.bf16.mxu1 %v12232_v54  ;;  %v3209_v24 = vpop.permute.xlu0 %3208 }
 0x3e4   : > { %v3214_v19 = vpop.permute.xlu1 %3213 }
 0x3e5   : > { %v3224_v7 = vpop.permute.xlu0 %3223 }
 0x3e8   : > { %v3219_v5 = vpop.permute.xlu1 %3218 }
 0x4a4   : > { %v3662_v0 = vpop.f32.mrb[0].mxu0 }
 0x4a5   : > { %v3664_v49 = vpop.f32.mrb[1].mxu0  ;;  %v10037_v31 = vadd.f32 %v3662_v0, %v3209_v24 }
 0x4a6   : > { %v3666_v2 = vpop.f32.mrb[2].mxu0  ;;  %v10039_v48 = vadd.f32 %v3664_v49, %v3209_v24 }
 0x4a7   : > { %v3668_v16 = vpop.f32.mrb[3].mxu0  ;;  %v10041_v44 = vadd.f32 %v3666_v2, %v3214_v19 }
 0x4a8   : > { %v10043_v23 = vadd.f32 %v3668_v16, %v3214_v19 }
 0x4ab   : > { %v3715_v47 = vpop.f32.mrb[0].mxu1 }
 0x4ac   : > { %v10038_v20 = vadd.f32 %v10037_v31, %v3715_v47  ;;  %v3672_v3 = vpop.f32.mrb[4].mxu0  ;;  %v3717_v29 = vpop.f32.mrb[1].mxu1 }
 0x4ad   : > { %v10040_v55 = vadd.f32 %v10039_v48, %v3717_v29  ;;  %v3674_v59 = vpop.f32.mrb[5].mxu0  ;;  %v3719_v4 = vpop.f32.mrb[2].mxu1  ;;  %v10045_v40 = vadd.f32 %v3672_v3, %v3219_v5 }
 0x4ae   : > { %v10042_v45 = vadd.f32 %v10041_v44, %v3719_v4  ;;  %v3676_v50 = vpop.f32.mrb[6].mxu0  ;;  %v3721_v53 = vpop.f32.mrb[3].mxu1  ;;  %v10047_v60 = vadd.f32 %v3674_v59, %v3219_v5 }
 0x4af   : > { %v10044_v46 = vadd.f32 %v10043_v23, %v3721_v53  ;;  %v3678_v56 = vpop.f32.mrb[7].mxu0  ;;  %v10049_v18 = vadd.f32 %v3676_v50, %v3224_v7 }
 0x4b0   : > { %v3734_v8 = vadd.f32 %v10042_v45, %v10038_v20  ;;  %v10051_v6 = vadd.f32 %v3678_v56, %v3224_v7 }
 0x4b1   : > { %v3743_v34 = vadd.f32 %v10044_v46, %v10040_v55 }
 0x4b3   : > { %v3725_v43 = vpop.f32.mrb[4].mxu1 }
 0x4b4   : > { %v10046_v14 = vadd.f32 %v10045_v40, %v3725_v43  ;;  %v3727_v27 = vpop.f32.mrb[5].mxu1 }
 0x4b5   : > { %v10048_v9 = vadd.f32 %v10047_v60, %v3727_v27  ;;  %v3729_v15 = vpop.f32.mrb[6].mxu1 }
 0x4b6   : > { %v3735_v41 = vadd.f32 %v10046_v14, %v3734_v8  ;;  %v10050_v26 = vadd.f32 %v10049_v18, %v3729_v15  ;;  %v3731_v36 = vpop.f32.mrb[7].mxu1 }
 0x4b7   : > { %v3744_v35 = vadd.f32 %v10048_v9, %v3743_v34  ;;  %v10052_v37 = vadd.f32 %v10051_v6, %v3731_v36 }
 0x4b8   : > { %v3736_v57 = vadd.f32 %v10050_v26, %v3735_v41 }
 0x4b9   : > { %v3745_v11 = vadd.f32 %v10052_v37, %v3744_v35 }
 0x4ba   : > { %v3737_v58 = vrot.slane %v3736_v57, 4 }
 0x4bb   : > { %v3746_v39 = vrot.slane %v3745_v11, 4 }
 0x4bc   : > { %v3738_v61 = vadd.f32 %v3737_v58, %v3736_v57 }
 0x4bd   : > { %v3747_v51 = vadd.f32 %v3746_v39, %v3745_v11 }
 0x4be   : > { %v3739_v21 = vrot.slane %v3738_v61, 2 }
 0x4bf   : > { %v3748_v63 = vrot.slane %v3747_v51, 2 }
 0x4c0   : > { %v3740_v1 = vadd.f32 %v3739_v21, %v3738_v61 }
 0x4c1   : > { %v3749_v38 = vadd.f32 %v3748_v63, %v3747_v51 }
 0x4c2   : > { %v3741_v62 = vrot.slane %v3740_v1, 1 }
 0x4c3   : > { %v3750_v10 = vrot.slane %v3749_v38, 1 }
 0x4c4   : > { %v3742_v42 = vadd.f32 %v3741_v62, %v3740_v1 }
 0x4c5   : > { %v3751_v30 = vadd.f32 %v3750_v10, %v3749_v38 }
 0x4c6   : > { %v3753_v12 = vmul.f32 0.03125, %v3742_v42  ;;  %v10492_v42 = vld [vmem:[%s14658_s4] sm:$0xff]  }
 0x4c7   : > { %v3754_v52 = vmul.f32 0.03125, %v3751_v30  ;;  %v10493_v30 = vld [vmem:[%s14658_s4 + $0x8] sm:$0xff]  }
 0x4c8   : > { %v3755_v0 = vsub.f32 %v10038_v20, %v3753_v12  ;;  %v3757_v49 = vsub.f32 %v10042_v45, %v3753_v12  ;;  %v3759_v2 = vsub.f32 %v10046_v14, %v3753_v12  ;;  %v3761_v24 = vsub.f32 %v10050_v26, %v3753_v12  ;;  %v10494_v12 = vld [vmem:[%s14658_s4 + $0x10] sm:$0xff]  }
 0x4c9   : > { %v3756_v16 = vsub.f32 %v10040_v55, %v3754_v52  ;;  %v3758_v19 = vsub.f32 %v10044_v46, %v3754_v52  ;;  %v3760_v31 = vsub.f32 %v10048_v9, %v3754_v52  ;;  %v3762_v48 = vsub.f32 %v10052_v37, %v3754_v52  ;;  %v10495_v52 = vld [vmem:[%s14658_s4 + $0x18] sm:$0xff]  }
 0x4ca   : > { %v3763_v47 = vmul.f32 %v3755_v0, %v3755_v0  ;;  %v3765_v44 = vmul.f32 %v3757_v49, %v3757_v49  ;;  %v3767_v23 = vmul.f32 %v3759_v2, %v3759_v2  ;;  %v3769_v53 = vmul.f32 %v3761_v24, %v3761_v24 }
 0x4cb   : > { %v3764_v3 = vmul.f32 %v3756_v16, %v3756_v16  ;;  %v3766_v29 = vmul.f32 %v3758_v19, %v3758_v19  ;;  %v3768_v4 = vmul.f32 %v3760_v31, %v3760_v31  ;;  %v3770_v56 = vmul.f32 %v3762_v48, %v3762_v48 }
 0x4cc   : > { %v3771_v59 = vadd.f32 %v3765_v44, %v3763_v47 }
 0x4cd   : > { %v3780_v50 = vadd.f32 %v3766_v29, %v3764_v3 }
 0x4ce   : > { %v3772_v5 = vadd.f32 %v3771_v59, %v3767_v23 }
 0x4cf   : > { %v3781_v8 = vadd.f32 %v3780_v50, %v3768_v4 }
 0x4d0   : > { %v3773_v20 = vadd.f32 %v3772_v5, %v3769_v53 }
 0x4d1   : > { %v3782_v45 = vadd.f32 %v3781_v8, %v3770_v56 }
 0x4d2   : > { %v3774_v34 = vrot.slane %v3773_v20, 4 }
 0x4d3   : > { %v3783_v7 = vrot.slane %v3782_v45, 4 }
 0x4d4   : > { %v3775_v55 = vadd.f32 %v3774_v34, %v3773_v20 }
 0x4d5   : > { %v3784_v46 = vadd.f32 %v3783_v7, %v3782_v45 }
 0x4d6   : > { %v3776_v40 = vrot.slane %v3775_v55, 2 }
 0x4d7   : > { %v3785_v60 = vrot.slane %v3784_v46, 2 }
 0x4d8   : > { %v3777_v43 = vadd.f32 %v3776_v40, %v3775_v55 }
 0x4d9   : > { %v3786_v14 = vadd.f32 %v3785_v60, %v3784_v46 }
 0x4da   : > { %v3778_v27 = vrot.slane %v3777_v43, 1 }
 0x4db   : > { %v3787_v18 = vrot.slane %v3786_v14, 1 }
 0x4dc   : > { %v3779_v6 = vadd.f32 %v3778_v27, %v3777_v43 }
 0x4dd   : > { %v3788_v9 = vadd.f32 %v3787_v18, %v3786_v14 }
 0x4de   : > { %v3789_v15 = vmul.f32 0.03125, %v3779_v6 }
 0x4df   : > { %v3790_v41 = vmul.f32 0.03125, %v3788_v9 }
 0x4e0   : > { %v3791_v26 = vadd.f32 1e-06, %v3789_v15 }
 0x4e1   : > { %v3792_v36 = vadd.f32 1e-06, %v3790_v41 }
 0x4e2   : > { %10605 = vrsqrt.f32 %v3791_v26 }
 0x4e3   : > { %10607 = vrsqrt.f32 %v3792_v36 }
 0x4ec   : > { %v10606_v35 = vpop.eup %10605 }
 0x4ed   : > { %v10608_v37 = vpop.eup %10607  ;;  %v3799_v57 = vmul.f32 %v10606_v35, %v3759_v2  ;;  %v3801_v11 = vmul.f32 %v10606_v35, %v3761_v24  ;;  %v3795_v58 = vmul.f32 %v10606_v35, %v3755_v0  ;;  %v3797_v39 = vmul.f32 %v10606_v35, %v3757_v49  ;;  %v3826_v49 = vpop.permute.xlu1 %3825 }
 0x4ee   : > { %v3802_v61 = vmul.f32 %v10608_v37, %v3762_v48  ;;  %v3796_v51 = vmul.f32 %v10608_v37, %v3756_v16  ;;  %v3798_v21 = vmul.f32 %v10608_v37, %v3758_v19  ;;  %v3800_v63 = vmul.f32 %v10608_v37, %v3760_v31  ;;  %v3831_v2 = vpop.permute.xlu0 %3830 }
 0x4ef   : > { %v3813_v1 = vpack.c.bf16 %v3801_v11, %v3799_v57  ;;  %v3811_v38 = vpack.c.bf16 %v3797_v39, %v3795_v58  ;;  %v10765_v0 = vmov 2  }
 0x4f0   : > { %v3812_v62 = vpack.c.bf16 %v3798_v21, %v3796_v51  ;;  %v3814_v10 = vpack.c.bf16 %v3802_v61, %v3800_v63  ;;  %10450 = vset.pattern.permute.xlu0 %v10765_v0  ;;  %10451 = vset.pattern.permute.xlu1 %v10765_v0 }
 0x4f1   : > { %4125 = vperm.xlu0 %10450, %v12182_v13   ;;  %4129 = vperm.xlu1 %10451, %v12189_v33   ;;  %v3836_v3 = vpop.permute.xlu1 %3835 }
 0x4f2   : > { %3895 = vmatprep.subr.bf16.mxu1 %v3812_v62  ;;  %v3846_v63 = vpop.permute.xlu0 %3845 }
 0x4f3   : > { %3896 = vmatpush1.bf16.msra.mxu1 %v3811_v38 }
 0x4f4   : > { %3897 = vmatprep.subr.bf16.mxu1 %v3814_v10 }
 0x4f5   : > { %4137 = vperm.xlu0 %10450, %v12194_v17   ;;  %4133 = vperm.xlu1 %10451, %v12201_v32   ;;  %v3841_v7 = vpop.permute.xlu1 %3840 }
 0x4f7   : > { %3898 = vmatpush1.bf16.msra.mxu1 %v3813_v1 }
 0x4f9   : > { %10452 = vset.pattern.permute.xlu1 %v12232_v54  ;;  %10453 = vset.pattern.permute.xlu0 %v12232_v54 }
 0x4fa   : > { %9472 = vmatmul.mubr.msk.bf16.vlgmr.msra.gmra.mrb[8].mxu1 %vm1248_vm3, %v10492_v42 }
 0x4fb   : > { %3937 = vmatprep.mubr.bf16.mxu1 %v12232_v54 }
 0x502   : > { %9473 = vmatmul.mubr.msk.bf16.gmra.mrb[12].mxu1 %vm1248_vm3, %v10493_v30 }
 0x503   : > { %3947 = vmatprep.mubr.bf16.mxu1 %v12232_v54 }
 0x50a   : > { %9474 = vmatmul.mubr.msk.bf16.gmra.mrb[16].mxu1 %vm1248_vm3, %v10494_v12 }
 0x50b   : > { %3957 = vmatprep.mubr.bf16.mxu1 %v12232_v54 }
 0x512   : > { %9475 = vmatmul.mubr.msk.bf16.gmra.mrb[20].mxu1 %vm1248_vm3, %v10495_v52 }
 0x513   : > { %4189 = vmatprep.mubr.bf16.mxu1 %v12232_v54 }
 0x5cd   : > { %v3929_v24 = vpop.f32.mrb[8].mxu1 }
 0x5ce   : > { %v3930_v16 = vadd.f32 %v3929_v24, %v3826_v49  ;;  %v3931_v19 = vpop.f32.mrb[9].mxu1 }
 0x5cf   : > { %v3932_v31 = vadd.f32 %v3931_v19, %v3826_v49  ;;  %v3933_v48 = vpop.f32.mrb[10].mxu1  ;;  %v3851_v49 = vpop.permute.xlu1 %3850 }
 0x5d0   : > { %v3984_v47 = vmul.f32 0.044715, %v3930_v16  ;;  %v3934_v44 = vadd.f32 %v3933_v48, %v3831_v2  ;;  %v3935_v13 = vpop.f32.mrb[11].mxu1  ;;  %v12285_v43 = vmul.f32 0.5, %v3930_v16 }
 0x5d1   : > { %v3985_v33 = vmul.f32 0.044715, %v3932_v31  ;;  %v3936_v29 = vadd.f32 %v3935_v13, %v3831_v2  ;;  %v12294_v21 = vmul.f32 0.5, %v3932_v31 }
 0x5d2   : > { %v4000_v17 = vmul.f32 %v3984_v47, %v3930_v16  ;;  %v3986_v23 = vmul.f32 0.044715, %v3934_v44  ;;  %v12296_v10 = vmul.f32 0.5, %v3934_v44 }
 0x5d3   : > { %v4001_v32 = vmul.f32 %v3985_v33, %v3932_v31  ;;  %v3987_v59 = vmul.f32 0.044715, %v3936_v29  ;;  %v12302_v0 = vmul.f32 0.5, %v3936_v29 }
 0x5d4   : > { %v4016_v4 = vmul.f32 %v4000_v17, %v3930_v16  ;;  %v4002_v50 = vmul.f32 %v3986_v23, %v3934_v44 }
 0x5d5   : > { %v4017_v53 = vmul.f32 %v4001_v32, %v3932_v31  ;;  %v4003_v5 = vmul.f32 %v3987_v59, %v3936_v29  ;;  %v3939_v56 = vpop.f32.mrb[12].mxu1 }
 0x5d6   : > { %v4032_v8 = vadd.f32 %v4016_v4, %v3930_v16  ;;  %v4018_v20 = vmul.f32 %v4002_v50, %v3934_v44  ;;  %v12283_v45 = vadd.f32 %v3939_v56, %v3836_v3  ;;  %v3941_v34 = vpop.f32.mrb[13].mxu1 }
 0x5d7   : > { %v4019_v55 = vmul.f32 %v4003_v5, %v3936_v29  ;;  %v3942_v46 = vadd.f32 %v3941_v34, %v3836_v3  ;;  %v3943_v40 = vpop.f32.mrb[14].mxu1  ;;  %v4033_v60 = vadd.f32 %v4017_v53, %v3932_v31 }
 0x5d8   : > { %v4048_v14 = vmul.f32 0.7978846, %v4032_v8  ;;  %v4034_v27 = vadd.f32 %v4018_v20, %v3934_v44  ;;  %v3988_v18 = vmul.f32 0.044715, %v12283_v45  ;;  %v12288_v6 = vadd.f32 %v3943_v40, %v3841_v7  ;;  %v3945_v9 = vpop.f32.mrb[15].mxu1 }
 0x5d9   : > { %v3989_v15 = vmul.f32 0.044715, %v3942_v46  ;;  %v3946_v41 = vadd.f32 %v3945_v9, %v3841_v7  ;;  %v4035_v26 = vadd.f32 %v4019_v55, %v3936_v29  ;;  %v4049_v36 = vmul.f32 0.7978846, %v4033_v60  ;;  %v3856_v55 = vpop.permute.xlu0 %3855 }
 0x5da   : > { %10609 = vtanh.f32 %v4048_v14  ;;  %v4050_v35 = vmul.f32 0.7978846, %v4034_v27  ;;  %v4004_v37 = vmul.f32 %v3988_v18, %v12283_v45  ;;  %v3990_v57 = vmul.f32 0.044715, %v12288_v6 }
 0x5db   : > { %v4005_v11 = vmul.f32 %v3989_v15, %v3942_v46  ;;  %v3991_v58 = vmul.f32 0.044715, %v3946_v41  ;;  %v4051_v39 = vmul.f32 0.7978846, %v4035_v26  ;;  %10611 = vtanh.f32 %v4049_v36 }
 0x5dc   : > { %10613 = vtanh.f32 %v4050_v35  ;;  %v4020_v61 = vmul.f32 %v4004_v37, %v12283_v45  ;;  %v4006_v51 = vmul.f32 %v3990_v57, %v12288_v6  ;;  %v12306_v19 = vmul.f32 0.5, %v3942_v46  ;;  %v3861_v35 = vpop.permute.xlu1 %3860 }
 0x5dd   : > { %v4021_v1 = vmul.f32 %v4005_v11, %v3942_v46  ;;  %v4007_v38 = vmul.f32 %v3991_v58, %v3946_v41  ;;  %v3949_v62 = vpop.f32.mrb[16].mxu1  ;;  %10615 = vtanh.f32 %v4051_v39  ;;  %v12321_v34 = vmul.f32 0.5, %v3946_v41 }
 0x5de   : > { %v4036_v42 = vadd.f32 %v4020_v61, %v12283_v45  ;;  %v4022_v30 = vmul.f32 %v4006_v51, %v12288_v6  ;;  %v12300_v12 = vadd.f32 %v3949_v62, %v3846_v63  ;;  %v3951_v52 = vpop.f32.mrb[17].mxu1 }
 0x5df   : > { %v4023_v2 = vmul.f32 %v4007_v38, %v3946_v41  ;;  %v12304_v24 = vadd.f32 %v3951_v52, %v3846_v63  ;;  %v3953_v16 = vpop.f32.mrb[18].mxu1  ;;  %v4037_v31 = vadd.f32 %v4021_v1, %v3942_v46 }
 0x5e0   : > { %v4052_v48 = vmul.f32 0.7978846, %v4036_v42  ;;  %v4038_v47 = vadd.f32 %v4022_v30, %v12288_v6  ;;  %v3992_v44 = vmul.f32 0.044715, %v12300_v12  ;;  %v12310_v13 = vadd.f32 %v3953_v16, %v3851_v49  ;;  %v3955_v3 = vpop.f32.mrb[19].mxu1 }
 0x5e1   : > { %v3993_v33 = vmul.f32 0.044715, %v12304_v24  ;;  %v12313_v29 = vadd.f32 %v3955_v3, %v3851_v49  ;;  %v4039_v17 = vadd.f32 %v4023_v2, %v3946_v41  ;;  %v4053_v23 = vmul.f32 0.7978846, %v4037_v31 }
 0x5e2   : > { %10617 = vtanh.f32 %v4052_v48  ;;  %v4054_v32 = vmul.f32 0.7978846, %v4038_v47  ;;  %v4008_v59 = vmul.f32 %v3992_v44, %v12300_v12  ;;  %v3994_v4 = vmul.f32 0.044715, %v12310_v13 }
 0x5e3   : > { %v4009_v50 = vmul.f32 %v3993_v33, %v12304_v24  ;;  %v3995_v53 = vmul.f32 0.044715, %v12313_v29  ;;  %v4055_v5 = vmul.f32 0.7978846, %v4039_v17  ;;  %10619 = vtanh.f32 %v4053_v23 }
 0x5e4   : > { %v10610_v56 = vpop.eup %10609  ;;  %10621 = vtanh.f32 %v4054_v32  ;;  %v4024_v8 = vmul.f32 %v4008_v59, %v12300_v12  ;;  %v4010_v20 = vmul.f32 %v3994_v4, %v12310_v13  ;;  %v3972_v33 = vmul.f32 0.5, %v12283_v45 }
 0x5e5   : > { %v10612_v7 = vpop.eup %10611  ;;  %v4025_v46 = vmul.f32 %v4009_v50, %v12304_v24  ;;  %v4011_v40 = vmul.f32 %v3995_v53, %v12313_v29  ;;  %v3959_v60 = vpop.f32.mrb[20].mxu1  ;;  %v4080_v14 = vadd.f32 1.0, %v10610_v56  ;;  %10623 = vtanh.f32 %v4055_v5 }
 0x5e6   : > { %v10614_v27 = vpop.eup %10613  ;;  %v4040_v18 = vadd.f32 %v4024_v8, %v12300_v12  ;;  %v4026_v9 = vmul.f32 %v4010_v20, %v12310_v13  ;;  %v12327_v15 = vadd.f32 %v3959_v60, %v3856_v55  ;;  %v3961_v26 = vpop.f32.mrb[21].mxu1  ;;  %v4081_v36 = vadd.f32 1.0, %v10612_v7 }
 0x5e7   : > { %v10616_v41 = vpop.eup %10615  ;;  %v4027_v37 = vmul.f32 %v4011_v40, %v12313_v29  ;;  %v12330_v57 = vadd.f32 %v3961_v26, %v3856_v55  ;;  %v3963_v11 = vpop.f32.mrb[22].mxu1  ;;  %v4082_v58 = vadd.f32 1.0, %v10614_v27  ;;  %v4096_v39 = vmul.f32 %v4080_v14, %v12285_v43 }
 0x5e8   : > { %v4056_v61 = vmul.f32 0.7978846, %v4040_v18  ;;  %v4042_v51 = vadd.f32 %v4026_v9, %v12310_v13  ;;  %v3996_v63 = vmul.f32 0.044715, %v12327_v15  ;;  %v12335_v1 = vadd.f32 %v3963_v11, %v3861_v35  ;;  %v3965_v38 = vpop.f32.mrb[23].mxu1 }
 0x5e9   : > { %v3997_v62 = vmul.f32 0.044715, %v12330_v57  ;;  %v12338_v42 = vadd.f32 %v3965_v38, %v3861_v35  ;;  %v4083_v30 = vadd.f32 1.0, %v10616_v41  ;;  %v4097_v52 = vmul.f32 %v4081_v36, %v12294_v21 }
 0x5ea   : > { %10625 = vtanh.f32 %v4056_v61  ;;  %v4058_v49 = vmul.f32 0.7978846, %v4042_v51  ;;  %v4012_v2 = vmul.f32 %v3996_v63, %v12327_v15  ;;  %v3998_v43 = vmul.f32 0.044715, %v12335_v1 }
 0x5eb   : > { %v4013_v16 = vmul.f32 %v3997_v62, %v12330_v57  ;;  %v3999_v31 = vmul.f32 0.044715, %v12338_v42  ;;  %v4099_v48 = vmul.f32 %v4083_v30, %v12302_v0  ;;  %v4098_v47 = vmul.f32 %v4082_v58, %v12296_v10 }
 0x5ec   : > { %v10618_v44 = vpop.eup %10617  ;;  %10627 = vtanh.f32 %v4058_v49  ;;  %v4028_v3 = vmul.f32 %v4012_v2, %v12327_v15  ;;  %v4014_v21 = vmul.f32 %v3998_v43, %v12335_v1  ;;  %v3974_v4 = vmul.f32 0.5, %v12288_v6 }
 0x5ed   : > { %v10620_v17 = vpop.eup %10619  ;;  %v4015_v23 = vmul.f32 %v3999_v31, %v12338_v42  ;;  %v4117_v32 = vpack.c.bf16 %v4099_v48, %v4097_v52  ;;  %v4116_v59 = vpack.c.bf16 %v4098_v47, %v4096_v39  ;;  %v4084_v5 = vadd.f32 1.0, %v10618_v44 }
 0x5ee   : > { %v10622_v50 = vpop.eup %10621  ;;  %v4044_v0 = vadd.f32 %v4028_v3, %v12327_v15  ;;  %v4030_v10 = vmul.f32 %v4014_v21, %v12335_v1  ;;  %v4085_v53 = vadd.f32 1.0, %v10620_v17  ;;  %v4029_v8 = vmul.f32 %v4013_v16, %v12330_v57 }
 0x5ef   : > { %v10624_v56 = vpop.eup %10623  ;;  %4157 = vmatprep.subr.bf16.mxu1 %v4117_v32  ;;  %v4086_v20 = vadd.f32 1.0, %v10622_v50  ;;  %v4041_v45 = vadd.f32 %v4025_v46, %v12304_v24  ;;  %v4043_v7 = vadd.f32 %v4027_v37, %v12313_v29  ;;  %v4031_v6 = vmul.f32 %v4015_v23, %v12338_v42 }
 0x5f0   : > { %v4060_v55 = vmul.f32 0.7978846, %v4044_v0  ;;  %v4046_v40 = vadd.f32 %v4030_v10, %v12335_v1  ;;  %4158 = vmatpush1.bf16.msra.mxu1 %v4116_v59  ;;  %v4087_v60 = vadd.f32 1.0, %v10624_v56  ;;  %v4100_v14 = vmul.f32 %v4084_v5, %v3972_v33  ;;  %v10496_v56 = vld [vmem:[%s14659_s5] sm:$0xff]  }
 0x5f1   : > { %v4102_v27 = vmul.f32 %v4086_v20, %v3974_v4  ;;  %v4057_v18 = vmul.f32 0.7978846, %v4041_v45  ;;  %v4059_v9 = vmul.f32 0.7978846, %v4043_v7  ;;  %v4101_v36 = vmul.f32 %v4085_v53, %v12306_v19  ;;  %v4233_v20 = vld [vmem:[%s369_s16 + $0x10] sm:$0xff]  ;;  %v4235_v45 = vld [vmem:[%s369_s16 + $0x20] sm:$0xff] }
 0x5f2   : > { %10629 = vtanh.f32 %v4060_v55  ;;  %v4062_v26 = vmul.f32 0.7978846, %v4046_v40  ;;  %v4103_v41 = vmul.f32 %v4087_v60, %v12321_v34  ;;  %v4045_v11 = vadd.f32 %v4029_v8, %v12330_v57  ;;  %v4232_v8 = vld [vmem:[%s369_s16 + $0x8] sm:$0xff]  ;;  %v4234_v7 = vld [vmem:[%s369_s16 + $0x18] sm:$0xff]  ;;  %v4237_v55 = vld [vmem:[%s369_s16 + $0x30] sm:$0xff] }
 0x5f3   : > { %v4118_v46 = vpack.c.bf16 %v4102_v27, %v4100_v14  ;;  %10631 = vtanh.f32 %v4057_v18  ;;  %v4047_v39 = vadd.f32 %v4031_v6, %v12338_v42  ;;  %v3976_v63 = vmul.f32 0.5, %v12300_v12  ;;  %4247 = vperm.xlu0 %10453, %v4232_v8   ;;  %v4236_v40 = vld [vmem:[%s369_s16 + $0x28] sm:$0xff]  ;;  %v4239_v6 = vld [vmem:[%s369_s16 + $0x40] sm:$0xff]  ;;  %v4238_v60 = vld [vmem:[%s369_s16 + $0x38] sm:$0xff]  ;;  %v4126_v14 = vpop.permute.xlu0 %4125  ;;  %v4130_v18 = vpop.permute.xlu1 %4129 }
 0x5f4   : > { %v10626_v35 = vpop.eup %10625  ;;  %10633 = vtanh.f32 %v4062_v26  ;;  %v4119_v37 = vpack.c.bf16 %v4103_v41, %v4101_v36  ;;  %v4061_v51 = vmul.f32 0.7978846, %v4045_v11  ;;  %v3978_v19 = vmul.f32 0.5, %v12310_v13  ;;  %v10658_v11 = vld [vmem:[%s10861_s19 + $0x10] sm:$0xff] }
 0x5f5   : > { %10635 = vtanh.f32 %v4059_v9  ;;  %v4088_v58 = vadd.f32 1.0, %v10626_v35  ;;  %v4063_v38 = vmul.f32 0.7978846, %v4047_v39  ;;  %v3980_v47 = vmul.f32 0.5, %v12327_v15  ;;  %v10659_v39 = vld [vmem:[%s10861_s19] sm:$0xff] }
 0x5f6   : > { %v10628_v61 = vpop.eup %10627  ;;  %4159 = vmatprep.subr.bf16.mxu1 %v4119_v37  ;;  %10637 = vtanh.f32 %v4061_v51  ;;  %v3982_v44 = vmul.f32 0.5, %v12335_v1  ;;  %v3977_v13 = vmul.f32 0.5, %v12304_v24  ;;  %v3979_v3 = vmul.f32 0.5, %v12313_v29  ;;  %v10660_v51 = vld [vmem:[%s10861_s19 + $0x18] sm:$0xff] }
 0x5f7   : > { %4160 = vmatpush1.bf16.msra.mxu1 %v4118_v46  ;;  %v4090_v34 = vadd.f32 1.0, %v10628_v61  ;;  %v4104_v62 = vmul.f32 %v4088_v58, %v3976_v63  ;;  %10639 = vtanh.f32 %v4063_v38  ;;  %v3981_v53 = vmul.f32 0.5, %v12330_v57  ;;  %v10497_v57 = vld [vmem:[%s14659_s5 + $0x8] sm:$0xff]   ;;  %4262 = vperm.xlu0 %10453, %v4235_v45   ;;  %v4134_v38 = vpop.permute.xlu1 %4133 }
 0x5f8   : > { %v3983_v15 = vmul.f32 0.5, %v12338_v42  ;;  %v4231_v42 = vld [vmem:[%s369_s16] sm:$0xff] }
 0x5f9   : > { %v4106_v30 = vmul.f32 %v4090_v34, %v3978_v19  ;;  %4242 = vperm.xlu1 %10452, %v4231_v42   ;;  %v10661_v19 = vld [vmem:[%s10861_s19 + $0x8] sm:$0xff] }
 0x5fb   : > { %v4120_v52 = vpack.c.bf16 %v4106_v30, %v4104_v62  ;;  %4272 = vperm.xlu0 %10453, %v4237_v55  }
 0x5fc   : > { %v10630_v49 = vpop.eup %10629 }
 0x5fd   : > { %v10632_v2 = vpop.eup %10631  ;;  %v4092_v43 = vadd.f32 1.0, %v10630_v49  ;;  %4252 = vperm.xlu1 %10452, %v4233_v20  }
 0x5fe   : > { %v10634_v16 = vpop.eup %10633  ;;  %v4089_v31 = vadd.f32 1.0, %v10632_v2 }
 0x5ff   : > { %v10636_v48 = vpop.eup %10635  ;;  %v4094_v12 = vadd.f32 1.0, %v10634_v16  ;;  %v4108_v33 = vmul.f32 %v4092_v43, %v3980_v47  ;;  %4282 = vperm.xlu0 %10453, %v4239_v6   ;;  %v4138_v43 = vpop.permute.xlu0 %4137 }
 0x600   : > { %v4091_v21 = vadd.f32 1.0, %v10636_v48  ;;  %v10638_v23 = vpop.eup %10637  ;;  %v4105_v32 = vmul.f32 %v4089_v31, %v3977_v13 }
 0x601   : > { %v4110_v17 = vmul.f32 %v4094_v12, %v3982_v44  ;;  %v10640_v4 = vpop.eup %10639  ;;  %v4093_v50 = vadd.f32 1.0, %v10638_v23  ;;  %4257 = vperm.xlu1 %10452, %v4234_v7   ;;  %v10662_v12 = vld [vmem:[%s10861_s19 + $0x20] sm:$0xff]  ;;  %v10665_v23 = vld [vmem:[%s10861_s19 + $0x38] sm:$0xff] }
 0x602   : > { %v4107_v59 = vmul.f32 %v4091_v21, %v3979_v3  ;;  %v4095_v1 = vadd.f32 1.0, %v10640_v4  ;;  %v10663_v3 = vld [vmem:[%s10861_s19 + $0x30] sm:$0xff] }
 0x603   : > { %v4122_v0 = vpack.c.bf16 %v4110_v17, %v4108_v33  ;;  %v4109_v24 = vmul.f32 %v4093_v50, %v3981_v53  ;;  %v10664_v33 = vld [vmem:[%s10861_s19 + $0x28] sm:$0xff]  ;;  %v10498_v50 = vld [vmem:[%s14660_s6] sm:$0xff]   ;;  %v10501_v53 = vld [vmem:[%s14660_s6 + $0x18] sm:$0xff]   ;;  %s14788_s19 = smov 94  }
 0x604   : > { %v4121_v10 = vpack.c.bf16 %v4107_v59, %v4105_v32  ;;  %v4111_v5 = vmul.f32 %v4095_v1, %v3983_v15  ;;  %v10502_v15 = vld [vmem:[%s14660_s6 + $0x20] ss:$0 sps:$4 sm:$0xff]  }
 0x605   : > { %4267 = vperm.xlu1 %10452, %v4236_v40  }
 0x606   : > { %4161 = vmatprep.subr.bf16.mxu1 %v4121_v10  ;;  %v4123_v29 = vpack.c.bf16 %v4111_v5, %v4109_v24  ;;  %v10500_v10 = vld [vmem:[%s14660_s6 + $0x10] sm:$0xff]  }
 0x607   : > { %4162 = vmatpush1.bf16.msra.mxu1 %v4120_v52 }
 0x608   : > { %4163 = vmatprep.subr.bf16.mxu1 %v4123_v29 }
 0x609   : > { %4277 = vperm.xlu1 %10452, %v4238_v60  }
 0x60b   : > { %4164 = vmatpush1.bf16.msra.mxu1 %v4122_v0  ;;  %v10499_v0 = vld [vmem:[%s14660_s6 + $0x8] sm:$0xff]  }
 0x60e   : > { %9478 = vmatmul.mubr.msk.bf16.vlgmr.msra.gmra.mrb[24].mxu1 %vm1946_vm13, %v10496_v56 }
 0x60f   : > { %4199 = vmatprep.mubr.bf16.mxu1 %v12232_v54 }
 0x616   : > { %9479 = vmatmul.mubr.msk.bf16.gmra.mrb[28].mxu1 %vm1946_vm13, %v10497_v57  ;;  %vm4405_vm13 = vcmask 273408  }
 0x617   : > { %4355 = vmatprep.mubr.bf16.mxu1 %v12232_v54  ;;  %4406 = vst.msk [vmem:[#allocation3 + $0x8] sm:$0xf] %vm4405_vm13, %v12232_v54  ;;  %4408 = vst.msk [vmem:[#allocation3 + $0x14] sm:$0xf] %vm4405_vm13, %v12232_v54 }
 0x618   : > { %4410 = vst.msk [vmem:[#allocation3 + $0x20] sm:$0xf] %vm4405_vm13, %v12232_v54  ;;  %4412 = vst.msk [vmem:[#allocation3 + $0x2c] sm:$0xf] %vm4405_vm13, %v12232_v54 }
 0x619   : > { %4414 = vst.msk [vmem:[#allocation3 + $0x38] sm:$0xf] %vm4405_vm13, %v12232_v54  ;;  %4416 = vst.msk [vmem:[#allocation3 + $0x44] sm:$0xf] %vm4405_vm13, %v12232_v54 }
 0x61a   : > { %4418 = vst.msk [vmem:[#allocation3 + $0x50] sm:$0xf] %vm4405_vm13, %v12232_v54  ;;  %4420 = vst.msk [vmem:[#allocation3 + $0x5c] sm:$0xf] %vm4405_vm13, %v12232_v54 }
 0x61b   : > { %4422 = vst.msk [vmem:[#allocation3 + $0x68] sm:$0xf] %vm4405_vm13, %v12232_v54 }
 0x672   : > { %v4248_v5 = vpop.permute.xlu0 %4247 }
 0x678   : > { %v4243_v1 = vpop.permute.xlu1 %4242 }
 0x67c   : > { %v4253_v7 = vpop.permute.xlu1 %4252 }
 0x6e1   : > { %v4191_v27 = vpop.f32.mrb[24].mxu1 }
 0x6e2   : > { %v4193_v9 = vpop.f32.mrb[25].mxu1  ;;  %v4192_v26 = vadd.f32 %v4191_v27, %v4126_v14  ;;  %v4258_v27 = vpop.permute.xlu1 %4257 }
 0x6e3   : > { %v4195_v36 = vpop.f32.mrb[26].mxu1  ;;  %v4194_v41 = vadd.f32 %v4193_v9, %v4126_v14 }
 0x6e4   : > { %v4196_v46 = vadd.f32 %v4195_v36, %v4130_v18  ;;  %v4197_v35 = vpop.f32.mrb[27].mxu1  ;;  %v4210_v61 = vadd.f32 %v10659_v39, %v4192_v26 }
 0x6e5   : > { %v4198_v37 = vadd.f32 %v4197_v35, %v4130_v18  ;;  %v4211_v34 = vadd.f32 %v10661_v19, %v4194_v41 }
 0x6e6   : > { %v4212_v58 = vadd.f32 %v10658_v11, %v4196_v46 }
 0x6e7   : > { %v4213_v63 = vadd.f32 %v10660_v51, %v4198_v37  ;;  %v4263_v37 = vpop.permute.xlu0 %4262 }
 0x6e8   : > { %v4227_v62 = vpack.c.bf16 %v4212_v58, %v4210_v61  ;;  %v4268_v61 = vpop.permute.xlu1 %4267 }
 0x6e9   : > { %v4201_v30 = vpop.f32.mrb[28].mxu1  ;;  %v4228_v52 = vpack.c.bf16 %v4213_v63, %v4211_v34 }
 0x6ea   : > { %v4202_v49 = vadd.f32 %v4201_v30, %v4134_v38  ;;  %v4203_v2 = vpop.f32.mrb[29].mxu1 }
 0x6eb   : > { %v4204_v16 = vadd.f32 %v4203_v2, %v4134_v38  ;;  %v4205_v31 = vpop.f32.mrb[30].mxu1  ;;  %4323 = vmatprep.subr.bf16.mxu1 %v4228_v52  ;;  %v4273_v52 = vpop.permute.xlu0 %4272 }
 0x6ec   : > { %v4206_v48 = vadd.f32 %v4205_v31, %v4138_v43  ;;  %v4207_v47 = vpop.f32.mrb[31].mxu1  ;;  %4324 = vmatpush1.bf16.msra.mxu1 %v4227_v62  ;;  %v4214_v13 = vadd.f32 %v10662_v12, %v4202_v49 }
 0x6ed   : > { %v4208_v44 = vadd.f32 %v4207_v47, %v4138_v43  ;;  %v4215_v17 = vadd.f32 %v10664_v33, %v4204_v16  ;;  %v4278_v16 = vpop.permute.xlu1 %4277 }
 0x6ee   : > { %v4216_v21 = vadd.f32 %v10663_v3, %v4206_v48 }
 0x6ef   : > { %v4217_v32 = vadd.f32 %v10665_v23, %v4208_v44 }
 0x6f0   : > { %v4229_v59 = vpack.c.bf16 %v4216_v21, %v4214_v13  ;;  %v4283_v21 = vpop.permute.xlu0 %4282 }
 0x6f1   : > { %v4230_v4 = vpack.c.bf16 %v4217_v32, %v4215_v17 }
 0x6f3   : > { %4325 = vmatprep.subr.bf16.mxu1 %v4230_v4 }
 0x6f4   : > { %4326 = vmatpush1.bf16.msra.mxu1 %v4229_v59 }
 0x6f7   : > { %9485 = vmatmul.mubr.msk.bf16.vlgmr.msra.gmra.mrb[32].mxu1 %vm1248_vm3, %v10498_v50 }
 0x6f8   : > { %4365 = vmatprep.mubr.bf16.mxu1 %v12232_v54 }
 0x6ff   : > { %9486 = vmatmul.mubr.msk.bf16.gmra.mrb[36].mxu1 %vm1248_vm3, %v10499_v0 }
 0x700   : > { %4375 = vmatprep.mubr.bf16.mxu1 %v12232_v54 }
 0x707   : > { %9487 = vmatmul.mubr.msk.bf16.gmra.mrb[40].mxu1 %vm1248_vm3, %v10500_v10  ;;  %v14720_v10 = vmov 0 }
 0x708   : > { %4385 = vmatprep.mubr.bf16.mxu1 %v12232_v54  ;;  %v14721_v10 = vsel %vm12442_vm10, 4294967295, %v14720_v10 }
 0x709   : > { %14722 = vst [vmem:[#allocation6_spill] sm:$0xff] %v14721_v10 }
 0x70f   : > { %9488 = vmatmul.mubr.msk.bf16.gmra.mrb[44].mxu1 %vm1248_vm3, %v10501_v53 }
 0x710   : > { %4395 = vmatprep.mubr.bf16.mxu1 %v12232_v54 }
 0x717   : > { %9489 = vmatmul.mubr.msk.bf16.gmra.mrb[48].mxu1 %vm1248_vm3, %v10502_v15 }
 0x718   : > { %4754 = vmatprep.mubr.bf16.mxu1 %v12232_v54 }
 0x7ca   : > { %v4357_v24 = vpop.f32.mrb[32].mxu1 }
 0x7cb   : > { %v4358_v29 = vadd.f32 %v4357_v24, %v4243_v1  ;;  %v4359_v56 = vpop.f32.mrb[33].mxu1 }
 0x7cc   : > { %v4360_v57 = vadd.f32 %v4359_v56, %v4243_v1  ;;  %v4361_v42 = vpop.f32.mrb[34].mxu1 }
 0x7cd   : > { %v4363_v8 = vpop.f32.mrb[35].mxu1  ;;  %v4362_v20 = vadd.f32 %v4361_v42, %v4248_v5 }
 0x7ce   : > { %v10016_v45 = vpack.c.bf16 %v4360_v57, %v4358_v29  ;;  %v4364_v55 = vadd.f32 %v4363_v8, %v4248_v5 }
 0x7d0   : > { %v10017_v40 = vpack.c.bf16 %v4364_v55, %v4362_v20  ;;  %4470 = vrot.lane.b32.xlu1 %v10016_v45, %s10686_s27 }
 0x7d2   : > { %v4367_v6 = vpop.f32.mrb[36].mxu1  ;;  %4472 = vrot.lane.b32.xlu0 %v10017_v40, %s10686_s27 }
 0x7d3   : > { %v4368_v60 = vadd.f32 %v4367_v6, %v4253_v7  ;;  %v4369_v14 = vpop.f32.mrb[37].mxu1 }
 0x7d4   : > { %v4370_v18 = vadd.f32 %v4369_v14, %v4253_v7  ;;  %v4371_v9 = vpop.f32.mrb[38].mxu1 }
 0x7d5   : > { %v4372_v26 = vadd.f32 %v4371_v9, %v4258_v27  ;;  %v4373_v36 = vpop.f32.mrb[39].mxu1 }
 0x7d6   : > { %v10018_v41 = vpack.c.bf16 %v4370_v18, %v4368_v60  ;;  %v4374_v46 = vadd.f32 %v4373_v36, %v4258_v27 }
 0x7d8   : > { %v10019_v35 = vpack.c.bf16 %v4374_v46, %v4372_v26  ;;  %4474 = vrot.lane.b32.xlu1 %v10018_v41, %s10686_s27 }
 0x7da   : > { %v4377_v11 = vpop.f32.mrb[40].mxu1  ;;  %4476 = vrot.lane.b32.xlu0 %v10019_v35, %s10686_s27 }
 0x7db   : > { %v4378_v58 = vadd.f32 %v4377_v11, %v4263_v37  ;;  %v4379_v39 = vpop.f32.mrb[41].mxu1 }
 0x7dc   : > { %v4380_v51 = vadd.f32 %v4379_v39, %v4263_v37  ;;  %v4381_v63 = vpop.f32.mrb[42].mxu1 }
 0x7dd   : > { %v4382_v19 = vadd.f32 %v4381_v63, %v4268_v61  ;;  %v4383_v34 = vpop.f32.mrb[43].mxu1 }
 0x7de   : > { %v10020_v38 = vpack.c.bf16 %v4380_v51, %v4378_v58  ;;  %v4384_v62 = vadd.f32 %v4383_v34, %v4268_v61  ;;  %v14724_v34 = vmov 0 }
 0x7e0   : > { %v10021_v30 = vpack.c.bf16 %v4384_v62, %v4382_v19  ;;  %4478 = vrot.lane.b32.xlu1 %v10020_v38, %s10686_s27 }
 0x7e2   : > { %v4387_v49 = vpop.f32.mrb[44].mxu1  ;;  %4480 = vrot.lane.b32.xlu0 %v10021_v30, %s10686_s27 }
 0x7e3   : > { %v4388_v2 = vadd.f32 %v4387_v49, %v4273_v52  ;;  %v4389_v43 = vpop.f32.mrb[45].mxu1 }
 0x7e4   : > { %v4390_v31 = vadd.f32 %v4389_v43, %v4273_v52  ;;  %v4391_v48 = vpop.f32.mrb[46].mxu1 }
 0x7e5   : > { %v4392_v47 = vadd.f32 %v4391_v48, %v4278_v16  ;;  %v4393_v44 = vpop.f32.mrb[47].mxu1 }
 0x7e6   : > { %v10022_v12 = vpack.c.bf16 %v4390_v31, %v4388_v2  ;;  %v4394_v13 = vadd.f32 %v4393_v44, %v4278_v16 }
 0x7e8   : > { %v10023_v3 = vpack.c.bf16 %v4394_v13, %v4392_v47  ;;  %4482 = vrot.lane.b32.xlu1 %v10022_v12, %s10686_s27 }
 0x7ea   : > { %v4397_v33 = vpop.f32.mrb[48].mxu1  ;;  %4484 = vrot.lane.b32.xlu0 %v10023_v3, %s10686_s27 }
 0x7eb   : > { %v4398_v17 = vadd.f32 %v4397_v33, %v4283_v21  ;;  %v4399_v23 = vpop.f32.mrb[49].mxu1 }
 0x7ec   : > { %v4400_v32 = vadd.f32 %v4399_v23, %v4283_v21  ;;  %v4401_v59 = vpop.f32.mrb[50].mxu1 }
 0x7ed   : > { %v4402_v4 = vpop.f32.mrb[51].mxu1 }
 0x7ee   : > { %v10024_v50 = vpack.c.bf16 %v4400_v32, %v4398_v17  ;;  %4917 = vrot.lane.b32.xlu0 %v10895_v28, %s10681_s22  ;;  %s14737_s22 = smov 112  }
 0x7f0   : > { %4486 = vrot.lane.b32.xlu1 %v10024_v50, %s10686_s27 }
 0x7f4   : > { %5154 = vrot.lane.b32.xlu1 %v10884_v25, %s10685_s26  ;;  %s14739_s26 = smov 111  }
 0x7f8   : > { %5544 = vrot.lane.b32.xlu1 %v10895_v28, %s10687_s28  ;;  %s14746_s28 = smov 110  }
 0x842   : > { %v4471_v0 = vpop.permute.xlu1 %4470 }
 0x843   : > { %v4488_v53 = vrot.slane %v4471_v0, 4 }
 0x844   : > { %v4473_v15 = vpop.permute.xlu0 %4472 }
 0x845   : > { %v4497_v1 = vsel %vm951_vm4, %v4488_v53, %v4471_v0  ;;  %4529 = vst.msk [vmem:[#allocation3 + $0x8] sm:$0xf] %vm14715_vm0, %v4488_v53  ;;  %v4489_v24 = vrot.slane %v4473_v15, 4 }
 0x846   : > { %4527 = vst.msk [vmem:[#allocation3] sm:$0xff] %vm12442_vm10, %v4497_v1 }
 0x847   : > { %v4498_v5 = vsel %vm951_vm4, %v4489_v24, %v4473_v15  ;;  %4531 = vst.msk [vmem:[#allocation3 + $0x14] sm:$0xf] %vm14715_vm0, %v4489_v24 }
 0x848   : > { %4530 = vst.msk [vmem:[#allocation3 + $0xc] sm:$0xff] %vm12442_vm10, %v4498_v5 }
 0x84a   : > { %v4475_v29 = vpop.permute.xlu1 %4474 }
 0x84b   : > { %v4490_v56 = vrot.slane %v4475_v29, 4 }
 0x84c   : > { %v4477_v57 = vpop.permute.xlu0 %4476  ;;  %v12458_v20 = vld [vmem:[#allocation3 + $0x8] sm:$0xf] }
 0x84d   : > { %v4499_v42 = vsel %vm951_vm4, %v4490_v56, %v4475_v29  ;;  %4533 = vst.msk [vmem:[#allocation3 + $0x20] sm:$0xf] %vm14715_vm0, %v4490_v56  ;;  %v4491_v8 = vrot.slane %v4477_v57, 4  ;;  %v12468_v40 = vld [vmem:[#allocation3] sm:$0xff] }
 0x84e   : > { %4532 = vst.msk [vmem:[#allocation3 + $0x18] sm:$0xff] %vm12442_vm10, %v4499_v42  ;;  %v12460_v45 = vld [vmem:[#allocation3 + $0x14] sm:$0xf] }
 0x84f   : > { %v4500_v7 = vsel %vm951_vm4, %v4491_v8, %v4477_v57  ;;  %4535 = vst.msk [vmem:[#allocation3 + $0x2c] sm:$0xf] %vm14715_vm0, %v4491_v8  ;;  %v12466_v55 = vcombine.low %v12458_v20, %v12460_v45  ;;  %v12470_v6 = vld [vmem:[#allocation3 + $0xc] sm:$0xff] }
 0x850   : > { %4534 = vst.msk [vmem:[#allocation3 + $0x24] sm:$0xff] %vm12442_vm10, %v4500_v7  ;;  %v12476_v60 = vcombine.high %v12468_v40, %v12470_v6  ;;  %v12484_v9 = vcombine.low %v12468_v40, %v12470_v6 }
 0x851   : > { %4661 = vrot.lane.b32.xlu0 %v12466_v55, %s10694_s18 }
 0x852   : > { %4659 = vrot.lane.b32.xlu1 %v12476_v60, %s10694_s18  ;;  %v4479_v14 = vpop.permute.xlu1 %4478 }
 0x853   : > { %v4492_v27 = vrot.slane %v4479_v14, 4 }
 0x854   : > { %v4481_v18 = vpop.permute.xlu0 %4480  ;;  %v12547_v3 = vld [vmem:[#allocation3 + $0x20] sm:$0xf] }
 0x855   : > { %v4501_v26 = vsel %vm951_vm4, %v4492_v27, %v4479_v14  ;;  %4537 = vst.msk [vmem:[#allocation3 + $0x38] sm:$0xf] %vm14715_vm0, %v4492_v27  ;;  %v4493_v36 = vrot.slane %v4481_v18, 4  ;;  %v12532_v48 = vld [vmem:[#allocation3 + $0x18] sm:$0xff] }
 0x856   : > { %4536 = vst.msk [vmem:[#allocation3 + $0x30] sm:$0xff] %vm12442_vm10, %v4501_v26  ;;  %4657 = vrot.lane.b32.xlu1 %v12484_v9, %s10694_s18  ;;  %14728 = vst [vmem:[#allocation10_spill] sm:$0xff] %v12532_v48  ;;  %v12540_v12 = vld [vmem:[#allocation3 + $0x2c] sm:$0xf] }
 0x857   : > { %v4502_v41 = vsel %vm951_vm4, %v4493_v36, %v4481_v18  ;;  %4539 = vst.msk [vmem:[#allocation3 + $0x44] sm:$0xf] %vm14715_vm0, %v4493_v36  ;;  %v12528_v31 = vld [vmem:[#allocation3 + $0x24] sm:$0xff]  ;;  %v12551_v21 = vcombine.low %v12547_v3, %v12540_v12 }
 0x858   : > { %4538 = vst.msk [vmem:[#allocation3 + $0x3c] sm:$0xff] %vm12442_vm10, %v4502_v41  ;;  %14727 = vst [vmem:[#allocation9_spill] sm:$0xff] %v12528_v31  ;;  %v12536_v47 = vcombine.high %v12532_v48, %v12528_v31  ;;  %v12545_v13 = vcombine.low %v12532_v48, %v12528_v31 }
 0x85a   : > { %v4483_v46 = vpop.permute.xlu1 %4482 }
 0x85b   : > { %v4494_v35 = vrot.slane %v4483_v46, 4 }
 0x85c   : > { %v4485_v37 = vpop.permute.xlu0 %4484  ;;  %v12573_v53 = vld [vmem:[#allocation3 + $0x38] sm:$0xf] }
 0x85d   : > { %v4503_v11 = vsel %vm951_vm4, %v4494_v35, %v4483_v46  ;;  %4541 = vst.msk [vmem:[#allocation3 + $0x50] sm:$0xf] %vm14715_vm0, %v4494_v35  ;;  %v4495_v58 = vrot.slane %v4485_v37, 4  ;;  %v12590_v29 = vld [vmem:[#allocation3 + $0x30] sm:$0xff] }
 0x85e   : > { %4540 = vst.msk [vmem:[#allocation3 + $0x48] sm:$0xff] %vm12442_vm10, %v4503_v11  ;;  %v12570_v50 = vld [vmem:[#allocation3 + $0x44] sm:$0xf] }
 0x85f   : > { %v4504_v39 = vsel %vm951_vm4, %v4495_v58, %v4485_v37  ;;  %4543 = vst.msk [vmem:[#allocation3 + $0x5c] sm:$0xf] %vm14715_vm0, %v4495_v58  ;;  %v12577_v15 = vcombine.low %v12573_v53, %v12570_v50  ;;  %v12579_v1 = vld [vmem:[#allocation3 + $0x3c] sm:$0xff] }
 0x860   : > { %4542 = vst.msk [vmem:[#allocation3 + $0x54] sm:$0xff] %vm12442_vm10, %v4504_v39  ;;  %v4918_v61 = vpop.permute.xlu0 %4917  ;;  %v12594_v56 = vcombine.high %v12590_v29, %v12579_v1  ;;  %v12603_v8 = vcombine.low %v12590_v29, %v12579_v1 }
 0x861   : > { %v4919_v51 = vrot.slane %v4918_v61, 4 }
 0x862   : > { %v4487_v63 = vpop.permute.xlu1 %4486 }
 0x863   : > { %v12505_v19 = vsel %vm612_vm7, %v4919_v51, %v4918_v61  ;;  %vm12507_vm2 = vcmp.ne.s16.totalorder %v4919_v51, 0  ;;  %v4496_v38 = vrot.slane %v4487_v63, 4 }
 0x864   : > { %14723 = vst [vmem:[#allocation7_spill] sm:$0xff] %v12505_v19  ;;  %v14725_v34 = vsel %vm12507_vm2, 4294967295, %v14724_v34  ;;  %vm14713_vm11 = vcmp.ne.s16.totalorder %v12505_v19, 0  ;;  %v4924_v62 = vsel %vm12507_vm2, %v12458_v20, 0  ;;  %v4926_v30 = vsel %vm12507_vm2, %v12460_v45, 0 }
 0x865   : > { %14726 = vst [vmem:[#allocation8_spill] sm:$0xff] %v14725_v34  ;;  %v4505_v52 = vsel %vm951_vm4, %v4496_v38, %v4487_v63  ;;  %4545 = vst.msk [vmem:[#allocation3 + $0x68] sm:$0xf] %vm14715_vm0, %v4496_v38  ;;  %v9553_v49 = vcombine.low %v4924_v62, %v4926_v30  ;;  %v4923_v2 = vsel %vm14713_vm11, %v12468_v40, 0  ;;  %v4925_v43 = vsel %vm14713_vm11, %v12470_v6, 0  ;;  %v12605_v7 = vld [vmem:[#allocation3 + $0x48] sm:$0xff] }
 0x866   : > { %4544 = vst.msk [vmem:[#allocation3 + $0x60] sm:$0xff] %vm12442_vm10, %v4505_v52  ;;  %v9552_v16 = vcombine.high %v4923_v2, %v4925_v43  ;;  %v9551_v44 = vcombine.low %v4923_v2, %v4925_v43  ;;  %v4927_v33 = vsel %vm14713_vm11, %v12532_v48, 0  ;;  %v4929_v17 = vsel %vm14713_vm11, %v12528_v31, 0  ;;  %v5155_v36 = vpop.permute.xlu1 %5154  ;;  %v12634_v39 = vld [vmem:[#allocation3 + $0x5c] sm:$0xf] }
 0x867   : > { %5024 = vrot.lane.b32.xlu0 %v9553_v49, %s10695_s20  ;;  %v4928_v23 = vsel %vm12507_vm2, %v12547_v3, 0  ;;  %v4930_v32 = vsel %vm12507_vm2, %v12540_v12, 0  ;;  %v9555_v59 = vcombine.high %v4927_v33, %v4929_v17  ;;  %v9554_v0 = vcombine.low %v4927_v33, %v4929_v17  ;;  %v12598_v42 = vld [vmem:[#allocation3 + $0x54] sm:$0xff]  ;;  %v12640_v51 = vld [vmem:[#allocation3 + $0x50] sm:$0xf] }
 0x868   : > { %5022 = vrot.lane.b32.xlu1 %v9552_v16, %s10695_s20  ;;  %v9556_v4 = vcombine.low %v4928_v23, %v4930_v32  ;;  %v4932_v24 = vsel %vm12507_vm2, %v12573_v53, 0  ;;  %v4934_v5 = vsel %vm12507_vm2, %v12570_v50, 0  ;;  %v12609_v14 = vcombine.high %v12605_v7, %v12598_v42 }
 0x869   : > { %v9559_v57 = vcombine.low %v4932_v24, %v4934_v5  ;;  %v4931_v27 = vsel %vm14713_vm11, %v12590_v29, 0  ;;  %v4933_v18 = vsel %vm14713_vm11, %v12579_v1, 0  ;;  %v12623_v41 = vcombine.low %v12605_v7, %v12598_v42 }
 0x86a   : > { %14729 = vst [vmem:[#allocation11_spill] sm:$0xff] %v12609_v14  ;;  %v9558_v26 = vcombine.high %v4931_v27, %v4933_v18  ;;  %v4937_v46 = vsel %vm14713_vm11, %v12598_v42, 0  ;;  %v5156_v35 = vrot.slane %v5155_v36, 4  ;;  %v9557_v37 = vcombine.low %v4931_v27, %v4933_v18 }
 0x86b   : > { %4665 = vrot.lane.b32.xlu0 %v12536_v47, %s10694_s18  ;;  %14730 = vst [vmem:[#allocation12_spill] sm:$0xff] %v12623_v41  ;;  %v4935_v11 = vsel %vm14713_vm11, %v12605_v7, 0  ;;  %v12647_v38 = vcombine.low %v12640_v51, %v12634_v39  ;;  %v4938_v30 = vsel %vm12507_vm2, %v12634_v39, 0  ;;  %v4936_v52 = vsel %vm12507_vm2, %v12640_v51, 0 }
 0x86c   : > { %5020 = vrot.lane.b32.xlu1 %v9551_v44, %s10695_s20  ;;  %v9561_v58 = vcombine.high %v4935_v11, %v4937_v46  ;;  %v12643_v63 = vsel %vm899_vm1, %v5156_v35, %v5155_v36  ;;  %v9562_v49 = vcombine.low %v4936_v52, %v4938_v30  ;;  %v9560_v2 = vcombine.low %v4935_v11, %v4937_v46  ;;  %v12664_v43 = vld [vmem:[#allocation3 + $0x68] sm:$0xf] }
 0x86d   : > { %v12637_v61 = vld [vmem:[#allocation3 + $0x60] sm:$0xff]  ;;  %14731 = vst [vmem:[#allocation13_spill] sm:$0xff] %v12643_v63  ;;  %vm14708_vm7 = vcmp.ne.s16.totalorder %v12643_v63, 0  ;;  %v12676_v33 = vcombine.low %v12664_v43, %v12664_v43  ;;  %vm12678_vm1 = vcmp.ne.s16.totalorder %v5156_v35, 0  ;;  %v14734_v23 = vmov 0 }
 0x86e   : > { %v12651_v62 = vcombine.high %v12637_v61, %v12637_v61  ;;  %v5160_v16 = vsel %vm14708_vm7, %v12468_v40, 0  ;;  %v5162_v44 = vsel %vm14708_vm7, %v12470_v6, 0  ;;  %v14735_v23 = vsel %vm12678_vm1, 4294967295, %v14734_v23 }
 0x86f   : > { %4663 = vrot.lane.b32.xlu0 %v12545_v13, %s10694_s18  ;;  %14733 = vst [vmem:[#allocation15_spill] sm:$0xff] %v12676_v33  ;;  %v9579_v17 = vcombine.high %v5160_v16, %v5162_v44  ;;  %14736 = vst [vmem:[#allocation16_spill] sm:$0xff] %v14735_v23  ;;  %v12687_v32 = vcombine.low %v12637_v61, %v12637_v61  ;;  %v5165_v24 = vsel %vm12678_vm1, %v12547_v3, 0  ;;  %v5167_v5 = vsel %vm12678_vm1, %v12540_v12, 0 }
 0x870   : > { %4667 = vrot.lane.b32.xlu1 %v12551_v21, %s10694_s18  ;;  %14732 = vst [vmem:[#allocation14_spill] sm:$0xff] %v12651_v62  ;;  %v9583_v27 = vcombine.low %v5165_v24, %v5167_v5  ;;  %v5164_v18 = vsel %vm14708_vm7, %v12532_v48, 0  ;;  %v5169_v46 = vsel %vm12678_vm1, %v12573_v53, 0  ;;  %v5171_v35 = vsel %vm12678_vm1, %v12570_v50, 0 }
 0x871   : > { %14738 = vst [vmem:[#allocation17_spill] sm:$0xff] %v12687_v32  ;;  %v9586_v11 = vcombine.low %v5169_v46, %v5171_v35  ;;  %v5170_v30 = vsel %vm14708_vm7, %v12579_v1, 0  ;;  %v5172_v52 = vsel %vm14708_vm7, %v12605_v7, 0  ;;  %v4940_v5 = vsel %vm12507_vm2, %v12664_v43, 0 }
 0x873   : > { %5028 = vrot.lane.b32.xlu0 %v9555_v59, %s10695_s20  ;;  %v9578_v59 = vcombine.low %v5160_v16, %v5162_v44 }
 0x874   : > { %5030 = vrot.lane.b32.xlu1 %v9556_v4, %s10695_s20  ;;  %v5161_v4 = vsel %vm12678_vm1, %v12458_v20, 0 }
 0x877   : > { %5026 = vrot.lane.b32.xlu0 %v9554_v0, %s10695_s20  ;;  %v5163_v0 = vsel %vm12678_vm1, %v12460_v45, 0 }
 0x878   : > { %4673 = vrot.lane.b32.xlu1 %v12577_v15, %s10694_s18 }
 0x87b   : > { %4671 = vrot.lane.b32.xlu0 %v12594_v56, %s10694_s18 }
 0x87c   : > { %5036 = vrot.lane.b32.xlu1 %v9559_v57, %s10695_s20  ;;  %v9580_v57 = vcombine.low %v5161_v4, %v5163_v0  ;;  %v4939_v0 = vsel %vm14713_vm11, %v12637_v61, 0 }
 0x87d   : > { %v9564_v24 = vcombine.high %v4939_v0, %v4939_v0 }
 0x87f   : > { %4669 = vrot.lane.b32.xlu0 %v12603_v8, %s10694_s18 }
 0x880   : > { %4677 = vrot.lane.b32.xlu1 %v12609_v14, %s10694_s18 }
 0x883   : > { %5034 = vrot.lane.b32.xlu0 %v9558_v26, %s10695_s20  ;;  %v5166_v26 = vsel %vm14708_vm7, %v12528_v31, 0 }
 0x884   : > { %4675 = vrot.lane.b32.xlu1 %v12623_v41, %s10694_s18  ;;  %v9582_v36 = vcombine.high %v5164_v18, %v5166_v26 }
 0x887   : > { %5032 = vrot.lane.b32.xlu0 %v9557_v37, %s10695_s20  ;;  %v9581_v37 = vcombine.low %v5164_v18, %v5166_v26  ;;  %v5545_v18 = vpop.permute.xlu1 %5544 }
 0x888   : > { %5040 = vrot.lane.b32.xlu1 %v9561_v58, %s10695_s20  ;;  %v5168_v58 = vsel %vm14708_vm7, %v12590_v29, 0 }
 0x889   : > { %v9584_v16 = vcombine.low %v5168_v58, %v5170_v30 }
 0x88b   : > { %4679 = vrot.lane.b32.xlu0 %v12647_v38, %s10694_s18 }
 0x88c   : > { %4683 = vrot.lane.b32.xlu1 %v12651_v62, %s10694_s18 }
 0x88f   : > { %5042 = vrot.lane.b32.xlu0 %v9562_v49, %s10695_s20  ;;  %v9585_v49 = vcombine.high %v5168_v58, %v5170_v30  ;;  %v5546_v30 = vrot.slane %v5545_v18, 4 }
 0x890   : > { %5038 = vrot.lane.b32.xlu1 %v9560_v2, %s10695_s20 }
 0x891   : > { %vm12791_vm13 = vcmp.ne.s16.totalorder %v5546_v30, 0 }
 0x893   : > { %4685 = vrot.lane.b32.xlu0 %v12676_v33, %s10694_s18 }
 0x894   : > { %5259 = vrot.lane.b32.xlu1 %v9579_v17, %s14737_s22  ;;  %v5173_v17 = vsel %vm12678_vm1, %v12640_v51, 0 }
 0x897   : > { %4681 = vrot.lane.b32.xlu0 %v12687_v32, %s10694_s18 }
 0x898   : > { %5257 = vrot.lane.b32.xlu1 %v9578_v59, %s14737_s22  ;;  %v5175_v59 = vsel %vm12678_vm1, %v12634_v39, 0 }
 0x899   : > { %v9589_v4 = vcombine.low %v5173_v17, %v5175_v59 }
 0x89b   : > { %5261 = vrot.lane.b32.xlu0 %v9580_v57, %s14737_s22  ;;  %v9565_v57 = vcombine.low %v4940_v5, %v4940_v5 }
 0x89c   : > { %5267 = vrot.lane.b32.xlu1 %v9583_v27, %s14737_s22  ;;  %v5177_v27 = vsel %vm12678_vm1, %v12664_v43, 0 }
 0x89d   : > { %v9592_v26 = vcombine.low %v5177_v27, %v5177_v27 }
 0x89f   : > { %5265 = vrot.lane.b32.xlu0 %v9582_v36, %s14737_s22 }
 0x8a0   : > { %5781 = vrot.lane.b32.xlu1 %v10884_v25, %s10691_s12  ;;  %v5174_v25 = vsel %vm14708_vm7, %v12598_v42, 0  ;;  %s14748_s12 = smov 34  }
 0x8a1   : > { %v9588_v2 = vcombine.high %v5172_v52, %v5174_v25  ;;  %v9587_v44 = vcombine.low %v5172_v52, %v5174_v25  ;;  %v5176_v52 = vsel %vm14708_vm7, %v12637_v61, 0  ;;  %v12789_v25 = vsel %vm14742_vm12, %v5546_v30, %v5545_v18  ;;  %vm14750_vm12 = vmmov %vm14740_vm5 }
 0x8a2   : > { %vm14710_vm8 = vcmp.ne.s16.totalorder %v12789_v25, 0 }
 0x8a3   : > { %5263 = vrot.lane.b32.xlu0 %v9581_v37, %s14737_s22  ;;  %v9563_v37 = vcombine.low %v4939_v0, %v4939_v0  ;;  %v5550_v59 = vsel %vm14710_vm8, %v12468_v40, 0  ;;  %v5554_v0 = vsel %vm14710_vm8, %v12532_v48, 0 }
 0x8a4   : > { %5273 = vrot.lane.b32.xlu1 %v9586_v11, %s14737_s22 }
 0x8a7   : > { %5271 = vrot.lane.b32.xlu0 %v9585_v49, %s14737_s22  ;;  %v14743_v49 = vmov 0 }
 0x8a8   : > { %5277 = vrot.lane.b32.xlu1 %v9588_v2, %s14737_s22  ;;  %v14744_v49 = vsel %vm12791_vm13, 4294967295, %v14743_v49  ;;  %v9591_v2 = vcombine.high %v5176_v52, %v5176_v52 }
 0x8a9   : > { %14745 = vst [vmem:[#allocation18_spill] sm:$0xff] %v14744_v49  ;;  %v4558_v49 = vsel %vm10873_vm6, %v12528_v31, 0 }
 0x8ab   : > { %5269 = vrot.lane.b32.xlu0 %v9584_v16, %s14737_s22  ;;  %v5551_v16 = vsel %vm12791_vm13, %v12458_v20, 0 }
 0x8ac   : > { %5275 = vrot.lane.b32.xlu1 %v9587_v44, %s14737_s22  ;;  %v5553_v44 = vsel %vm12791_vm13, %v12460_v45, 0 }
 0x8ad   : > { %v9619_v17 = vcombine.low %v5551_v16, %v5553_v44  ;;  %v5557_v44 = vsel %vm12791_vm13, %v12540_v12, 0 }
 0x8af   : > { %5279 = vrot.lane.b32.xlu0 %v9589_v4, %s14737_s22  ;;  %v5552_v4 = vsel %vm14710_vm8, %v12470_v6, 0 }
 0x8b0   : > { %5412 = vrot.lane.b32.xlu1 %v12476_v60, %s14739_s26  ;;  %v9617_v30 = vcombine.low %v5550_v59, %v5552_v4 }
 0x8b3   : > { %5414 = vrot.lane.b32.xlu0 %v12466_v55, %s14739_s26 }
 0x8b4   : > { %5410 = vrot.lane.b32.xlu1 %v12484_v9, %s14739_s26 }
 0x8b7   : > { %5418 = vrot.lane.b32.xlu0 %v12536_v47, %s14739_s26 }
 0x8b8   : > { %5420 = vrot.lane.b32.xlu1 %v12551_v21, %s14739_s26 }
 0x8bb   : > { %5416 = vrot.lane.b32.xlu0 %v12545_v13, %s14739_s26 }
 0x8bc   : > { %5046 = vrot.lane.b32.xlu1 %v9564_v24, %s10695_s20  ;;  %v5556_v24 = vsel %vm14710_vm8, %v12528_v31, 0 }
 0x8bd   : > { %v9621_v18 = vcombine.high %v5554_v0, %v5556_v24 }
 0x8bf   : > { %5048 = vrot.lane.b32.xlu0 %v9565_v57, %s10695_s20  ;;  %v9618_v57 = vcombine.high %v5550_v59, %v5552_v4 }
 0x8c0   : > { %5424 = vrot.lane.b32.xlu1 %v12594_v56, %s14739_s26 }
 0x8c3   : > { %v4662_v36 = vpop.permute.xlu0 %4661  ;;  %5285 = vrot.lane.b32.xlu0 %v9592_v26, %s14737_s22 }
 0x8c4   : > { %5422 = vrot.lane.b32.xlu1 %v12603_v8, %s14739_s26  ;;  %v4660_v46 = vpop.permute.xlu1 %4659 }
 0x8c5   : > { %v4688_v35 = vsel %vm14740_vm5, %v4660_v46, %v4662_v36  ;;  %v9590_v36 = vcombine.low %v5176_v52, %v5176_v52  ;;  %v5555_v52 = vsel %vm12791_vm13, %v12547_v3, 0 }
 0x8c6   : > { %4722 = vmatprep.subr.bf16.mxu1 %v4688_v35  ;;  %v9620_v35 = vcombine.low %v5554_v0, %v5556_v24  ;;  %v9622_v4 = vcombine.low %v5555_v52, %v5557_v44 }
 0x8c7   : > { %5044 = vrot.lane.b32.xlu0 %v9563_v37, %s10695_s20  ;;  %v5558_v37 = vsel %vm14710_vm8, %v12590_v29, 0 }
 0x8c8   : > { %5432 = vrot.lane.b32.xlu1 %v12647_v38, %s14739_s26  ;;  %v4658_v11 = vpop.permute.xlu1 %4657 }
 0x8c9   : > { %v4687_v58 = vsel %vm14741_vm9, %v4658_v11, %v4660_v46  ;;  %v5560_v11 = vsel %vm14710_vm8, %v12579_v1, 0  ;;  %vm14749_vm9 = vmmov %vm14740_vm5 }
 0x8ca   : > { %4723 = vmatpush1.bf16.msra.mxu1 %v4687_v58  ;;  %v9624_v16 = vcombine.high %v5558_v37, %v5560_v11 }
 0x8cb   : > { %5426 = vrot.lane.b32.xlu0 %v12577_v15, %s14739_s26 }
 0x8cc   : > { %5434 = vrot.lane.b32.xlu1 %v12687_v32, %s14739_s26 }
 0x8cf   : > { %5430 = vrot.lane.b32.xlu0 %v12609_v14, %s14739_s26 }
 0x8d0   : > { %5438 = vrot.lane.b32.xlu1 %v12676_v33, %s14739_s26 }
 0x8d3   : > { %5428 = vrot.lane.b32.xlu0 %v12623_v41, %s14739_s26 }
 0x8d4   : > { %5283 = vrot.lane.b32.xlu1 %v9591_v2, %s14737_s22 }
 0x8d7   : > { %5436 = vrot.lane.b32.xlu0 %v12651_v62, %s14739_s26 }
 0x8d8   : > { %5651 = vrot.lane.b32.xlu1 %v9619_v17, %s14746_s28 }
 0x8d9   : > { %v12822_v5 = vpop.permute.xlu0 %5024 }
 0x8da   : > { %v12824_v27 = vpop.permute.xlu1 %5022 }
 0x8db   : > { %5649 = vrot.lane.b32.xlu0 %v9618_v57, %s14746_s28  ;;  %v9623_v57 = vcombine.low %v5558_v37, %v5560_v11  ;;  %v5559_v37 = vsel %vm12791_vm13, %v12573_v53, 0  ;;  %v5561_v11 = vsel %vm12791_vm13, %v12570_v50, 0 }
 0x8dc   : > { %5655 = vrot.lane.b32.xlu1 %v9621_v18, %s14746_s28  ;;  %v5563_v18 = vsel %vm12791_vm13, %v12640_v51, 0 }
 0x8dd   : > { %v4666_v26 = vpop.permute.xlu0 %4665 }
 0x8de   : > { %v12828_v46 = vpop.permute.xlu1 %5020 }
 0x8df   : > { %5281 = vrot.lane.b32.xlu0 %v9590_v36, %s14737_s22 }
 0x8e0   : > { %5653 = vrot.lane.b32.xlu1 %v9620_v35, %s14746_s28 }
 0x8e1   : > { %v4664_v58 = vpop.permute.xlu0 %4663 }
 0x8e2   : > { %v4668_v2 = vpop.permute.xlu1 %4667  ;;  %v4689_v0 = vsel %vm14740_vm5, %v4664_v58, %v4666_v26 }
 0x8e3   : > { %5647 = vrot.lane.b32.xlu0 %v9617_v30, %s14746_s28  ;;  %v4690_v17 = vsel %vm14747_vm14, %v4666_v26, %v4668_v2  ;;  %v5565_v26 = vsel %vm12791_vm13, %v12634_v39, 0  ;;  %v5567_v30 = vsel %vm12791_vm13, %v12664_v43, 0  ;;  %vm14751_vm14 = vmmov %vm14740_vm5 }
 0x8e4   : > { %5661 = vrot.lane.b32.xlu1 %v9624_v16, %s14746_s28  ;;  %4724 = vmatprep.subr.bf16.mxu1 %v4690_v17  ;;  %v9628_v58 = vcombine.low %v5563_v18, %v5565_v26  ;;  %v9625_v16 = vcombine.low %v5559_v37, %v5561_v11  ;;  %v9631_v17 = vcombine.low %v5567_v30, %v5567_v30 }
 0x8e5   : > { %v12848_v59 = vpop.permute.xlu0 %5028  ;;  %4725 = vmatpush1.bf16.msra.mxu1 %v4689_v0  ;;  %v5562_v0 = vsel %vm14710_vm8, %v12605_v7, 0 }
 0x8e6   : > { %v12850_v24 = vpop.permute.xlu1 %5030 }
 0x8e7   : > { %5657 = vrot.lane.b32.xlu0 %v9622_v4, %s14746_s28 }
 0x8e8   : > { %5659 = vrot.lane.b32.xlu1 %v9623_v57, %s14746_s28 }
 0x8e9   : > { %v12860_v36 = vpop.permute.xlu0 %5026 }
 0x8ea   : > { %v4674_v35 = vpop.permute.xlu1 %4673 }
 0x8eb   : > { %6171 = vrot.lane.b32.xlu0 %v10895_v28, %s14748_s12  ;;  %v5564_v28 = vsel %vm14710_vm8, %v12598_v42, 0 }
 0x8ec   : > { %5669 = vrot.lane.b32.xlu1 %v9628_v58, %s14746_s28  ;;  %v9627_v57 = vcombine.high %v5562_v0, %v5564_v28  ;;  %v9626_v58 = vcombine.low %v5562_v0, %v5564_v28 }
 0x8ed   : > { %v4672_v2 = vpop.permute.xlu0 %4671 }
 0x8ee   : > { %v12874_v52 = vpop.permute.xlu1 %5036  ;;  %v4692_v44 = vsel %vm14749_vm9, %v4672_v2, %v4674_v35  ;;  %vm14752_vm9 = vmmov %vm14740_vm5 }
 0x8ef   : > { %5663 = vrot.lane.b32.xlu0 %v9625_v16, %s14746_s28  ;;  %4726 = vmatprep.subr.bf16.mxu1 %v4692_v44 }
 0x8f0   : > { %5675 = vrot.lane.b32.xlu1 %v9631_v17, %s14746_s28 }
 0x8f1   : > { %v4670_v4 = vpop.permute.xlu0 %4669 }
 0x8f2   : > { %v4691_v18 = vsel %vm14750_vm12, %v4670_v4, %v4672_v2  ;;  %v4678_v26 = vpop.permute.xlu1 %4677  ;;  %vm4715_vm12 = vcmask 1043456  }
 0x8f3   : > { %5667 = vrot.lane.b32.xlu0 %v9627_v57, %s14746_s28  ;;  %4727 = vmatpush1.bf16.msra.mxu1 %v4691_v18 }
 0x8f5   : > { %v12887_v35 = vpop.permute.xlu0 %5034 }
 0x8f6   : > { %v4676_v37 = vpop.permute.xlu1 %4675 }
 0x8f7   : > { %5665 = vrot.lane.b32.xlu0 %v9626_v58, %s14746_s28  ;;  %v4693_v2 = vsel %vm14740_vm5, %v4676_v37, %v4678_v26  ;;  %v4556_v58 = vsel %vm10873_vm6, %v12470_v6, 0 }
 0x8f9   : > { %v12890_v11 = vpop.permute.xlu0 %5032 }
 0x8fa   : > { %v12892_v30 = vpop.permute.xlu1 %5040 }
 0x8fd   : > { %v4680_v16 = vpop.permute.xlu0 %4679 }
 0x8fe   : > { %v4684_v44 = vpop.permute.xlu1 %4683  ;;  %v4694_v17 = vsel %vm14751_vm14, %v4678_v26, %v4680_v16  ;;  %vm14753_vm14 = vmmov %vm14740_vm5  ;;  %vm4705_vm5 = vcmask 588800  }
 0x8ff   : > { %4728 = vmatprep.subr.bf16.mxu1 %v4694_v17  ;;  %v4555_v17 = vsel %vm10873_vm6, %v12468_v40, 0 }
 0x900   : > { %4729 = vmatpush1.bf16.msra.mxu1 %v4693_v2 }
 0x901   : > { %v12896_v4 = vpop.permute.xlu0 %5042 }
 0x902   : > { %v12898_v57 = vpop.permute.xlu1 %5038 }
 0x905   : > { %v4686_v0 = vpop.permute.xlu0 %4685 }
 0x906   : > { %v4696_v28 = vsel %vm14752_vm9, %v4684_v44, %v4686_v0  ;;  %v12901_v18 = vpop.permute.xlu1 %5259  ;;  %v9530_v0 = vcombine.high %v4555_v17, %v4556_v58 }
 0x907   : > { %9522 = vmatprep.subr.msk.bf16.mxu1 %vm4715_vm12, %v4696_v28  ;;  %v10517_v28 = vld [vmem:[%s14661_s7 + $0x14] sm:$0xff]  }
 0x909   : > { %v4682_v16 = vpop.permute.xlu0 %4681 }
 0x90a   : > { %v4695_v26 = vsel %vm14753_vm14, %v4682_v16, %v4684_v44  ;;  %v12908_v37 = vpop.permute.xlu1 %5257  ;;  %v9529_v16 = vcombine.low %v4555_v17, %v4556_v58 }
 0x90b   : > { %v4717_v2 = vsel %vm4715_vm12, %v4695_v26, 0  ;;  %v4557_v26 = vsel %vm10873_vm6, %v12532_v48, 0 }
 0x90c   : > { %4731 = vmatpush1.bf16.msra.mxu1 %v4717_v2  ;;  %v9532_v63 = vcombine.high %v4557_v26, %v4558_v49  ;;  %v4560_v2 = vsel %vm10873_vm6, %v12579_v1, 0  ;;  %v9531_v58 = vcombine.low %v4557_v26, %v4558_v49 }
 0x90d   : > { %v12920_v44 = vpop.permute.xlu0 %5261  ;;  %4856 = vmatprep.subr.bf16.mxu1 %v9530_v0  ;;  %v4559_v0 = vsel %vm10873_vm6, %v12590_v29, 0 }
 0x90e   : > { %v12922_v23 = vpop.permute.xlu1 %5267  ;;  %v9534_v10 = vcombine.high %v4559_v0, %v4560_v2  ;;  %v9533_v26 = vcombine.low %v4559_v0, %v4560_v2 }
 0x90f   : > { %9523 = vmatmul.mubr.msk.bf16.vlgmr.msra.gmra.mrb[52].mxu1 %vm4705_vm5, %v10517_v28  ;;  %v10518_v28 = vld [vmem:[%s14661_s7 + $0x1c] sm:$0xff]  }
 0x910   : > { %4857 = vmatpush1.bf16.msra.mxu1 %v9529_v16  ;;  %4764 = vmatprep.mubr.bf16.mxu1 %v12232_v54  ;;  %v4562_v16 = vsel %vm10873_vm6, %v12598_v42, 0 }
 0x911   : > { %v12932_v34 = vpop.permute.xlu0 %5265  ;;  %4858 = vmatprep.subr.bf16.mxu1 %v9532_v63 }
 0x912   : > { %v5782_v17 = vpop.permute.xlu1 %5781 }
 0x913   : > { %v5783_v19 = vrot.slane %v5782_v17, 4 }
 0x914   : > { %4859 = vmatpush1.bf16.msra.mxu1 %v9531_v58  ;;  %v4561_v58 = vsel %vm10873_vm6, %v12605_v7, 0 }
 0x915   : > { %v12944_v62 = vsel %vm1248_vm3, %v5783_v19, %v5782_v17  ;;  %vm12946_vm9 = vcmp.ne.s16.totalorder %v5783_v19, 0  ;;  %v12950_v49 = vpop.permute.xlu0 %5263  ;;  %4860 = vmatprep.subr.bf16.mxu1 %v9534_v10  ;;  %v9536_v2 = vcombine.high %v4561_v58, %v4562_v16  ;;  %vm14756_vm3 = vcmask 1031168  }
 0x916   : > { %vm14709_vm14 = vcmp.ne.s16.totalorder %v12944_v62, 0  ;;  %v12953_v33 = vpop.permute.xlu1 %5273  ;;  %v5788_v17 = vsel %vm12946_vm9, %v12458_v20, 0  ;;  %v5790_v19 = vsel %vm12946_vm9, %v12460_v45, 0  ;;  %v4563_v20 = vsel %vm10873_vm6, %v12637_v61, 0  ;;  %vm14757_vm7 = vmmov %vm14756_vm3 }
 0x917   : > { %9524 = vmatmul.mubr.msk.bf16.gmra.mrb[56].mxu1 %vm4705_vm5, %v10518_v28  ;;  %v9646_v10 = vcombine.low %v5788_v17, %v5790_v19  ;;  %v5787_v0 = vsel %vm14709_vm14, %v12468_v40, 0  ;;  %v5789_v41 = vsel %vm14709_vm14, %v12470_v6, 0  ;;  %v5791_v45 = vsel %vm14709_vm14, %v12532_v48, 0 }
 0x918   : > { %4861 = vmatpush1.bf16.msra.mxu1 %v9533_v26  ;;  %v9645_v32 = vcombine.high %v5787_v0, %v5789_v41  ;;  %v5793_v28 = vsel %vm14709_vm14, %v12528_v31, 0  ;;  %4774 = vmatprep.mubr.bf16.mxu1 %v12232_v54  ;;  %v9535_v6 = vcombine.low %v4561_v58, %v4562_v16  ;;  %v9538_v17 = vcombine.high %v4563_v20, %v4563_v20 }
 0x919   : > { %v12981_v40 = vpop.permute.xlu0 %5271  ;;  %4862 = vmatprep.subr.bf16.mxu1 %v9536_v2  ;;  %5888 = vrot.lane.b32.xlu1 %v9646_v10, %s10711_s11  ;;  %v9648_v19 = vcombine.high %v5791_v45, %v5793_v28  ;;  %v9537_v48 = vcombine.low %v4563_v20, %v4563_v20  ;;  %v9644_v31 = vcombine.low %v5787_v0, %v5789_v41  ;;  %v5794_v16 = vsel %vm12946_vm9, %v12540_v12, 0 }
 0x91a   : > { %5886 = vrot.lane.b32.xlu0 %v9645_v32, %s10711_s11  ;;  %v12985_v26 = vpop.permute.xlu1 %5277  ;;  %v5792_v32 = vsel %vm12946_vm9, %v12547_v3, 0  ;;  %v9647_v2 = vcombine.low %v5791_v45, %v5793_v28  ;;  %v5051_v10 = vsel %vm14756_vm3, %v12824_v27, %v12822_v5  ;;  %v5796_v20 = vsel %vm12946_vm9, %v12573_v53, 0 }
 0x91b   : > { %v4851_v41 = vsel %vm4715_vm12, %v9537_v48, 0  ;;  %v9649_v0 = vcombine.low %v5792_v32, %v5794_v16  ;;  %v5795_v48 = vsel %vm14709_vm14, %v12590_v29, 0  ;;  %v5797_v5 = vsel %vm14709_vm14, %v12579_v1, 0 }
 0x91c   : > { %4863 = vmatpush1.bf16.msra.mxu1 %v9535_v6  ;;  %v10520_v6 = vld [vmem:[%s14661_s7] sm:$0xff]  }
 0x91d   : > { %v12990_v14 = vpop.permute.xlu0 %5269  ;;  %9539 = vmatprep.subr.msk.bf16.mxu1 %vm4715_vm12, %v9538_v17  ;;  %5892 = vrot.lane.b32.xlu1 %v9648_v19, %s10711_s11  ;;  %v9651_v17 = vcombine.high %v5795_v48, %v5797_v5  ;;  %v5566_v19 = vsel %vm14710_vm8, %v12637_v61, 0 }
 0x91e   : > { %5884 = vrot.lane.b32.xlu0 %v9644_v31, %s10711_s11  ;;  %v13001_v58 = vpop.permute.xlu1 %5275  ;;  %v5798_v31 = vsel %vm12946_vm9, %v12570_v50, 0 }
 0x91f   : > { %9525 = vmatmul.mubr.msk.bf16.gmra.mrb[60].mxu1 %vm4705_vm5, %v10519_v22  ;;  %v9652_v28 = vcombine.low %v5796_v20, %v5798_v31  ;;  %v5799_v20 = vsel %vm14709_vm14, %v12605_v7, 0  ;;  %v5801_v31 = vsel %vm14709_vm14, %v12598_v42, 0 }
 0x920   : > { %4865 = vmatpush1.bf16.msra.mxu1 %v4851_v41  ;;  %4888 = vmatprep.mubr.bf16.mxu1 %v12232_v54  ;;  %v5050_v41 = vsel %vm14756_vm3, %v12828_v46, %v12824_v27 }
 0x921   : > { %v13015_v22 = vpop.permute.xlu0 %5279  ;;  %5083 = vmatprep.subr.bf16.mxu1 %v5051_v10  ;;  %5890 = vrot.lane.b32.xlu1 %v9647_v2, %s10711_s11  ;;  %v9629_v2 = vcombine.low %v5566_v19, %v5566_v19  ;;  %v5053_v10 = vsel %vm14757_vm7, %v12848_v59, %v12850_v24  ;;  %vm14758_vm7 = vmmov %vm14756_vm3 }
 0x922   : > { %5894 = vrot.lane.b32.xlu0 %v9649_v0, %s10711_s11  ;;  %v13025_v45 = vpop.permute.xlu1 %5412  ;;  %v9650_v0 = vcombine.low %v5795_v48, %v5797_v5  ;;  %v5052_v24 = vsel %vm14758_vm7, %v12860_v36, %v12848_v59  ;;  %v9654_v48 = vcombine.high %v5799_v20, %v5801_v31  ;;  %v10521_v5 = vld [vmem:[%s14661_s7 + $0x8] sm:$0xff]   ;;  %v5800_v59 = vsel %vm12946_vm9, %v12640_v51, 0  ;;  %vm14759_vm7 = vmmov %vm14756_vm3 }
 0x923   : > { %v5802_v36 = vsel %vm12946_vm9, %v12634_v39, 0 }
 0x925   : > { %v13033_v32 = vpop.permute.xlu0 %5414  ;;  %5900 = vrot.lane.b32.xlu1 %v9652_v28, %s10711_s11  ;;  %v5055_v28 = vsel %vm14756_vm3, %v12887_v35, %v12874_v52  ;;  %v5054_v52 = vsel %vm14759_vm7, %v12890_v11, %v12887_v35  ;;  %vm14760_vm7 = vmmov %vm14756_vm3 }
 0x926   : > { %5898 = vrot.lane.b32.xlu0 %v9651_v17, %s10711_s11  ;;  %v13037_v16 = vpop.permute.xlu1 %5410 }
 0x927   : > { %9540 = vmatmul.mubr.msk.bf16.vlgmr.msra.gmra.mrb[52].mxu1 %vm4705_vm5, %v10520_v6  ;;  %v9630_v6 = vcombine.high %v5566_v19, %v5566_v19  ;;  %v9653_v19 = vcombine.low %v5799_v20, %v5801_v31  ;;  %v10522_v20 = vld [vmem:[%s14661_s7 + $0x10] ss:$0 sps:$4 sm:$0x33]  }
 0x928   : > { %5084 = vmatpush1.bf16.msra.mxu1 %v5050_v41  ;;  %4898 = vmatprep.mubr.bf16.mxu1 %v12232_v54 }
 0x929   : > { %5085 = vmatprep.subr.bf16.mxu1 %v5053_v10  ;;  %v13053_v27 = vpop.permute.xlu0 %5418  ;;  %5671 = vrot.lane.b32.xlu1 %v9629_v2, %s14746_s28  ;;  %v5057_v2 = vsel %vm14756_vm3, %v12892_v30, %v12896_v4  ;;  %v9655_v10 = vcombine.low %v5800_v59, %v5802_v36  ;;  %v5056_v4 = vsel %vm14756_vm3, %v12898_v57, %v12892_v30 }
 0x92a   : > { %5896 = vrot.lane.b32.xlu0 %v9650_v0, %s10711_s11  ;;  %v13057_v46 = vpop.permute.xlu1 %5420 }
 0x92c   : > { %5086 = vmatpush1.bf16.msra.mxu1 %v5052_v24  ;;  %v5804_v24 = vsel %vm12946_vm9, %v12664_v43, 0 }
 0x92d   : > { %5087 = vmatprep.subr.bf16.mxu1 %v5055_v28  ;;  %v13068_v17 = vpop.permute.xlu0 %5416  ;;  %5904 = vrot.lane.b32.xlu1 %v9654_v48, %s10711_s11  ;;  %v9658_v31 = vcombine.low %v5804_v24, %v5804_v24 }
 0x92e   : > { %5673 = vrot.lane.b32.xlu0 %v9630_v6, %s14746_s28  ;;  %v5047_v41 = vpop.permute.xlu1 %5046  ;;  %v10523_v6 = vld [vmem:[%s14661_s7 + $0x28] sm:$0xff]  }
 0x92f   : > { %9541 = vmatmul.mubr.msk.bf16.gmra.mrb[56].mxu1 %vm4705_vm5, %v10521_v5 }
 0x930   : > { %5088 = vmatpush1.bf16.msra.mxu1 %v5054_v52  ;;  %4908 = vmatprep.mubr.bf16.mxu1 %v12232_v54 }
 0x931   : > { %5089 = vmatprep.subr.bf16.mxu1 %v5057_v2  ;;  %v5049_v0 = vpop.permute.xlu0 %5048  ;;  %5902 = vrot.lane.b32.xlu1 %v9653_v19, %s10711_s11 }
 0x932   : > { %v5059_v35 = vsel %vm14760_vm7, %v5047_v41, %v5049_v0  ;;  %5906 = vrot.lane.b32.xlu0 %v9655_v10, %s10711_s11  ;;  %v13092_v11 = vpop.permute.xlu1 %5424  ;;  %vm14762_vm7 = vmmov %vm14756_vm3  ;;  %vm14763_vm3 = vcmask 916480   ;;  %v14772_v10 = vld [vmem:[#allocation12_spill] sm:$0xff]  ;;  %v10526_v0 = vld [vmem:[%s14661_s7 + $0x3c] sm:$0xff]  }
 0x933   : > { %v5288_v59 = vsel %vm14763_vm3, %v12901_v18, %v12920_v44  ;;  %v5290_v52 = vsel %vm14763_vm3, %v12932_v34, %v12922_v23  ;;  %v10524_v23 = vld [vmem:[%s14661_s7 + $0x30] sm:$0xff]  }
 0x934   : > { %5090 = vmatpush1.bf16.msra.mxu1 %v5056_v4  ;;  %v14774_v4 = vld [vmem:[#allocation15_spill] sm:$0xff] }
 0x935   : > { %9566 = vmatprep.subr.msk.bf16.mxu1 %vm4715_vm12, %v5059_v35  ;;  %v5286_v48 = vpop.permute.xlu0 %5285  ;;  %6039 = vrot.lane.b32.xlu1 %v12476_v60, %s14761_s29 }
 0x936   : > { %5912 = vrot.lane.b32.xlu0 %v9658_v31, %s10711_s11  ;;  %v13104_v5 = vpop.permute.xlu1 %5422 }
 0x937   : > { %9542 = vmatmul.mubr.msk.bf16.gmra.mrb[60].mxu1 %vm4705_vm5, %v10522_v20  ;;  %v14775_v20 = vld [vmem:[#allocation14_spill] sm:$0xff] }
 0x938   : > { %5115 = vmatprep.mubr.bf16.mxu1 %v12232_v54 }
 0x939   : > { %v5045_v30 = vpop.permute.xlu0 %5044  ;;  %6037 = vrot.lane.b32.xlu1 %v12484_v9, %s14761_s29  ;;  %v5803_v9 = vsel %vm14709_vm14, %v12637_v61, 0  ;;  %vm14767_vm14 = vmmov %vm14763_vm3 }
 0x93a   : > { %v5058_v57 = vsel %vm14762_vm7, %v5045_v30, %v5047_v41  ;;  %6041 = vrot.lane.b32.xlu0 %v12466_v55, %s14761_s29  ;;  %v13113_v28 = vpop.permute.xlu1 %5432  ;;  %vm14764_vm7 = vmmov %vm14763_vm3  ;;  %v9657_v44 = vcombine.high %v5803_v9, %v5803_v9  ;;  %v9656_v19 = vcombine.low %v5803_v9, %v5803_v9 }
 0x93b   : > { %v5078_v60 = vsel %vm4715_vm12, %v5058_v57, 0  ;;  %v5287_v41 = vsel %vm14764_vm7, %v12908_v37, %v12901_v18  ;;  %vm14765_vm7 = vmmov %vm14763_vm3  ;;  %v5292_v37 = vsel %vm14763_vm3, %v12981_v40, %v12953_v33 }
 0x93c   : > { %5092 = vmatpush1.bf16.msra.mxu1 %v5078_v60 }
 0x93d   : > { %v13125_v36 = vpop.permute.xlu0 %5426  ;;  %6047 = vrot.lane.b32.xlu1 %v12551_v21, %s14761_s29  ;;  %5320 = vmatprep.subr.bf16.mxu1 %v5288_v59 }
 0x93e   : > { %6045 = vrot.lane.b32.xlu0 %v12536_v47, %s14761_s29  ;;  %v13131_v55 = vpop.permute.xlu1 %5434  ;;  %v5289_v47 = vsel %vm14765_vm7, %v12950_v49, %v12932_v34  ;;  %vm14766_vm7 = vmmov %vm14763_vm3 }
 0x93f   : > { %9567 = vmatmul.mubr.msk.bf16.vlgmr.msra.gmra.mrb[52].mxu1 %vm4705_vm5, %v10523_v6  ;;  %v5291_v34 = vsel %vm14766_vm7, %v12990_v14, %v12981_v40  ;;  %v10525_v14 = vld [vmem:[%s14661_s7 + $0x38] ss:$0 sps:$4 sm:$0x33]   ;;  %vm14771_vm7 = vmmov %vm14763_vm3 }
 0x940   : > { %5321 = vmatpush1.bf16.msra.mxu1 %v5287_v41  ;;  %5125 = vmatprep.mubr.bf16.mxu1 %v12232_v54 }
 0x941   : > { %v13141_v21 = vpop.permute.xlu0 %5430  ;;  %5910 = vrot.lane.b32.xlu1 %v9657_v44, %s10711_s11  ;;  %5322 = vmatprep.subr.bf16.mxu1 %v5290_v52  ;;  %v10668_v52 = vld [vmem:[#allocation3] sm:$0xff] }
 0x942   : > { %6043 = vrot.lane.b32.xlu0 %v12545_v13, %s14761_s29  ;;  %v13149_v18 = vpop.permute.xlu1 %5438  ;;  %v5294_v13 = vsel %vm14767_vm14, %v12985_v26, %v13015_v22  ;;  %vm14768_vm14 = vmmov %vm14763_vm3 }
 0x944   : > { %5323 = vmatpush1.bf16.msra.mxu1 %v5289_v47 }
 0x945   : > { %v13157_v2 = vpop.permute.xlu0 %5428  ;;  %6051 = vrot.lane.b32.xlu1 %v12594_v56, %s14761_s29  ;;  %5324 = vmatprep.subr.bf16.mxu1 %v5292_v37  ;;  %v5293_v56 = vsel %vm14763_vm3, %v13001_v58, %v12985_v26  ;;  %v14770_v26 = vld [vmem:[#allocation17_spill] sm:$0xff]  ;;  %vm14773_vm3 = vcmask 908288  }
 0x946   : > { %5908 = vrot.lane.b32.xlu0 %v9656_v19, %s10711_s11  ;;  %v5284_v33 = vpop.permute.xlu1 %5283  ;;  %v5441_v24 = vsel %vm14773_vm3, %v13025_v45, %v13033_v32  ;;  %v5442_v57 = vsel %vm14773_vm3, %v13068_v17, %v13053_v27 }
 0x947   : > { %9568 = vmatmul.mubr.msk.bf16.gmra.mrb[56].mxu1 %vm4705_vm5, %v10524_v23  ;;  %v5296_v40 = vsel %vm14768_vm14, %v5284_v33, %v5286_v48  ;;  %vm14776_vm14 = vmmov %vm14773_vm3  ;;  %v10669_v23 = vld [vmem:[#allocation3 + $0xc] sm:$0xff] }
 0x948   : > { %5325 = vmatpush1.bf16.msra.mxu1 %v5291_v34  ;;  %5135 = vmatprep.mubr.bf16.mxu1 %v12232_v54  ;;  %v5440_v31 = vsel %vm14776_vm14, %v13037_v16, %v13025_v45  ;;  %v10527_v45 = vld [vmem:[%s14661_s7 + $0x44] sm:$0xff]   ;;  %vm14778_vm14 = vmmov %vm14773_vm3  ;;  %v10528_v34 = vld [vmem:[%s14661_s7 + $0x4c] ss:$0 sps:$4 sm:$0x33]  }
 0x949   : > { %v13170_v49 = vpop.permute.xlu0 %5436  ;;  %6049 = vrot.lane.b32.xlu1 %v12603_v8, %s14761_s29  ;;  %5326 = vmatprep.subr.bf16.mxu1 %v5294_v13  ;;  %v5445_v16 = vsel %vm14778_vm14, %v13092_v11, %v13125_v36  ;;  %v10667_v36 = vld [vmem:[#allocation3 + $0x14] sm:$0xf] }
 0x94a   : > { %6053 = vrot.lane.b32.xlu0 %v12577_v15, %s14761_s29  ;;  %v14769_v15 = vld [vmem:[#allocation11_spill] sm:$0xff]  ;;  %v5652_v48 = vpop.permute.xlu1 %5651  ;;  %v14785_v13 = vld [vmem:[#allocation10_spill] sm:$0xff] }
 0x94c   : > { %5327 = vmatpush1.bf16.msra.mxu1 %v5293_v56  ;;  %v14786_v56 = vld [vmem:[#allocation9_spill] sm:$0xff] }
 0x94d   : > { %v13183_v22 = vpop.permute.xlu0 %5649  ;;  %6059 = vrot.lane.b32.xlu1 %v12647_v38, %s14761_s29  ;;  %9593 = vmatprep.subr.msk.bf16.mxu1 %vm4715_vm12, %v5296_v40 }
 0x94e   : > { %6057 = vrot.lane.b32.xlu0 %v14769_v15, %s14761_s29  ;;  %v13232_v59 = vpop.permute.xlu1 %5655 }
 0x94f   : > { %9569 = vmatmul.mubr.msk.bf16.gmra.mrb[60].mxu1 %vm4705_vm5, %v10525_v14 }
 0x950   : > { %5352 = vmatprep.mubr.bf16.mxu1 %v12232_v54 }
 0x951   : > { %v5282_v8 = vpop.permute.xlu0 %5281  ;;  %6061 = vrot.lane.b32.xlu1 %v14770_v26, %s14761_s29 }
 0x952   : > { %v5295_v58 = vsel %vm14771_vm7, %v5282_v8, %v5284_v33  ;;  %6055 = vrot.lane.b32.xlu0 %v14772_v10, %s14761_s29  ;;  %vm14777_vm7 = vmmov %vm14773_vm3 }
 0x953   : > { %v5315_v38 = vsel %vm4715_vm12, %v5295_v58, 0  ;;  %v5443_v32 = vsel %vm14777_vm7, %v13053_v27, %v13057_v46  ;;  %vm14779_vm7 = vmmov %vm14773_vm3  ;;  %vm14780_vm3 = vcmask 277504  }
 0x954   : > { %5329 = vmatpush1.bf16.msra.mxu1 %v5315_v38  ;;  %v5444_v6 = vsel %vm14779_vm7, %v13104_v5, %v13092_v11  ;;  %vm14783_vm14 = vmmov %vm14779_vm7  ;;  %v10666_v11 = vld [vmem:[#allocation3 + $0x8] sm:$0xf] }
 0x955   : > { %v13204_v35 = vpop.permute.xlu0 %5647  ;;  %6065 = vrot.lane.b32.xlu1 %v14774_v4, %s14761_s29  ;;  %5473 = vmatprep.subr.bf16.mxu1 %v5441_v24  ;;  %v5447_v9 = vsel %vm14783_vm14, %v13141_v21, %v13113_v28 }
 0x956   : > { %6063 = vrot.lane.b32.xlu0 %v14775_v20, %s14761_s29 }
 0x957   : > { %9594 = vmatmul.mubr.msk.bf16.vlgmr.msra.gmra.mrb[52].mxu1 %vm4705_vm5, %v10526_v0  ;;  %v10529_v0 = vld [vmem:[%s14661_s7 + $0x50] sm:$0xff]  }
 0x958   : > { %5474 = vmatpush1.bf16.msra.mxu1 %v5440_v31  ;;  %5362 = vmatprep.mubr.bf16.mxu1 %v12232_v54 }
 0x959   : > { %v13218_v30 = vpop.permute.xlu0 %5657  ;;  %5475 = vmatprep.subr.bf16.mxu1 %v5443_v32 }
 0x95c   : > { %5476 = vmatpush1.bf16.msra.mxu1 %v5442_v57 }
 0x95d   : > { %v6172_v46 = vpop.permute.xlu0 %6171  ;;  %5477 = vmatprep.subr.bf16.mxu1 %v5445_v16 }
 0x95e   : > { %v6173_v60 = vrot.slane %v6172_v46, 4 }
 0x95f   : > { %9595 = vmatmul.mubr.msk.bf16.gmra.mrb[56].mxu1 %vm4705_vm5, %v10527_v45 }
 0x960   : > { %v13236_v27 = vsel %vm14780_vm3, %v6173_v60, %v6172_v46  ;;  %vm13238_vm8 = vcmp.ne.s16.totalorder %v6173_v60, 0  ;;  %5478 = vmatpush1.bf16.msra.mxu1 %v5444_v6  ;;  %5372 = vmatprep.mubr.bf16.mxu1 %v12232_v54  ;;  %vm14784_vm3 = vmmov %vm14783_vm14 }
 0x961   : > { %vm14711_vm7 = vcmp.ne.s16.totalorder %v13236_v27, 0  ;;  %5479 = vmatprep.subr.bf16.mxu1 %v5447_v9  ;;  %v6178_v5 = vsel %vm13238_vm8, %v10666_v11, 0  ;;  %v6180_v41 = vsel %vm13238_vm8, %v10667_v36, 0  ;;  %v5446_v37 = vsel %vm14784_vm3, %v13157_v2, %v13141_v21  ;;  %vm14787_vm14 = vmmov %vm14784_vm3  ;;  %v5654_v2 = vpop.permute.xlu1 %5653  ;;  %v5664_v24 = vpop.permute.xlu0 %5663 }
 0x962   : > { %v9685_v44 = vcombine.low %v6178_v5, %v6180_v41  ;;  %v6177_v47 = vsel %vm14711_vm7, %v10668_v52, 0  ;;  %v6179_v28 = vsel %vm14711_vm7, %v10669_v23, 0  ;;  %v6181_v33 = vsel %vm14711_vm7, %v14785_v13, 0 }
 0x963   : > { %v9684_v19 = vcombine.high %v6177_v47, %v6179_v28  ;;  %v6183_v14 = vsel %vm14711_vm7, %v14786_v56, 0  ;;  %v5448_v40 = vsel %vm14787_vm14, %v13131_v55, %v13170_v49  ;;  %v5449_v21 = vsel %vm14784_vm3, %v13170_v49, %v13149_v18 }
 0x964   : > { %6278 = vrot.lane.b32.xlu1 %v9685_v44, %s14788_s19  ;;  %5480 = vmatpush1.bf16.msra.mxu1 %v5446_v37  ;;  %v9687_v15 = vcombine.high %v6181_v33, %v6183_v14  ;;  %v5468_v8 = vsel %vm4715_vm12, %v5448_v40, 0  ;;  %v9683_v26 = vcombine.low %v6177_v47, %v6179_v28  ;;  %vm14789_vm14 = vcmask 900096  }
 0x965   : > { %6276 = vrot.lane.b32.xlu0 %v9684_v19, %s14788_s19  ;;  %9605 = vmatprep.subr.msk.bf16.mxu1 %vm4715_vm12, %v5449_v21  ;;  %v5678_v55 = vsel %vm14789_vm14, %v13183_v22, %v5652_v48  ;;  %v6182_v18 = vsel %vm13238_vm8, %v12547_v3, 0  ;;  %v6184_v49 = vsel %vm13238_vm8, %v12540_v12, 0  ;;  %v9686_v58 = vcombine.low %v6181_v33, %v6183_v14  ;;  %v5662_v10 = vpop.permute.xlu1 %5661  ;;  %vm14790_vm3 = vmmov %vm14789_vm14 }
 0x966   : > { %v9688_v38 = vcombine.low %v6182_v18, %v6184_v49  ;;  %v6186_v3 = vsel %vm13238_vm8, %v12573_v53, 0  ;;  %v6188_v12 = vsel %vm13238_vm8, %v12570_v50, 0  ;;  %v6185_v4 = vsel %vm14711_vm7, %v12590_v29, 0  ;;  %vm14791_vm14 = vmmov %vm14790_vm3 }
 0x967   : > { %9596 = vmatmul.mubr.msk.bf16.gmra.mrb[60].mxu1 %vm4705_vm5, %v10528_v34  ;;  %v6187_v20 = vsel %vm14711_vm7, %v12579_v1, 0  ;;  %v9691_v31 = vcombine.low %v6186_v3, %v6188_v12  ;;  %v5677_v53 = vsel %vm14790_vm3, %v13204_v35, %v13183_v22  ;;  %v6189_v32 = vsel %vm14711_vm7, %v12605_v7, 0  ;;  %v5668_v22 = vpop.permute.xlu0 %5667  ;;  %v10533_v3 = vld [vmem:[%s14661_s7 + $0x6c] sm:$0xff]  }
 0x968   : > { %6282 = vrot.lane.b32.xlu1 %v9687_v15, %s14788_s19  ;;  %5482 = vmatpush1.bf16.msra.mxu1 %v5468_v8  ;;  %v9690_v50 = vcombine.high %v6185_v4, %v6187_v20  ;;  %v6191_v29 = vsel %vm14711_vm7, %v12598_v42, 0  ;;  %v5680_v1 = vsel %vm14791_vm14, %v13232_v59, %v13218_v30  ;;  %v5679_v7 = vsel %vm14790_vm3, %v5654_v2, %v13232_v59  ;;  %v10530_v42 = vld [vmem:[%s14661_s7 + $0x58] sm:$0xff]   ;;  %vm14792_vm14 = vmmov %vm14790_vm3  ;;  %v10532_v8 = vld [vmem:[%s14661_s7 + $0x64] sm:$0xff]  }
 0x969   : > { %6274 = vrot.lane.b32.xlu0 %v9683_v26, %s14788_s19  ;;  %5710 = vmatprep.subr.bf16.mxu1 %v5678_v55  ;;  %v5660_v48 = vpop.permute.xlu1 %5659  ;;  %v9693_v35 = vcombine.high %v6189_v32, %v6191_v29  ;;  %v9689_v57 = vcombine.low %v6185_v4, %v6187_v20  ;;  %v5682_v30 = vsel %vm14792_vm14, %v5662_v10, %v5664_v24  ;;  %v6190_v45 = vsel %vm13238_vm8, %v12640_v51, 0  ;;  %vm14793_vm14 = vmmov %vm14790_vm3 }
 0x96a   : > { %5505 = vmatprep.mubr.bf16.mxu1 %v12232_v54  ;;  %v6192_v16 = vsel %vm13238_vm8, %v12634_v39, 0  ;;  %v9692_v46 = vcombine.low %v6189_v32, %v6191_v29  ;;  %v5681_v60 = vsel %vm14790_vm3, %v5660_v48, %v5662_v10  ;;  %v6193_v9 = vsel %vm14711_vm7, %v12637_v61, 0  ;;  %v10531_v61 = vld [vmem:[%s14661_s7 + $0x60] ss:$0 sps:$4 sm:$0x33]  }
 0x96b   : > { %v9694_v59 = vcombine.low %v6190_v45, %v6192_v16  ;;  %v5666_v11 = vpop.permute.xlu0 %5665  ;;  %v9696_v51 = vcombine.high %v6193_v9, %v6193_v9  ;;  %v9695_v36 = vcombine.low %v6193_v9, %v6193_v9  ;;  %v6194_v41 = vsel %vm13238_vm8, %v12664_v43, 0  ;;  %v10534_v29 = vld [vmem:[%s14661_s7 + $0x74] ss:$0 sps:$4 sm:$0x33]  }
 0x96c   : > { %6280 = vrot.lane.b32.xlu1 %v9686_v58, %s14788_s19  ;;  %v5683_v5 = vsel %vm14790_vm3, %v5666_v11, %v5668_v22  ;;  %v9697_v44 = vcombine.low %v6194_v41, %v6194_v41 }
 0x96d   : > { %6284 = vrot.lane.b32.xlu0 %v9688_v38, %s14788_s19  ;;  %v5670_v6 = vpop.permute.xlu1 %5669 }
 0x96e   : > { %v5684_v39 = vsel %vm14793_vm14, %v5668_v22, %v5670_v6  ;;  %vm14794_vm14 = vmmov %vm14790_vm3 }
 0x96f   : > { %9606 = vmatmul.mubr.msk.bf16.vlgmr.msra.gmra.mrb[52].mxu1 %vm4705_vm5, %v10529_v0 }
 0x970   : > { %5711 = vmatpush1.bf16.msra.mxu1 %v5677_v53  ;;  %6290 = vrot.lane.b32.xlu1 %v9691_v31, %s14788_s19 }
 0x971   : > { %5712 = vmatprep.subr.bf16.mxu1 %v5680_v1  ;;  %6288 = vrot.lane.b32.xlu0 %v9690_v50, %s14788_s19  ;;  %v5676_v52 = vpop.permute.xlu1 %5675 }
 0x972   : > { %5515 = vmatprep.mubr.bf16.mxu1 %v12232_v54 }
 0x974   : > { %5713 = vmatpush1.bf16.msra.mxu1 %v5679_v7  ;;  %6294 = vrot.lane.b32.xlu1 %v9693_v35, %s14788_s19 }
 0x975   : > { %5714 = vmatprep.subr.bf16.mxu1 %v5682_v30  ;;  %6286 = vrot.lane.b32.xlu0 %v9689_v57, %s14788_s19  ;;  %v10535_v30 = vld [vmem:[%s14661_s7 + $0x78] sm:$0xff]  }
 0x977   : > { %9607 = vmatmul.mubr.msk.bf16.gmra.mrb[56].mxu1 %vm4705_vm5, %v10530_v42 }
 0x978   : > { %5715 = vmatpush1.bf16.msra.mxu1 %v5681_v60  ;;  %6292 = vrot.lane.b32.xlu1 %v9692_v46, %s14788_s19 }
 0x979   : > { %5716 = vmatprep.subr.bf16.mxu1 %v5684_v39  ;;  %6296 = vrot.lane.b32.xlu0 %v9694_v59, %s14788_s19  ;;  %v10536_v39 = vld [vmem:[%s14661_s7 + $0x80] sm:$0xff]  }
 0x97a   : > { %5525 = vmatprep.mubr.bf16.mxu1 %v12232_v54 }
 0x97c   : > { %5717 = vmatpush1.bf16.msra.mxu1 %v5683_v5  ;;  %6300 = vrot.lane.b32.xlu1 %v9696_v51, %s14788_s19 }
 0x97d   : > { %6298 = vrot.lane.b32.xlu0 %v9695_v36, %s14788_s19 }
 0x97f   : > { %9608 = vmatmul.mubr.msk.bf16.gmra.mrb[60].mxu1 %vm4705_vm5, %v10531_v61 }
 0x980   : > { %5742 = vmatprep.mubr.bf16.mxu1 %v12232_v54 }
 0x981   : > { %6302 = vrot.lane.b32.xlu0 %v9697_v44, %s14788_s19 }
 0x98b   : > { %v5889_v47 = vpop.permute.xlu1 %5888 }
 0x98c   : > { %v5887_v23 = vpop.permute.xlu0 %5886 }
 0x98d   : > { %v5915_v55 = vsel %vm14712_vm15, %v5887_v23, %v5889_v47 }
 0x98f   : > { %v5893_v28 = vpop.permute.xlu1 %5892 }
 0x990   : > { %v5885_v37 = vpop.permute.xlu0 %5884 }
 0x991   : > { %v5914_v49 = vsel %vm14712_vm15, %v5885_v37, %v5887_v23  ;;  %v10537_v23 = vld [vmem:[%s14661_s7 + $0x88] ss:$0 sps:$4 sm:$0x33]  }
 0x993   : > { %v5891_v19 = vpop.permute.xlu1 %5890 }
 0x994   : > { %v5895_v34 = vpop.permute.xlu0 %5894  ;;  %v5916_v0 = vsel %vm14712_vm15, %v5891_v19, %v5893_v28 }
 0x995   : > { %v5917_v10 = vsel %vm14712_vm15, %v5893_v28, %v5895_v34  ;;  %v10538_v34 = vld [vmem:[%s14661_s7 + $0x8c] sm:$0xff]  }
 0x997   : > { %v5901_v13 = vpop.permute.xlu1 %5900 }
 0x998   : > { %v5899_v33 = vpop.permute.xlu0 %5898 }
 0x999   : > { %v5919_v24 = vsel %vm14712_vm15, %v5899_v33, %v5901_v13 }
 0x99b   : > { %v5672_v56 = vpop.permute.xlu1 %5671 }
 0x99c   : > { %v5897_v43 = vpop.permute.xlu0 %5896 }
 0x99d   : > { %v5918_v20 = vsel %vm14712_vm15, %v5897_v43, %v5899_v33 }
 0x99f   : > { %v5905_v14 = vpop.permute.xlu1 %5904 }
 0x9a0   : > { %v5674_v40 = vpop.permute.xlu0 %5673 }
 0x9a1   : > { %v5685_v21 = vsel %vm14794_vm14, %v5672_v56, %v5674_v40  ;;  %v5686_v2 = vsel %vm14790_vm3, %v5674_v40, %v5676_v52  ;;  %vm14795_vm14 = vcmask 777216  }
 0x9a2   : > { %9632 = vmatprep.subr.msk.bf16.mxu1 %vm4715_vm12, %v5686_v2  ;;  %v5705_v15 = vsel %vm4715_vm12, %v5685_v21, 0  ;;  %vm14796_vm3 = vmmov %vm14795_vm14 }
 0x9a3   : > { %5719 = vmatpush1.bf16.msra.mxu1 %v5705_v15  ;;  %v5903_v26 = vpop.permute.xlu1 %5902  ;;  %vm14797_vm7 = vmmov %vm14796_vm3 }
 0x9a4   : > { %v5907_v18 = vpop.permute.xlu0 %5906  ;;  %5947 = vmatprep.subr.bf16.mxu1 %v5915_v55  ;;  %v5920_v32 = vsel %vm14712_vm15, %v5903_v26, %v5905_v14 }
 0x9a5   : > { %v5921_v53 = vsel %vm14712_vm15, %v5905_v14, %v5907_v18  ;;  %v10539_v14 = vld [vmem:[%s14661_s7 + $0x94] sm:$0xff]   ;;  %v10540_v18 = vld [vmem:[%s14661_s7 + $0x9c] ss:$0 sps:$4 sm:$0x33]  }
 0x9a6   : > { %9633 = vmatmul.mubr.msk.bf16.vlgmr.msra.gmra.mrb[52].mxu1 %vm4705_vm5, %v10532_v8 }
 0x9a7   : > { %5948 = vmatpush1.bf16.msra.mxu1 %v5914_v49  ;;  %v6040_v58 = vpop.permute.xlu1 %6039  ;;  %5752 = vmatprep.mubr.bf16.mxu1 %v12232_v54 }
 0x9a8   : > { %v5913_v38 = vpop.permute.xlu0 %5912  ;;  %5949 = vmatprep.subr.bf16.mxu1 %v5917_v10 }
 0x9ab   : > { %5950 = vmatpush1.bf16.msra.mxu1 %v5916_v0  ;;  %v6038_v12 = vpop.permute.xlu1 %6037 }
 0x9ac   : > { %v6042_v4 = vpop.permute.xlu0 %6041  ;;  %5951 = vmatprep.subr.bf16.mxu1 %v5919_v24  ;;  %v6067_v60 = vsel %vm14796_vm3, %v6038_v12, %v6040_v58 }
 0x9ad   : > { %v6068_v16 = vsel %vm14795_vm14, %v6040_v58, %v6042_v4  ;;  %vm14799_vm14 = vmmov %vm14796_vm3 }
 0x9ae   : > { %9634 = vmatmul.mubr.msk.bf16.gmra.mrb[56].mxu1 %vm4705_vm5, %v10533_v3 }
 0x9af   : > { %5952 = vmatpush1.bf16.msra.mxu1 %v5918_v20  ;;  %v6048_v31 = vpop.permute.xlu1 %6047  ;;  %5762 = vmatprep.mubr.bf16.mxu1 %v12232_v54 }
 0x9b0   : > { %v6046_v50 = vpop.permute.xlu0 %6045  ;;  %5953 = vmatprep.subr.bf16.mxu1 %v5921_v53 }
 0x9b1   : > { %v6070_v59 = vsel %vm14797_vm7, %v6046_v50, %v6048_v31  ;;  %vm14800_vm7 = vmmov %vm14796_vm3 }
 0x9b3   : > { %5954 = vmatpush1.bf16.msra.mxu1 %v5920_v32  ;;  %v5911_v1 = vpop.permute.xlu1 %5910 }
 0x9b4   : > { %v6044_v48 = vpop.permute.xlu0 %6043  ;;  %v5923_v22 = vsel %vm14712_vm15, %v5911_v1, %v5913_v38 }
 0x9b5   : > { %9659 = vmatprep.subr.msk.bf16.mxu1 %vm4715_vm12, %v5923_v22  ;;  %v10543_v22 = vld [vmem:[%s14661_s7 + $0xb0] ss:$0 sps:$4 sm:$0x33]  }
 0x9b6   : > { %9635 = vmatmul.mubr.msk.bf16.gmra.mrb[60].mxu1 %vm4705_vm5, %v10534_v29 }
 0x9b7   : > { %v6052_v35 = vpop.permute.xlu1 %6051  ;;  %5979 = vmatprep.mubr.bf16.mxu1 %v12232_v54 }
 0x9b8   : > { %v5909_v7 = vpop.permute.xlu0 %5908 }
 0x9b9   : > { %v5922_v57 = vsel %vm14712_vm15, %v5909_v7, %v5911_v1  ;;  %vm14798_vm15 = vmmov %vm14796_vm3  ;;  %v10541_v1 = vld [vmem:[%s14661_s7 + $0xa0] sm:$0xff]  }
 0x9ba   : > { %v5942_v42 = vsel %vm4715_vm12, %v5922_v57, 0  ;;  %v6069_v11 = vsel %vm14798_vm15, %v6044_v48, %v6046_v50  ;;  %vm14801_vm15 = vmmov %vm14796_vm3  ;;  %v10542_v48 = vld [vmem:[%s14661_s7 + $0xa8] sm:$0xff]  }
 0x9bb   : > { %5956 = vmatpush1.bf16.msra.mxu1 %v5942_v42  ;;  %v6050_v45 = vpop.permute.xlu1 %6049 }
 0x9bc   : > { %v6054_v46 = vpop.permute.xlu0 %6053  ;;  %6100 = vmatprep.subr.bf16.mxu1 %v6068_v16  ;;  %v6071_v61 = vsel %vm14796_vm3, %v6050_v45, %v6052_v35 }
 0x9bd   : > { %v6072_v5 = vsel %vm14799_vm14, %v6052_v35, %v6054_v46  ;;  %vm14802_vm14 = vmmov %vm14796_vm3 }
 0x9be   : > { %9660 = vmatmul.mubr.msk.bf16.vlgmr.msra.gmra.mrb[52].mxu1 %vm4705_vm5, %v10535_v30 }
 0x9bf   : > { %6101 = vmatpush1.bf16.msra.mxu1 %v6067_v60  ;;  %v6060_v6 = vpop.permute.xlu1 %6059  ;;  %5989 = vmatprep.mubr.bf16.mxu1 %v12232_v54 }
 0x9c0   : > { %v6058_v9 = vpop.permute.xlu0 %6057  ;;  %6102 = vmatprep.subr.bf16.mxu1 %v6070_v59 }
 0x9c1   : > { %v6074_v41 = vsel %vm14800_vm7, %v6058_v9, %v6060_v6  ;;  %vm14803_vm7 = vcmask 769024  }
 0x9c3   : > { %6103 = vmatpush1.bf16.msra.mxu1 %v6069_v11  ;;  %v6062_v51 = vpop.permute.xlu1 %6061 }
 0x9c4   : > { %v6056_v36 = vpop.permute.xlu0 %6055  ;;  %6104 = vmatprep.subr.bf16.mxu1 %v6072_v5 }
 0x9c5   : > { %v6073_v47 = vsel %vm14801_vm15, %v6056_v36, %v6058_v9  ;;  %vm14804_vm15 = vmmov %vm14803_vm7 }
 0x9c6   : > { %9661 = vmatmul.mubr.msk.bf16.gmra.mrb[56].mxu1 %vm4705_vm5, %v10536_v39 }
 0x9c7   : > { %6105 = vmatpush1.bf16.msra.mxu1 %v6071_v61  ;;  %5999 = vmatprep.mubr.bf16.mxu1 %v12232_v54  ;;  %v6066_v44 = vpop.permute.xlu1 %6065 }
 0x9c8   : > { %v6064_v52 = vpop.permute.xlu0 %6063  ;;  %6106 = vmatprep.subr.bf16.mxu1 %v6074_v41 }
 0x9c9   : > { %v6075_v28 = vsel %vm14802_vm14, %v6062_v51, %v6064_v52  ;;  %v6076_v37 = vsel %vm14796_vm3, %v6064_v52, %v6066_v44  ;;  %vm14805_vm14 = vmmov %vm14803_vm7 }
 0x9ca   : > { %v6095_v19 = vsel %vm4715_vm12, %v6075_v28, 0  ;;  %vm14806_vm3 = vmmov %vm14803_vm7 }
 0x9cb   : > { %6107 = vmatpush1.bf16.msra.mxu1 %v6073_v47  ;;  %vm14811_vm11 = vmmov %vm14806_vm3 }
 0x9cc   : > { %9671 = vmatprep.subr.msk.bf16.mxu1 %vm4715_vm12, %v6076_v37 }
 0x9ce   : > { %9662 = vmatmul.mubr.msk.bf16.gmra.mrb[60].mxu1 %vm4705_vm5, %v10537_v23 }
 0x9cf   : > { %6109 = vmatpush1.bf16.msra.mxu1 %v6095_v19  ;;  %6132 = vmatprep.mubr.bf16.mxu1 %v12232_v54 }
 0x9d6   : > { %v6279_v13 = vpop.permute.xlu1 %6278  ;;  %9672 = vmatmul.mubr.msk.bf16.vlgmr.msra.gmra.mrb[52].mxu1 %vm4705_vm5, %v10538_v34 }
 0x9d7   : > { %v6277_v33 = vpop.permute.xlu0 %6276  ;;  %6142 = vmatprep.mubr.bf16.mxu1 %v12232_v54 }
 0x9d8   : > { %v6305_v56 = vsel %vm14803_vm7, %v6277_v33, %v6279_v13  ;;  %vm14807_vm7 = vmmov %vm14806_vm3 }
 0x9d9   : > { %6337 = vmatprep.subr.bf16.mxu1 %v6305_v56 }
 0x9da   : > { %v6283_v43 = vpop.permute.xlu1 %6282 }
 0x9db   : > { %v6275_v40 = vpop.permute.xlu0 %6274 }
 0x9dc   : > { %v6304_v21 = vsel %vm14804_vm15, %v6275_v40, %v6277_v33  ;;  %vm14808_vm15 = vmmov %vm14806_vm3 }
 0x9dd   : > { %6338 = vmatpush1.bf16.msra.mxu1 %v6304_v21 }
 0x9de   : > { %v6281_v2 = vpop.permute.xlu1 %6280  ;;  %9673 = vmatmul.mubr.msk.bf16.gmra.mrb[56].mxu1 %vm4705_vm5, %v10539_v14 }
 0x9df   : > { %v6285_v15 = vpop.permute.xlu0 %6284  ;;  %6152 = vmatprep.mubr.bf16.mxu1 %v12232_v54  ;;  %v6306_v26 = vsel %vm14806_vm3, %v6281_v2, %v6283_v43 }
 0x9e0   : > { %v6307_v8 = vsel %vm14805_vm14, %v6283_v43, %v6285_v15  ;;  %vm14809_vm14 = vmmov %vm14806_vm3 }
 0x9e1   : > { %6339 = vmatprep.subr.bf16.mxu1 %v6307_v8 }
 0x9e2   : > { %6340 = vmatpush1.bf16.msra.mxu1 %v6306_v26  ;;  %v6291_v55 = vpop.permute.xlu1 %6290 }
 0x9e3   : > { %v6289_v49 = vpop.permute.xlu0 %6288 }
 0x9e4   : > { %v6309_v58 = vsel %vm14807_vm7, %v6289_v49, %v6291_v55  ;;  %vm14810_vm7 = vmmov %vm14806_vm3 }
 0x9e5   : > { %6341 = vmatprep.subr.bf16.mxu1 %v6309_v58 }
 0x9e6   : > { %v6295_v10 = vpop.permute.xlu1 %6294  ;;  %9674 = vmatmul.mubr.msk.bf16.gmra.mrb[60].mxu1 %vm4705_vm5, %v10540_v18 }
 0x9e7   : > { %v6287_v38 = vpop.permute.xlu0 %6286  ;;  %6369 = vmatprep.mubr.bf16.mxu1 %v12232_v54 }
 0x9e8   : > { %v6308_v0 = vsel %vm14808_vm15, %v6287_v38, %v6289_v49 }
 0x9e9   : > { %6342 = vmatpush1.bf16.msra.mxu1 %v6308_v0 }
 0x9ea   : > { %v6293_v3 = vpop.permute.xlu1 %6292 }
 0x9eb   : > { %v6297_v12 = vpop.permute.xlu0 %6296  ;;  %v6310_v4 = vsel %vm14806_vm3, %v6293_v3, %v6295_v10 }
 0x9ec   : > { %v6311_v24 = vsel %vm14809_vm14, %v6295_v10, %v6297_v12 }
 0x9ed   : > { %6343 = vmatprep.subr.bf16.mxu1 %v6311_v24 }
 0x9ee   : > { %6344 = vmatpush1.bf16.msra.mxu1 %v6310_v4  ;;  %v6301_v20 = vpop.permute.xlu1 %6300 }
 0x9ef   : > { %v6299_v31 = vpop.permute.xlu0 %6298 }
 0x9f0   : > { %v6312_v53 = vsel %vm14810_vm7, %v6299_v31, %v6301_v20 }
 0x9f1   : > { %v6332_v29 = vsel %vm4715_vm12, %v6312_v53, 0 }
 0x9f3   : > { %v6303_v50 = vpop.permute.xlu0 %6302 }
 0x9f4   : > { %v6313_v32 = vsel %vm14811_vm11, %v6301_v20, %v6303_v50  ;;  %vm6473_vm11 = vcmask 1041544   ;;  %v14815_v50 = vld [vmem:[#allocation7_spill] sm:$0xff] }
 0x9f5   : > { %9698 = vmatprep.subr.msk.bf16.mxu1 %vm4715_vm12, %v6313_v32  ;;  %vm6474_vm12 = vcmask 1045508   ;;  %vm14816_vm14 = vcmp.ne.s16.totalorder %v14815_v50, 0 }
 0x9f6   : > { %6346 = vmatpush1.bf16.msra.mxu1 %v6332_v29  ;;  %vm13498_vm15 = vmor %vm6474_vm12, %vm6473_vm11 }
 0x9f7   : > { %vm14817_vm3 = vmmov %vm14816_vm14 }
 0x9f8   : > { %vm14819_vm7 = vmmov %vm14817_vm3 }
 0x9f9   : > { %9699 = vmatmul.mubr.msk.bf16.vlgmr.msra.gmra.mrb[52].mxu1 %vm4705_vm5, %v10541_v1  ;;  %vm14820_vm11 = vmmov %vm14817_vm3 }
 0x9fa   : > { %6379 = vmatprep.mubr.bf16.mxu1 %v12232_v54  ;;  %vm14821_vm12 = vmmov %vm14817_vm3 }
 0xa01   : > { %9700 = vmatmul.mubr.msk.bf16.gmra.mrb[56].mxu1 %vm4705_vm5, %v10542_v48 }
 0xa02   : > { %6389 = vmatprep.mubr.bf16.mxu1 %v12232_v54 }
 0xa09   : > { %9701 = vmatmul.mubr.msk.bf16.gmra.mrb[60].mxu1 %vm4705_vm5, %v10543_v22  ;;  %vm14714_vm5 = vcmask 132096  }
 0xa0a   : > { %6629 = vmatprep.mubr.bf16.mxu1 %v12232_v54 }
 0xacc   : > { %v6371_v35 = vpop.f32.mrb[52].mxu1 }
 0xacd   : > { %v6373_v7 = vpop.f32.mrb[53].mxu1 }
 0xace   : > { %v10025_v57 = vpack.c.bf16 %v6373_v7, %v6371_v35  ;;  %v6375_v42 = vpop.f32.mrb[54].mxu1 }
 0xacf   : > { %v6377_v30 = vpop.f32.mrb[55].mxu1 }
 0xad0   : > { %v10026_v45 = vpack.c.bf16 %v6377_v30, %v6375_v42  ;;  %6435 = vrot.lane.b32.xlu1 %v10025_v57, %s10686_s27 }
 0xad2   : > { %6437 = vrot.lane.b32.xlu0 %v10026_v45, %s10686_s27 }
 0xad4   : > { %v6381_v16 = vpop.f32.mrb[56].mxu1 }
 0xad5   : > { %v6383_v46 = vpop.f32.mrb[57].mxu1 }
 0xad6   : > { %v10027_v60 = vpack.c.bf16 %v6383_v46, %v6381_v16  ;;  %v6385_v6 = vpop.f32.mrb[58].mxu1 }
 0xad7   : > { %v6387_v59 = vpop.f32.mrb[59].mxu1 }
 0xad8   : > { %v10028_v9 = vpack.c.bf16 %v6387_v59, %v6385_v6  ;;  %6439 = vrot.lane.b32.xlu1 %v10027_v60, %s10686_s27 }
 0xada   : > { %6441 = vrot.lane.b32.xlu0 %v10028_v9, %s10686_s27 }
 0xadc   : > { %v6391_v11 = vpop.f32.mrb[60].mxu1 }
 0xadd   : > { %v6393_v39 = vpop.f32.mrb[61].mxu1 }
 0xade   : > { %v10029_v51 = vpack.c.bf16 %v6393_v39, %v6391_v11  ;;  %v6395_v5 = vpop.f32.mrb[62].mxu1 }
 0xadf   : > { %v6396_v36 = vpop.f32.mrb[63].mxu1  ;;  %v14822_v5 = vld [vmem:[#allocation13_spill] sm:$0xff] }
 0xae0   : > { %6443 = vrot.lane.b32.xlu1 %v10029_v51, %s10686_s27 }
 0xb42   : > { %v6436_v61 = vpop.permute.xlu1 %6435 }
 0xb43   : > { %v6445_v41 = vrot.slane %v6436_v61, 4 }
 0xb44   : > { %v6438_v44 = vpop.permute.xlu0 %6437 }
 0xb45   : > { %v6450_v52 = vsel %vm951_vm4, %v6445_v41, %v6436_v61  ;;  %6466 = vst.msk [vmem:[#allocation3 + $0x8] sm:$0xf] %vm14715_vm0, %v6445_v41  ;;  %v6446_v47 = vrot.slane %v6438_v44, 4 }
 0xb46   : > { %6465 = vst.msk [vmem:[#allocation3] sm:$0xff] %vm12442_vm10, %v6450_v52 }
 0xb47   : > { %v6451_v28 = vsel %vm951_vm4, %v6446_v47, %v6438_v44  ;;  %6468 = vst.msk [vmem:[#allocation3 + $0x14] sm:$0xf] %vm14715_vm0, %v6446_v47 }
 0xb48   : > { %6467 = vst.msk [vmem:[#allocation3 + $0xc] sm:$0xff] %vm12442_vm10, %v6451_v28 }
 0xb4a   : > { %v6440_v37 = vpop.permute.xlu1 %6439 }
 0xb4b   : > { %v6447_v19 = vrot.slane %v6440_v37, 4 }
 0xb4c   : > { %v6442_v34 = vpop.permute.xlu0 %6441  ;;  %v13474_v56 = vld [vmem:[#allocation3 + $0x8] sm:$0xf] }
 0xb4d   : > { %v6452_v13 = vsel %vm951_vm4, %v6447_v19, %v6440_v37  ;;  %6470 = vst.msk [vmem:[#allocation3 + $0x20] sm:$0xf] %vm14715_vm0, %v6447_v19  ;;  %v6448_v33 = vrot.slane %v6442_v34, 4  ;;  %v13484_v21 = vld [vmem:[#allocation3] sm:$0xff]  ;;  %v6773_v7 = vsel %vm12507_vm2, %v13474_v56, 0  ;;  %v6950_v28 = vsel %vm12678_vm1, %v13474_v56, 0 }
 0xb4e   : > { %6469 = vst.msk [vmem:[#allocation3 + $0x18] sm:$0xff] %vm12442_vm10, %v6452_v13  ;;  %v13476_v43 = vld [vmem:[#allocation3 + $0x14] sm:$0xf]  ;;  %v6772_v1 = vsel %vm14817_vm3, %v13484_v21, 0 }
 0xb4f   : > { %v6453_v14 = vsel %vm951_vm4, %v6448_v33, %v6442_v34  ;;  %6472 = vst.msk [vmem:[#allocation3 + $0x2c] sm:$0xf] %vm14715_vm0, %v6448_v33  ;;  %v13482_v40 = vcombine.low %v13474_v56, %v13476_v43  ;;  %v13486_v2 = vld [vmem:[#allocation3 + $0xc] sm:$0xff]  ;;  %v6775_v22 = vsel %vm12507_vm2, %v13476_v43, 0  ;;  %v6952_v52 = vsel %vm12678_vm1, %v13476_v43, 0 }
 0xb50   : > { %6471 = vst.msk [vmem:[#allocation3 + $0x24] sm:$0xff] %vm12442_vm10, %v6453_v14  ;;  %v13492_v15 = vcombine.high %v13484_v21, %v13486_v2  ;;  %v13504_v18 = vcombine.low %v13484_v21, %v13486_v2  ;;  %v6774_v32 = vsel %vm14816_vm14, %v13486_v2, 0  ;;  %v9751_v57 = vcombine.low %v6773_v7, %v6775_v22 }
 0xb51   : > { %6556 = vrot.lane.b32.xlu1 %v13482_v40, %s10694_s18  ;;  %v9750_v35 = vcombine.high %v6772_v1, %v6774_v32  ;;  %v9749_v30 = vcombine.low %v6772_v1, %v6774_v32  ;;  %vm14823_vm14 = vcmp.ne.s16.totalorder %v14822_v5, 0  ;;  %v9772_v37 = vcombine.low %v6950_v28, %v6952_v52 }
 0xb52   : > { %6554 = vrot.lane.b32.xlu0 %v13492_v15, %s10694_s18  ;;  %v6444_v8 = vpop.permute.xlu1 %6443  ;;  %v6951_v36 = vsel %vm14823_vm14, %v13486_v2, 0  ;;  %vm14824_vm3 = vmmov %vm14823_vm14  ;;  %vm14829_vm14 = vcmp.ne.s16.totalorder %v12789_v25, 0 }
 0xb53   : > { %v6449_v55 = vrot.slane %v6444_v8, 4  ;;  %v6949_v41 = vsel %vm14824_vm3, %v13484_v21, 0 }
 0xb54   : > { %v13512_v58 = vld [vmem:[#allocation3 + $0x20] sm:$0xf]  ;;  %v9771_v47 = vcombine.high %v6949_v41, %v6951_v36  ;;  %v9770_v34 = vcombine.low %v6949_v41, %v6951_v36 }
 0xb55   : > { %v6454_v49 = vsel %vm951_vm4, %v6449_v55, %v6444_v8  ;;  %6478 = vst.msk [vmem:[#allocation3 + $0x38] sm:$0x3] %vm14714_vm5, %v6449_v55  ;;  %v13520_v0 = vld [vmem:[#allocation3 + $0x18] sm:$0xff]  ;;  %v6777_v60 = vsel %vm12507_vm2, %v13512_v58, 0  ;;  %v6954_v8 = vsel %vm12678_vm1, %v13512_v58, 0 }
 0xb56   : > { %6476 = vst.msk [vmem:[#allocation3 + $0x30] sm:$0x33] %vm13498_vm15, %v6454_v49  ;;  %6552 = vrot.lane.b32.xlu0 %v13504_v18, %s10694_s18  ;;  %v13514_v10 = vld [vmem:[#allocation3 + $0x2c] sm:$0xf]  ;;  %v6776_v45 = vsel %vm14820_vm11, %v13520_v0, 0  ;;  %vm14827_vm11 = vmmov %vm14824_vm3 }
 0xb57   : > { %v13518_v38 = vcombine.low %v13512_v58, %v13514_v10  ;;  %v13522_v3 = vld [vmem:[#allocation3 + $0x24] sm:$0xff]  ;;  %v6779_v16 = vsel %vm12507_vm2, %v13514_v10, 0  ;;  %v6953_v13 = vsel %vm14827_vm11, %v13520_v0, 0  ;;  %v6956_v33 = vsel %vm12678_vm1, %v13514_v10, 0 }
 0xb58   : > { %v13526_v12 = vcombine.high %v13520_v0, %v13522_v3  ;;  %v13534_v24 = vcombine.low %v13520_v0, %v13522_v3  ;;  %v6778_v42 = vsel %vm14819_vm7, %v13522_v3, 0  ;;  %v9754_v6 = vcombine.low %v6777_v60, %v6779_v16  ;;  %vm14826_vm7 = vmmov %vm14824_vm3 }
 0xb59   : > { %v9753_v46 = vcombine.high %v6776_v45, %v6778_v42  ;;  %v9752_v9 = vcombine.low %v6776_v45, %v6778_v42  ;;  %v6955_v19 = vsel %vm14826_vm7, %v13522_v3, 0  ;;  %v9775_v55 = vcombine.low %v6954_v8, %v6956_v33 }
 0xb5a   : > { %6562 = vrot.lane.b32.xlu0 %v13518_v38, %s10694_s18  ;;  %6560 = vrot.lane.b32.xlu1 %v13526_v12, %s10694_s18  ;;  %v9774_v14 = vcombine.high %v6953_v13, %v6955_v19  ;;  %v9773_v32 = vcombine.low %v6953_v13, %v6955_v19  ;;  %v7262_v45 = vsel %vm12791_vm13, %v13476_v43, 0  ;;  %v7439_v13 = vsel %vm12946_vm9, %v13476_v43, 0 }
 0xb5c   : > { %v13544_v31 = vld [vmem:[#allocation3 + $0x38] sm:$0x3] }
 0xb5d   : > { %v13536_v4 = vld [vmem:[#allocation3 + $0x30] sm:$0x33]  ;;  %v13559_v29 = vcombine.low %v13544_v31, %v13544_v31  ;;  %v6781_v39 = vsel %vm12507_vm2, %v13544_v31, 0  ;;  %v6958_v22 = vsel %vm12678_vm1, %v13544_v31, 0 }
 0xb5e   : > { %6558 = vrot.lane.b32.xlu1 %v13534_v24, %s10694_s18  ;;  %v13542_v20 = vcombine.low %v13536_v4, %v13536_v4  ;;  %v13550_v53 = vcombine.high %v13536_v4, %v13536_v4  ;;  %v6780_v59 = vsel %vm14821_vm12, %v13536_v4, 0  ;;  %v9757_v61 = vcombine.low %v6781_v39, %v6781_v39  ;;  %vm14828_vm12 = vmmov %vm14824_vm3 }
 0xb5f   : > { %v9755_v11 = vcombine.low %v6780_v59, %v6780_v59  ;;  %v9756_v51 = vcombine.high %v6780_v59, %v6780_v59  ;;  %v6957_v49 = vsel %vm14828_vm12, %v13536_v4, 0  ;;  %v9778_v7 = vcombine.low %v6958_v22, %v6958_v22  ;;  %vm14830_vm3 = vmmov %vm14829_vm14 }
 0xb60   : > { %6564 = vrot.lane.b32.xlu0 %v13542_v20, %s10694_s18  ;;  %v9776_v1 = vcombine.low %v6957_v49, %v6957_v49  ;;  %v7259_v42 = vsel %vm14830_vm3, %v13484_v21, 0  ;;  %vm14832_vm7 = vmmov %vm14830_vm3 }
 0xb61   : > { %vm14833_vm11 = vmmov %vm14830_vm3 }
 0xb62   : > { %6566 = vrot.lane.b32.xlu1 %v13550_v53, %s10694_s18  ;;  %vm14834_vm12 = vmmov %vm14830_vm3 }
 0xb64   : > { %6568 = vrot.lane.b32.xlu0 %v13559_v29, %s10694_s18 }
 0xb66   : > { %6837 = vrot.lane.b32.xlu1 %v9750_v35, %s10695_s20  ;;  %v9777_v35 = vcombine.high %v6957_v49, %v6957_v49 }
 0xb68   : > { %6839 = vrot.lane.b32.xlu0 %v9751_v57, %s10695_s20  ;;  %v7261_v57 = vsel %vm14829_vm14, %v13486_v2, 0  ;;  %vm14835_vm14 = vcmp.ne.s16.totalorder %v12944_v62, 0 }
 0xb69   : > { %v9804_v16 = vcombine.high %v7259_v42, %v7261_v57  ;;  %v9803_v59 = vcombine.low %v7259_v42, %v7261_v57  ;;  %vm14836_vm3 = vmmov %vm14835_vm14 }
 0xb6a   : > { %6835 = vrot.lane.b32.xlu1 %v9749_v30, %s10695_s20 }
 0xb6c   : > { %6843 = vrot.lane.b32.xlu0 %v9753_v46, %s10695_s20  ;;  %v7260_v46 = vsel %vm12791_vm13, %v13474_v56, 0 }
 0xb6d   : > { %v9805_v60 = vcombine.low %v7260_v46, %v7262_v45 }
 0xb6e   : > { %6845 = vrot.lane.b32.xlu1 %v9754_v6, %s10695_s20  ;;  %v7265_v6 = vsel %vm14832_vm7, %v13522_v3, 0  ;;  %vm14837_vm7 = vmmov %vm14836_vm3 }
 0xb70   : > { %6841 = vrot.lane.b32.xlu0 %v9752_v9, %s10695_s20  ;;  %v7263_v9 = vsel %vm14833_vm11, %v13520_v0, 0  ;;  %vm14838_vm11 = vmmov %vm14836_vm3 }
 0xb71   : > { %v9807_v39 = vcombine.high %v7263_v9, %v7265_v6  ;;  %v9806_v41 = vcombine.low %v7263_v9, %v7265_v6 }
 0xb72   : > { %6847 = vrot.lane.b32.xlu1 %v9755_v11, %s10695_s20  ;;  %v7266_v11 = vsel %vm12791_vm13, %v13514_v10, 0 }
 0xb74   : > { %6849 = vrot.lane.b32.xlu0 %v9756_v51, %s10695_s20  ;;  %v7264_v51 = vsel %vm12791_vm13, %v13512_v58, 0 }
 0xb75   : > { %v9808_v36 = vcombine.low %v7264_v51, %v7266_v11 }
 0xb76   : > { %6851 = vrot.lane.b32.xlu1 %v9757_v61, %s10695_s20  ;;  %v7267_v61 = vsel %vm14834_vm12, %v13536_v4, 0  ;;  %vm14839_vm12 = vmmov %vm14836_vm3 }
 0xb77   : > { %v9809_v52 = vcombine.low %v7267_v61, %v7267_v61  ;;  %v9810_v28 = vcombine.high %v7267_v61, %v7267_v61  ;;  %v7444_v57 = vsel %vm14839_vm12, %v13536_v4, 0 }
 0xb78   : > { %7014 = vrot.lane.b32.xlu0 %v9771_v47, %s14737_s22  ;;  %v7268_v47 = vsel %vm12791_vm13, %v13544_v31, 0  ;;  %v9830_v45 = vcombine.low %v7444_v57, %v7444_v57  ;;  %v9831_v46 = vcombine.high %v7444_v57, %v7444_v57 }
 0xb79   : > { %v9811_v19 = vcombine.low %v7268_v47, %v7268_v47 }
 0xb7a   : > { %7016 = vrot.lane.b32.xlu1 %v9772_v37, %s14737_s22  ;;  %v7438_v37 = vsel %vm14835_vm14, %v13486_v2, 0  ;;  %vm14840_vm14 = vcmask 1039360  }
 0xb7c   : > { %7012 = vrot.lane.b32.xlu0 %v9770_v34, %s14737_s22  ;;  %v7436_v34 = vsel %vm14836_vm3, %v13484_v21, 0  ;;  %vm14841_vm3 = vmmov %vm14840_vm14 }
 0xb7d   : > { %v9825_v33 = vcombine.high %v7436_v34, %v7438_v37  ;;  %v9824_v49 = vcombine.low %v7436_v34, %v7438_v37  ;;  %v10588_v37 = vld [vmem:[%s14663_s9 + $0x18] sm:$0xff]  }
 0xb7e   : > { %7020 = vrot.lane.b32.xlu1 %v9774_v14, %s14737_s22  ;;  %v7437_v14 = vsel %vm12946_vm9, %v13474_v56, 0 }
 0xb7f   : > { %v9826_v8 = vcombine.low %v7437_v14, %v7439_v13  ;;  %v7751_v14 = vsel %vm13238_vm8, %v13512_v58, 0 }
 0xb80   : > { %7022 = vrot.lane.b32.xlu0 %v9775_v55, %s14737_s22  ;;  %v7442_v55 = vsel %vm14837_vm7, %v13522_v3, 0  ;;  %vm14842_vm7 = vmmov %vm14841_vm3 }
 0xb82   : > { %7018 = vrot.lane.b32.xlu1 %v9773_v32, %s14737_s22  ;;  %v7440_v32 = vsel %vm14838_vm11, %v13520_v0, 0  ;;  %vm14843_vm11 = vcmp.ne.s16.totalorder %v13236_v27, 0 }
 0xb83   : > { %v9828_v22 = vcombine.high %v7440_v32, %v7442_v55  ;;  %v9827_v42 = vcombine.low %v7440_v32, %v7442_v55  ;;  %vm14844_vm12 = vmmov %vm14843_vm11  ;;  %v10552_v32 = vld [vmem:[%s14662_s8 + $0x14] sm:$0xff]  }
 0xb84   : > { %7024 = vrot.lane.b32.xlu0 %v9776_v1, %s14737_s22  ;;  %v7443_v1 = vsel %vm12946_vm9, %v13514_v10, 0 }
 0xb86   : > { %7026 = vrot.lane.b32.xlu1 %v9777_v35, %s14737_s22  ;;  %v7441_v35 = vsel %vm12946_vm9, %v13512_v58, 0 }
 0xb88   : > { %7028 = vrot.lane.b32.xlu0 %v9778_v7, %s14737_s22  ;;  %v9829_v7 = vcombine.low %v7441_v35, %v7443_v1 }
 0xb8a   : > { %7147 = vrot.lane.b32.xlu1 %v13492_v15, %s14739_s26 }
 0xb8c   : > { %7149 = vrot.lane.b32.xlu0 %v13482_v40, %s14739_s26 }
 0xb8e   : > { %7145 = vrot.lane.b32.xlu1 %v13504_v18, %s14739_s26 }
 0xb90   : > { %7153 = vrot.lane.b32.xlu0 %v13526_v12, %s14739_s26 }
 0xb92   : > { %7155 = vrot.lane.b32.xlu1 %v13518_v38, %s14739_s26 }
 0xb94   : > { %7151 = vrot.lane.b32.xlu0 %v13534_v24, %s14739_s26 }
 0xb96   : > { %7157 = vrot.lane.b32.xlu1 %v13542_v20, %s14739_s26 }
 0xb98   : > { %7159 = vrot.lane.b32.xlu0 %v13550_v53, %s14739_s26 }
 0xb9a   : > { %7161 = vrot.lane.b32.xlu1 %v13559_v29, %s14739_s26 }
 0xb9c   : > { %7324 = vrot.lane.b32.xlu0 %v9804_v16, %s14746_s28  ;;  %v7445_v16 = vsel %vm12946_vm9, %v13544_v31, 0 }
 0xb9e   : > { %7326 = vrot.lane.b32.xlu1 %v9805_v60, %s14746_s28  ;;  %v9832_v60 = vcombine.low %v7445_v16, %v7445_v16  ;;  %v6488_v16 = vsel %vm10873_vm6, %v13536_v4, 0 }
 0xba0   : > { %7322 = vrot.lane.b32.xlu0 %v9803_v59, %s14746_s28 }
 0xba2   : > { %7330 = vrot.lane.b32.xlu1 %v9807_v39, %s14746_s28 }
 0xba4   : > { %7332 = vrot.lane.b32.xlu0 %v9808_v36, %s14746_s28 }
 0xba6   : > { %7328 = vrot.lane.b32.xlu1 %v9806_v41, %s14746_s28 }
 0xba8   : > { %7334 = vrot.lane.b32.xlu0 %v9809_v52, %s14746_s28 }
 0xbaa   : > { %7336 = vrot.lane.b32.xlu1 %v9810_v28, %s14746_s28 }
 0xbac   : > { %7338 = vrot.lane.b32.xlu0 %v9811_v19, %s14746_s28  ;;  %v6485_v19 = vsel %vm10873_vm6, %v13486_v2, 0 }
 0xbae   : > { %7501 = vrot.lane.b32.xlu1 %v9825_v33, %s10711_s11 }
 0xbb0   : > { %7503 = vrot.lane.b32.xlu0 %v9826_v8, %s10711_s11  ;;  %v6484_v8 = vsel %vm10873_vm6, %v13484_v21, 0 }
 0xbb1   : > { %v9731_v35 = vcombine.low %v6484_v8, %v6485_v19 }
 0xbb2   : > { %7499 = vrot.lane.b32.xlu1 %v9824_v49, %s10711_s11  ;;  %v9732_v49 = vcombine.high %v6484_v8, %v6485_v19  ;;  %v10557_v8 = vld [vmem:[%s14662_s8 + $0x10] ss:$0 sps:$4 sm:$0x33]  }
 0xbb4   : > { %7507 = vrot.lane.b32.xlu0 %v9828_v22, %s10711_s11 }
 0xbb6   : > { %7509 = vrot.lane.b32.xlu1 %v9829_v7, %s10711_s11  ;;  %v6486_v7 = vsel %vm10873_vm6, %v13520_v0, 0 }
 0xbb8   : > { %7505 = vrot.lane.b32.xlu0 %v9827_v42, %s10711_s11 }
 0xbba   : > { %7511 = vrot.lane.b32.xlu1 %v9830_v45, %s10711_s11 }
 0xbbc   : > { %7513 = vrot.lane.b32.xlu0 %v9831_v46, %s10711_s11 }
 0xbbe   : > { %7515 = vrot.lane.b32.xlu1 %v9832_v60, %s10711_s11 }
 0xbc0   : > { %7634 = vrot.lane.b32.xlu0 %v13492_v15, %s14761_s29 }
 0xbc2   : > { %7636 = vrot.lane.b32.xlu1 %v13482_v40, %s14761_s29 }
 0xbc3   : > { %v6557_v6 = vpop.permute.xlu1 %6556 }
 0xbc4   : > { %v6555_v59 = vpop.permute.xlu0 %6554  ;;  %7632 = vrot.lane.b32.xlu0 %v13504_v18, %s14761_s29 }
 0xbc5   : > { %v6571_v9 = vsel %vm14840_vm14, %v6555_v59, %v6557_v6  ;;  %vm14845_vm14 = vmmov %vm14841_vm3 }
 0xbc6   : > { %7640 = vrot.lane.b32.xlu1 %v13526_v12, %s14761_s29  ;;  %6597 = vmatprep.subr.bf16.mxu1 %v6571_v9  ;;  %v7748_v12 = vsel %vm14843_vm11, %v13486_v2, 0  ;;  %v9736_v9 = vcombine.high %v6488_v16, %v6488_v16 }
 0xbc8   : > { %v6553_v11 = vpop.permute.xlu0 %6552  ;;  %7642 = vrot.lane.b32.xlu0 %v13518_v38, %s14761_s29  ;;  %v7746_v38 = vsel %vm14844_vm12, %v13484_v21, 0  ;;  %vm14849_vm12 = vmmov %vm14842_vm7  ;;  %v6487_v21 = vsel %vm10873_vm6, %v13522_v3, 0 }
 0xbc9   : > { %v6570_v15 = vsel %vm14841_vm3, %v6553_v11, %v6555_v59  ;;  %v9858_v51 = vcombine.high %v7746_v38, %v7748_v12  ;;  %vm14846_vm3 = vmmov %vm14843_vm11  ;;  %v9857_v52 = vcombine.low %v7746_v38, %v7748_v12  ;;  %v9734_v45 = vcombine.high %v6486_v7, %v6487_v21  ;;  %v10554_v38 = vld [vmem:[%s14662_s8 + $0x24] ss:$0 sps:$4 sm:$0x33]  }
 0xbca   : > { %7638 = vrot.lane.b32.xlu1 %v13534_v24, %s14761_s29  ;;  %6598 = vmatpush1.bf16.msra.mxu1 %v6570_v15  ;;  %v7749_v24 = vsel %vm13238_vm8, %v13476_v43, 0  ;;  %v7752_v43 = vsel %vm14846_vm3, %v13522_v3, 0  ;;  %vm14847_vm11 = vmmov %vm14846_vm3  ;;  %v7754_v58 = vsel %vm14846_vm3, %v13536_v4, 0  ;;  %v7755_v3 = vsel %vm13238_vm8, %v13544_v31, 0  ;;  %v10553_v31 = vld [vmem:[%s14662_s8 + $0x1c] sm:$0xff]  }
 0xbcb   : > { %v7750_v28 = vsel %vm14847_vm11, %v13520_v0, 0  ;;  %v9863_v42 = vcombine.low %v7754_v58, %v7754_v58  ;;  %v9864_v46 = vcombine.high %v7754_v58, %v7754_v58  ;;  %v9733_v60 = vcombine.low %v6486_v7, %v6487_v21 }
 0xbcc   : > { %v6563_v40 = vpop.permute.xlu0 %6562  ;;  %7644 = vrot.lane.b32.xlu0 %v13542_v20, %s14761_s29  ;;  %v6561_v18 = vpop.permute.xlu1 %6560  ;;  %v9861_v13 = vcombine.high %v7750_v28, %v7752_v43  ;;  %v9860_v22 = vcombine.low %v7750_v28, %v7752_v43  ;;  %v9865_v59 = vcombine.low %v7755_v3, %v7755_v3  ;;  %v9735_v11 = vcombine.low %v6488_v16, %v6488_v16 }
 0xbcd   : > { %v6573_v39 = vsel %vm14842_vm7, %v6561_v18, %v6563_v40 }
 0xbce   : > { %7646 = vrot.lane.b32.xlu1 %v13550_v53, %s14761_s29  ;;  %6599 = vmatprep.subr.bf16.mxu1 %v6573_v39  ;;  %v7747_v53 = vsel %vm13238_vm8, %v13474_v56, 0  ;;  %v7753_v56 = vsel %vm13238_vm8, %v13514_v10, 0 }
 0xbcf   : > { %v9859_v41 = vcombine.low %v7747_v53, %v7749_v24  ;;  %v9862_v55 = vcombine.low %v7751_v14, %v7753_v56  ;;  %v10555_v53 = vld [vmem:[%s14662_s8] sm:$0xff]  }
 0xbd0   : > { %7648 = vrot.lane.b32.xlu0 %v13559_v29, %s14761_s29  ;;  %v6559_v20 = vpop.permute.xlu1 %6558 }
 0xbd1   : > { %v6572_v36 = vsel %vm14845_vm14, %v6559_v20, %v6561_v18  ;;  %vm6590_vm14 = vcmask 1041408  }
 0xbd2   : > { %7811 = vrot.lane.b32.xlu1 %v9858_v51, %s14788_s19  ;;  %v6565_v61 = vpop.permute.xlu0 %6564  ;;  %6600 = vmatpush1.bf16.msra.mxu1 %v6572_v36  ;;  %v6706_v40 = vsel %vm6590_vm14, %v9735_v11, 0 }
 0xbd4   : > { %7813 = vrot.lane.b32.xlu0 %v9859_v41, %s14788_s19  ;;  %v6567_v29 = vpop.permute.xlu1 %6566 }
 0xbd5   : > { %v6574_v47 = vsel %vm14842_vm7, %v6565_v61, %v6567_v29  ;;  %vm14850_vm7 = vcmask 293888  }
 0xbd6   : > { %7809 = vrot.lane.b32.xlu1 %v9857_v52, %s14788_s19  ;;  %v6569_v34 = vpop.permute.xlu0 %6568  ;;  %v6592_v10 = vsel %vm6590_vm14, %v6574_v47, 0  ;;  %vm14851_vm11 = vmmov %vm14850_vm7  ;;  %v10556_v47 = vld [vmem:[%s14662_s8 + $0x8] sm:$0xff]  }
 0xbd7   : > { %v6575_v33 = vsel %vm14849_vm12, %v6567_v29, %v6569_v34  ;;  %vm14852_vm12 = vcmask 1031168   ;;  %vm14853_vm3 = vmmov %vm14850_vm7 }
 0xbd8   : > { %7817 = vrot.lane.b32.xlu0 %v9861_v13, %s14788_s19  ;;  %9724 = vmatprep.subr.msk.bf16.mxu1 %vm6590_vm14, %v6575_v33  ;;  %v6838_v2 = vpop.permute.xlu1 %6837 }
 0xbd9   : > { %6602 = vmatpush1.bf16.msra.mxu1 %v6592_v10 }
 0xbda   : > { %7819 = vrot.lane.b32.xlu1 %v9862_v55, %s14788_s19  ;;  %v6840_v1 = vpop.permute.xlu0 %6839  ;;  %6711 = vmatprep.subr.bf16.mxu1 %v9732_v49  ;;  %v10558_v49 = vld [vmem:[%s14662_s8 + $0x28] sm:$0xff]  }
 0xbdb   : > { %v6854_v18 = vsel %vm14852_vm12, %v6838_v2, %v6840_v1 }
 0xbdc   : > { %7815 = vrot.lane.b32.xlu0 %v9860_v22, %s14788_s19  ;;  %9725 = vmatmul.mubr.msk.bf16.vlgmr.msra.gmra.mrb[64].mxu1 %vm14850_vm7, %v10552_v32  ;;  %v6836_v57 = vpop.permute.xlu1 %6835  ;;  %vm14854_vm7 = vmmov %vm14852_vm12 }
 0xbdd   : > { %6712 = vmatpush1.bf16.msra.mxu1 %v9731_v35  ;;  %6639 = vmatprep.mubr.bf16.mxu1 %v12232_v54  ;;  %v6853_v61 = vsel %vm14854_vm7, %v6836_v57, %v6838_v2  ;;  %vm14856_vm12 = vmmov %vm14854_vm7  ;;  %v10559_v35 = vld [vmem:[%s14662_s8 + $0x30] sm:$0xff]  }
 0xbde   : > { %7821 = vrot.lane.b32.xlu1 %v9863_v42, %s14788_s19  ;;  %v6844_v0 = vpop.permute.xlu0 %6843  ;;  %6713 = vmatprep.subr.bf16.mxu1 %v9734_v45 }
 0xbe0   : > { %7823 = vrot.lane.b32.xlu0 %v9864_v46, %s14788_s19  ;;  %v6846_v6 = vpop.permute.xlu1 %6845  ;;  %v10560_v46 = vld [vmem:[%s14662_s8 + $0x38] ss:$0 sps:$4 sm:$0x33]  }
 0xbe1   : > { %6714 = vmatpush1.bf16.msra.mxu1 %v9733_v60  ;;  %v6856_v43 = vsel %vm14856_vm12, %v6844_v0, %v6846_v6 }
 0xbe2   : > { %7825 = vrot.lane.b32.xlu1 %v9865_v59, %s14788_s19  ;;  %v6842_v4 = vpop.permute.xlu0 %6841  ;;  %9737 = vmatprep.subr.msk.bf16.mxu1 %vm6590_vm14, %v9736_v9  ;;  %v10561_v9 = vld [vmem:[%s14662_s8 + $0x3c] sm:$0xff]  }
 0xbe4   : > { %9726 = vmatmul.mubr.msk.bf16.gmra.mrb[68].mxu1 %vm14851_vm11, %v10553_v31  ;;  %v6848_v15 = vpop.permute.xlu1 %6847  ;;  %vm14855_vm11 = vmmov %vm14853_vm3 }
 0xbe5   : > { %6716 = vmatpush1.bf16.msra.mxu1 %v6706_v40  ;;  %6649 = vmatprep.mubr.bf16.mxu1 %v12232_v54 }
 0xbe6   : > { %v6850_v39 = vpop.permute.xlu0 %6849  ;;  %6878 = vmatprep.subr.bf16.mxu1 %v6854_v18  ;;  %v10562_v18 = vld [vmem:[%s14662_s8 + $0x44] sm:$0xff]  }
 0xbe8   : > { %v6852_v12 = vpop.permute.xlu1 %6851 }
 0xbea   : > { %v7015_v24 = vpop.permute.xlu0 %7014 }
 0xbec   : > { %9727 = vmatmul.mubr.msk.bf16.gmra.mrb[72].mxu1 %vm14853_vm3, %v10554_v38  ;;  %v7017_v20 = vpop.permute.xlu1 %7016  ;;  %vm14857_vm3 = vmmov %vm14854_vm7 }
 0xbed   : > { %6743 = vmatprep.mubr.bf16.mxu1 %v12232_v54  ;;  %v6855_v52 = vsel %vm14857_vm3, %v6842_v4, %v6844_v0  ;;  %vm14858_vm5 = vmmov %vm14857_vm3 }
 0xbee   : > { %v7013_v51 = vpop.permute.xlu0 %7012  ;;  %v6857_v28 = vsel %vm14858_vm5, %v6848_v15, %v6850_v39  ;;  %vm14859_vm0 = vmmov %vm14857_vm3 }
 0xbef   : > { %v6858_v56 = vsel %vm14859_vm0, %v6850_v39, %v6852_v12  ;;  %vm14860_vm7 = vmmov %vm14855_vm11  ;;  %v6873_v13 = vsel %vm6590_vm14, %v6857_v28, 0 }
 0xbf0   : > { %v7021_v36 = vpop.permute.xlu1 %7020  ;;  %vm14862_vm0 = vmmov %vm14860_vm7 }
 0xbf1   : > { %vm14864_vm12 = vmmov %vm14862_vm0 }
 0xbf2   : > { %v7023_v41 = vpop.permute.xlu0 %7022 }
 0xbf4   : > { %9738 = vmatmul.mubr.msk.bf16.vlgmr.msra.gmra.mrb[64].mxu1 %vm14855_vm11, %v10555_v53  ;;  %v7019_v29 = vpop.permute.xlu1 %7018  ;;  %vm14861_vm11 = vcmask 916480   ;;  %v10563_v53 = vld [vmem:[%s14662_s8 + $0x4c] ss:$0 sps:$4 sm:$0x33]  }
 0xbf5   : > { %6879 = vmatpush1.bf16.msra.mxu1 %v6853_v61  ;;  %6753 = vmatprep.mubr.bf16.mxu1 %v12232_v54  ;;  %v7031_v33 = vsel %vm14861_vm11, %v7015_v24, %v7017_v20  ;;  %vm14863_vm5 = vmmov %vm14861_vm11 }
 0xbf6   : > { %6880 = vmatprep.subr.bf16.mxu1 %v6856_v43  ;;  %v7025_v19 = vpop.permute.xlu0 %7024  ;;  %v7030_v32 = vsel %vm14863_vm5, %v7013_v51, %v7015_v24  ;;  %vm14865_vm3 = vmmov %vm14863_vm5 }
 0xbf7   : > { %v7033_v21 = vsel %vm14865_vm3, %v7021_v36, %v7023_v41  ;;  %vm14867_vm11 = vmmov %vm14865_vm3 }
 0xbf8   : > { %v7027_v34 = vpop.permute.xlu1 %7026  ;;  %vm14869_vm5 = vmmov %vm14864_vm12 }
 0xbf9   : > { %6881 = vmatpush1.bf16.msra.mxu1 %v6855_v52  ;;  %v7034_v7 = vsel %vm14867_vm11, %v7025_v19, %v7027_v34 }
 0xbfa   : > { %9758 = vmatprep.subr.msk.bf16.mxu1 %vm6590_vm14, %v6858_v56  ;;  %v7029_v14 = vpop.permute.xlu0 %7028  ;;  %v7050_v3 = vsel %vm6590_vm14, %v7034_v7, 0 }
 0xbfc   : > { %9739 = vmatmul.mubr.msk.bf16.gmra.mrb[68].mxu1 %vm14860_vm7, %v10556_v47  ;;  %v7148_v2 = vpop.permute.xlu1 %7147  ;;  %vm14866_vm7 = vmmov %vm14865_vm3 }
 0xbfd   : > { %6883 = vmatpush1.bf16.msra.mxu1 %v6873_v13  ;;  %6763 = vmatprep.mubr.bf16.mxu1 %v12232_v54  ;;  %v7032_v22 = vsel %vm14866_vm7, %v7019_v29, %v7021_v36  ;;  %v10564_v29 = vld [vmem:[%s14662_s8 + $0x50] sm:$0xff]  }
 0xbfe   : > { %7055 = vmatprep.subr.bf16.mxu1 %v7031_v33  ;;  %v7150_v10 = vpop.permute.xlu0 %7149 }
 0xc00   : > { %v7146_v55 = vpop.permute.xlu1 %7145 }
 0xc02   : > { %v7154_v58 = vpop.permute.xlu0 %7153 }
 0xc04   : > { %9740 = vmatmul.mubr.msk.bf16.gmra.mrb[72].mxu1 %vm14862_vm0, %v10557_v8  ;;  %v7156_v1 = vpop.permute.xlu1 %7155  ;;  %vm14868_vm0 = vmmov %vm14865_vm3 }
 0xc05   : > { %6910 = vmatprep.mubr.bf16.mxu1 %v12232_v54  ;;  %v7035_v57 = vsel %vm14868_vm0, %v7027_v34, %v7029_v14  ;;  %vm14871_vm3 = vmmov %vm14869_vm5  ;;  %v10565_v34 = vld [vmem:[%s14662_s8 + $0x58] sm:$0xff]  }
 0xc06   : > { %v7152_v42 = vpop.permute.xlu0 %7151  ;;  %vm14873_vm11 = vmmov %vm14871_vm3 }
 0xc08   : > { %v7158_v45 = vpop.permute.xlu1 %7157 }
 0xc0a   : > { %v7160_v0 = vpop.permute.xlu0 %7159 }
 0xc0c   : > { %9759 = vmatmul.mubr.msk.bf16.vlgmr.msra.gmra.mrb[64].mxu1 %vm14864_vm12, %v10558_v49  ;;  %vm14870_vm12 = vcmask 908288   ;;  %v7162_v60 = vpop.permute.xlu1 %7161  ;;  %v10566_v49 = vld [vmem:[%s14662_s8 + $0x60] ss:$0 sps:$4 sm:$0x33]  }
 0xc0d   : > { %7056 = vmatpush1.bf16.msra.mxu1 %v7030_v32  ;;  %6920 = vmatprep.mubr.bf16.mxu1 %v12232_v54  ;;  %v7164_v16 = vsel %vm14870_vm12, %v7148_v2, %v7150_v10  ;;  %vm14872_vm7 = vmmov %vm14870_vm12 }
 0xc0e   : > { %7057 = vmatprep.subr.bf16.mxu1 %v7033_v21  ;;  %v7325_v6 = vpop.permute.xlu0 %7324  ;;  %v7163_v31 = vsel %vm14872_vm7, %v7146_v55, %v7148_v2  ;;  %vm14874_vm0 = vmmov %vm14872_vm7 }
 0xc0f   : > { %v7166_v4 = vsel %vm14874_vm0, %v7154_v58, %v7156_v1  ;;  %vm14876_vm12 = vmmov %vm14874_vm0  ;;  %v10567_v1 = vld [vmem:[%s14662_s8 + $0x64] sm:$0xff]  }
 0xc10   : > { %v7327_v59 = vpop.permute.xlu1 %7326  ;;  %v7167_v39 = vsel %vm14876_vm12, %v7158_v45, %v7160_v0  ;;  %vm14878_vm7 = vmmov %vm14873_vm11  ;;  %v10568_v45 = vld [vmem:[%s14662_s8 + $0x6c] sm:$0xff]  }
 0xc11   : > { %7058 = vmatpush1.bf16.msra.mxu1 %v7032_v22  ;;  %v7183_v20 = vsel %vm6590_vm14, %v7167_v39, 0 }
 0xc12   : > { %9779 = vmatprep.subr.msk.bf16.mxu1 %vm6590_vm14, %v7035_v57  ;;  %v7323_v11 = vpop.permute.xlu0 %7322 }
 0xc14   : > { %9760 = vmatmul.mubr.msk.bf16.gmra.mrb[68].mxu1 %vm14869_vm5, %v10559_v35  ;;  %v7331_v15 = vpop.permute.xlu1 %7330  ;;  %vm14875_vm5 = vmmov %vm14874_vm0 }
 0xc15   : > { %7060 = vmatpush1.bf16.msra.mxu1 %v7050_v3  ;;  %6930 = vmatprep.mubr.bf16.mxu1 %v12232_v54  ;;  %v7165_v40 = vsel %vm14875_vm5, %v7152_v42, %v7154_v58 }
 0xc16   : > { %7188 = vmatprep.subr.bf16.mxu1 %v7164_v16  ;;  %v7333_v38 = vpop.permute.xlu0 %7332 }
 0xc18   : > { %v7329_v24 = vpop.permute.xlu1 %7328 }
 0xc1a   : > { %v7335_v36 = vpop.permute.xlu0 %7334 }
 0xc1c   : > { %9761 = vmatmul.mubr.msk.bf16.gmra.mrb[72].mxu1 %vm14871_vm3, %v10560_v46  ;;  %vm14877_vm3 = vmmov %vm14874_vm0  ;;  %v7337_v61 = vpop.permute.xlu1 %7336 }
 0xc1d   : > { %7087 = vmatprep.mubr.bf16.mxu1 %v12232_v54  ;;  %v7168_v12 = vsel %vm14877_vm3, %v7160_v0, %v7162_v60  ;;  %vm14880_vm0 = vmmov %vm14878_vm7 }
 0xc1e   : > { %v7339_v41 = vpop.permute.xlu0 %7338  ;;  %vm14882_vm12 = vmmov %vm14880_vm0 }
 0xc20   : > { %v7502_v43 = vpop.permute.xlu1 %7501 }
 0xc22   : > { %v7504_v47 = vpop.permute.xlu0 %7503 }
 0xc24   : > { %9780 = vmatmul.mubr.msk.bf16.vlgmr.msra.gmra.mrb[64].mxu1 %vm14873_vm11, %v10561_v9  ;;  %vm14879_vm11 = vcmask 900096   ;;  %v7500_v56 = vpop.permute.xlu1 %7499  ;;  %v10569_v9 = vld [vmem:[%s14662_s8 + $0x74] ss:$0 sps:$4 sm:$0x33]  }
 0xc25   : > { %7189 = vmatpush1.bf16.msra.mxu1 %v7163_v31  ;;  %7097 = vmatprep.mubr.bf16.mxu1 %v12232_v54  ;;  %v7341_v51 = vsel %vm14879_vm11, %v7325_v6, %v7327_v59  ;;  %vm14881_vm5 = vmmov %vm14879_vm11 }
 0xc26   : > { %7190 = vmatprep.subr.bf16.mxu1 %v7166_v4  ;;  %v7340_v52 = vsel %vm14881_vm5, %v7323_v11, %v7325_v6  ;;  %vm14883_vm3 = vmmov %vm14881_vm5  ;;  %v7508_v14 = vpop.permute.xlu0 %7507 }
 0xc27   : > { %v7343_v28 = vsel %vm14883_vm3, %v7331_v15, %v7333_v38  ;;  %vm14885_vm11 = vmmov %vm14883_vm3 }
 0xc28   : > { %v7344_v13 = vsel %vm14885_vm11, %v7335_v36, %v7337_v61  ;;  %v7510_v8 = vpop.permute.xlu1 %7509  ;;  %vm14887_vm5 = vmmov %vm14882_vm12 }
 0xc29   : > { %7191 = vmatpush1.bf16.msra.mxu1 %v7165_v40  ;;  %v7360_v2 = vsel %vm6590_vm14, %v7344_v13, 0 }
 0xc2a   : > { %9791 = vmatprep.subr.msk.bf16.mxu1 %vm6590_vm14, %v7168_v12  ;;  %v7506_v55 = vpop.permute.xlu0 %7505 }
 0xc2c   : > { %9781 = vmatmul.mubr.msk.bf16.gmra.mrb[68].mxu1 %vm14878_vm7, %v10562_v18  ;;  %vm14884_vm7 = vmmov %vm14883_vm3  ;;  %v7512_v32 = vpop.permute.xlu1 %7511 }
 0xc2d   : > { %7193 = vmatpush1.bf16.msra.mxu1 %v7183_v20  ;;  %7107 = vmatprep.mubr.bf16.mxu1 %v12232_v54  ;;  %v7342_v19 = vsel %vm14884_vm7, %v7329_v24, %v7331_v15  ;;  %v10570_v15 = vld [vmem:[%s14662_s8 + $0x78] sm:$0xff]   ;;  %v10571_v24 = vld [vmem:[%s14662_s8 + $0x80] sm:$0xff]  }
 0xc2e   : > { %7365 = vmatprep.subr.bf16.mxu1 %v7341_v51  ;;  %v7514_v58 = vpop.permute.xlu0 %7513 }
 0xc30   : > { %v7516_v21 = vpop.permute.xlu1 %7515 }
 0xc32   : > { %v7635_v35 = vpop.permute.xlu0 %7634 }
 0xc34   : > { %9782 = vmatmul.mubr.msk.bf16.gmra.mrb[72].mxu1 %vm14880_vm0, %v10563_v53  ;;  %vm14886_vm0 = vmmov %vm14883_vm3  ;;  %v7637_v57 = vpop.permute.xlu1 %7636 }
 0xc35   : > { %7220 = vmatprep.mubr.bf16.mxu1 %v12232_v54  ;;  %v7345_v33 = vsel %vm14886_vm0, %v7337_v61, %v7339_v41  ;;  %vm14889_vm3 = vmmov %vm14887_vm5 }
 0xc36   : > { %vm14891_vm11 = vmmov %vm14889_vm3  ;;  %v7633_v0 = vpop.permute.xlu0 %7632 }
 0xc38   : > { %v7641_v60 = vpop.permute.xlu1 %7640 }
 0xc3a   : > { %v7643_v59 = vpop.permute.xlu0 %7642 }
 0xc3c   : > { %9792 = vmatmul.mubr.msk.bf16.vlgmr.msra.gmra.mrb[64].mxu1 %vm14882_vm12, %v10564_v29  ;;  %vm14888_vm12 = vcmask 785408   ;;  %v7639_v31 = vpop.permute.xlu1 %7638 }
 0xc3d   : > { %7366 = vmatpush1.bf16.msra.mxu1 %v7340_v52  ;;  %7230 = vmatprep.mubr.bf16.mxu1 %v12232_v54  ;;  %v7518_v10 = vsel %vm14888_vm12, %v7502_v43, %v7504_v47  ;;  %vm14890_vm7 = vmmov %vm14888_vm12 }
 0xc3e   : > { %7367 = vmatprep.subr.bf16.mxu1 %v7343_v28  ;;  %v7517_v22 = vsel %vm14890_vm7, %v7500_v56, %v7502_v43  ;;  %vm14892_vm0 = vmmov %vm14890_vm7  ;;  %v7645_v11 = vpop.permute.xlu0 %7644  ;;  %v10572_v43 = vld [vmem:[%s14662_s8 + $0x88] ss:$0 sps:$4 sm:$0x33]   ;;  %v10573_v56 = vld [vmem:[%s14662_s8 + $0x8c] sm:$0xff]  }
 0xc3f   : > { %v7520_v7 = vsel %vm14892_vm0, %v7508_v14, %v7510_v8  ;;  %vm14894_vm12 = vmmov %vm14892_vm0  ;;  %v10574_v8 = vld [vmem:[%s14662_s8 + $0x94] sm:$0xff]  }
 0xc40   : > { %v7521_v3 = vsel %vm14894_vm12, %v7512_v32, %v7514_v58  ;;  %vm14896_vm7 = vmmov %vm14891_vm11  ;;  %v7647_v4 = vpop.permute.xlu1 %7646  ;;  %v10576_v32 = vld [vmem:[%s14662_s8 + $0xa0] sm:$0xff]  }
 0xc41   : > { %7368 = vmatpush1.bf16.msra.mxu1 %v7342_v19  ;;  %v7537_v46 = vsel %vm6590_vm14, %v7521_v3, 0 }
 0xc42   : > { %9812 = vmatprep.subr.msk.bf16.mxu1 %vm6590_vm14, %v7345_v33  ;;  %v7649_v18 = vpop.permute.xlu0 %7648 }
 0xc44   : > { %9793 = vmatmul.mubr.msk.bf16.gmra.mrb[68].mxu1 %vm14887_vm5, %v10565_v34  ;;  %vm14893_vm5 = vmmov %vm14892_vm0  ;;  %v7812_v12 = vpop.permute.xlu1 %7811 }
 0xc45   : > { %7370 = vmatpush1.bf16.msra.mxu1 %v7360_v2  ;;  %7240 = vmatprep.mubr.bf16.mxu1 %v12232_v54  ;;  %v7519_v42 = vsel %vm14893_vm5, %v7506_v55, %v7508_v14 }
 0xc46   : > { %7542 = vmatprep.subr.bf16.mxu1 %v7518_v10  ;;  %v7814_v36 = vpop.permute.xlu0 %7813 }
 0xc48   : > { %v7810_v61 = vpop.permute.xlu1 %7809 }
 0xc4a   : > { %v7818_v29 = vpop.permute.xlu0 %7817 }
 0xc4c   : > { %9794 = vmatmul.mubr.msk.bf16.gmra.mrb[72].mxu1 %vm14889_vm3, %v10566_v49  ;;  %vm14895_vm3 = vmmov %vm14892_vm0  ;;  %v7820_v52 = vpop.permute.xlu1 %7819  ;;  %v10575_v49 = vld [vmem:[%s14662_s8 + $0x9c] ss:$0 sps:$4 sm:$0x33]  }
 0xc4d   : > { %7397 = vmatprep.mubr.bf16.mxu1 %v12232_v54  ;;  %v7522_v16 = vsel %vm14895_vm3, %v7514_v58, %v7516_v21  ;;  %vm14898_vm0 = vmmov %vm14896_vm7  ;;  %v10577_v58 = vld [vmem:[%s14662_s8 + $0xa8] sm:$0xff]   ;;  %v10578_v21 = vld [vmem:[%s14662_s8 + $0xb0] ss:$0 sps:$4 sm:$0x33]  }
 0xc4e   : > { %vm14900_vm12 = vmmov %vm14898_vm0  ;;  %v7816_v47 = vpop.permute.xlu0 %7815 }
 0xc50   : > { %v7822_v28 = vpop.permute.xlu1 %7821 }
 0xc52   : > { %v7824_v13 = vpop.permute.xlu0 %7823 }
 0xc54   : > { %9813 = vmatmul.mubr.msk.bf16.vlgmr.msra.gmra.mrb[64].mxu1 %vm14891_vm11, %v10567_v1  ;;  %vm14897_vm11 = vcmask 777216   ;;  %v7826_v33 = vpop.permute.xlu1 %7825 }
 0xc55   : > { %7543 = vmatpush1.bf16.msra.mxu1 %v7517_v22  ;;  %7407 = vmatprep.mubr.bf16.mxu1 %v12232_v54  ;;  %v7651_v6 = vsel %vm14897_vm11, %v7635_v35, %v7637_v57  ;;  %vm14899_vm5 = vmmov %vm14897_vm11 }
 0xc56   : > { %7544 = vmatprep.subr.bf16.mxu1 %v7520_v7  ;;  %v7650_v40 = vsel %vm14899_vm5, %v7633_v0, %v7635_v35  ;;  %vm14901_vm3 = vmmov %vm14899_vm5 }
 0xc57   : > { %v7653_v39 = vsel %vm14901_vm3, %v7641_v60, %v7643_v59  ;;  %vm14903_vm11 = vmmov %vm14901_vm3 }
 0xc58   : > { %v7654_v20 = vsel %vm14903_vm11, %v7645_v11, %v7647_v4  ;;  %vm14905_vm5 = vmmov %vm14900_vm12 }
 0xc59   : > { %7545 = vmatpush1.bf16.msra.mxu1 %v7519_v42  ;;  %v7670_v53 = vsel %vm6590_vm14, %v7654_v20, 0 }
 0xc5a   : > { %9833 = vmatprep.subr.msk.bf16.mxu1 %vm6590_vm14, %v7522_v16 }
 0xc5c   : > { %9814 = vmatmul.mubr.msk.bf16.gmra.mrb[68].mxu1 %vm14896_vm7, %v10568_v45  ;;  %vm14902_vm7 = vmmov %vm14901_vm3 }
 0xc5d   : > { %7547 = vmatpush1.bf16.msra.mxu1 %v7537_v46  ;;  %7417 = vmatprep.mubr.bf16.mxu1 %v12232_v54  ;;  %v7652_v38 = vsel %vm14902_vm7, %v7639_v31, %v7641_v60 }
 0xc5e   : > { %7675 = vmatprep.subr.bf16.mxu1 %v7651_v6 }
 0xc64   : > { %9815 = vmatmul.mubr.msk.bf16.gmra.mrb[72].mxu1 %vm14898_vm0, %v10569_v9  ;;  %vm14904_vm0 = vmmov %vm14901_vm3 }
 0xc65   : > { %7574 = vmatprep.mubr.bf16.mxu1 %v12232_v54  ;;  %v7655_v51 = vsel %vm14904_vm0, %v7647_v4, %v7649_v18  ;;  %vm14907_vm3 = vmmov %vm14905_vm5 }
 0xc66   : > { %vm14909_vm11 = vmmov %vm14907_vm3 }
 0xc6c   : > { %9834 = vmatmul.mubr.msk.bf16.vlgmr.msra.gmra.mrb[64].mxu1 %vm14900_vm12, %v10570_v15  ;;  %vm14906_vm12 = vcmask 769024  }
 0xc6d   : > { %7676 = vmatpush1.bf16.msra.mxu1 %v7650_v40  ;;  %7584 = vmatprep.mubr.bf16.mxu1 %v12232_v54  ;;  %v7828_v41 = vsel %vm14906_vm12, %v7812_v12, %v7814_v36  ;;  %vm14908_vm7 = vmmov %vm14906_vm12 }
 0xc6e   : > { %7677 = vmatprep.subr.bf16.mxu1 %v7653_v39  ;;  %v7827_v19 = vsel %vm14908_vm7, %v7810_v61, %v7812_v12  ;;  %vm14910_vm0 = vmmov %vm14908_vm7 }
 0xc6f   : > { %v7830_v34 = vsel %vm14910_vm0, %v7818_v29, %v7820_v52  ;;  %vm14912_vm12 = vmmov %vm14910_vm0 }
 0xc70   : > { %v7831_v2 = vsel %vm14912_vm12, %v7822_v28, %v7824_v13  ;;  %vm14914_vm7 = vmmov %vm14909_vm11 }
 0xc71   : > { %7678 = vmatpush1.bf16.msra.mxu1 %v7652_v38  ;;  %v7847_v55 = vsel %vm6590_vm14, %v7831_v2, 0 }
 0xc72   : > { %9845 = vmatprep.subr.msk.bf16.mxu1 %vm6590_vm14, %v7655_v51 }
 0xc74   : > { %9835 = vmatmul.mubr.msk.bf16.gmra.mrb[68].mxu1 %vm14905_vm5, %v10571_v24  ;;  %vm14911_vm5 = vmmov %vm14910_vm0 }
 0xc75   : > { %7680 = vmatpush1.bf16.msra.mxu1 %v7670_v53  ;;  %7594 = vmatprep.mubr.bf16.mxu1 %v12232_v54  ;;  %v7829_v14 = vsel %vm14911_vm5, %v7816_v47, %v7818_v29 }
 0xc76   : > { %7852 = vmatprep.subr.bf16.mxu1 %v7828_v41 }
 0xc7c   : > { %9836 = vmatmul.mubr.msk.bf16.gmra.mrb[72].mxu1 %vm14907_vm3, %v10572_v43  ;;  %vm14913_vm3 = vmmov %vm14910_vm0 }
 0xc7d   : > { %7707 = vmatprep.mubr.bf16.mxu1 %v12232_v54  ;;  %v7832_v10 = vsel %vm14913_vm3, %v7824_v13, %v7826_v33  ;;  %vm14916_vm0 = vmmov %vm14914_vm7  ;;  %vm14919_vm3 = vcmask 134144  }
 0xc7e   : > { %vm14917_vm5 = vmmov %vm14916_vm0 }
 0xc7f   : > { %vm14918_vm12 = vmmov %vm14916_vm0 }
 0xc84   : > { %9846 = vmatmul.mubr.msk.bf16.vlgmr.msra.gmra.mrb[64].mxu1 %vm14909_vm11, %v10573_v56  ;;  %vm14915_vm11 = vmmov %vm14914_vm7 }
 0xc85   : > { %7853 = vmatpush1.bf16.msra.mxu1 %v7827_v19  ;;  %7717 = vmatprep.mubr.bf16.mxu1 %v12232_v54 }
 0xc86   : > { %7854 = vmatprep.subr.bf16.mxu1 %v7830_v34 }
 0xc89   : > { %7855 = vmatpush1.bf16.msra.mxu1 %v7829_v14 }
 0xc8a   : > { %9866 = vmatprep.subr.msk.bf16.mxu1 %vm6590_vm14, %v7832_v10 }
 0xc8c   : > { %9847 = vmatmul.mubr.msk.bf16.gmra.mrb[68].mxu1 %vm14914_vm7, %v10574_v8  ;;  %vm14920_vm7 = vmmov %vm14919_vm3 }
 0xc8d   : > { %7857 = vmatpush1.bf16.msra.mxu1 %v7847_v55  ;;  %7727 = vmatprep.mubr.bf16.mxu1 %v12232_v54 }
 0xc94   : > { %9848 = vmatmul.mubr.msk.bf16.gmra.mrb[72].mxu1 %vm14915_vm11, %v10575_v49  ;;  %vm14921_vm11 = vmmov %vm14919_vm3 }
 0xc95   : > { %7884 = vmatprep.mubr.bf16.mxu1 %v12232_v54 }
 0xc9c   : > { %9867 = vmatmul.mubr.msk.bf16.vlgmr.msra.gmra.mrb[64].mxu1 %vm14916_vm0, %v10576_v32  ;;  %vm14922_vm0 = vmmov %vm14919_vm3 }
 0xc9d   : > { %7894 = vmatprep.mubr.bf16.mxu1 %v12232_v54 }
 0xca4   : > { %9868 = vmatmul.mubr.msk.bf16.gmra.mrb[68].mxu1 %vm14917_vm5, %v10577_v58  ;;  %vm14923_vm5 = vcmp.ne.s16.totalorder %v12789_v25, 0 }
 0xca5   : > { %7904 = vmatprep.mubr.bf16.mxu1 %v12232_v54 }
 0xcac   : > { %9869 = vmatmul.mubr.msk.bf16.gmra.mrb[72].mxu1 %vm14918_vm12, %v10578_v21  ;;  %vm14924_vm12 = vmmov %vm14923_vm5 }
 0xd6f   : > { %v7886_v1 = vpop.f32.mrb[64].mxu1 }
 0xd70   : > { %v7888_v22 = vpop.f32.mrb[65].mxu1 }
 0xd71   : > { %v10030_v35 = vpack.c.bf16 %v7888_v22, %v7886_v1  ;;  %v7890_v7 = vpop.f32.mrb[66].mxu1 }
 0xd72   : > { %v7892_v57 = vpop.f32.mrb[67].mxu1 }
 0xd73   : > { %v10031_v42 = vpack.c.bf16 %v7892_v57, %v7890_v7  ;;  %7950 = vrot.lane.b32.xlu0 %v10030_v35, %s10686_s27 }
 0xd75   : > { %7952 = vrot.lane.b32.xlu1 %v10031_v42, %s10686_s27 }
 0xd77   : > { %v7896_v45 = vpop.f32.mrb[68].mxu1 }
 0xd78   : > { %v7898_v3 = vpop.f32.mrb[69].mxu1 }
 0xd79   : > { %v10032_v16 = vpack.c.bf16 %v7898_v3, %v7896_v45  ;;  %v7900_v0 = vpop.f32.mrb[70].mxu1 }
 0xd7a   : > { %v7902_v46 = vpop.f32.mrb[71].mxu1 }
 0xd7b   : > { %v10033_v60 = vpack.c.bf16 %v7902_v46, %v7900_v0  ;;  %7954 = vrot.lane.b32.xlu0 %v10032_v16, %s10686_s27 }
 0xd7d   : > { %7956 = vrot.lane.b32.xlu1 %v10033_v60, %s10686_s27 }
 0xd7f   : > { %v7906_v6 = vpop.f32.mrb[72].mxu1 }
 0xd80   : > { %v7908_v59 = vpop.f32.mrb[73].mxu1 }
 0xd81   : > { %v10034_v9 = vpack.c.bf16 %v7908_v59, %v7906_v6  ;;  %v7910_v31 = vpop.f32.mrb[74].mxu1 }
 0xd82   : > { %v7911_v11 = vpop.f32.mrb[75].mxu1 }
 0xd83   : > { %7958 = vrot.lane.b32.xlu0 %v10034_v9, %s10686_s27  ;;  %s15031_s27 = sshll.u32 %s15033_s14, 6 }
 0xde5   : > { %v7951_v4 = vpop.permute.xlu0 %7950 }
 0xde6   : > { %v7960_v15 = vrot.slane %v7951_v4, 4 }
 0xde7   : > { %v7953_v40 = vpop.permute.xlu1 %7952 }
 0xde8   : > { %v7965_v18 = vsel %vm951_vm4, %v7960_v15, %v7951_v4  ;;  %7981 = vst.msk [vmem:[#allocation3 + $0x8] sm:$0xf] %vm14919_vm3, %v7960_v15  ;;  %v7961_v39 = vrot.slane %v7953_v40, 4  ;;  %vm14926_vm3 = vcmask 132096  }
 0xde9   : > { %7980 = vst.msk [vmem:[#allocation3] sm:$0xff] %vm12442_vm10, %v7965_v18 }
 0xdea   : > { %v7966_v12 = vsel %vm951_vm4, %v7961_v39, %v7953_v40  ;;  %7983 = vst.msk [vmem:[#allocation3 + $0x14] sm:$0xf] %vm14920_vm7, %v7961_v39 }
 0xdeb   : > { %7982 = vst.msk [vmem:[#allocation3 + $0xc] sm:$0xff] %vm12442_vm10, %v7966_v12 }
 0xded   : > { %v7955_v38 = vpop.permute.xlu0 %7954 }
 0xdee   : > { %v7962_v24 = vrot.slane %v7955_v38, 4 }
 0xdef   : > { %v7957_v20 = vpop.permute.xlu1 %7956  ;;  %v14023_v53 = vld [vmem:[#allocation3 + $0x8] sm:$0xf] }
 0xdf0   : > { %v7967_v51 = vsel %vm951_vm4, %v7962_v24, %v7955_v38  ;;  %7985 = vst.msk [vmem:[#allocation3 + $0x20] sm:$0xf] %vm14921_vm11, %v7962_v24  ;;  %v7963_v36 = vrot.slane %v7957_v20, 4  ;;  %v14033_v29 = vld [vmem:[#allocation3] sm:$0xff]  ;;  %v8688_v19 = vsel %vm12791_vm13, %v14023_v53, 0  ;;  %v8848_v0 = vsel %vm12946_vm9, %v14023_v53, 0 }
 0xdf1   : > { %7984 = vst.msk [vmem:[#allocation3 + $0x18] sm:$0xff] %vm12442_vm10, %v7967_v51  ;;  %v14025_v61 = vld [vmem:[#allocation3 + $0x14] sm:$0xf]  ;;  %v14050_v56 = vsel %vm14923_vm5, %v14033_v29, 0 }
 0xdf2   : > { %v7968_v41 = vsel %vm951_vm4, %v7963_v36, %v7957_v20  ;;  %7987 = vst.msk [vmem:[#allocation3 + $0x2c] sm:$0xf] %vm14922_vm0, %v7963_v36  ;;  %v14031_v43 = vcombine.low %v14023_v53, %v14025_v61  ;;  %v14035_v52 = vld [vmem:[#allocation3 + $0xc] sm:$0xff]  ;;  %v8690_v34 = vsel %vm12791_vm13, %v14025_v61, 0  ;;  %v8850_v57 = vsel %vm12946_vm9, %v14025_v61, 0 }
 0xdf3   : > { %7986 = vst.msk [vmem:[#allocation3 + $0x24] sm:$0xff] %vm12442_vm10, %v7968_v41  ;;  %v14041_v47 = vcombine.high %v14033_v29, %v14035_v52  ;;  %v14055_v23 = vsel %vm14924_vm12, %v14035_v52, 0  ;;  %v14065_v14 = vcombine.low %v8688_v19, %v8690_v34  ;;  %v14071_v2 = vcombine.low %v14033_v29, %v14035_v52 }
 0xdf4   : > { %8062 = vrot.lane.b32.xlu0 %v14031_v43, %s10694_s18  ;;  %vm14925_vm10 = vcmp.ne.s16.totalorder %v12944_v62, 0  ;;  %v14139_v6 = vcombine.low %v8848_v0, %v8850_v57  ;;  %v8254_v18 = vsel %vm12507_vm2, %v14025_v61, 0  ;;  %vm14931_vm0 = vcmp.ne.s16.totalorder %v14815_v50, 0 }
 0xdf5   : > { %8060 = vrot.lane.b32.xlu1 %v14041_v47, %s10694_s18  ;;  %v7959_v28 = vpop.permute.xlu0 %7958  ;;  %v14076_v10 = vsel %vm14925_vm10, %v14035_v52, 0  ;;  %vm14927_vm7 = vmmov %vm14925_vm10  ;;  %v8253_v12 = vsel %vm14931_vm0, %v14035_v52, 0  ;;  %v8252_v20 = vsel %vm12507_vm2, %v14023_v53, 0  ;;  %v9124_v0 = vsel %vm13238_vm8, %v14023_v53, 0 }
 0xdf6   : > { %v7964_v13 = vrot.slane %v7959_v28, 4  ;;  %v14083_v49 = vsel %vm14927_vm7, %v14033_v29, 0  ;;  %vm14930_vm11 = vmmov %vm14927_vm7  ;;  %v9912_v19 = vcombine.low %v8252_v20, %v8254_v18  ;;  %v14252_v18 = vsel %vm10873_vm6, %v14033_v29, 0 }
 0xdf7   : > { %v14089_v32 = vld [vmem:[#allocation3 + $0x20] sm:$0xf]  ;;  %vm14933_vm12 = vmmov %vm14931_vm0  ;;  %v14257_v51 = vsel %vm10873_vm6, %v14035_v52, 0  ;;  %v8414_v8 = vsel %vm12678_vm1, %v14025_v61, 0 }
 0xdf8   : > { %v7969_v55 = vsel %vm951_vm4, %v7964_v13, %v7959_v28  ;;  %7989 = vst.msk [vmem:[#allocation3 + $0x38] sm:$0x3] %vm14926_vm3, %v7964_v13  ;;  %v14099_v22 = vld [vmem:[#allocation3 + $0x18] sm:$0xff]  ;;  %v8692_v42 = vsel %vm12791_vm13, %v14089_v32, 0  ;;  %vm14928_vm4 = vmmov %vm14923_vm5  ;;  %v8852_v24 = vsel %vm12946_vm9, %v14089_v32, 0  ;;  %v8251_v28 = vsel %vm14933_vm12, %v14033_v29, 0 }
 0xdf9   : > { %7988 = vst.msk [vmem:[#allocation3 + $0x30] sm:$0x33] %vm13498_vm15, %v7969_v55  ;;  %8058 = vrot.lane.b32.xlu1 %v14071_v2, %s10694_s18  ;;  %v14091_v58 = vld [vmem:[#allocation3 + $0x2c] sm:$0xf]  ;;  %v14123_v45 = vsel %vm14928_vm4, %v14099_v22, 0  ;;  %vm14929_vm15 = vmmov %vm14928_vm4  ;;  %v9911_v13 = vcombine.high %v8251_v28, %v8253_v12  ;;  %vm14935_vm3 = vcmp.ne.s16.totalorder %v13236_v27, 0  ;;  %v9910_v60 = vcombine.low %v8251_v28, %v8253_v12 }
 0xdfa   : > { %v14097_v1 = vcombine.low %v14089_v32, %v14091_v58  ;;  %v14101_v35 = vld [vmem:[#allocation3 + $0x24] sm:$0xff]  ;;  %v8694_v26 = vsel %vm12791_vm13, %v14091_v58, 0  ;;  %v8854_v15 = vsel %vm12946_vm9, %v14091_v58, 0  ;;  %vm14932_vm5 = vmmov %vm14927_vm7  ;;  %v9128_v34 = vsel %vm13238_vm8, %v14089_v32, 0 }
 0xdfb   : > { %v14108_v7 = vcombine.high %v14099_v22, %v14101_v35  ;;  %v14128_v3 = vsel %vm14929_vm15, %v14101_v35, 0  ;;  %v14130_v16 = vcombine.low %v8692_v42, %v8694_v26  ;;  %v14145_v9 = vcombine.low %v14099_v22, %v14101_v35  ;;  %vm14934_vm10 = vmmov %vm14931_vm0 }
 0xdfc   : > { %v14158_v4 = vsel %vm14930_vm11, %v14101_v35, 0  ;;  %v14180_v38 = vsel %vm14932_vm5, %v14099_v22, 0  ;;  %v14190_v36 = vcombine.low %v8852_v24, %v8854_v15  ;;  %v8257_v55 = vsel %vm14934_vm10, %v14101_v35, 0  ;;  %vm14936_vm7 = vmmov %vm14935_vm3 }
 0xdfd   : > { %8068 = vrot.lane.b32.xlu1 %v14097_v1, %s10694_s18  ;;  %8066 = vrot.lane.b32.xlu0 %v14108_v7, %s10694_s18  ;;  %v14209_v26 = vsel %vm14935_vm3, %v14033_v29, 0  ;;  %v14214_v57 = vsel %vm14936_vm7, %v14035_v52, 0  ;;  %v9126_v15 = vsel %vm13238_vm8, %v14025_v61, 0  ;;  %vm14937_vm4 = vmmov %vm14935_vm3  ;;  %v14271_v46 = vsel %vm10873_vm6, %v14099_v22, 0 }
 0xdfe   : > { %v14228_v24 = vcombine.low %v9124_v0, %v9126_v15  ;;  %v14233_v20 = vsel %vm14937_vm4, %v14099_v22, 0  ;;  %vm14938_vm15 = vmmov %vm14935_vm3  ;;  %v9130_v15 = vsel %vm13238_vm8, %v14091_v58, 0  ;;  %v8256_v21 = vsel %vm12507_vm2, %v14089_v32, 0 }
 0xdff   : > { %v14163_v40 = vld [vmem:[#allocation3 + $0x38] sm:$0x3]  ;;  %v14238_v42 = vsel %vm14938_vm15, %v14101_v35, 0  ;;  %v14259_v59 = vcombine.low %v9128_v34, %v9130_v15  ;;  %v14276_v34 = vsel %vm10873_vm6, %v14101_v35, 0  ;;  %vm14939_vm11 = vmmov %vm14931_vm0  ;;  %v8412_v28 = vsel %vm12678_vm1, %v14023_v53, 0 }
 0xe00   : > { %v14147_v31 = vld [vmem:[#allocation3 + $0x30] sm:$0x33]  ;;  %v14196_v41 = vcombine.low %v14163_v40, %v14163_v40  ;;  %v8255_v15 = vsel %vm14939_vm11, %v14099_v22, 0  ;;  %vm14940_vm0 = vcmp.ne.s16.totalorder %v14822_v5, 0  ;;  %v9930_v33 = vcombine.low %v8412_v28, %v8414_v8  ;;  %vm14944_vm3 = vmmov %vm14939_vm11 }
 0xe01   : > { %8064 = vrot.lane.b32.xlu0 %v14145_v9, %s10694_s18  ;;  %v14153_v11 = vcombine.low %v14147_v31, %v14147_v31  ;;  %v14172_v39 = vcombine.high %v14147_v31, %v14147_v31  ;;  %v9913_v12 = vcombine.low %v8255_v15, %v8257_v55  ;;  %vm14941_vm5 = vmmov %vm14940_vm0  ;;  %v14946_v5 = vcombine.high %v14050_v56, %v14055_v23 }
 0xe02   : > { %vm14942_vm12 = vmmov %vm14940_vm0 }
 0xe03   : > { %8070 = vrot.lane.b32.xlu1 %v14153_v11, %s10694_s18  ;;  %v8417_v61 = vsel %vm14942_vm12, %v14101_v35, 0  ;;  %vm14943_vm10 = vmmov %vm14940_vm0  ;;  %vm14968_vm12 = vcmask 293888  }
 0xe04   : > { %v8415_v53 = vsel %vm14943_vm10, %v14099_v22, 0  ;;  %v8260_v22 = vsel %vm12507_vm2, %v14163_v40, 0 }
 0xe05   : > { %8072 = vrot.lane.b32.xlu0 %v14172_v39, %s10694_s18  ;;  %v9931_v35 = vcombine.low %v8415_v53, %v8417_v61 }
 0xe07   : > { %8074 = vrot.lane.b32.xlu1 %v14196_v41, %s10694_s18 }
 0xe09   : > { %8312 = vrot.lane.b32.xlu0 %v9911_v13, %s10695_s20  ;;  %v8258_v13 = vsel %vm12507_vm2, %v14091_v58, 0  ;;  %vm14945_vm2 = vmmov %vm14940_vm0 }
 0xe0a   : > { %v9915_v0 = vcombine.low %v8256_v21, %v8258_v13  ;;  %v8411_v21 = vsel %vm14941_vm5, %v14033_v29, 0  ;;  %v8418_v29 = vsel %vm12678_vm1, %v14091_v58, 0  ;;  %v8259_v13 = vsel %vm14944_vm3, %v14147_v31, 0 }
 0xe0b   : > { %8314 = vrot.lane.b32.xlu1 %v9912_v19, %s10695_s20  ;;  %v9914_v19 = vcombine.high %v8255_v15, %v8257_v55  ;;  %v9918_v58 = vcombine.low %v8260_v22, %v8260_v22  ;;  %v9917_v15 = vcombine.high %v8259_v13, %v8259_v13  ;;  %v9916_v48 = vcombine.low %v8259_v13, %v8259_v13  ;;  %v10587_v22 = vld [vmem:[%s14663_s9 + $0x10] sm:$0xff]  }
 0xe0c   : > { %v8419_v50 = vsel %vm14945_vm2, %v14147_v31, 0  ;;  %vm14965_vm5 = vcmp.ne.s16.totalorder %v13236_v27, 0  ;;  %v14967_v13 = vcombine.low %v14233_v20, %v14238_v42  ;;  %v14969_v27 = vcombine.low %v14252_v18, %v14257_v51 }
 0xe0d   : > { %8310 = vrot.lane.b32.xlu0 %v9910_v60, %s10695_s20  ;;  %v8413_v60 = vsel %vm14940_vm0, %v14035_v52, 0  ;;  %v9932_v52 = vcombine.high %v8415_v53, %v8417_v61  ;;  %v9934_v44 = vcombine.low %v8419_v50, %v8419_v50  ;;  %v9935_v28 = vcombine.high %v8419_v50, %v8419_v50 }
 0xe0e   : > { %v9929_v55 = vcombine.high %v8411_v21, %v8413_v60  ;;  %v9928_v8 = vcombine.low %v8411_v21, %v8413_v60  ;;  %v14948_v60 = vcombine.high %v14123_v45, %v14128_v3  ;;  %v8696_v21 = vsel %vm12791_vm13, %v14163_v40, 0 }
 0xe0f   : > { %8318 = vrot.lane.b32.xlu1 %v9914_v19, %s10695_s20  ;;  %v14947_v19 = vcombine.low %v14050_v56, %v14055_v23  ;;  %v9963_v61 = vcombine.low %v8696_v21, %v8696_v21  ;;  %v14950_v56 = vcombine.high %v14083_v49, %v14076_v10  ;;  %v14952_v23 = vcombine.low %v14083_v49, %v14076_v10 }
 0xe10   : > { %v14954_v10 = vcombine.low %v14180_v38, %v14158_v4  ;;  %vm14955_vm13 = vcmp.ne.s16.totalorder %v12944_v62, 0 }
 0xe11   : > { %8320 = vrot.lane.b32.xlu0 %v9915_v0, %s10695_s20 }
 0xe13   : > { %8316 = vrot.lane.b32.xlu1 %v9913_v12, %s10695_s20 }
 0xe15   : > { %8474 = vrot.lane.b32.xlu0 %v9930_v33, %s14737_s22  ;;  %v8416_v33 = vsel %vm12678_vm1, %v14089_v32, 0  ;;  %v8420_v32 = vsel %vm12678_vm1, %v14163_v40, 0  ;;  %vm14951_vm1 = vcmp.ne.s16.totalorder %v12789_v25, 0  ;;  %v8856_v25 = vsel %vm12946_vm9, %v14163_v40, 0 }
 0xe16   : > { %v9933_v0 = vcombine.low %v8416_v33, %v8418_v29  ;;  %v9936_v12 = vcombine.low %v8420_v32, %v8420_v32  ;;  %v8695_v30 = vsel %vm14951_vm1, %v14147_v31, 0  ;;  %v9981_v49 = vcombine.low %v8856_v25, %v8856_v25 }
 0xe17   : > { %8472 = vrot.lane.b32.xlu1 %v9929_v55, %s14737_s22  ;;  %vm14956_vm9 = vcmask 1039360   ;;  %v14964_v33 = vcombine.high %v14233_v20, %v14238_v42  ;;  %v7999_v32 = vsel %vm10873_vm6, %v14147_v31, 0  ;;  %v14970_v20 = vcombine.high %v14271_v46, %v14276_v34  ;;  %vm14972_vm6 = vmmov %vm14968_vm12 }
 0xe18   : > { %vm14957_vm7 = vmmov %vm14956_vm9  ;;  %v9900_v17 = vcombine.high %v7999_v32, %v7999_v32 }
 0xe19   : > { %8478 = vrot.lane.b32.xlu0 %v9932_v52, %s14737_s22  ;;  %vm14958_vm4 = vmmov %vm14957_vm7 }
 0xe1a   : > { %vm14959_vm15 = vmmov %vm14958_vm4 }
 0xe1b   : > { %8470 = vrot.lane.b32.xlu1 %v9928_v8, %s14737_s22  ;;  %vm14961_vm11 = vmmov %vm14958_vm4 }
 0xe1c   : > { %vm14963_vm0 = vmmov %vm14958_vm4 }
 0xe1d   : > { %8476 = vrot.lane.b32.xlu0 %v9931_v35, %s14737_s22  ;;  %vm14975_vm3 = vmmov %vm14972_vm6 }
 0xe1f   : > { %8480 = vrot.lane.b32.xlu1 %v9933_v0, %s14737_s22  ;;  %v14966_v0 = vcombine.high %v14252_v18, %v14257_v51 }
 0xe21   : > { %8326 = vrot.lane.b32.xlu0 %v9918_v58, %s10695_s20 }
 0xe23   : > { %8324 = vrot.lane.b32.xlu1 %v9917_v15, %s10695_s20 }
 0xe25   : > { %8322 = vrot.lane.b32.xlu0 %v9916_v48, %s10695_s20 }
 0xe27   : > { %8486 = vrot.lane.b32.xlu1 %v9936_v12, %s14737_s22 }
 0xe29   : > { %8588 = vrot.lane.b32.xlu0 %v14041_v47, %s14739_s26 }
 0xe2b   : > { %8590 = vrot.lane.b32.xlu1 %v14031_v43, %s14739_s26 }
 0xe2d   : > { %8586 = vrot.lane.b32.xlu0 %v14071_v2, %s14739_s26 }
 0xe2f   : > { %8594 = vrot.lane.b32.xlu1 %v14108_v7, %s14739_s26 }
 0xe31   : > { %8596 = vrot.lane.b32.xlu0 %v14097_v1, %s14739_s26 }
 0xe33   : > { %8482 = vrot.lane.b32.xlu1 %v9934_v44, %s14737_s22 }
 0xe35   : > { %8484 = vrot.lane.b32.xlu0 %v9935_v28, %s14737_s22 }
 0xe37   : > { %8592 = vrot.lane.b32.xlu1 %v14145_v9, %s14739_s26 }
 0xe39   : > { %8598 = vrot.lane.b32.xlu0 %v14153_v11, %s14739_s26 }
 0xe3b   : > { %8600 = vrot.lane.b32.xlu1 %v14172_v39, %s14739_s26 }
 0xe3d   : > { %8602 = vrot.lane.b32.xlu0 %v14196_v41, %s14739_s26 }
 0xe3f   : > { %8748 = vrot.lane.b32.xlu1 %v14946_v5, %s14746_s28 }
 0xe41   : > { %8750 = vrot.lane.b32.xlu0 %v14065_v14, %s14746_s28  ;;  %v14949_v14 = vcombine.low %v14123_v45, %v14128_v3  ;;  %v9961_v45 = vcombine.low %v8695_v30, %v8695_v30  ;;  %v9962_v3 = vcombine.high %v8695_v30, %v8695_v30 }
 0xe43   : > { %8746 = vrot.lane.b32.xlu1 %v14947_v19, %s14746_s28 }
 0xe45   : > { %8754 = vrot.lane.b32.xlu0 %v14948_v60, %s14746_s28 }
 0xe47   : > { %8756 = vrot.lane.b32.xlu1 %v14130_v16, %s14746_s28  ;;  %v14953_v16 = vcombine.high %v14180_v38, %v14158_v4 }
 0xe49   : > { %8752 = vrot.lane.b32.xlu0 %v14949_v14, %s14746_s28 }
 0xe4b   : > { %8762 = vrot.lane.b32.xlu1 %v9963_v61, %s14746_s28 }
 0xe4d   : > { %8908 = vrot.lane.b32.xlu0 %v14950_v56, %s10711_s11 }
 0xe4f   : > { %8910 = vrot.lane.b32.xlu1 %v14139_v6, %s10711_s11  ;;  %v8855_v6 = vsel %vm14955_vm13, %v14147_v31, 0 }
 0xe50   : > { %v9980_v63 = vcombine.high %v8855_v6, %v8855_v6 }
 0xe51   : > { %8906 = vrot.lane.b32.xlu0 %v14952_v23, %s10711_s11  ;;  %v10590_v23 = vld [vmem:[%s14663_s9 + $0x8] sm:$0xff]  }
 0xe53   : > { %8758 = vrot.lane.b32.xlu1 %v9961_v45, %s14746_s28 }
 0xe55   : > { %8760 = vrot.lane.b32.xlu0 %v9962_v3, %s14746_s28 }
 0xe57   : > { %8914 = vrot.lane.b32.xlu1 %v14953_v16, %s10711_s11 }
 0xe59   : > { %8916 = vrot.lane.b32.xlu0 %v14190_v36, %s10711_s11  ;;  %v9979_v36 = vcombine.low %v8855_v6, %v8855_v6 }
 0xe5b   : > { %8912 = vrot.lane.b32.xlu1 %v14954_v10, %s10711_s11 }
 0xe5d   : > { %8922 = vrot.lane.b32.xlu0 %v9981_v49, %s10711_s11 }
 0xe5f   : > { %9024 = vrot.lane.b32.xlu1 %v14041_v47, %s14761_s29 }
 0xe61   : > { %9026 = vrot.lane.b32.xlu0 %v14031_v43, %s14761_s29 }
 0xe63   : > { %8920 = vrot.lane.b32.xlu1 %v9980_v63, %s10711_s11 }
 0xe65   : > { %8918 = vrot.lane.b32.xlu0 %v9979_v36, %s10711_s11  ;;  %v10591_v36 = vld [vmem:[%s14663_s9 + $0x20] sm:$0xff]   ;;  %s14641_s11 = scalar_lea.vmem %s14664_s10, %s15031_s27 }
 0xe66   : > { %v8063_v4 = vpop.permute.xlu0 %8062 }
 0xe67   : > { %v8061_v38 = vpop.permute.xlu1 %8060  ;;  %9022 = vrot.lane.b32.xlu1 %v14071_v2, %s14761_s29 }
 0xe68   : > { %v8077_v62 = vsel %vm14956_vm9, %v8061_v38, %v8063_v4  ;;  %vm14979_vm9 = vmmov %vm14975_vm3 }
 0xe69   : > { %9030 = vrot.lane.b32.xlu0 %v14108_v7, %s14761_s29  ;;  %8098 = vmatprep.subr.bf16.mxu0 %v8077_v62 }
 0xe6b   : > { %v8059_v47 = vpop.permute.xlu1 %8058  ;;  %9032 = vrot.lane.b32.xlu1 %v14097_v1, %s14761_s29 }
 0xe6c   : > { %v8076_v43 = vsel %vm14957_vm7, %v8059_v47, %v8061_v38 }
 0xe6d   : > { %9028 = vrot.lane.b32.xlu0 %v14145_v9, %s14761_s29  ;;  %8099 = vmatpush1.bf16.msra.mxu0 %v8076_v43  ;;  %v14960_v9 = vcombine.high %v14209_v26, %v14214_v57 }
 0xe6f   : > { %v8069_v55 = vpop.permute.xlu1 %8068  ;;  %9034 = vrot.lane.b32.xlu1 %v14153_v11, %s14761_s29  ;;  %v8067_v2 = vpop.permute.xlu0 %8066 }
 0xe70   : > { %v8079_v53 = vsel %vm14958_vm4, %v8067_v2, %v8069_v55  ;;  %vm14981_vm4 = vcmask 916480  }
 0xe71   : > { %9036 = vrot.lane.b32.xlu0 %v14172_v39, %s14761_s29  ;;  %8100 = vmatprep.subr.bf16.mxu0 %v8079_v53  ;;  %v10592_v53 = vld [vmem:[%s14663_s9 + $0x28] sm:$0xff]  }
 0xe73   : > { %9038 = vrot.lane.b32.xlu1 %v14196_v41, %s14761_s29  ;;  %v8065_v1 = vpop.permute.xlu0 %8064  ;;  %v14962_v41 = vcombine.low %v14209_v26, %v14214_v57  ;;  %v9131_v26 = vsel %vm14965_vm5, %v14147_v31, 0  ;;  %v9899_v31 = vcombine.low %v7999_v32, %v7999_v32 }
 0xe74   : > { %v8078_v7 = vsel %vm14959_vm15, %v8065_v1, %v8067_v2  ;;  %v10006_v15 = vcombine.low %v9131_v26, %v9131_v26  ;;  %v10007_v48 = vcombine.high %v9131_v26, %v9131_v26  ;;  %vm14982_vm15 = vmmov %vm14981_vm4 }
 0xe75   : > { %9184 = vrot.lane.b32.xlu0 %v14960_v9, %s14788_s19  ;;  %v8071_v52 = vpop.permute.xlu1 %8070  ;;  %8101 = vmatpush1.bf16.msra.mxu0 %v8078_v7  ;;  %v8193_v44 = vsel %vm6590_vm14, %v9899_v31, 0 }
 0xe77   : > { %9186 = vrot.lane.b32.xlu1 %v14228_v24, %s14788_s19  ;;  %v8073_v11 = vpop.permute.xlu0 %8072 }
 0xe78   : > { %v8080_v39 = vsel %vm14961_vm11, %v8071_v52, %v8073_v11  ;;  %vm14983_vm11 = vmmov %vm14975_vm3 }
 0xe79   : > { %9182 = vrot.lane.b32.xlu0 %v14962_v41, %s14788_s19  ;;  %v8075_v8 = vpop.permute.xlu1 %8074  ;;  %v8093_v35 = vsel %vm6590_vm14, %v8080_v39, 0 }
 0xe7a   : > { %v8081_v29 = vsel %vm14963_vm0, %v8073_v11, %v8075_v8  ;;  %vm14984_vm0 = vmmov %vm14981_vm4 }
 0xe7b   : > { %9190 = vrot.lane.b32.xlu1 %v14964_v33, %s14788_s19  ;;  %9890 = vmatprep.subr.msk.bf16.mxu0 %vm6590_vm14, %v8081_v29  ;;  %v8313_v24 = vpop.permute.xlu0 %8312  ;;  %vm14985_vm5 = vmmov %vm14984_vm0  ;;  %v10593_v29 = vld [vmem:[%s14663_s9 + $0x30] sm:$0xff]  }
 0xe7c   : > { %8103 = vmatpush1.bf16.msra.mxu0 %v8093_v35 }
 0xe7d   : > { %9192 = vrot.lane.b32.xlu0 %v14259_v59, %s14788_s19  ;;  %v8315_v57 = vpop.permute.xlu1 %8314  ;;  %8198 = vmatprep.subr.bf16.mxu0 %v14966_v0  ;;  %v9132_v59 = vsel %vm13238_vm8, %v14163_v40, 0  ;;  %v14971_v40 = vcombine.low %v14271_v46, %v14276_v34  ;;  %vm14973_vm8 = vcmask 1031168   ;;  %v10589_v46 = vld [vmem:[%s14663_s9] sm:$0xff]  }
 0xe7e   : > { %v10008_v18 = vcombine.low %v9132_v59, %v9132_v59  ;;  %v8329_v28 = vsel %vm14973_vm8, %v8313_v24, %v8315_v57  ;;  %vm14974_vm10 = vmmov %vm14973_vm8 }
 0xe7f   : > { %9188 = vrot.lane.b32.xlu1 %v14967_v13, %s14788_s19  ;;  %9891 = vmatmul.mubr.msk.bf16.vlgmr.msra.gmra.mrb[8].mxu0 %vm14968_vm12, %v10587_v22  ;;  %v8311_v58 = vpop.permute.xlu0 %8310  ;;  %vm14976_vm2 = vmmov %vm14973_vm8  ;;  %v10594_v13 = vld [vmem:[%s14663_s9 + $0x38] sm:$0xff]  }
 0xe80   : > { %8199 = vmatpush1.bf16.msra.mxu0 %v14969_v27  ;;  %8140 = vmatprep.mubr.bf16.mxu0 %v12232_v54  ;;  %v8328_v60 = vsel %vm14974_vm10, %v8311_v58, %v8313_v24  ;;  %vm14977_vm1 = vmmov %vm14976_vm2  ;;  %vm14989_vm10 = vcmask 908288  }
 0xe81   : > { %9194 = vrot.lane.b32.xlu0 %v10006_v15, %s14788_s19  ;;  %v8319_v42 = vpop.permute.xlu1 %8318  ;;  %8200 = vmatprep.subr.bf16.mxu0 %v14970_v20  ;;  %vm14978_vm13 = vmmov %vm14977_vm1 }
 0xe82   : > { %vm14980_vm7 = vmmov %vm14977_vm1 }
 0xe83   : > { %9196 = vrot.lane.b32.xlu1 %v10007_v48, %s14788_s19  ;;  %v8321_v51 = vpop.permute.xlu0 %8320  ;;  %vm14986_vm12 = vmmov %vm14975_vm3 }
 0xe84   : > { %8201 = vmatpush1.bf16.msra.mxu0 %v14971_v40  ;;  %v8331_v14 = vsel %vm14976_vm2, %v8319_v42, %v8321_v51  ;;  %vm14988_vm8 = vmmov %vm14984_vm0  ;;  %v10595_v51 = vld [vmem:[%s14663_s9 + $0x40] sm:$0xff]  }
 0xe85   : > { %9198 = vrot.lane.b32.xlu0 %v10008_v18, %s14788_s19  ;;  %v8317_v12 = vpop.permute.xlu1 %8316  ;;  %9901 = vmatprep.subr.msk.bf16.mxu0 %vm6590_vm14, %v9900_v17  ;;  %vm14991_vm2 = vmmov %vm14979_vm9 }
 0xe86   : > { %v8330_v56 = vsel %vm14977_vm1, %v8317_v12, %v8319_v42 }
 0xe87   : > { %9892 = vmatmul.mubr.msk.bf16.gmra.mrb[12].mxu0 %vm14972_vm6, %v10588_v37  ;;  %v8475_v50 = vpop.permute.xlu0 %8474  ;;  %vm14987_vm6 = vmmov %vm14984_vm0 }
 0xe88   : > { %8203 = vmatpush1.bf16.msra.mxu0 %v8193_v44  ;;  %8230 = vmatprep.mubr.bf16.mxu0 %v12232_v54  ;;  %v10596_v44 = vld [vmem:[%s14663_s9 + $0x48] sm:$0xff]  }
 0xe89   : > { %v8473_v5 = vpop.permute.xlu1 %8472  ;;  %8350 = vmatprep.subr.bf16.mxu0 %v8329_v28 }
 0xe8a   : > { %v8489_v6 = vsel %vm14981_vm4, %v8473_v5, %v8475_v50  ;;  %vm14996_vm4 = vmmov %vm14991_vm2 }
 0xe8b   : > { %v8479_v19 = vpop.permute.xlu0 %8478 }
 0xe8d   : > { %v8471_v34 = vpop.permute.xlu1 %8470 }
 0xe8e   : > { %v8488_v38 = vsel %vm14982_vm15, %v8471_v34, %v8473_v5  ;;  %vm14997_vm15 = vcmask 900096  }
 0xe8f   : > { %9902 = vmatmul.mubr.msk.bf16.vlgmr.msra.gmra.mrb[8].mxu0 %vm14975_vm3, %v10589_v46  ;;  %v8477_v21 = vpop.permute.xlu0 %8476  ;;  %vm14990_vm3 = vmmov %vm14989_vm10 }
 0xe90   : > { %8351 = vmatpush1.bf16.msra.mxu0 %v8328_v60  ;;  %8240 = vmatprep.mubr.bf16.mxu0 %v12232_v54  ;;  %v8490_v55 = vsel %vm14985_vm5, %v8477_v21, %v8479_v19  ;;  %vm14992_vm1 = vmmov %vm14990_vm3 }
 0xe91   : > { %8352 = vmatprep.subr.bf16.mxu0 %v8331_v14  ;;  %v8481_v61 = vpop.permute.xlu1 %8480 }
 0xe92   : > { %v8491_v47 = vsel %vm14984_vm0, %v8479_v19, %v8481_v61  ;;  %vm14999_vm0 = vmmov %vm14991_vm2  ;;  %v10597_v61 = vld [vmem:[%s14663_s9 + $0x50] sm:$0xff]  }
 0xe93   : > { %v8327_v30 = vpop.permute.xlu0 %8326 }
 0xe94   : > { %8353 = vmatpush1.bf16.msra.mxu0 %v8330_v56 }
 0xe95   : > { %v8325_v45 = vpop.permute.xlu1 %8324 }
 0xe96   : > { %v8333_v3 = vsel %vm14978_vm13, %v8325_v45, %v8327_v30  ;;  %vm14993_vm13 = vmmov %vm14992_vm1 }
 0xe97   : > { %9903 = vmatmul.mubr.msk.bf16.gmra.mrb[12].mxu0 %vm14979_vm9, %v10590_v23  ;;  %9919 = vmatprep.subr.msk.bf16.mxu0 %vm6590_vm14, %v8333_v3  ;;  %v8323_v16 = vpop.permute.xlu0 %8322  ;;  %vm14994_vm9 = vmmov %vm14992_vm1 }
 0xe98   : > { %v8332_v25 = vsel %vm14980_vm7, %v8323_v16, %v8325_v45  ;;  %8382 = vmatprep.mubr.bf16.mxu0 %v12232_v54  ;;  %vm14995_vm7 = vmmov %vm14992_vm1 }
 0xe99   : > { %v8345_v10 = vsel %vm6590_vm14, %v8332_v25, 0  ;;  %v8487_v49 = vpop.permute.xlu1 %8486 }
 0xe9a   : > { %8355 = vmatpush1.bf16.msra.mxu0 %v8345_v10  ;;  %v10598_v10 = vld [vmem:[%s14663_s9 + $0x58] sm:$0xff]  }
 0xe9b   : > { %8510 = vmatprep.subr.bf16.mxu0 %v8489_v6  ;;  %v8589_v63 = vpop.permute.xlu0 %8588 }
 0xe9d   : > { %v8591_v4 = vpop.permute.xlu1 %8590 }
 0xe9e   : > { %v8605_v41 = vsel %vm14989_vm10, %v8589_v63, %v8591_v4 }
 0xe9f   : > { %9920 = vmatmul.mubr.msk.bf16.vlgmr.msra.gmra.mrb[8].mxu0 %vm14983_vm11, %v10591_v36  ;;  %v8587_v62 = vpop.permute.xlu0 %8586  ;;  %vm14998_vm11 = vmmov %vm14997_vm15 }
 0xea0   : > { %8511 = vmatpush1.bf16.msra.mxu0 %v8488_v38  ;;  %8392 = vmatprep.mubr.bf16.mxu0 %v12232_v54  ;;  %v8604_v33 = vsel %vm14990_vm3, %v8587_v62, %v8589_v63  ;;  %vm15000_vm5 = vmmov %vm14998_vm11  ;;  %vm15005_vm3 = vcmask 785408  }
 0xea1   : > { %8512 = vmatprep.subr.bf16.mxu0 %v8491_v47  ;;  %v8595_v43 = vpop.permute.xlu1 %8594  ;;  %vm15004_vm10 = vmmov %vm15000_vm5 }
 0xea3   : > { %v8597_v2 = vpop.permute.xlu0 %8596 }
 0xea4   : > { %8513 = vmatpush1.bf16.msra.mxu0 %v8490_v55  ;;  %v8607_v22 = vsel %vm14992_vm1, %v8595_v43, %v8597_v2  ;;  %vm15007_vm1 = vmmov %vm14999_vm0 }
 0xea5   : > { %v8483_v1 = vpop.permute.xlu1 %8482 }
 0xea7   : > { %9921 = vmatmul.mubr.msk.bf16.gmra.mrb[12].mxu0 %vm14986_vm12, %v10592_v53  ;;  %v8485_v7 = vpop.permute.xlu0 %8484  ;;  %vm15001_vm12 = vmmov %vm15000_vm5 }
 0xea8   : > { %v8492_v9 = vsel %vm14987_vm6, %v8483_v1, %v8485_v7  ;;  %v8493_v52 = vsel %vm14988_vm8, %v8485_v7, %v8487_v49  ;;  %8542 = vmatprep.mubr.bf16.mxu0 %v12232_v54  ;;  %vm15002_vm6 = vmmov %vm14999_vm0 }
 0xea9   : > { %v8505_v11 = vsel %vm6590_vm14, %v8492_v9, 0  ;;  %v8593_v39 = vpop.permute.xlu1 %8592  ;;  %9937 = vmatprep.subr.msk.bf16.mxu0 %vm6590_vm14, %v8493_v52  ;;  %vm15003_vm8 = vmmov %vm15000_vm5 }
 0xeaa   : > { %8515 = vmatpush1.bf16.msra.mxu0 %v8505_v11  ;;  %v8606_v57 = vsel %vm14993_vm13, %v8593_v39, %v8595_v43  ;;  %v10599_v43 = vld [vmem:[%s14663_s9 + $0x60] sm:$0xff]   ;;  %v10600_v11 = vld [vmem:[%s14663_s9 + $0x68] sm:$0xff]  }
 0xeab   : > { %8626 = vmatprep.subr.bf16.mxu0 %v8605_v41  ;;  %v8599_v8 = vpop.permute.xlu0 %8598 }
 0xead   : > { %v8601_v35 = vpop.permute.xlu1 %8600 }
 0xeae   : > { %v8608_v58 = vsel %vm14994_vm9, %v8599_v8, %v8601_v35 }
 0xeaf   : > { %9938 = vmatmul.mubr.msk.bf16.vlgmr.msra.gmra.mrb[8].mxu0 %vm14991_vm2, %v10593_v29  ;;  %v8603_v24 = vpop.permute.xlu0 %8602  ;;  %v8621_v59 = vsel %vm6590_vm14, %v8608_v58, 0  ;;  %vm15006_vm2 = vmmov %vm15005_vm3 }
 0xeb0   : > { %8627 = vmatpush1.bf16.msra.mxu0 %v8604_v33  ;;  %8552 = vmatprep.mubr.bf16.mxu0 %v12232_v54  ;;  %v8609_v15 = vsel %vm14995_vm7, %v8601_v35, %v8603_v24  ;;  %vm15008_vm13 = vmmov %vm15006_vm2 }
 0xeb1   : > { %8628 = vmatprep.subr.bf16.mxu0 %v8607_v22  ;;  %v8749_v26 = vpop.permute.xlu1 %8748  ;;  %vm15009_vm9 = vmmov %vm15006_vm2 }
 0xeb2   : > { %vm15010_vm7 = vmmov %vm15006_vm2 }
 0xeb3   : > { %v8751_v0 = vpop.permute.xlu0 %8750 }
 0xeb4   : > { %8629 = vmatpush1.bf16.msra.mxu0 %v8606_v57  ;;  %v8765_v42 = vsel %vm14997_vm15, %v8749_v26, %v8751_v0  ;;  %vm15012_vm15 = vmmov %vm15006_vm2 }
 0xeb5   : > { %9946 = vmatprep.subr.msk.bf16.mxu0 %vm6590_vm14, %v8609_v15  ;;  %v8747_v27 = vpop.permute.xlu1 %8746 }
 0xeb6   : > { %v8764_v17 = vsel %vm14998_vm11, %v8747_v27, %v8749_v26  ;;  %vm15013_vm11 = vcmask 777216   ;;  %v10601_v26 = vld [vmem:[%s14663_s9 + $0x70] sm:$0xff]  }
 0xeb7   : > { %9939 = vmatmul.mubr.msk.bf16.gmra.mrb[12].mxu0 %vm14996_vm4, %v10594_v13  ;;  %v8755_v32 = vpop.permute.xlu0 %8754  ;;  %vm15011_vm4 = vmmov %vm14999_vm0 }
 0xeb8   : > { %8631 = vmatpush1.bf16.msra.mxu0 %v8621_v59  ;;  %8658 = vmatprep.mubr.bf16.mxu0 %v12232_v54 }
 0xeb9   : > { %8786 = vmatprep.subr.bf16.mxu0 %v8765_v42  ;;  %v8757_v20 = vpop.permute.xlu1 %8756 }
 0xeba   : > { %v8767_v31 = vsel %vm15000_vm5, %v8755_v32, %v8757_v20 }
 0xebb   : > { %v8753_v48 = vpop.permute.xlu0 %8752 }
 0xebc   : > { %v8766_v12 = vsel %vm15001_vm12, %v8753_v48, %v8755_v32  ;;  %vm15016_vm12 = vmmov %vm15007_vm1  ;;  %v10602_v32 = vld [vmem:[%s14663_s9 + $0x78] sm:$0xff]  }
 0xebd   : > { %v8763_v18 = vpop.permute.xlu1 %8762 }
 0xebf   : > { %9947 = vmatmul.mubr.msk.bf16.vlgmr.msra.gmra.mrb[8].mxu0 %vm14999_vm0, %v10595_v51  ;;  %v8909_v37 = vpop.permute.xlu0 %8908  ;;  %vm15014_vm0 = vmmov %vm15013_vm11 }
 0xec0   : > { %8787 = vmatpush1.bf16.msra.mxu0 %v8764_v17  ;;  %8668 = vmatprep.mubr.bf16.mxu0 %v12232_v54  ;;  %vm15015_vm5 = vmmov %vm15014_vm0  ;;  %v10603_v17 = vld [vmem:[%s14663_s9 + $0x80] sm:$0xff]  }
 0xec1   : > { %8788 = vmatprep.subr.bf16.mxu0 %v8767_v31  ;;  %v8911_v40 = vpop.permute.xlu1 %8910 }
 0xec2   : > { %v8925_v21 = vsel %vm15005_vm3, %v8909_v37, %v8911_v40  ;;  %vm15020_vm3 = vmmov %vm15007_vm1 }
 0xec3   : > { %v8907_v50 = vpop.permute.xlu0 %8906 }
 0xec4   : > { %8789 = vmatpush1.bf16.msra.mxu0 %v8766_v12  ;;  %v8924_v30 = vsel %vm15006_vm2, %v8907_v50, %v8909_v37  ;;  %vm15021_vm2 = vcmask 769024   ;;  %v10604_v37 = vld [vmem:[%s14663_s9 + $0x88] sm:$0xff]  }
 0xec5   : > { %v8759_v28 = vpop.permute.xlu1 %8758 }
 0xec7   : > { %9948 = vmatmul.mubr.msk.bf16.gmra.mrb[12].mxu0 %vm15002_vm6, %v10596_v44  ;;  %v8761_v5 = vpop.permute.xlu0 %8760  ;;  %vm15017_vm6 = vmmov %vm15014_vm0 }
 0xec8   : > { %v8768_v19 = vsel %vm15003_vm8, %v8759_v28, %v8761_v5  ;;  %v8769_v46 = vsel %vm15004_vm10, %v8761_v5, %v8763_v18  ;;  %8818 = vmatprep.mubr.bf16.mxu0 %v12232_v54  ;;  %vm15018_vm8 = vmmov %vm15014_vm0 }
 0xec9   : > { %v8781_v34 = vsel %vm6590_vm14, %v8768_v19, 0  ;;  %v8915_v60 = vpop.permute.xlu1 %8914  ;;  %9964 = vmatprep.subr.msk.bf16.mxu0 %vm6590_vm14, %v8769_v46  ;;  %vm15019_vm10 = vmmov %vm15014_vm0 }
 0xeca   : > { %8791 = vmatpush1.bf16.msra.mxu0 %v8781_v34 }
 0xecb   : > { %8946 = vmatprep.subr.bf16.mxu0 %v8925_v21  ;;  %v8917_v14 = vpop.permute.xlu0 %8916 }
 0xecc   : > { %v8927_v45 = vsel %vm15008_vm13, %v8915_v60, %v8917_v14  ;;  %vm15023_vm13 = vmmov %vm15020_vm3 }
 0xecd   : > { %v8913_v56 = vpop.permute.xlu1 %8912 }
 0xece   : > { %v8926_v16 = vsel %vm15009_vm9, %v8913_v56, %v8915_v60 }
 0xecf   : > { %9965 = vmatmul.mubr.msk.bf16.vlgmr.msra.gmra.mrb[8].mxu0 %vm15007_vm1, %v10597_v61  ;;  %v8923_v23 = vpop.permute.xlu0 %8922  ;;  %vm15022_vm1 = vmmov %vm15021_vm2 }
 0xed0   : > { %8947 = vmatpush1.bf16.msra.mxu0 %v8924_v30  ;;  %8828 = vmatprep.mubr.bf16.mxu0 %v12232_v54  ;;  %vm15024_vm9 = vmmov %vm15022_vm1 }
 0xed1   : > { %8948 = vmatprep.subr.bf16.mxu0 %v8927_v45  ;;  %v9025_v3 = vpop.permute.xlu1 %9024 }
 0xed3   : > { %v9027_v25 = vpop.permute.xlu0 %9026 }
 0xed4   : > { %8949 = vmatpush1.bf16.msra.mxu0 %v8926_v16  ;;  %v9041_v62 = vsel %vm15013_vm11, %v9025_v3, %v9027_v25  ;;  %vm15028_vm11 = vmmov %vm15022_vm1 }
 0xed5   : > { %v8921_v49 = vpop.permute.xlu1 %8920 }
 0xed6   : > { %v8929_v6 = vsel %vm15010_vm7, %v8921_v49, %v8923_v23  ;;  %vm15025_vm7 = vmmov %vm15022_vm1 }
 0xed7   : > { %9966 = vmatmul.mubr.msk.bf16.gmra.mrb[12].mxu0 %vm15011_vm4, %v10598_v10  ;;  %9982 = vmatprep.subr.msk.bf16.mxu0 %vm6590_vm14, %v8929_v6  ;;  %v8919_v63 = vpop.permute.xlu0 %8918  ;;  %vm15026_vm4 = vmmov %vm15022_vm1 }
 0xed8   : > { %v8928_v36 = vsel %vm15012_vm15, %v8919_v63, %v8921_v49  ;;  %8978 = vmatprep.mubr.bf16.mxu0 %v12232_v54  ;;  %vm15027_vm15 = vmmov %vm15020_vm3 }
 0xed9   : > { %v8941_v4 = vsel %vm6590_vm14, %v8928_v36, 0  ;;  %v9023_v38 = vpop.permute.xlu1 %9022 }
 0xeda   : > { %8951 = vmatpush1.bf16.msra.mxu0 %v8941_v4  ;;  %v9040_v53 = vsel %vm15015_vm5, %v9023_v38, %v9025_v3 }
 0xedb   : > { %9062 = vmatprep.subr.bf16.mxu0 %v9041_v62  ;;  %v9031_v47 = vpop.permute.xlu0 %9030 }
 0xedd   : > { %v9033_v55 = vpop.permute.xlu1 %9032 }
 0xede   : > { %v9043_v2 = vsel %vm15014_vm0, %v9031_v47, %v9033_v55  ;;  %vm15029_vm0 = vmmov %vm15020_vm3 }
 0xedf   : > { %9983 = vmatmul.mubr.msk.bf16.vlgmr.msra.gmra.mrb[8].mxu0 %vm15016_vm12, %v10599_v43  ;;  %v9029_v1 = vpop.permute.xlu0 %9028  ;;  %vm15030_vm5 = vmmov %vm15029_vm0 }
 0xee0   : > { %9063 = vmatpush1.bf16.msra.mxu0 %v9040_v53  ;;  %8988 = vmatprep.mubr.bf16.mxu0 %v12232_v54  ;;  %v9042_v9 = vsel %vm15017_vm6, %v9029_v1, %v9031_v47 }
 0xee1   : > { %9064 = vmatprep.subr.bf16.mxu0 %v9043_v2  ;;  %v9035_v7 = vpop.permute.xlu1 %9034 }
 0xee3   : > { %v9037_v52 = vpop.permute.xlu0 %9036 }
 0xee4   : > { %9065 = vmatpush1.bf16.msra.mxu0 %v9042_v9  ;;  %v9044_v39 = vsel %vm15018_vm8, %v9035_v7, %v9037_v52 }
 0xee5   : > { %v9039_v41 = vpop.permute.xlu1 %9038  ;;  %v9057_v29 = vsel %vm6590_vm14, %v9044_v39, 0 }
 0xee6   : > { %v9045_v8 = vsel %vm15019_vm10, %v9037_v52, %v9039_v41 }
 0xee7   : > { %9984 = vmatmul.mubr.msk.bf16.gmra.mrb[12].mxu0 %vm15020_vm3, %v10600_v11  ;;  %9991 = vmatprep.subr.msk.bf16.mxu0 %vm6590_vm14, %v9045_v8  ;;  %v9185_v35 = vpop.permute.xlu0 %9184 }
 0xee8   : > { %9067 = vmatpush1.bf16.msra.mxu0 %v9057_v29  ;;  %9094 = vmatprep.mubr.bf16.mxu0 %v12232_v54 }
 0xee9   : > { %v9187_v33 = vpop.permute.xlu1 %9186 }
 0xeea   : > { %v9201_v24 = vsel %vm15021_vm2, %v9185_v35, %v9187_v33 }
 0xeeb   : > { %9222 = vmatprep.subr.bf16.mxu0 %v9201_v24  ;;  %v9183_v22 = vpop.permute.xlu0 %9182 }
 0xeec   : > { %v9200_v0 = vsel %vm15022_vm1, %v9183_v22, %v9185_v35 }
 0xeed   : > { %v9191_v57 = vpop.permute.xlu1 %9190 }
 0xeef   : > { %9992 = vmatmul.mubr.msk.bf16.vlgmr.msra.gmra.mrb[8].mxu0 %vm15023_vm13, %v10601_v26  ;;  %v9193_v13 = vpop.permute.xlu0 %9192 }
 0xef0   : > { %9223 = vmatpush1.bf16.msra.mxu0 %v9200_v0  ;;  %v9203_v58 = vsel %vm15024_vm9, %v9191_v57, %v9193_v13  ;;  %9104 = vmatprep.mubr.bf16.mxu0 %v12232_v54 }
 0xef1   : > { %v9189_v15 = vpop.permute.xlu1 %9188  ;;  %9224 = vmatprep.subr.bf16.mxu0 %v9203_v58 }
 0xef2   : > { %v9202_v27 = vsel %vm15025_vm7, %v9189_v15, %v9191_v57 }
 0xef3   : > { %v9195_v59 = vpop.permute.xlu0 %9194 }
 0xef4   : > { %9225 = vmatpush1.bf16.msra.mxu0 %v9202_v27 }
 0xef5   : > { %v9197_v42 = vpop.permute.xlu1 %9196 }
 0xef6   : > { %v9204_v20 = vsel %vm15026_vm4, %v9195_v59, %v9197_v42 }
 0xef7   : > { %9993 = vmatmul.mubr.msk.bf16.gmra.mrb[12].mxu0 %vm15027_vm15, %v10602_v32  ;;  %v9199_v48 = vpop.permute.xlu0 %9198  ;;  %v9217_v18 = vsel %vm6590_vm14, %v9204_v20, 0 }
 0xef8   : > { %v9205_v51 = vsel %vm15028_vm11, %v9197_v42, %v9199_v48  ;;  %9254 = vmatprep.mubr.bf16.mxu0 %v12232_v54 }
 0xef9   : > { %10009 = vmatprep.subr.msk.bf16.mxu0 %vm6590_vm14, %v9205_v51 }
 0xefa   : > { %9227 = vmatpush1.bf16.msra.mxu0 %v9217_v18 }
 0xeff   : > { %10010 = vmatmul.mubr.msk.bf16.vlgmr.msra.gmra.mrb[8].mxu0 %vm15029_vm0, %v10603_v17 }
 0xf00   : > { %9264 = vmatprep.mubr.bf16.mxu0 %v12232_v54 }
 0xf07   : > { %10011 = vmatmul.mubr.msk.bf16.gmra.mrb[12].mxu0 %vm15030_vm5, %v10604_v37 }
 0xfd2   : > { %v9256_v31 = vpop.f32.mrb[8].mxu0 }
 0xfd3   : > { %v9291_v40 = vmul.f32 0.044715, %v9256_v31  ;;  %v9258_v12 = vpop.f32.mrb[9].mxu0  ;;  %v9283_v0 = vmul.f32 0.5, %v9256_v31 }
 0xfd4   : > { %v9292_v50 = vmul.f32 0.044715, %v9258_v12  ;;  %v9260_v44 = vpop.f32.mrb[10].mxu0  ;;  %v9284_v15 = vmul.f32 0.5, %v9258_v12 }
 0xfd5   : > { %v9299_v28 = vmul.f32 %v9291_v40, %v9256_v31  ;;  %v9293_v5 = vmul.f32 0.044715, %v9260_v44  ;;  %v9262_v19 = vpop.f32.mrb[11].mxu0  ;;  %v9285_v42 = vmul.f32 0.5, %v9260_v44 }
 0xfd6   : > { %v9300_v46 = vmul.f32 %v9292_v50, %v9258_v12  ;;  %v9294_v34 = vmul.f32 0.044715, %v9262_v19  ;;  %v9286_v51 = vmul.f32 0.5, %v9262_v19 }
 0xfd7   : > { %v9307_v60 = vmul.f32 %v9299_v28, %v9256_v31  ;;  %v9301_v21 = vmul.f32 %v9293_v5, %v9260_v44 }
 0xfd8   : > { %v9308_v14 = vmul.f32 %v9300_v46, %v9258_v12  ;;  %v9302_v54 = vmul.f32 %v9294_v34, %v9262_v19 }
 0xfd9   : > { %v9315_v61 = vadd.f32 %v9307_v60, %v9256_v31  ;;  %v9309_v56 = vmul.f32 %v9301_v21, %v9260_v44 }
 0xfda   : > { %v9316_v30 = vadd.f32 %v9308_v14, %v9258_v12  ;;  %v9310_v23 = vmul.f32 %v9302_v54, %v9262_v19  ;;  %v9266_v45 = vpop.f32.mrb[12].mxu0 }
 0xfdb   : > { %v9323_v3 = vmul.f32 0.7978846, %v9315_v61  ;;  %v9317_v16 = vadd.f32 %v9309_v56, %v9260_v44  ;;  %v9295_v25 = vmul.f32 0.044715, %v9266_v45  ;;  %v9268_v10 = vpop.f32.mrb[13].mxu0  ;;  %v9287_v12 = vmul.f32 0.5, %v9266_v45 }
 0xfdc   : > { %v9324_v49 = vmul.f32 0.7978846, %v9316_v30  ;;  %v9318_v6 = vadd.f32 %v9310_v23, %v9262_v19  ;;  %v9296_v63 = vmul.f32 0.044715, %v9268_v10  ;;  %v9270_v36 = vpop.f32.mrb[14].mxu0  ;;  %v9288_v28 = vmul.f32 0.5, %v9268_v10 }
 0xfdd   : > { %10641 = vtanh.f32 %v9323_v3  ;;  %v9325_v4 = vmul.f32 0.7978846, %v9317_v16  ;;  %v9303_v38 = vmul.f32 %v9295_v25, %v9266_v45  ;;  %v9272_v62 = vpop.f32.mrb[15].mxu0  ;;  %v9297_v55 = vmul.f32 0.044715, %v9270_v36 }
 0xfde   : > { %10643 = vtanh.f32 %v9324_v49  ;;  %v9326_v47 = vmul.f32 0.7978846, %v9318_v6  ;;  %v9304_v43 = vmul.f32 %v9296_v63, %v9268_v10  ;;  %v9298_v53 = vmul.f32 0.044715, %v9272_v62 }
 0xfdf   : > { %10645 = vtanh.f32 %v9325_v4  ;;  %v9311_v2 = vmul.f32 %v9303_v38, %v9266_v45  ;;  %v9305_v7 = vmul.f32 %v9297_v55, %v9270_v36  ;;  %v9289_v60 = vmul.f32 0.5, %v9270_v36 }
 0xfe0   : > { %10647 = vtanh.f32 %v9326_v47  ;;  %v9312_v1 = vmul.f32 %v9304_v43, %v9268_v10  ;;  %v9306_v52 = vmul.f32 %v9298_v53, %v9272_v62  ;;  %v9290_v14 = vmul.f32 0.5, %v9272_v62 }
 0xfe1   : > { %v9319_v9 = vadd.f32 %v9311_v2, %v9266_v45  ;;  %v9313_v39 = vmul.f32 %v9305_v7, %v9270_v36 }
 0xfe2   : > { %v9320_v11 = vadd.f32 %v9312_v1, %v9268_v10  ;;  %v9314_v8 = vmul.f32 %v9306_v52, %v9272_v62 }
 0xfe3   : > { %v9327_v41 = vmul.f32 0.7978846, %v9319_v9  ;;  %v9321_v35 = vadd.f32 %v9313_v39, %v9270_v36 }
 0xfe4   : > { %v9328_v29 = vmul.f32 0.7978846, %v9320_v11  ;;  %v9322_v33 = vadd.f32 %v9314_v8, %v9272_v62 }
 0xfe5   : > { %10649 = vtanh.f32 %v9327_v41  ;;  %v9329_v24 = vmul.f32 0.7978846, %v9321_v35 }
 0xfe6   : > { %10651 = vtanh.f32 %v9328_v29  ;;  %v9330_v26 = vmul.f32 0.7978846, %v9322_v33 }
 0xfe7   : > { %v10642_v22 = vpop.eup %10641  ;;  %10653 = vtanh.f32 %v9329_v24 }
 0xfe8   : > { %v10644_v57 = vpop.eup %10643  ;;  %v9339_v13 = vadd.f32 1.0, %v10642_v22  ;;  %10655 = vtanh.f32 %v9330_v26 }
 0xfe9   : > { %v10646_v58 = vpop.eup %10645  ;;  %v9340_v27 = vadd.f32 1.0, %v10644_v57 }
 0xfea   : > { %v10648_v59 = vpop.eup %10647  ;;  %v9347_v32 = vmul.f32 %v9339_v13, %v9283_v0  ;;  %v9341_v20 = vadd.f32 1.0, %v10646_v58 }
 0xfeb   : > { %v9348_v48 = vmul.f32 %v9340_v27, %v9284_v15  ;;  %v9342_v18 = vadd.f32 1.0, %v10648_v59 }
 0xfec   : > { %9355 = vst [vmem:[%s14641_s11] sm:$0xff] %v9347_v32  ;;  %v9349_v17 = vmul.f32 %v9341_v20, %v9285_v42 }
 0xfed   : > { %9356 = vst [vmem:[%s14641_s11 + $0x8] sm:$0xff] %v9348_v48  ;;  %v9350_v37 = vmul.f32 %v9342_v18, %v9286_v51 }
 0xfee   : > { %9357 = vst [vmem:[%s14641_s11 + $0x10] sm:$0xff] %v9349_v17 }
 0xfef   : > { %v10650_v31 = vpop.eup %10649  ;;  %9358 = vst [vmem:[%s14641_s11 + $0x18] sm:$0xff] %v9350_v37 }
 0xff0   : > { %v10652_v40 = vpop.eup %10651  ;;  %v9343_v50 = vadd.f32 1.0, %v10650_v31 }
 0xff1   : > { %v9344_v44 = vadd.f32 1.0, %v10652_v40  ;;  %v10654_v5 = vpop.eup %10653 }
 0xff2   : > { %v9351_v46 = vmul.f32 %v9343_v50, %v9287_v12  ;;  %v10656_v19 = vpop.eup %10655  ;;  %v9345_v21 = vadd.f32 1.0, %v10654_v5 }
 0xff3   : > { %v9352_v34 = vmul.f32 %v9344_v44, %v9288_v28  ;;  %v9346_v54 = vadd.f32 1.0, %v10656_v19 }
 0xff4   : > { %9359 = vst [vmem:[%s14641_s11 + $0x20] sm:$0xff] %v9351_v46  ;;  %v9353_v61 = vmul.f32 %v9345_v21, %v9289_v60 }
 0xff5   : > { %9360 = vst [vmem:[%s14641_s11 + $0x28] sm:$0xff] %v9352_v34  ;;  %v9354_v56 = vmul.f32 %v9346_v54, %v9290_v14 }
 0xff6   : > { %9361 = vst [vmem:[%s14641_s11 + $0x30] sm:$0xff] %v9353_v61 }
 0xff7   : > { %9362 = vst [vmem:[%s14641_s11 + $0x38] sm:$0xff] %v9354_v56 }
 0xff8 PF: > { %s20_s13 = sadd.s32 1, %s10676_s13  }
 0xff9   : > { %p17_p4 = scmp.ge.s32.totalorder %s20_s13, 4  }
 0xffb   :  { %19 = sbr.rel (!%p17_p4) target bundleno = 1 (0x1), region = 117 }

</bundles_post_ra>
